<compile_context>
chip_gen: v7x
topology: tpu7x:2x2x1
jax: 0.10.0
libtpu: 0.0.40
codegen_flags: <defaults>
</compile_context>

<pallas_src>
import functools

import numpy as np
import jax
import jax.numpy as jnp
from jax.experimental import pallas as pl
from jax.experimental.pallas import tpu as pltpu

_OUT_PAD = 128   # lane-dense padded width for the 9-wide output row
_FEAT = 1024     # conv3 output channels / global feature width


def _stn3d_kernel(x_ref,                                  # (1, TN, 3) f32 point tile
                  w1, b1, w2, b2, w3, b3,                 # conv params (w1 f32, w2/w3 bf16)
                  w4, b4, w5, b5, w6, b6,                 # fc params (weights bf16)
                  iden_ref,                               # (1, 128) f32 padded identity row
                  o_ref,                                  # (1, 1, 128) per-batch output block
                  gmax_ref):                              # (8, 1024) f32 running-max scratch
    n = pl.program_id(1)

    @pl.when(n == 0)
    def _():
        # Pre-ReLU conv3 maxima can be negative -> -inf init (ReLU applied at finalize).
        gmax_ref[...] = jnp.full(gmax_ref.shape, -jnp.inf, dtype=gmax_ref.dtype)

    x = x_ref[0]                                          # (TN, 3) f32
    w1v = w1[...]                                         # (3, 64) f32

    # conv1 (K=3) on the VPU: 3 broadcast multiply-adds instead of an MXU matmul.
    h = (x[:, 0:1] * w1v[0:1, :]
         + x[:, 1:2] * w1v[1:2, :]
         + x[:, 2:3] * w1v[2:3, :]) + b1[...]
    h = jnp.maximum(h, 0.0)                               # (TN, 64)

    # conv2 on the MXU (bf16 operands, f32 accumulation).
    h = jnp.dot(h.astype(jnp.bfloat16), w2[...],
                preferred_element_type=jnp.float32) + b2[...]
    h = jnp.maximum(h, 0.0)                               # (TN, 128)

    # conv3 on the MXU — bias/ReLU deferred to finalize (exact: uniform bias, monotone ReLU).
    h3 = jnp.dot(h.astype(jnp.bfloat16), w3[...],
                 preferred_element_type=jnp.float32)      # (TN, 1024)

    # Fold into the (8,1024) running max with element-wise maxima only: no per-tile
    # sublane reduce, no masked sub-8-row store.  (Layout-preserving reshape: it only
    # splits the sublane axis into groups of 8.)
    tn = h3.shape[0]
    hg = jnp.max(h3.reshape(tn // 8, 8, h3.shape[1]), axis=0)          # (8, 1024)
    gmax_ref[...] = jnp.maximum(gmax_ref[...], hg)

    # FC head (fc1/fc2/fc3 + identity) fused onto the last point tile of this batch.
    @pl.when(n == pl.num_programs(1) - 1)
    def _():
        g = jnp.max(gmax_ref[...], axis=0, keepdims=True)              # (1, 1024)
        g = jnp.maximum(g + b3[...], 0.0)                              # deferred conv3 bias+ReLU
        f = jnp.dot(g.astype(jnp.bfloat16), w4[...],
                    preferred_element_type=jnp.float32) + b4[...]
        f = jnp.maximum(f, 0.0)
        f = jnp.dot(f.astype(jnp.bfloat16), w5[...],
                    preferred_element_type=jnp.float32) + b5[...]
        f = jnp.maximum(f, 0.0)
        f = jnp.dot(f.astype(jnp.bfloat16), w6[...],
                    preferred_element_type=jnp.float32) + b6[...]      # (1, 128)
        o_ref[0] = f + iden_ref[...]


def _pack_params(params):
    """bf16 MXU weights (conv2..fc3), f32 conv1 weight/biases, 128-lane padded fc3, identity."""
    w1, b1, w2, b2, w3, b3, w4, b4, w5, b5, w6, b6 = params
    bf = lambda a: a.astype(jnp.bfloat16)
    w6p = jnp.pad(w6, ((0, 0), (0, _OUT_PAD - w6.shape[1])))
    b6p = jnp.pad(b6, ((0, 0), (0, _OUT_PAD - b6.shape[1])))
    iden = np.zeros((1, _OUT_PAD), np.float32)
    iden[0, [0, 4, 8]] = 1.0
    return (w1, b1, bf(w2), b2, bf(w3), b3,
            bf(w4), b4, bf(w5), b5, bf(w6p), b6p, jnp.asarray(iden))


@functools.partial(jax.jit, static_argnames=("tn",))
def stn3d_forward(x_bcn, params, *, tn=1024):
    """x_bcn: (B, 3, N) float32 (PyTorch NCW layout). Returns (B, 3, 3) float32.

    tn: point-tile size (multiple of 8).  Sweepable; keep tn <= 2048 when targeting v7x's
    64 MiB VMEM for the 6890-point humans path; a single tile per batch is best for small N.
    """
    B, C, N = x_bcn.shape
    assert C == 3
    assert tn % 8 == 0
    n_tiles = pl.cdiv(N, tn)
    n_pad = n_tiles * tn

    x = jnp.transpose(x_bcn, (0, 2, 1))                   # (B, N, 3) points-major
    if n_pad != N:
        # Edge-replicate the last valid point: duplicates cannot change the max,
        # so no in-kernel mask is needed.
        x = jnp.pad(x, ((0, 0), (0, n_pad - N), (0, 0)), mode="edge")

    packed = _pack_params(params)
    const_specs = [pl.BlockSpec(p.shape, lambda b, n: (0, 0)) for p in packed]

    flops = (2 * B * n_pad * (3 * 64 + 64 * 128 + 128 * 1024)
             + 2 * B * (1024 * 512 + 512 * 256 + 256 * 9))
    bytes_accessed = (x.size * 4
                      + sum(int(p.size) * p.dtype.itemsize for p in packed)
                      + B * _OUT_PAD * 4)

    out = pl.pallas_call(
        _stn3d_kernel,
        out_shape=jax.ShapeDtypeStruct((B, 1, _OUT_PAD), jnp.float32),
        grid_spec=pltpu.PrefetchScalarGridSpec(
            num_scalar_prefetch=0,
            grid=(B, n_tiles),
            in_specs=[pl.BlockSpec((1, tn, 3), lambda b, n: (b, n, 0))] + const_specs,
            out_specs=pl.BlockSpec((1, 1, _OUT_PAD), lambda b, n: (b, 0, 0)),
            scratch_shapes=[pltpu.VMEM((8, _FEAT), jnp.float32)],
        ),
        compiler_params=pltpu.CompilerParams(
            dimension_semantics=("parallel", "arbitrary"),
            vmem_limit_bytes=32 * 1024 * 1024),
        cost_estimate=pl.CostEstimate(flops=flops, transcendentals=0,
                                      bytes_accessed=bytes_accessed),
    )(x, *packed)

    return out[:, 0, :9].reshape(B, 3, 3)


def init_params(key):
    """Deterministic synthetic parameters with the STN3d shapes.

    Conv1d(Cin, Cout, 1) weight stored as (Cin, Cout); Linear(Fin, Fout) weight as
    (Fin, Fout); biases as (1, Cout)."""
    dims = [(3, 64), (64, 128), (128, 1024), (1024, 512), (512, 256), (256, 9)]
    params = []
    for cin, cout in dims:
        kw, kb, key = jax.random.split(key, 3)
        w = 0.05 * jax.random.normal(kw, (cin, cout), dtype=jnp.float32)
        b = 0.05 * jax.random.normal(kb, (1, cout), dtype=jnp.float32)
        params += [w, b]
    return tuple(params)


def stn3d_reference(x_bcn, params, *, mxu_dtype=jnp.float32):
    """Pure-JAX reference of the PyTorch STN3d forward.

    conv1 is always f32 (the kernel computes it on the VPU in f32); the remaining matmuls
    use `mxu_dtype` operands with f32 accumulation so the kernel's bf16 MXU policy can be
    matched exactly."""
    w1, b1, w2, b2, w3, b3, w4, b4, w5, b5, w6, b6 = params

    def mm(a, w, dt):
        prec = jax.lax.Precision.HIGHEST if dt == jnp.float32 else jax.lax.Precision.DEFAULT
        return jnp.dot(a.astype(dt), w.astype(dt),
                       preferred_element_type=jnp.float32, precision=prec)

    x = jnp.transpose(x_bcn, (0, 2, 1))                   # (B, N, 3)
    h = jax.nn.relu(mm(x, w1, jnp.float32) + b1)
    h = jax.nn.relu(mm(h, w2, mxu_dtype) + b2)
    h = jax.nn.relu(mm(h, w3, mxu_dtype) + b3)
    g = jnp.max(h, axis=1)                                # (B, 1024)
    f = jax.nn.relu(mm(g, w4, mxu_dtype) + b4[0])
    f = jax.nn.relu(mm(f, w5, mxu_dtype) + b5[0])
    f = mm(f, w6, mxu_dtype) + b6[0]
    iden = jnp.array([1, 0, 0, 0, 1, 0, 0, 0, 1], dtype=jnp.float32)
    return (f + iden).reshape(-1, 3, 3)


if __name__ == "__main__":
    key = jax.random.PRNGKey(0)
    kx, kp = jax.random.split(key)

    B, N = 2, 2500   # STN3d's default num_points; exercises N % TN != 0 edge-padding
    x = jax.random.normal(kx, (B, 3, N), dtype=jnp.float32)   # PyTorch NCW layout
    params = init_params(kp)

    ref_matched = stn3d_reference(x, params, mxu_dtype=jnp.bfloat16)  # kernel precision policy
    ref_f32 = stn3d_reference(x, params, mxu_dtype=jnp.float32)       # module (f32) semantics

    # tn=1024 exercises the multi-tile running-max path; tn=2560 is the reviewer-suggested
    # single-tile-per-batch configuration for small N.
    for tn in (1024, 2560):
        out = jax.block_until_ready(stn3d_forward(x, params, tn=tn))
        assert out.shape == (B, 3, 3)
        assert jnp.allclose(out, ref_matched, atol=2e-3, rtol=2e-3), \
            f"mismatch vs bf16-matched reference (tn={tn})"
        assert jnp.allclose(out, ref_f32, atol=1e-1, rtol=1e-1), \
            f"mismatch vs f32 reference (tn={tn})"

    print("KERNEL_OK")
</pallas_src>

<mosaic_0001>
module attributes {stable_mosaic.version = 11 : i64} {
  func.func @_stn3d_kernel(%arg0: i32, %arg1: i32, %arg2: memref<1x1024x3xf32, #tpu.memory_space<vmem>>, %arg3: memref<3x64xf32, #tpu.memory_space<vmem>>, %arg4: memref<1x64xf32, #tpu.memory_space<vmem>>, %arg5: memref<64x128xbf16, #tpu.memory_space<vmem>>, %arg6: memref<1x128xf32, #tpu.memory_space<vmem>>, %arg7: memref<128x1024xbf16, #tpu.memory_space<vmem>>, %arg8: memref<1x1024xf32, #tpu.memory_space<vmem>>, %arg9: memref<1024x512xbf16, #tpu.memory_space<vmem>>, %arg10: memref<1x512xf32, #tpu.memory_space<vmem>>, %arg11: memref<512x256xbf16, #tpu.memory_space<vmem>>, %arg12: memref<1x256xf32, #tpu.memory_space<vmem>>, %arg13: memref<256x128xbf16, #tpu.memory_space<vmem>>, %arg14: memref<1x128xf32, #tpu.memory_space<vmem>>, %arg15: memref<1x128xf32, #tpu.memory_space<vmem>>, %arg16: memref<1x1x128xf32, #tpu.memory_space<vmem>>, %arg17: memref<8x1024xf32, #tpu.memory_space<vmem>>) attributes {dimension_semantics = [#tpu.dimension_semantics<parallel>, #tpu.dimension_semantics<arbitrary>], iteration_bounds = array<i64: 2, 3>, scalar_prefetch = 0 : i64, scratch_operands = 1 : i64, tpu.core_type = #tpu.core_type<tc>, window_params = [{transform_indices = @transform_0, window_bounds = array<i64: 1, 1024, 3>}, {pipeline_mode = #tpu.pipeline_mode<synchronous>, transform_indices = @transform_1, window_bounds = array<i64: 3, 64>}, {pipeline_mode = #tpu.pipeline_mode<synchronous>, transform_indices = @transform_2, window_bounds = array<i64: 1, 64>}, {pipeline_mode = #tpu.pipeline_mode<synchronous>, transform_indices = @transform_3, window_bounds = array<i64: 64, 128>}, {pipeline_mode = #tpu.pipeline_mode<synchronous>, transform_indices = @transform_4, window_bounds = array<i64: 1, 128>}, {pipeline_mode = #tpu.pipeline_mode<synchronous>, transform_indices = @transform_5, window_bounds = array<i64: 128, 1024>}, {pipeline_mode = #tpu.pipeline_mode<synchronous>, transform_indices = @transform_6, window_bounds = array<i64: 1, 1024>}, {pipeline_mode = #tpu.pipeline_mode<synchronous>, transform_indices = @transform_7, window_bounds = array<i64: 1024, 512>}, {pipeline_mode = #tpu.pipeline_mode<synchronous>, transform_indices = @transform_8, window_bounds = array<i64: 1, 512>}, {pipeline_mode = #tpu.pipeline_mode<synchronous>, transform_indices = @transform_9, window_bounds = array<i64: 512, 256>}, {pipeline_mode = #tpu.pipeline_mode<synchronous>, transform_indices = @transform_10, window_bounds = array<i64: 1, 256>}, {pipeline_mode = #tpu.pipeline_mode<synchronous>, transform_indices = @transform_11, window_bounds = array<i64: 256, 128>}, {pipeline_mode = #tpu.pipeline_mode<synchronous>, transform_indices = @transform_12, window_bounds = array<i64: 1, 128>}, {pipeline_mode = #tpu.pipeline_mode<synchronous>, transform_indices = @transform_13, window_bounds = array<i64: 1, 128>}, {transform_indices = @transform_14, window_bounds = array<i64: 1, 1, 128>}]} {
    %c0_i32 = arith.constant 0 : i32
    %0 = arith.cmpi eq, %arg1, %c0_i32 : i32
    %1 = arith.extui %0 : i1 to i32
    %c0_i32_0 = arith.constant 0 : i32
    %2 = arith.cmpi ne, %1, %c0_i32_0 : i32
    scf.if %2 {
      %cst_22 = arith.constant 0xFF800000 : f32
      %47 = vector.broadcast %cst_22 : f32 to vector<8x1024xf32>
      %c0_23 = arith.constant 0 : index
      %c0_24 = arith.constant 0 : index
      %48 = vector.load %arg17[%c0_23, %c0_24] : memref<8x1024xf32, #tpu.memory_space<vmem>>, vector<8x1024xf32>
      tpu.vector_store %arg17[%c0_23, %c0_24], %47 {strides = array<i32>} : memref<8x1024xf32, #tpu.memory_space<vmem>>, vector<8x1024xf32>,
    } else {
    }
    %c0 = arith.constant 0 : index
    %c0_1 = arith.constant 0 : index
    %c0_2 = arith.constant 0 : index
    %3 = vector.load %arg2[%c0, %c0_1, %c0_2] : memref<1x1024x3xf32, #tpu.memory_space<vmem>>, vector<1x1024x3xf32>
    %4 = vector.shape_cast %3 : vector<1x1024x3xf32> to vector<1024x3xf32>
    %c0_3 = arith.constant 0 : index
    %c0_4 = arith.constant 0 : index
    %5 = vector.load %arg3[%c0_3, %c0_4] : memref<3x64xf32, #tpu.memory_space<vmem>>, vector<3x64xf32>
    %6 = vector.extract_strided_slice %4 {offsets = [0, 0], sizes = [1024, 1], strides = [1, 1]} : vector<1024x3xf32> to vector<1024x1xf32>
    %7 = vector.extract_strided_slice %5 {offsets = [0, 0], sizes = [1, 64], strides = [1, 1]} : vector<3x64xf32> to vector<1x64xf32>
    %8 = vector.broadcast %6 : vector<1024x1xf32> to vector<1024x64xf32>
    %9 = vector.broadcast %7 : vector<1x64xf32> to vector<1024x64xf32>
    %10 = arith.mulf %8, %9 : vector<1024x64xf32>
    %11 = vector.extract_strided_slice %4 {offsets = [0, 1], sizes = [1024, 1], strides = [1, 1]} : vector<1024x3xf32> to vector<1024x1xf32>
    %12 = vector.extract_strided_slice %5 {offsets = [1, 0], sizes = [1, 64], strides = [1, 1]} : vector<3x64xf32> to vector<1x64xf32>
    %13 = vector.broadcast %11 : vector<1024x1xf32> to vector<1024x64xf32>
    %14 = vector.broadcast %12 : vector<1x64xf32> to vector<1024x64xf32>
    %15 = arith.mulf %13, %14 : vector<1024x64xf32>
    %16 = arith.addf %10, %15 : vector<1024x64xf32>
    %17 = vector.extract_strided_slice %4 {offsets = [0, 2], sizes = [1024, 1], strides = [1, 1]} : vector<1024x3xf32> to vector<1024x1xf32>
    %18 = vector.extract_strided_slice %5 {offsets = [2, 0], sizes = [1, 64], strides = [1, 1]} : vector<3x64xf32> to vector<1x64xf32>
    %19 = vector.broadcast %17 : vector<1024x1xf32> to vector<1024x64xf32>
    %20 = vector.broadcast %18 : vector<1x64xf32> to vector<1024x64xf32>
    %21 = arith.mulf %19, %20 : vector<1024x64xf32>
    %22 = arith.addf %16, %21 : vector<1024x64xf32>
    %c0_5 = arith.constant 0 : index
    %c0_6 = arith.constant 0 : index
    %23 = vector.load %arg4[%c0_5, %c0_6] : memref<1x64xf32, #tpu.memory_space<vmem>>, vector<1x64xf32>
    %24 = vector.broadcast %23 : vector<1x64xf32> to vector<1024x64xf32>
    %25 = arith.addf %22, %24 : vector<1024x64xf32>
    %cst = arith.constant 0.000000e+00 : f32
    %26 = vector.broadcast %cst : f32 to vector<1024x64xf32>
    %27 = arith.maximumf %25, %26 : vector<1024x64xf32>
    %28 = arith.truncf %27 : vector<1024x64xf32> to vector<1024x64xbf16>
    %c0_7 = arith.constant 0 : index
    %c0_8 = arith.constant 0 : index
    %29 = vector.load %arg5[%c0_7, %c0_8] : memref<64x128xbf16, #tpu.memory_space<vmem>>, vector<64x128xbf16>
    %cst_9 = arith.constant dense<0.000000e+00> : vector<1024x128xf32>
    %30 = tpu.matmul %28, %29, %cst_9 {dimension_numbers = #tpu.dot_dimension_numbers<[1], [0], [0], [1], [0, 0, 1, 1], [], []>} : vector<1024x64xbf16>, vector<64x128xbf16>, vector<1024x128xf32> -> vector<1024x128xf32>
    %c0_10 = arith.constant 0 : index
    %c0_11 = arith.constant 0 : index
    %31 = vector.load %arg6[%c0_10, %c0_11] : memref<1x128xf32, #tpu.memory_space<vmem>>, vector<1x128xf32>
    %32 = vector.broadcast %31 : vector<1x128xf32> to vector<1024x128xf32>
    %33 = arith.addf %30, %32 : vector<1024x128xf32>
    %cst_12 = arith.constant 0.000000e+00 : f32
    %34 = vector.broadcast %cst_12 : f32 to vector<1024x128xf32>
    %35 = arith.maximumf %33, %34 : vector<1024x128xf32>
    %36 = arith.truncf %35 : vector<1024x128xf32> to vector<1024x128xbf16>
    %c0_13 = arith.constant 0 : index
    %c0_14 = arith.constant 0 : index
    %37 = vector.load %arg7[%c0_13, %c0_14] : memref<128x1024xbf16, #tpu.memory_space<vmem>>, vector<128x1024xbf16>
    %cst_15 = arith.constant dense<0.000000e+00> : vector<1024x1024xf32>
    %38 = tpu.matmul %36, %37, %cst_15 {dimension_numbers = #tpu.dot_dimension_numbers<[1], [0], [0], [1], [0, 0, 1, 1], [], []>} : vector<1024x128xbf16>, vector<128x1024xbf16>, vector<1024x1024xf32> -> vector<1024x1024xf32>
    %39 = vector.shape_cast %38 : vector<1024x1024xf32> to vector<128x8x1024xf32>
    %cst_16 = arith.constant dense<0xFF800000> : vector<8x1024xf32>
    %40 = vector.multi_reduction <maximumf>, %39, %cst_16 [0] : vector<128x8x1024xf32> to vector<8x1024xf32>
    %c0_17 = arith.constant 0 : index
    %c0_18 = arith.constant 0 : index
    %41 = vector.load %arg17[%c0_17, %c0_18] : memref<8x1024xf32, #tpu.memory_space<vmem>>, vector<8x1024xf32>
    %42 = arith.maximumf %41, %40 : vector<8x1024xf32>
    %c0_19 = arith.constant 0 : index
    %c0_20 = arith.constant 0 : index
    %43 = vector.load %arg17[%c0_19, %c0_20] : memref<8x1024xf32, #tpu.memory_space<vmem>>, vector<8x1024xf32>
    tpu.vector_store %arg17[%c0_19, %c0_20], %42 {strides = array<i32>} : memref<8x1024xf32, #tpu.memory_space<vmem>>, vector<8x1024xf32>,
    %c2_i32 = arith.constant 2 : i32
    %44 = arith.cmpi eq, %arg1, %c2_i32 : i32
    %45 = arith.extui %44 : i1 to i32
    %c0_i32_21 = arith.constant 0 : i32
    %46 = arith.cmpi ne, %45, %c0_i32_21 : i32
    scf.if %46 {
      %c0_22 = arith.constant 0 : index
      %c0_23 = arith.constant 0 : index
      %47 = vector.load %arg17[%c0_22, %c0_23] : memref<8x1024xf32, #tpu.memory_space<vmem>>, vector<8x1024xf32>
      %cst_24 = arith.constant dense<0xFF800000> : vector<1024xf32>
      %48 = vector.multi_reduction <maximumf>, %47, %cst_24 [0] : vector<8x1024xf32> to vector<1024xf32>
      %49 = vector.shape_cast %48 : vector<1024xf32> to vector<1x1024xf32>
      %c0_25 = arith.constant 0 : index
      %c0_26 = arith.constant 0 : index
      %50 = vector.load %arg8[%c0_25, %c0_26] : memref<1x1024xf32, #tpu.memory_space<vmem>>, vector<1x1024xf32>
      %51 = arith.addf %49, %50 : vector<1x1024xf32>
      %cst_27 = arith.constant 0.000000e+00 : f32
      %52 = vector.broadcast %cst_27 : f32 to vector<1x1024xf32>
      %53 = arith.maximumf %51, %52 : vector<1x1024xf32>
      %54 = arith.truncf %53 : vector<1x1024xf32> to vector<1x1024xbf16>
      %c0_28 = arith.constant 0 : index
      %c0_29 = arith.constant 0 : index
      %55 = vector.load %arg9[%c0_28, %c0_29] : memref<1024x512xbf16, #tpu.memory_space<vmem>>, vector<1024x512xbf16>
      %cst_30 = arith.constant dense<0.000000e+00> : vector<1x512xf32>
      %56 = tpu.matmul %54, %55, %cst_30 {dimension_numbers = #tpu.dot_dimension_numbers<[1], [0], [0], [1], [0, 0, 1, 1], [], []>} : vector<1x1024xbf16>, vector<1024x512xbf16>, vector<1x512xf32> -> vector<1x512xf32>
      %c0_31 = arith.constant 0 : index
      %c0_32 = arith.constant 0 : index
      %57 = vector.load %arg10[%c0_31, %c0_32] : memref<1x512xf32, #tpu.memory_space<vmem>>, vector<1x512xf32>
      %58 = arith.addf %56, %57 : vector<1x512xf32>
      %cst_33 = arith.constant 0.000000e+00 : f32
      %59 = vector.broadcast %cst_33 : f32 to vector<1x512xf32>
      %60 = arith.maximumf %58, %59 : vector<1x512xf32>
      %61 = arith.truncf %60 : vector<1x512xf32> to vector<1x512xbf16>
      %c0_34 = arith.constant 0 : index
      %c0_35 = arith.constant 0 : index
      %62 = vector.load %arg11[%c0_34, %c0_35] : memref<512x256xbf16, #tpu.memory_space<vmem>>, vector<512x256xbf16>
      %cst_36 = arith.constant dense<0.000000e+00> : vector<1x256xf32>
      %63 = tpu.matmul %61, %62, %cst_36 {dimension_numbers = #tpu.dot_dimension_numbers<[1], [0], [0], [1], [0, 0, 1, 1], [], []>} : vector<1x512xbf16>, vector<512x256xbf16>, vector<1x256xf32> -> vector<1x256xf32>
      %c0_37 = arith.constant 0 : index
      %c0_38 = arith.constant 0 : index
      %64 = vector.load %arg12[%c0_37, %c0_38] : memref<1x256xf32, #tpu.memory_space<vmem>>, vector<1x256xf32>
      %65 = arith.addf %63, %64 : vector<1x256xf32>
      %cst_39 = arith.constant 0.000000e+00 : f32
      %66 = vector.broadcast %cst_39 : f32 to vector<1x256xf32>
      %67 = arith.maximumf %65, %66 : vector<1x256xf32>
      %68 = arith.truncf %67 : vector<1x256xf32> to vector<1x256xbf16>
      %c0_40 = arith.constant 0 : index
      %c0_41 = arith.constant 0 : index
      %69 = vector.load %arg13[%c0_40, %c0_41] : memref<256x128xbf16, #tpu.memory_space<vmem>>, vector<256x128xbf16>
      %cst_42 = arith.constant dense<0.000000e+00> : vector<1x128xf32>
      %70 = tpu.matmul %68, %69, %cst_42 {dimension_numbers = #tpu.dot_dimension_numbers<[1], [0], [0], [1], [0, 0, 1, 1], [], []>} : vector<1x256xbf16>, vector<256x128xbf16>, vector<1x128xf32> -> vector<1x128xf32>
      %c0_43 = arith.constant 0 : index
      %c0_44 = arith.constant 0 : index
      %71 = vector.load %arg14[%c0_43, %c0_44] : memref<1x128xf32, #tpu.memory_space<vmem>>, vector<1x128xf32>
      %72 = arith.addf %70, %71 : vector<1x128xf32>
      %c0_45 = arith.constant 0 : index
      %c0_46 = arith.constant 0 : index
      %73 = vector.load %arg15[%c0_45, %c0_46] : memref<1x128xf32, #tpu.memory_space<vmem>>, vector<1x128xf32>
      %74 = arith.addf %72, %73 : vector<1x128xf32>
      %c0_47 = arith.constant 0 : index
      %c0_48 = arith.constant 0 : index
      %c0_49 = arith.constant 0 : index
      %75 = vector.load %arg16[%c0_47, %c0_48, %c0_49] : memref<1x1x128xf32, #tpu.memory_space<vmem>>, vector<1x1x128xf32>
      %76 = vector.shape_cast %75 : vector<1x1x128xf32> to vector<1x128xf32>
      %77 = vector.shape_cast %74 : vector<1x128xf32> to vector<1x1x128xf32>
      tpu.vector_store %arg16[%c0_47, %c0_48, %c0_49], %77 {strides = array<i32>} : memref<1x1x128xf32, #tpu.memory_space<vmem>>, vector<1x1x128xf32>,
    } else {
    }
    return
  }
  func.func @transform_0(%arg0: i32, %arg1: i32) -> (i32, i32, i32) {
    %c0_i32 = arith.constant 0 : i32
    %c0_i32_0 = arith.constant 0 : i32
    return %arg0, %arg1, %c0_i32 : i32, i32, i32
  }
  func.func @transform_1(%arg0: i32, %arg1: i32) -> (i32, i32) {
    %c0_i32 = arith.constant 0 : i32
    %c0_i32_0 = arith.constant 0 : i32
    %c0_i32_1 = arith.constant 0 : i32
    return %c0_i32, %c0_i32_0 : i32, i32
  }
  func.func @transform_2(%arg0: i32, %arg1: i32) -> (i32, i32) {
    %c0_i32 = arith.constant 0 : i32
    %c0_i32_0 = arith.constant 0 : i32
    %c0_i32_1 = arith.constant 0 : i32
    return %c0_i32, %c0_i32_0 : i32, i32
  }
  func.func @transform_3(%arg0: i32, %arg1: i32) -> (i32, i32) {
    %c0_i32 = arith.constant 0 : i32
    %c0_i32_0 = arith.constant 0 : i32
    %c0_i32_1 = arith.constant 0 : i32
    return %c0_i32, %c0_i32_0 : i32, i32
  }
  func.func @transform_4(%arg0: i32, %arg1: i32) -> (i32, i32) {
    %c0_i32 = arith.constant 0 : i32
    %c0_i32_0 = arith.constant 0 : i32
    %c0_i32_1 = arith.constant 0 : i32
    return %c0_i32, %c0_i32_0 : i32, i32
  }
  func.func @transform_5(%arg0: i32, %arg1: i32) -> (i32, i32) {
    %c0_i32 = arith.constant 0 : i32
    %c0_i32_0 = arith.constant 0 : i32
    %c0_i32_1 = arith.constant 0 : i32
    return %c0_i32, %c0_i32_0 : i32, i32
  }
  func.func @transform_6(%arg0: i32, %arg1: i32) -> (i32, i32) {
    %c0_i32 = arith.constant 0 : i32
    %c0_i32_0 = arith.constant 0 : i32
    %c0_i32_1 = arith.constant 0 : i32
    return %c0_i32, %c0_i32_0 : i32, i32
  }
  func.func @transform_7(%arg0: i32, %arg1: i32) -> (i32, i32) {
    %c0_i32 = arith.constant 0 : i32
    %c0_i32_0 = arith.constant 0 : i32
    %c0_i32_1 = arith.constant 0 : i32
    return %c0_i32, %c0_i32_0 : i32, i32
  }
  func.func @transform_8(%arg0: i32, %arg1: i32) -> (i32, i32) {
    %c0_i32 = arith.constant 0 : i32
    %c0_i32_0 = arith.constant 0 : i32
    %c0_i32_1 = arith.constant 0 : i32
    return %c0_i32, %c0_i32_0 : i32, i32
  }
  func.func @transform_9(%arg0: i32, %arg1: i32) -> (i32, i32) {
    %c0_i32 = arith.constant 0 : i32
    %c0_i32_0 = arith.constant 0 : i32
    %c0_i32_1 = arith.constant 0 : i32
    return %c0_i32, %c0_i32_0 : i32, i32
  }
  func.func @transform_10(%arg0: i32, %arg1: i32) -> (i32, i32) {
    %c0_i32 = arith.constant 0 : i32
    %c0_i32_0 = arith.constant 0 : i32
    %c0_i32_1 = arith.constant 0 : i32
    return %c0_i32, %c0_i32_0 : i32, i32
  }
  func.func @transform_11(%arg0: i32, %arg1: i32) -> (i32, i32) {
    %c0_i32 = arith.constant 0 : i32
    %c0_i32_0 = arith.constant 0 : i32
    %c0_i32_1 = arith.constant 0 : i32
    return %c0_i32, %c0_i32_0 : i32, i32
  }
  func.func @transform_12(%arg0: i32, %arg1: i32) -> (i32, i32) {
    %c0_i32 = arith.constant 0 : i32
    %c0_i32_0 = arith.constant 0 : i32
    %c0_i32_1 = arith.constant 0 : i32
    return %c0_i32, %c0_i32_0 : i32, i32
  }
  func.func @transform_13(%arg0: i32, %arg1: i32) -> (i32, i32) {
    %c0_i32 = arith.constant 0 : i32
    %c0_i32_0 = arith.constant 0 : i32
    %c0_i32_1 = arith.constant 0 : i32
    return %c0_i32, %c0_i32_0 : i32, i32
  }
  func.func @transform_14(%arg0: i32, %arg1: i32) -> (i32, i32, i32) {
    %c0_i32 = arith.constant 0 : i32
    %c0_i32_0 = arith.constant 0 : i32
    %c0_i32_1 = arith.constant 0 : i32
    return %arg0, %c0_i32, %c0_i32_0 : i32, i32, i32
  }
}

</mosaic_0001>

<bundles_post_ra>
// kernel: squeeze.1
= control target key start
LH: loop header
LB: loop body
LE: loop exit
PB: predicated region body
PF: predicated region fallthrough
CT: control target
= control target key end

     0   :  { %vm7_vm0 = vcmask 23552   ;;  %s36_s8 = smov 122   ;;  %s56_s0 = inlined_call_operand.vmem [shape: f32[2,9], index: 0, kind: input, shape index: {}]   ;;  %s57_s1 = inlined_call_operand.vmem [shape: f32[2,3,3], index: 1, kind: output, shape index: {}]  }
   0x1   :  { %v4_v0 = vld [vmem:[%s56_s0] sm:$0x3]  ;;  %s35_s0 = smov 125  }
   0x2   :  { %5 = vst [vmem:[#allocation1] sm:$0x3] %v4_v0 }
   0x9   :  { %v9_v1 = vld [vmem:[#allocation1] sm:$0x3]  }
   0xa   :  { %v6_v2 = vld [vmem:[#allocation1] sm:$0x3]   ;;  %10 = vrot.lane.b32.xlu0 %v9_v1, %s35_s0 }
   0xb   :  { %8 = vst.msk [vmem:[#allocation0] ss:$8 sm:$0x3] %vm7_vm0, %v6_v2   ;;  %v15_v3 = vld [vmem:[#allocation1] sm:$0x3]  }
   0xe   :  { %16 = vrot.lane.b32.xlu0 %v15_v3, %s36_s8 }
  0x7c   :  { %v11_v4 = vpop.permute.xlu0 %10  }
  0x7d   :  { %14 = vst.msk [vmem:[#allocation0 + $0x1] ss:$8 sm:$0x3] %vm7_vm0, %v11_v4  }
  0x80   :  { %v17_v5 = vpop.permute.xlu0 %16  }
  0x81   :  { %20 = vst.msk [vmem:[#allocation0 + $0x2] ss:$8 sm:$0x3] %vm7_vm0, %v17_v5  }
  0x88   :  { %v24_v6 = vld [vmem:[#allocation0] sm:$0xf]  ;;  %v28_v7 = vld [vmem:[#allocation0 + $0x8] sm:$0xf] }
  0x89   :  { %26 = vst [vmem:[%s57_s1] sm:$0xf] %v24_v6  ;;  %32 = vst [vmem:[%s57_s1 + $0x4] sm:$0xf] %v28_v7 }

// kernel: stn3d_forward.1
= control target key start
LH: loop header
LB: loop body
LE: loop exit
PB: predicated region body
PF: predicated region fallthrough
CT: control target
= control target key end

     0   :  { %s12727_s29 = smov 0   ;;  %s12729_s30 = smov 0   ;;  %s16946_s0 = inlined_call_operand.vmem [shape: f32[2,3072,3], index: 0, kind: input, shape index: {}]   ;;  %s16947_s1 = inlined_call_operand.vmem [shape: f32[3,64], index: 1, kind: input, shape index: {}]   ;;  %s16948_s2 = inlined_call_operand.vmem [shape: f32[1,64], index: 2, kind: input, shape index: {}]   ;;  %s16949_s3 = inlined_call_operand.vmem [shape: bf16[64,128], index: 3, kind: input, shape index: {}]   ;;  %s16950_s4 = inlined_call_operand.vmem [shape: f32[1,128], index: 4, kind: input, shape index: {}]   ;;  %s16951_s5 = inlined_call_operand.vmem [shape: bf16[128,1024], index: 5, kind: input, shape index: {}]   ;;  %s16952_s6 = inlined_call_operand.vmem [shape: f32[1,1024], index: 6, kind: input, shape index: {}]   ;;  %s16953_s7 = inlined_call_operand.vmem [shape: bf16[1024,512], index: 7, kind: input, shape index: {}]   ;;  %s16954_s8 = inlined_call_operand.vmem [shape: f32[1,512], index: 8, kind: input, shape index: {}]   ;;  %s16955_s9 = inlined_call_operand.vmem [shape: bf16[512,256], index: 9, kind: input, shape index: {}]   ;;  %s16956_s10 = inlined_call_operand.vmem [shape: f32[1,256], index: 10, kind: input, shape index: {}]   ;;  %s16957_s11 = inlined_call_operand.vmem [shape: bf16[256,128], index: 11, kind: input, shape index: {}]   ;;  %s16958_s12 = inlined_call_operand.vmem [shape: f32[1,128], index: 12, kind: input, shape index: {}]   ;;  %s16959_s13 = inlined_call_operand.vmem [shape: f32[1,128], index: 13, kind: input, shape index: {}]   ;;  %s16960_s14 = inlined_call_operand.vmem [shape: f32[2,1,128], index: 14, kind: output, shape index: {}]  }
   0x1   :  { %s12731_s15 = smov 0   ;;  %s12733_s16 = smov 0  }
   0x2   :  { %s12735_s17 = smov 0  }
   0x3 LB: > { %s33_s18 = sadd.s32 1, %s12638_s15  ;;  %s36_s19 = sadd.s32 1, %s12642_s16  ;;  %s12646_s17 = sphi %s12735_s17, %s24_s17   ;;  %s12642_s16 = sphi %s12733_s16, %s17393_s16   ;;  %s12638_s15 = sphi %s12731_s15, %s17392_s15   ;;  %s12634_s30 = sphi %s12729_s30, %s17391_s30   ;;  %s12630_s29 = sphi %s12727_s29, %s17390_s29  }
   0x4   : > { %p34_p0 = scmp.ge.s32.totalorder %s33_s18, 3  ;;  %p11104_p1 = scmp.ge.s32.totalorder %s12646_s17, 1 }
   0x5   : > { %p431_p2 = scmp.lt.s32.totalorder %s12646_s17, 7 }
   0x6   : > { %s17395_s18 = smov (%p34_p0, %s33_s18), 0  ;;  %s17397_s19 = smov (!%p34_p0, %s36_s19), %s12642_s16 }
   0x7   : > { %p432_p3 = pnand %p11104_p1, %p431_p2  ;;  %p38_p4 = scmp.ge.s32.totalorder %s17397_s19, 2 }
   0x9   : > { %s17399_s19 = smov (%p38_p4, %s17397_s19), 0  ;;  %435 = sbr.rel (%p432_p3) target bundleno = 3460 (0xd84), region = 76 }
   0xa   : > { %17033 = sst [smem:[#allocation3_spill]] %s17399_s19 }
  0x10   : > { %s11105_s20 = sshll.u32 %s12630_s29, 7  ;;  %p480_p5 = scmp.lt.s32.totalorder %s12634_s30, 1 }
  0x11   : > { %p482_p6 = scmp.lt.s32.totalorder %s11105_s20, 383  ;;  %p11107_p7 = scmp.ne.s32.totalorder %s12630_s29, 0 }
  0x12   : > { %s17401_s30 = smov (!%p480_p5, %s12634_s30), 1  ;;  %v12648_v0 = vmov (!%p11107_p7), -inf  }
  0x13   : > { %s17403_s20 = smov (!%p482_p6, %s11105_s20), 383  ;;  %s11847_s21 = smul.u32 384, %s17401_s30  ;;  %497 = vst [vmem:[#allocation2] sm:$0xff] (!%p11107_p7), %v12648_v0  ;;  %498 = vst [vmem:[#allocation2 + $0x8] sm:$0xff] (!%p11107_p7), %v12648_v0 }
  0x14   : > { %s491_s24 = scalar_lea.vmem %s16960_s14, %s17401_s30  ;;  %496 = sbr.rel (%p11107_p7) target bundleno = 27 (0x1b), region = 80  ;;  %499 = vst [vmem:[#allocation2 + $0x10] sm:$0xff] (!%p11107_p7), %v12648_v0  ;;  %500 = vst [vmem:[#allocation2 + $0x18] sm:$0xff] (!%p11107_p7), %v12648_v0 }
  0x15   : > { %s485_s25 = sadd.s32 %s11847_s21, %s17403_s20  ;;  %501 = vst [vmem:[#allocation2 + $0x20] sm:$0xff] (!%p11107_p7), %v12648_v0  ;;  %502 = vst [vmem:[#allocation2 + $0x28] sm:$0xff] (!%p11107_p7), %v12648_v0 }
  0x16   : > { %s11106_s26 = sshll.u32 %s485_s25, 3  ;;  %503 = vst [vmem:[#allocation2 + $0x30] sm:$0xff] (!%p11107_p7), %v12648_v0  ;;  %504 = vst [vmem:[#allocation2 + $0x38] sm:$0xff] (!%p11107_p7), %v12648_v0 }
  0x17   : > { %s12770_s19 = scalar_lea.vmem %s16946_s0, %s11106_s26 }
  0x1b PF: > { %v506_v1 = vld [vmem:[%s12770_s19 + $0x8] sm:$0xff]  ;;  %v505_v2 = vld [vmem:[%s12770_s19] sm:$0xff]  ;;  %v16961_v3 = vmov 2   ;;  %v16963_v4 = vmov 1   ;;  %v16969_v5 = vmov 0   ;;  %v508_v6 = vld [vmem:[%s12770_s19 + $0x18] sm:$0xff]  ;;  %v1274_v44 = vlaneseq }
  0x1c   : > { %11896 = vset.pattern.permute.xlu0 %v16961_v3  ;;  %11892 = vset.pattern.permute.xlu1 %v16963_v4  ;;  %v12781_v7 = vld [vmem:[%s12770_s19 + $0x10] sm:$0xff]  ;;  %v12786_v8 = vld [vmem:[%s12770_s19 + $0x20] sm:$0xff]  ;;  %v12791_v9 = vld [vmem:[%s12770_s19 + $0x48] sm:$0xff]  ;;  %vm3316_vm0 = vcmask 523264   ;;  %p11242_p8 = scmp.ne.s32.totalorder %s12630_s29, 2 }
  0x1d   : > { %2183 = vperm.xlu0 %11896, %v506_v1   ;;  %1407 = vperm.xlu1 %11892, %v505_v2   ;;  %v12795_v10 = vld [vmem:[%s12770_s19 + $0x50] sm:$0xff]  ;;  %v12800_v11 = vld [vmem:[%s12770_s19 + $0x60] sm:$0xff]  ;;  %v12804_v12 = vld [vmem:[%s12770_s19 + $0x28] sm:$0xff]  ;;  %v12920_v48 = vshrl.u32 %v1274_v44, 7 }
  0x1e   : > { %v12807_v13 = vld [vmem:[%s12770_s19 + $0x88] sm:$0xff]  ;;  %v12813_v14 = vld [vmem:[%s12770_s19 + $0x90] sm:$0xff]  ;;  %v12819_v15 = vld [vmem:[%s12770_s19 + $0xa0] sm:$0xff] }
  0x1f   : > { %v12822_v16 = vld [vmem:[%s12770_s19 + $0x30] sm:$0xff]  ;;  %v12828_v17 = vld [vmem:[%s12770_s19 + $0x208] sm:$0xff]  ;;  %v12831_v18 = vld [vmem:[%s12770_s19 + $0x38] sm:$0xff]  ;;  %17034 = vst [vmem:[#allocation4_spill] sm:$0xff] %v12920_v48  ;;  %v12925_v51 = vsub.s32 0, %v12920_v48  ;;  %v12929_v54 = vsub.s32 1, %v12920_v48 }
  0x20   : > { %v12836_v19 = vld [vmem:[%s12770_s19 + $0x210] sm:$0xff]  ;;  %v12841_v20 = vld [vmem:[%s12770_s19 + $0x220] sm:$0xff]  ;;  %v12846_v21 = vld [vmem:[%s12770_s19 + $0x248] sm:$0xff]  ;;  %v12932_v55 = vsub.s32 2, %v12920_v48 }
  0x21   : > { %11897 = vset.pattern.permute.xlu0 %v16969_v5  ;;  %1411 = vperm.xlu1 %11892, %v506_v1   ;;  %v12852_v22 = vld [vmem:[%s12770_s19 + $0x250] sm:$0xff]  ;;  %v12857_v23 = vld [vmem:[%s12770_s19 + $0x260] sm:$0xff]  ;;  %v12863_v25 = vld [vmem:[%s12770_s19 + $0x288] sm:$0xff]  ;;  %17035 = vst [vmem:[#allocation5_spill] sm:$0xff] %v12925_v51 }
  0x22   : > { %636 = vperm.xlu0 %11897, %v505_v2   ;;  %v513_v24 = vld [vmem:[%s12770_s19 + $0x40] sm:$0xff]  ;;  %v12868_v26 = vld [vmem:[%s12770_s19 + $0x290] sm:$0xff]  ;;  %v516_v28 = vld [vmem:[%s12770_s19 + $0x58] sm:$0xff]  ;;  %17036 = vst [vmem:[#allocation6_spill] sm:$0xff] %v12929_v54 }
  0x23   : > { %v589_v27 = vld [vmem:[%s12770_s19 + $0x2a0] sm:$0xff]  ;;  %v594_v29 = vld [vmem:[%s12770_s19 + $0x2c8] sm:$0xff]  ;;  %v12877_v30 = vld [vmem:[%s12770_s19 + $0x2d0] sm:$0xff]  ;;  %17037 = vst [vmem:[#allocation7_spill] sm:$0xff] %v12932_v55 }
  0x24   : > { %v597_v31 = vld [vmem:[%s12770_s19 + $0x2e0] sm:$0xff]  ;;  %v602_v32 = vld [vmem:[%s12770_s19 + $0x308] sm:$0xff]  ;;  %v12886_v33 = vld [vmem:[%s12770_s19 + $0x310] sm:$0xff] }
  0x25   : > { %11893 = vset.pattern.permute.xlu1 %v16969_v5  ;;  %v605_v34 = vld [vmem:[%s12770_s19 + $0x320] sm:$0xff]  ;;  %v12891_v35 = vld [vmem:[%s12770_s19 + $0x68] sm:$0xff]  ;;  %v12898_v37 = vld [vmem:[%s12770_s19 + $0x350] sm:$0xff] }
  0x26   : > { %641 = vperm.xlu0 %11897, %v506_v1   ;;  %651 = vperm.xlu1 %11893, %v508_v6   ;;  %v610_v36 = vld [vmem:[%s12770_s19 + $0x348] sm:$0xff]  ;;  %v12903_v38 = vld [vmem:[%s12770_s19 + $0x70] sm:$0xff]  ;;  %v613_v39 = vld [vmem:[%s12770_s19 + $0x360] sm:$0xff] }
  0x27   : > { %v12909_v40 = vld [vmem:[%s12770_s19 + $0x78] sm:$0xff]  ;;  %v554_v41 = vld [vmem:[%s12770_s19 + $0x188] sm:$0xff]  ;;  %v557_v43 = vld [vmem:[%s12770_s19 + $0x1a0] sm:$0xff] }
  0x28   : > { %v556_v42 = vld [vmem:[%s12770_s19 + $0x198] sm:$0xff]  ;;  %v622_v45 = vld [vmem:[%s12770_s19 + $0x3a8] sm:$0xff]  ;;  %v559_v49 = vld [vmem:[%s12770_s19 + $0x1b0] sm:$0xff] }
  0x29   : > { %v521_v53 = vld [vmem:[%s12770_s19 + $0x80] sm:$0xff]  ;;  %v624_v57 = vld [vmem:[%s12770_s19 + $0x3b8] sm:$0xff]  ;;  %v562_v0 = vld [vmem:[%s12770_s19 + $0x1c8] sm:$0xff] }
  0x2a   : > { %646 = vperm.xlu0 %11897, %v12781_v7   ;;  %11894 = vset.pattern.permute.xlu1 %v16963_v4  ;;  %v633_v56 = vld [vmem:[%s16947_s1] sm:$0x7]  ;;  %v13096_v48 = vld [vmem:[%s12770_s19 + $0x230] sm:$0xff] }
  0x2b   : > { %1419 = vperm.xlu1 %11894, %v508_v6   ;;  %v12940_v58 = vrot.slane %v633_v56, %v12925_v51  ;;  %v12945_v61 = vrot.slane %v633_v56, %v12929_v54  ;;  %v12948_v62 = vrot.slane %v633_v56, %v12932_v55  ;;  %v17054_v55 = vmov 1  }
  0x2e   : > { %656 = vperm.xlu0 %11897, %v12786_v8  }
  0x2f   : > { %11895 = vset.pattern.permute.xlu1 %v16961_v3 }
  0x30   : > { %2179 = vperm.xlu1 %11895, %v505_v2  }
  0x32   : > { %681 = vperm.xlu0 %11897, %v12791_v9  }
  0x34   : > { %2187 = vperm.xlu1 %11895, %v12781_v7  }
  0x36   : > { %686 = vperm.xlu0 %11897, %v12795_v10  }
  0x38   : > { %2191 = vperm.xlu1 %11895, %v508_v6  }
  0x3a   : > { %696 = vperm.xlu0 %11897, %v12800_v11  }
  0x3c   : > { %11898 = vset.pattern.permute.xlu1 %v16969_v5 }
  0x3d   : > { %661 = vperm.xlu1 %11898, %v12804_v12  }
  0x3e   : > { %721 = vperm.xlu0 %11897, %v12807_v13  }
  0x41   : > { %11899 = vset.pattern.permute.xlu1 %v16963_v4 }
  0x42   : > { %726 = vperm.xlu0 %11897, %v12813_v14   ;;  %1423 = vperm.xlu1 %11899, %v12786_v8  }
  0x46   : > { %736 = vperm.xlu0 %11897, %v12819_v15   ;;  %11900 = vset.pattern.permute.xlu1 %v16969_v5 }
  0x47   : > { %666 = vperm.xlu1 %11900, %v12822_v16  }
  0x4a   : > { %961 = vperm.xlu0 %11897, %v12828_v17  }
  0x4b   : > { %671 = vperm.xlu1 %11900, %v12831_v18  }
  0x4e   : > { %966 = vperm.xlu0 %11897, %v12836_v19  }
  0x4f   : > { %11901 = vset.pattern.permute.xlu1 %v16963_v4 }
  0x50   : > { %1435 = vperm.xlu1 %11901, %v12831_v18  }
  0x52   : > { %976 = vperm.xlu0 %11897, %v12841_v20  }
  0x54   : > { %11902 = vset.pattern.permute.xlu1 %v16961_v3 }
  0x55   : > { %2199 = vperm.xlu1 %11902, %v12804_v12  }
  0x56   : > { %1001 = vperm.xlu0 %11897, %v12846_v21  }
  0x59   : > { %2203 = vperm.xlu1 %11902, %v12822_v16  }
  0x5a   : > { %1006 = vperm.xlu0 %11897, %v12852_v22  }
  0x5d   : > { %11903 = vset.pattern.permute.xlu1 %v16969_v5 }
  0x5e   : > { %1016 = vperm.xlu0 %11897, %v12857_v23   ;;  %676 = vperm.xlu1 %11903, %v513_v24  }
  0x62   : > { %1041 = vperm.xlu0 %11897, %v12863_v25   ;;  %11904 = vset.pattern.permute.xlu1 %v16963_v4 }
  0x63   : > { %1439 = vperm.xlu1 %11904, %v513_v24  }
  0x66   : > { %1046 = vperm.xlu0 %11897, %v12868_v26  }
  0x67   : > { %1443 = vperm.xlu1 %11904, %v12791_v9  }
  0x6a   : > { %1056 = vperm.xlu0 %11897, %v589_v27  }
  0x6b   : > { %11905 = vset.pattern.permute.xlu1 %v16969_v5 }
  0x6c   : > { %691 = vperm.xlu1 %11905, %v516_v28  }
  0x6e   : > { %1081 = vperm.xlu0 %11897, %v594_v29  }
  0x70   : > { %11906 = vset.pattern.permute.xlu1 %v16963_v4 }
  0x71   : > { %1451 = vperm.xlu1 %11906, %v516_v28  }
  0x72   : > { %1086 = vperm.xlu0 %11897, %v12877_v30  }
  0x75   : > { %11907 = vset.pattern.permute.xlu1 %v16961_v3 }
  0x76   : > { %1096 = vperm.xlu0 %11897, %v597_v31   ;;  %2211 = vperm.xlu1 %11907, %v513_v24  }
  0x7a   : > { %1121 = vperm.xlu0 %11897, %v602_v32   ;;  %2219 = vperm.xlu1 %11907, %v12795_v10  }
  0x7e   : > { %1126 = vperm.xlu0 %11897, %v12886_v33   ;;  %2223 = vperm.xlu1 %11907, %v516_v28   ;;  %v564_v28 = vld [vmem:[%s12770_s19 + $0x1d8] sm:$0xff] }
  0x82   : > { %1136 = vperm.xlu0 %11897, %v605_v34   ;;  %11908 = vset.pattern.permute.xlu1 %v16969_v5 }
  0x83   : > { %701 = vperm.xlu1 %11908, %v12891_v35  }
  0x86   : > { %1161 = vperm.xlu0 %11897, %v610_v36  }
  0x87   : > { %11909 = vset.pattern.permute.xlu1 %v16963_v4 }
  0x88   : > { %1455 = vperm.xlu1 %11909, %v12800_v11  }
  0x8a   : > { %1166 = vperm.xlu0 %11897, %v12898_v37  }
  0x8c   : > { %11910 = vset.pattern.permute.xlu1 %v16969_v5 }
  0x8d   : > { %706 = vperm.xlu1 %11910, %v12903_v38  }
  0x8e   : > { %1176 = vperm.xlu0 %11897, %v613_v39   ;;  %v565_v39 = vld [vmem:[%s12770_s19 + $0x1e0] sm:$0xff] }
  0x91   : > { %711 = vperm.xlu1 %11910, %v12909_v40  }
  0x92   : > { %881 = vperm.xlu0 %11897, %v554_v41   ;;  %v524_v41 = vld [vmem:[%s12770_s19 + $0x98] sm:$0xff] }
  0x95   : > { %11911 = vset.pattern.permute.xlu1 %v16963_v4 }
  0x96   : > { %891 = vperm.xlu0 %11897, %v556_v42   ;;  %1467 = vperm.xlu1 %11911, %v12909_v40   ;;  %v12970_v42 = vld [vmem:[%s16948_s2] ss:$0 sm:$0xff] }
  0x9a   : > { %896 = vperm.xlu0 %11897, %v557_v43   ;;  %11912 = vset.pattern.permute.xlu1 %v16961_v3 }
  0x9b   : > { %2231 = vperm.xlu1 %11912, %v12891_v35  }
  0x9c   : > { %v1408_v46 = vpop.permute.xlu1 %1407  ;;  %v2184_v47 = vpop.permute.xlu0 %2183 }
  0x9d   : > { %v2695_v6 = vmul.f32 %v12948_v62, %v2184_v47  ;;  %v1922_v32 = vmul.f32 %v12945_v61, %v1408_v46 }
  0x9e   : > { %1221 = vperm.xlu0 %11897, %v622_v45  }
  0x9f   : > { %2235 = vperm.xlu1 %11912, %v12903_v38  }
  0xa0   : > { %v1412_v50 = vpop.permute.xlu1 %1411 }
  0xa1   : > { %v637_v52 = vpop.permute.xlu0 %636  ;;  %v1923_v1 = vmul.f32 %v12945_v61, %v1412_v50  ;;  %v630_v50 = vld [vmem:[%s12770_s19 + $0x3e8] sm:$0xff] }
  0xa2   : > { %906 = vperm.xlu0 %11897, %v559_v49   ;;  %v1278_v29 = vmul.f32 %v12940_v58, %v637_v52 }
  0xa3   : > { %11913 = vset.pattern.permute.xlu1 %v16969_v5 }
  0xa4   : > { %716 = vperm.xlu1 %11913, %v521_v53   ;;  %v2050_v43 = vadd.f32 %v1922_v32, %v1278_v29  ;;  %v12041_v32 = vld [vmem:[%s16949_s3] sm:$0xff]  }
  0xa5   : > { %v642_v59 = vpop.permute.xlu0 %641  ;;  %v12942_v60 = vpop.permute.xlu1 %651  ;;  %11671 = vmatprep.subr.bf16.mxu0 %v12041_v32  ;;  %11807 = vmatprep.subr.bf16.mxu1 %v12041_v32 }
  0xa6   : > { %v1279_v63 = vmul.f32 %v12940_v58, %v642_v59  ;;  %1231 = vperm.xlu0 %11897, %v624_v57   ;;  %11672 = vmatpush3.bf16.msra.mxu0 %v12041_v32 }
  0xa7   : > { %11811 = vmatpush3.bf16.msra.mxu1 %v12041_v32 }
  0xa8   : > { %11914 = vset.pattern.permute.xlu1 %v16963_v4  ;;  %v2051_v24 = vadd.f32 %v1923_v1, %v1279_v63 }
  0xa9   : > { %1471 = vperm.xlu1 %11914, %v521_v53   ;;  %v12954_v2 = vpop.permute.xlu0 %646 }
  0xaa   : > { %921 = vperm.xlu0 %11897, %v562_v0   ;;  %v12957_v27 = vpop.permute.xlu1 %1419  ;;  %v2823_v34 = vadd.f32 %v2695_v6, %v2051_v24  ;;  %v567_v0 = vld [vmem:[%s12770_s19 + $0x1f0] sm:$0xff]  ;;  %v632_v24 = vld [vmem:[%s12770_s19 + $0x3f8] sm:$0xff] }
  0xac   : > { %v2958_v47 = vadd.f32 %v12970_v42, %v2823_v34 }
  0xad   : > { %1475 = vperm.xlu1 %11914, %v12807_v13   ;;  %v12962_v31 = vpop.permute.xlu0 %656 }
  0xae   : > { %931 = vperm.xlu0 %11897, %v564_v28   ;;  %v3086_v59 = vmax.f32 %v2958_v47, 0.0 }
  0xaf   : > { %v2180_v36 = vpop.permute.xlu1 %2179 }
  0xb0   : > { %v2694_v44 = vmul.f32 %v12948_v62, %v2180_v36 }
  0xb1   : > { %11915 = vset.pattern.permute.xlu1 %v16969_v5  ;;  %v12974_v45 = vpop.permute.xlu0 %681 }
  0xb2   : > { %v2822_v46 = vadd.f32 %v2694_v44, %v2050_v43  ;;  %936 = vperm.xlu0 %11897, %v565_v39   ;;  %731 = vperm.xlu1 %11915, %v524_v41   ;;  %v12043_v43 = vld [vmem:[%s16949_s3 + $0x10] sm:$0xff]  }
  0xb3   : > { %v12977_v49 = vpop.permute.xlu1 %2187 }
  0xb4   : > { %v2957_v52 = vadd.f32 %v12970_v42, %v2822_v46  ;;  %v526_v46 = vld [vmem:[%s12770_s19 + $0xa8] sm:$0xff] }
  0xb5   : > { %v12981_v56 = vpop.permute.xlu0 %686 }
  0xb6   : > { %1261 = vperm.xlu0 %11897, %v630_v50   ;;  %11916 = vset.pattern.permute.xlu1 %v16963_v4  ;;  %v3085_v57 = vmax.f32 %v2957_v52, 0.0  ;;  %v527_v52 = vld [vmem:[%s12770_s19 + $0xb0] sm:$0xff] }
  0xb7   : > { %1483 = vperm.xlu1 %11916, %v524_v41   ;;  %v12984_v63 = vpop.permute.xlu1 %2191 }
  0xb8   : > { %v3213_v1 = vpack.c.bf16 %v3086_v59, %v3085_v57  ;;  %v13042_v59 = vld [vmem:[%s12770_s19 + $0xb8] sm:$0xff] }
  0xb9   : > { %v12987_v6 = vpop.permute.xlu0 %696 }
  0xba   : > { %946 = vperm.xlu0 %11897, %v567_v0   ;;  %11679 = vmatprep.mubr.msk.bf16.mxu0 %vm3316_vm0, %v3213_v1 }
  0xbb   : > { %11917 = vset.pattern.permute.xlu1 %v16961_v3 }
  0xbc   : > { %2243 = vperm.xlu1 %11917, %v521_v53   ;;  %v12992_v28 = vpop.permute.xlu1 %661  ;;  %v12042_v53 = vld [vmem:[%s16949_s3 + $0x8] sm:$0xff]  }
  0xbd   : > { %v12994_v29 = vpop.permute.xlu0 %721  ;;  %11673 = vmatprep.subr.bf16.mxu0 %v12042_v53  ;;  %11808 = vmatprep.subr.bf16.mxu1 %v12042_v53 }
  0xbe   : > { %1271 = vperm.xlu0 %11897, %v632_v24   ;;  %11674 = vmatpush3.bf16.msra.mxu0 %v12042_v53 }
  0xbf   : > { %11812 = vmatpush3.bf16.msra.mxu1 %v12042_v53  ;;  %11675 = vmatprep.subr.bf16.mxu0 %v12043_v43 }
  0xc0   : > { %2251 = vperm.xlu1 %11917, %v12813_v14   ;;  %11809 = vmatprep.subr.bf16.mxu1 %v12043_v43 }
  0xc1   : > { %v13000_v34 = vpop.permute.xlu1 %1423  ;;  %v13002_v36 = vpop.permute.xlu0 %726 }
  0xc2   : > { %12037 = vset.pattern.permute.xlu0 %v16963_v4  ;;  %11676 = vmatpush3.bf16.msra.mxu0 %v12043_v43 }
  0xc3   : > { %1415 = vperm.xlu0 %12037, %v12781_v7   ;;  %11813 = vmatpush3.bf16.msra.mxu1 %v12043_v43  ;;  %v569_v43 = vld [vmem:[%s12770_s19 + $0x200] sm:$0xff] }
  0xc4   : > { %2255 = vperm.xlu1 %11917, %v524_v41   ;;  %v12044_v41 = vld [vmem:[%s16949_s3 + $0x18] sm:$0xff]  }
  0xc5   : > { %v13009_v39 = vpop.permute.xlu0 %736  ;;  %11677 = vmatprep.subr.bf16.mxu0 %v12044_v41  ;;  %11810 = vmatprep.subr.bf16.mxu1 %v12044_v41 }
  0xc6   : > { %17038 = vst [vmem:[#allocation8_spill] sm:$0xff] %v13009_v39  ;;  %v13014_v44 = vpop.permute.xlu1 %666  ;;  %11678 = vmatpush3.bf16.msra.mxu0 %v12044_v41  ;;  %v13189_v39 = vld [vmem:[%s12770_s19 + $0x2b0] sm:$0xff] }
  0xc7   : > { %17039 = vst [vmem:[#allocation9_spill] sm:$0xff] %v13014_v44  ;;  %1427 = vperm.xlu0 %12037, %v12804_v12   ;;  %11814 = vmatpush3.bf16.msra.mxu1 %v12044_v41  ;;  %v13071_v41 = vld [vmem:[%s12770_s19 + $0xc0] sm:$0xff]  ;;  %17076 = vst [vmem:[#allocation43_spill] sm:$0xff] %v13189_v39 }
  0xc8   : > { %11918 = vset.pattern.permute.xlu1 %v16969_v5 }
  0xc9   : > { %741 = vperm.xlu1 %11918, %v526_v46   ;;  %v13019_v7 = vpop.permute.xlu0 %961 }
  0xca   : > { %17040 = vst [vmem:[#allocation10_spill] sm:$0xff] %v13019_v7  ;;  %v13024_v47 = vpop.permute.xlu1 %671  ;;  %v13162_v7 = vld [vmem:[%s12770_s19 + $0x100] sm:$0xff] }
  0xcb   : > { %17041 = vst [vmem:[#allocation11_spill] sm:$0xff] %v13024_v47  ;;  %1431 = vperm.xlu0 %12037, %v12822_v16  }
  0xcd   : > { %11919 = vset.pattern.permute.xlu1 %v16963_v4  ;;  %v13028_v12 = vpop.permute.xlu0 %966 }
  0xce   : > { %17042 = vst [vmem:[#allocation12_spill] sm:$0xff] %v13028_v12  ;;  %1487 = vperm.xlu1 %11919, %v12819_v15  }
  0xcf   : > { %1447 = vperm.xlu0 %12037, %v12795_v10   ;;  %v13032_v50 = vpop.permute.xlu1 %1435 }
  0xd1   : > { %v13035_v57 = vpop.permute.xlu0 %976 }
  0xd2   : > { %17043 = vst [vmem:[#allocation13_spill] sm:$0xff] %v13035_v57  ;;  %11920 = vset.pattern.permute.xlu1 %v16969_v5 }
  0xd3   : > { %1459 = vperm.xlu0 %12037, %v12891_v35   ;;  %746 = vperm.xlu1 %11920, %v527_v52  }
  0xd4   : > { %v13039_v16 = vpop.permute.xlu1 %2199 }
  0xd5   : > { %17044 = vst [vmem:[#allocation14_spill] sm:$0xff] %v13039_v16  ;;  %v13044_v0 = vpop.permute.xlu0 %1001  ;;  %v13133_v16 = vld [vmem:[%s12770_s19 + $0x268] sm:$0xff] }
  0xd6   : > { %17045 = vst [vmem:[#allocation15_spill] sm:$0xff] %v13044_v0  ;;  %v13124_v0 = vld [vmem:[%s12770_s19 + $0xf0] sm:$0xff] }
  0xd7   : > { %1463 = vperm.xlu0 %12037, %v12903_v38   ;;  %751 = vperm.xlu1 %11920, %v13042_v59  }
  0xd8   : > { %v13048_v10 = vpop.permute.xlu1 %2203 }
  0xd9   : > { %17046 = vst [vmem:[#allocation16_spill] sm:$0xff] %v13048_v10  ;;  %v13050_v1 = vpop.permute.xlu0 %1006 }
  0xda   : > { %17047 = vst [vmem:[#allocation17_spill] sm:$0xff] %v13050_v1  ;;  %v13115_v1 = vld [vmem:[%s12770_s19 + $0xe0] sm:$0xff] }
  0xdb   : > { %1479 = vperm.xlu0 %12037, %v12813_v14   ;;  %11921 = vset.pattern.permute.xlu1 %v16963_v4 }
  0xdc   : > { %1499 = vperm.xlu1 %11921, %v13042_v59  }
  0xdd   : > { %v13055_v35 = vpop.permute.xlu1 %676  ;;  %v13057_v24 = vpop.permute.xlu0 %1016 }
  0xde   : > { %17048 = vst [vmem:[#allocation18_spill] sm:$0xff] %v13057_v24 }
  0xdf   : > { %1491 = vperm.xlu0 %12037, %v526_v46  }
  0xe0   : > { %11922 = vset.pattern.permute.xlu1 %v16961_v3  ;;  %v13080_v3 = vld [vmem:[%s12770_s19 + $0xd0] sm:$0xff] }
  0xe1   : > { %2263 = vperm.xlu1 %11922, %v526_v46   ;;  %v13060_v38 = vpop.permute.xlu0 %1041 }
  0xe2   : > { %17049 = vst [vmem:[#allocation19_spill] sm:$0xff] %v13060_v38  ;;  %v13062_v32 = vpop.permute.xlu1 %1439  ;;  %v17057_v38 = vmov 0  }
  0xe3   : > { %1495 = vperm.xlu0 %12037, %v527_v52  }
  0xe5   : > { %2267 = vperm.xlu1 %11922, %v527_v52   ;;  %v13064_v14 = vpop.permute.xlu0 %1046 }
  0xe6   : > { %17050 = vst [vmem:[#allocation20_spill] sm:$0xff] %v13064_v14  ;;  %v13066_v53 = vpop.permute.xlu1 %1443  ;;  %v13103_v14 = vld [vmem:[%s12770_s19 + $0x218] sm:$0xff] }
  0xe7   : > { %17051 = vst [vmem:[#allocation21_spill] sm:$0xff] %v13066_v53  ;;  %1671 = vperm.xlu0 %12037, %v12836_v19  }
  0xe9   : > { %11923 = vset.pattern.permute.xlu1 %v16969_v5  ;;  %v13074_v46 = vpop.permute.xlu0 %1056  ;;  %v13089_v5 = vld [vmem:[%s12770_s19 + $0x228] sm:$0xff] }
  0xea   : > { %17052 = vst [vmem:[#allocation22_spill] sm:$0xff] %v13074_v46  ;;  %956 = vperm.xlu1 %11923, %v569_v43  }
  0xeb   : > { %1503 = vperm.xlu0 %12037, %v13071_v41   ;;  %v13077_v52 = vpop.permute.xlu1 %691 }
  0xed   : > { %v13082_v4 = vpop.permute.xlu0 %1081 }
  0xee   : > { %17053 = vst [vmem:[#allocation23_spill] sm:$0xff] %v13082_v4  ;;  %11924 = vset.pattern.permute.xlu1 %v17054_v55 }
  0xef   : > { %1511 = vperm.xlu0 %12037, %v13080_v3   ;;  %1663 = vperm.xlu1 %11924, %v569_v43  }
  0xf0   : > { %v13086_v51 = vpop.permute.xlu1 %1451 }
  0xf1   : > { %v13091_v54 = vpop.permute.xlu0 %1086 }
  0xf2   : > { %17055 = vst [vmem:[#allocation24_spill] sm:$0xff] %v13091_v54 }
  0xf3   : > { %1683 = vperm.xlu0 %12037, %v13089_v5   ;;  %1667 = vperm.xlu1 %11924, %v12828_v17  }
  0xf5   : > { %v13098_v4 = vpop.permute.xlu1 %2211  ;;  %v13100_v46 = vpop.permute.xlu0 %1096 }
  0xf6   : > { %17056 = vst [vmem:[#allocation25_spill] sm:$0xff] %v13100_v46 }
  0xf7   : > { %1687 = vperm.xlu0 %12037, %v13096_v48   ;;  %11925 = vset.pattern.permute.xlu1 %v17057_v38 }
  0xf8   : > { %971 = vperm.xlu1 %11925, %v13103_v14  }
  0xf9   : > { %v13108_v54 = vpop.permute.xlu1 %2219  ;;  %v13110_v24 = vpop.permute.xlu0 %1121 }
  0xfa   : > { %17058 = vst [vmem:[#allocation26_spill] sm:$0xff] %v13108_v54  ;;  %17059 = vst [vmem:[#allocation27_spill] sm:$0xff] %v13110_v24  ;;  %v17061_v54 = vmov 2  }
  0xfb   : > { %1703 = vperm.xlu0 %12037, %v12852_v22  }
  0xfc   : > { %11926 = vset.pattern.permute.xlu1 %v17054_v55 }
  0xfd   : > { %1675 = vperm.xlu1 %11926, %v13103_v14   ;;  %v13118_v46 = vpop.permute.xlu1 %2223  ;;  %v13120_v10 = vpop.permute.xlu0 %1126 }
  0xfe   : > { %17060 = vst [vmem:[#allocation28_spill] sm:$0xff] %v13120_v10 }
  0xff   : > { %1519 = vperm.xlu0 %12037, %v13115_v1  }
 0x101   : > { %11927 = vset.pattern.permute.xlu1 %v17061_v54  ;;  %v13127_v24 = vpop.permute.xlu0 %1136 }
 0x102   : > { %17062 = vst [vmem:[#allocation29_spill] sm:$0xff] %v13127_v24  ;;  %2435 = vperm.xlu1 %11927, %v569_v43   ;;  %v13129_v53 = vpop.permute.xlu1 %701  ;;  %v13143_v24 = vld [vmem:[%s12770_s19 + $0x270] sm:$0xff]  ;;  %v13146_v43 = vld [vmem:[%s12770_s19 + $0xc8] sm:$0xff] }
 0x103   : > { %17063 = vst [vmem:[#allocation30_spill] sm:$0xff] %v13129_v53  ;;  %1527 = vperm.xlu0 %12037, %v13124_v0  }
 0x105   : > { %v13135_v57 = vpop.permute.xlu0 %1161 }
 0x106   : > { %17064 = vst [vmem:[#allocation31_spill] sm:$0xff] %v13135_v57  ;;  %11928 = vset.pattern.permute.xlu1 %v17057_v38 }
 0x107   : > { %1715 = vperm.xlu0 %12037, %v13133_v16   ;;  %756 = vperm.xlu1 %11928, %v13071_v41   ;;  %v13140_v10 = vpop.permute.xlu1 %1455 }
 0x108   : > { %17065 = vst [vmem:[#allocation32_spill] sm:$0xff] %v13140_v10 }
 0x109   : > { %v13148_v53 = vpop.permute.xlu0 %1166 }
 0x10a   : > { %17066 = vst [vmem:[#allocation33_spill] sm:$0xff] %v13148_v53 }
 0x10b   : > { %1719 = vperm.xlu0 %12037, %v13143_v24   ;;  %761 = vperm.xlu1 %11928, %v13146_v43  }
 0x10c   : > { %v13152_v57 = vpop.permute.xlu1 %706 }
 0x10d   : > { %17067 = vst [vmem:[#allocation34_spill] sm:$0xff] %v13152_v57  ;;  %v13154_v12 = vpop.permute.xlu0 %1176  ;;  %v13169_v57 = vld [vmem:[%s12770_s19 + $0x110] sm:$0xff] }
 0x10e   : > { %17068 = vst [vmem:[#allocation35_spill] sm:$0xff] %v13154_v12 }
 0x10f   : > { %1735 = vperm.xlu0 %12037, %v12868_v26   ;;  %11929 = vset.pattern.permute.xlu1 %v17054_v55 }
 0x110   : > { %1507 = vperm.xlu1 %11929, %v13146_v43   ;;  %v13159_v10 = vpop.permute.xlu1 %711 }
 0x111   : > { %17069 = vst [vmem:[#allocation36_spill] sm:$0xff] %v13159_v10  ;;  %v13164_v53 = vpop.permute.xlu0 %881  ;;  %v13178_v10 = vld [vmem:[%s12770_s19 + $0x2a8] sm:$0xff] }
 0x112   : > { %17070 = vst [vmem:[#allocation37_spill] sm:$0xff] %v13164_v53  ;;  %17073 = vst [vmem:[#allocation40_spill] sm:$0xff] %v13178_v10 }
 0x113   : > { %1535 = vperm.xlu0 %12037, %v13162_v7  }
 0x114   : > { %11930 = vset.pattern.permute.xlu1 %v17061_v54 }
 0x115   : > { %2443 = vperm.xlu1 %11930, %v12836_v19   ;;  %v13172_v26 = vpop.permute.xlu1 %1467  ;;  %v13174_v12 = vpop.permute.xlu0 %891  ;;  %v532_v19 = vld [vmem:[%s12770_s19 + $0xd8] sm:$0xff] }
 0x116   : > { %17071 = vst [vmem:[#allocation38_spill] sm:$0xff] %v13172_v26  ;;  %17072 = vst [vmem:[#allocation39_spill] sm:$0xff] %v13174_v12 }
 0x117   : > { %1543 = vperm.xlu0 %12037, %v13169_v57  }
 0x119   : > { %11931 = vset.pattern.permute.xlu1 %v17057_v38  ;;  %v13181_v53 = vpop.permute.xlu0 %896 }
 0x11a   : > { %17074 = vst [vmem:[#allocation41_spill] sm:$0xff] %v13181_v53  ;;  %766 = vperm.xlu1 %11931, %v13080_v3   ;;  %v13184_v44 = vpop.permute.xlu1 %2231 }
 0x11b   : > { %17075 = vst [vmem:[#allocation42_spill] sm:$0xff] %v13184_v44  ;;  %1747 = vperm.xlu0 %12037, %v13178_v10   ;;  %v541_v44 = vld [vmem:[%s12770_s19 + $0x120] sm:$0xff] }
 0x11d   : > { %v13191_v12 = vpop.permute.xlu0 %1221 }
 0x11e   : > { %17077 = vst [vmem:[#allocation44_spill] sm:$0xff] %v13191_v12  ;;  %771 = vperm.xlu1 %11931, %v532_v19   ;;  %v13193_v26 = vpop.permute.xlu1 %2235 }
 0x11f   : > { %17078 = vst [vmem:[#allocation45_spill] sm:$0xff] %v13193_v26  ;;  %1751 = vperm.xlu0 %12037, %v13189_v39   ;;  %v598_v26 = vld [vmem:[%s12770_s19 + $0x2e8] sm:$0xff] }
 0x121   : > { %v13196_v47 = vpop.permute.xlu0 %906 }
 0x122   : > { %17079 = vst [vmem:[#allocation46_spill] sm:$0xff] %v13196_v47  ;;  %11932 = vset.pattern.permute.xlu1 %v17054_v55  ;;  %v543_v47 = vld [vmem:[%s12770_s19 + $0x130] sm:$0xff] }
 0x123   : > { %1767 = vperm.xlu0 %12037, %v12877_v30   ;;  %1515 = vperm.xlu1 %11932, %v532_v19   ;;  %v13200_v53 = vpop.permute.xlu1 %716 }
 0x124   : > { %17080 = vst [vmem:[#allocation47_spill] sm:$0xff] %v13200_v53 }
 0x125   : > { %v13203_v10 = vpop.permute.xlu0 %1231 }
 0x126   : > { %17081 = vst [vmem:[#allocation48_spill] sm:$0xff] %v13203_v10 }
 0x127   : > { %1551 = vperm.xlu0 %12037, %v541_v44   ;;  %11933 = vset.pattern.permute.xlu1 %v17061_v54  ;;  %v599_v44 = vld [vmem:[%s12770_s19 + $0x2f0] sm:$0xff] }
 0x128   : > { %2275 = vperm.xlu1 %11933, %v13071_v41   ;;  %v13207_v12 = vpop.permute.xlu1 %1471 }
 0x129   : > { %17082 = vst [vmem:[#allocation49_spill] sm:$0xff] %v13207_v12  ;;  %v13210_v39 = vpop.permute.xlu0 %921 }
 0x12a   : > { %17083 = vst [vmem:[#allocation50_spill] sm:$0xff] %v13210_v39  ;;  %v606_v39 = vld [vmem:[%s12770_s19 + $0x328] sm:$0xff] }
 0x12b   : > { %1559 = vperm.xlu0 %12037, %v543_v47  }
 0x12c   : > { %2283 = vperm.xlu1 %11933, %v13080_v3   ;;  %v13213_v30 = vpop.permute.xlu1 %1475 }
 0x12d   : > { %17084 = vst [vmem:[#allocation51_spill] sm:$0xff] %v13213_v30  ;;  %v13216_v53 = vpop.permute.xlu0 %931  ;;  %v13252_v30 = vld [vmem:[%s12770_s19 + $0x238] sm:$0xff] }
 0x12e   : > { %17085 = vst [vmem:[#allocation52_spill] sm:$0xff] %v13216_v53 }
 0x12f   : > { %1779 = vperm.xlu0 %12037, %v598_v26   ;;  %v545_v26 = vld [vmem:[%s12770_s19 + $0x140] sm:$0xff] }
 0x130   : > { %2287 = vperm.xlu1 %11933, %v532_v19  }
 0x131   : > { %v13219_v10 = vpop.permute.xlu1 %731  ;;  %v13221_v41 = vpop.permute.xlu0 %936 }
 0x132   : > { %17086 = vst [vmem:[#allocation53_spill] sm:$0xff] %v13219_v10  ;;  %17087 = vst [vmem:[#allocation54_spill] sm:$0xff] %v13221_v41  ;;  %v547_v41 = vld [vmem:[%s12770_s19 + $0x150] sm:$0xff] }
 0x133   : > { %1783 = vperm.xlu0 %12037, %v599_v44  }
 0x134   : > { %11934 = vset.pattern.permute.xlu1 %v17057_v38 }
 0x135   : > { %981 = vperm.xlu1 %11934, %v13089_v5   ;;  %v13225_v47 = vpop.permute.xlu0 %1261 }
 0x136   : > { %17088 = vst [vmem:[#allocation55_spill] sm:$0xff] %v13225_v47  ;;  %v13227_v3 = vpop.permute.xlu1 %1483  ;;  %v1925_v47 = vmul.f32 %v12945_v61, %v12957_v27  ;;  %v1280_v27 = vmul.f32 %v12940_v58, %v12954_v2 }
 0x137   : > { %17089 = vst [vmem:[#allocation56_spill] sm:$0xff] %v13227_v3  ;;  %1799 = vperm.xlu0 %12037, %v12886_v33   ;;  %v1281_v33 = vmul.f32 %v12940_v58, %v12942_v60 }
 0x139   : > { %11935 = vset.pattern.permute.xlu1 %v17054_v55  ;;  %v13232_v19 = vpop.permute.xlu0 %946 }
 0x13a   : > { %17090 = vst [vmem:[#allocation57_spill] sm:$0xff] %v13232_v19  ;;  %1679 = vperm.xlu1 %11935, %v12841_v20   ;;  %v2697_v19 = vmul.f32 %v12948_v62, %v12984_v63  ;;  %v607_v63 = vld [vmem:[%s12770_s19 + $0x330] sm:$0xff] }
 0x13b   : > { %1567 = vperm.xlu0 %12037, %v545_v26   ;;  %v13235_v44 = vpop.permute.xlu1 %2243 }
 0x13c   : > { %17091 = vst [vmem:[#allocation58_spill] sm:$0xff] %v13235_v44 }
 0x13d   : > { %v13240_v53 = vpop.permute.xlu0 %1271 }
 0x13e   : > { %17092 = vst [vmem:[#allocation59_spill] sm:$0xff] %v13240_v53  ;;  %11936 = vset.pattern.permute.xlu1 %v17057_v38  ;;  %v2053_v53 = vadd.f32 %v1925_v47, %v1281_v33 }
 0x13f   : > { %1575 = vperm.xlu0 %12037, %v547_v41   ;;  %986 = vperm.xlu1 %11936, %v13096_v48   ;;  %v13248_v26 = vpop.permute.xlu1 %2251  ;;  %v2696_v41 = vmul.f32 %v12948_v62, %v12977_v49 }
 0x140   : > { %17093 = vst [vmem:[#allocation60_spill] sm:$0xff] %v13248_v26  ;;  %v2825_v3 = vadd.f32 %v2697_v19, %v2053_v53 }
 0x142   : > { %v1416_v10 = vpop.permute.xlu0 %1415  ;;  %v2960_v2 = vadd.f32 %v12970_v42, %v2825_v3  ;;  %v549_v3 = vld [vmem:[%s12770_s19 + $0x160] sm:$0xff] }
 0x143   : > { %v1924_v44 = vmul.f32 %v12945_v61, %v1416_v10  ;;  %1811 = vperm.xlu0 %12037, %v606_v39   ;;  %991 = vperm.xlu1 %11936, %v13252_v30   ;;  %v13258_v60 = vpop.permute.xlu1 %2255 }
 0x144   : > { %v3088_v19 = vmax.f32 %v2960_v2, 0.0 }
 0x145   : > { %v2052_v26 = vadd.f32 %v1924_v44, %v1280_v27  ;;  %v551_v27 = vld [vmem:[%s12770_s19 + $0x170] sm:$0xff] }
 0x146   : > { %v13263_v12 = vpop.permute.xlu0 %1427 }
 0x147   : > { %v2824_v47 = vadd.f32 %v2696_v41, %v2052_v26  ;;  %1815 = vperm.xlu0 %12037, %v607_v63   ;;  %11937 = vset.pattern.permute.xlu1 %v17054_v55  ;;  %v577_v41 = vld [vmem:[%s12770_s19 + $0x240] sm:$0xff] }
 0x148   : > { %1691 = vperm.xlu1 %11937, %v13252_v30   ;;  %v13268_v39 = vpop.permute.xlu1 %741 }
 0x149   : > { %17094 = vst [vmem:[#allocation61_spill] sm:$0xff] %v13268_v39  ;;  %v2959_v10 = vadd.f32 %v12970_v42, %v2824_v47 }
 0x14a   : > { %v13271_v53 = vpop.permute.xlu0 %1431 }
 0x14b   : > { %v3087_v49 = vmax.f32 %v2959_v10, 0.0  ;;  %1831 = vperm.xlu0 %12037, %v12898_v37   ;;  %v615_v10 = vld [vmem:[%s12770_s19 + $0x370] sm:$0xff] }
 0x14c   : > { %11938 = vset.pattern.permute.xlu1 %v17061_v54 }
 0x14d   : > { %2455 = vperm.xlu1 %11938, %v13089_v5   ;;  %v13277_v44 = vpop.permute.xlu1 %1487  ;;  %v3214_v33 = vpack.c.bf16 %v3088_v19, %v3087_v49  ;;  %v614_v5 = vld [vmem:[%s12770_s19 + $0x368] sm:$0xff]  ;;  %v553_v49 = vld [vmem:[%s12770_s19 + $0x180] sm:$0xff] }
 0x14e   : > { %17095 = vst [vmem:[#allocation62_spill] sm:$0xff] %v13277_v44  ;;  %v13279_v26 = vpop.permute.xlu0 %1447  ;;  %v620_v44 = vld [vmem:[%s12770_s19 + $0x398] sm:$0xff] }
 0x14f   : > { %1583 = vperm.xlu0 %12037, %v549_v3   ;;  %11680 = vmatmul.mubr.msk.bf16.vlgmr.msra.gmra.mrb[0].mxu0 %vm3316_vm0, %v3214_v33 }
 0x151   : > { %2459 = vperm.xlu1 %11938, %v13096_v48  }
 0x152   : > { %v13284_v63 = vpop.permute.xlu0 %1459  ;;  %v13286_v37 = vpop.permute.xlu1 %746 }
 0x153   : > { %17096 = vst [vmem:[#allocation63_spill] sm:$0xff] %v13286_v37  ;;  %1591 = vperm.xlu0 %12037, %v551_v27   ;;  %v618_v27 = vld [vmem:[%s12770_s19 + $0x388] sm:$0xff] }
 0x154   : > { %v558_v37 = vld [vmem:[%s12770_s19 + $0x1a8] sm:$0xff] }
 0x155   : > { %11939 = vset.pattern.permute.xlu1 %v17057_v38 }
 0x156   : > { %v13291_v2 = vpop.permute.xlu0 %1463  ;;  %996 = vperm.xlu1 %11939, %v577_v41   ;;  %v13293_v47 = vpop.permute.xlu1 %751 }
 0x157   : > { %17097 = vst [vmem:[#allocation64_spill] sm:$0xff] %v13293_v47  ;;  %1843 = vperm.xlu0 %12037, %v614_v5   ;;  %v13309_v5 = vld [vmem:[%s12770_s19 + $0x258] sm:$0xff] }
 0x15a   : > { %v13296_v48 = vpop.permute.xlu0 %1479  ;;  %11940 = vset.pattern.permute.xlu1 %v17054_v55 }
 0x15b   : > { %1847 = vperm.xlu0 %12037, %v615_v10   ;;  %1695 = vperm.xlu1 %11940, %v577_v41   ;;  %v13299_v19 = vpop.permute.xlu1 %1499 }
 0x15c   : > { %17098 = vst [vmem:[#allocation65_spill] sm:$0xff] %v13299_v19  ;;  %v555_v19 = vld [vmem:[%s12770_s19 + $0x190] sm:$0xff] }
 0x15e   : > { %v13302_v3 = vpop.permute.xlu0 %1491 }
 0x15f   : > { %1599 = vperm.xlu0 %12037, %v553_v49   ;;  %1699 = vperm.xlu1 %11940, %v12846_v21  }
 0x160   : > { %v13305_v33 = vpop.permute.xlu1 %2263 }
 0x161   : > { %17099 = vst [vmem:[#allocation66_spill] sm:$0xff] %v13305_v33 }
 0x162   : > { %v13311_v47 = vpop.permute.xlu0 %1495 }
 0x163   : > { %17100 = vst [vmem:[#allocation67_spill] sm:$0xff] %v13311_v47  ;;  %1859 = vperm.xlu0 %12037, %v618_v27   ;;  %11941 = vset.pattern.permute.xlu1 %v17057_v38 }
 0x164   : > { %1011 = vperm.xlu1 %11941, %v13309_v5   ;;  %v13315_v10 = vpop.permute.xlu1 %2267 }
 0x165   : > { %17101 = vst [vmem:[#allocation68_spill] sm:$0xff] %v13315_v10 }
 0x166   : > { %v13318_v49 = vpop.permute.xlu0 %1671 }
 0x167   : > { %17102 = vst [vmem:[#allocation69_spill] sm:$0xff] %v13318_v49  ;;  %1607 = vperm.xlu0 %12037, %v555_v19   ;;  %v560_v49 = vld [vmem:[%s12770_s19 + $0x1b8] sm:$0xff] }
 0x168   : > { %11942 = vset.pattern.permute.xlu1 %v17054_v55 }
 0x169   : > { %1707 = vperm.xlu1 %11942, %v13309_v5   ;;  %v13323_v33 = vpop.permute.xlu1 %956 }
 0x16a   : > { %17103 = vst [vmem:[#allocation70_spill] sm:$0xff] %v13323_v33  ;;  %v13325_v27 = vpop.permute.xlu0 %1503 }
 0x16b   : > { %17104 = vst [vmem:[#allocation71_spill] sm:$0xff] %v13325_v27  ;;  %1867 = vperm.xlu0 %12037, %v620_v44   ;;  %v561_v44 = vld [vmem:[%s12770_s19 + $0x1c0] sm:$0xff] }
 0x16d   : > { %11943 = vset.pattern.permute.xlu1 %v17061_v54 }
 0x16e   : > { %2467 = vperm.xlu1 %11943, %v577_v41   ;;  %v13329_v10 = vpop.permute.xlu1 %1663  ;;  %v13331_v19 = vpop.permute.xlu0 %1511  ;;  %v13342_v41 = vld [vmem:[%s12770_s19 + $0xe8] sm:$0xff] }
 0x16f   : > { %17105 = vst [vmem:[#allocation72_spill] sm:$0xff] %v13329_v10  ;;  %17106 = vst [vmem:[#allocation73_spill] sm:$0xff] %v13331_v19  ;;  %1619 = vperm.xlu0 %12037, %v558_v37   ;;  %v626_v19 = vld [vmem:[%s12770_s19 + $0x3c8] sm:$0xff] }
 0x172   : > { %11944 = vset.pattern.permute.xlu1 %v17057_v38  ;;  %v13335_v39 = vpop.permute.xlu1 %1667  ;;  %v13337_v33 = vpop.permute.xlu0 %1683 }
 0x173   : > { %17107 = vst [vmem:[#allocation74_spill] sm:$0xff] %v13335_v39  ;;  %17108 = vst [vmem:[#allocation75_spill] sm:$0xff] %v13337_v33  ;;  %1627 = vperm.xlu0 %12037, %v560_v49   ;;  %776 = vperm.xlu1 %11944, %v13115_v1   ;;  %v563_v33 = vld [vmem:[%s12770_s19 + $0x1d0] sm:$0xff] }
 0x176   : > { %v13344_v27 = vpop.permute.xlu0 %1687 }
 0x177   : > { %17109 = vst [vmem:[#allocation76_spill] sm:$0xff] %v13344_v27  ;;  %1631 = vperm.xlu0 %12037, %v561_v44   ;;  %781 = vperm.xlu1 %11944, %v13342_v41   ;;  %v13347_v37 = vpop.permute.xlu1 %971  ;;  %v628_v44 = vld [vmem:[%s12770_s19 + $0x3d8] sm:$0xff] }
 0x178   : > { %17110 = vst [vmem:[#allocation77_spill] sm:$0xff] %v13347_v37 }
 0x17a   : > { %v13350_v39 = vpop.permute.xlu0 %1703 }
 0x17b   : > { %17111 = vst [vmem:[#allocation78_spill] sm:$0xff] %v13350_v39  ;;  %1891 = vperm.xlu0 %12037, %v626_v19   ;;  %11945 = vset.pattern.permute.xlu1 %v17054_v55  ;;  %v566_v39 = vld [vmem:[%s12770_s19 + $0x1e8] sm:$0xff] }
 0x17c   : > { %1523 = vperm.xlu1 %11945, %v13342_v41   ;;  %v13354_v49 = vpop.permute.xlu1 %1675 }
 0x17d   : > { %17112 = vst [vmem:[#allocation79_spill] sm:$0xff] %v13354_v49 }
 0x17e   : > { %v13357_v27 = vpop.permute.xlu0 %1519 }
 0x17f   : > { %17113 = vst [vmem:[#allocation80_spill] sm:$0xff] %v13357_v27  ;;  %1639 = vperm.xlu0 %12037, %v563_v33   ;;  %v536_v33 = vld [vmem:[%s12770_s19 + $0xf8] sm:$0xff] }
 0x180   : > { %11946 = vset.pattern.permute.xlu1 %v17061_v54  ;;  %v568_v27 = vld [vmem:[%s12770_s19 + $0x1f8] sm:$0xff] }
 0x181   : > { %2475 = vperm.xlu1 %11946, %v12852_v22   ;;  %v13362_v37 = vpop.permute.xlu1 %2435 }
 0x182   : > { %v13364_v19 = vpop.permute.xlu0 %1527 }
 0x183   : > { %17114 = vst [vmem:[#allocation81_spill] sm:$0xff] %v13364_v19  ;;  %1899 = vperm.xlu0 %12037, %v628_v44  }
 0x185   : > { %11947 = vset.pattern.permute.xlu1 %v17057_v38 }
 0x186   : > { %786 = vperm.xlu1 %11947, %v13124_v0   ;;  %v13369_v49 = vpop.permute.xlu1 %756  ;;  %v13371_v10 = vpop.permute.xlu0 %1715 }
 0x187   : > { %17115 = vst [vmem:[#allocation82_spill] sm:$0xff] %v13371_v10  ;;  %1651 = vperm.xlu0 %12037, %v566_v39  }
 0x18a   : > { %791 = vperm.xlu1 %11947, %v536_v33   ;;  %v13375_v47 = vpop.permute.xlu1 %761  ;;  %v13377_v22 = vpop.permute.xlu0 %1719 }
 0x18b   : > { %17116 = vst [vmem:[#allocation83_spill] sm:$0xff] %v13377_v22  ;;  %1659 = vperm.xlu0 %12037, %v568_v27  }
 0x18e   : > { %11948 = vset.pattern.permute.xlu1 %v17054_v55  ;;  %v13380_v44 = vpop.permute.xlu0 %1735 }
 0x18f   : > { %17117 = vst [vmem:[#allocation84_spill] sm:$0xff] %v13380_v44  ;;  %12039 = vset.pattern.permute.xlu0 %v17061_v54  ;;  %1531 = vperm.xlu1 %11948, %v536_v33   ;;  %v13383_v19 = vpop.permute.xlu1 %1507 }
 0x190   : > { %2195 = vperm.xlu0 %12039, %v12786_v8  }
 0x192   : > { %v13386_v39 = vpop.permute.xlu0 %1535 }
 0x193   : > { %17118 = vst [vmem:[#allocation85_spill] sm:$0xff] %v13386_v39  ;;  %11949 = vset.pattern.permute.xlu1 %v17061_v54 }
 0x194   : > { %2207 = vperm.xlu0 %12039, %v12831_v18   ;;  %2291 = vperm.xlu1 %11949, %v13115_v1   ;;  %v13391_v27 = vpop.permute.xlu1 %2443 }
 0x196   : > { %v13393_v22 = vpop.permute.xlu0 %1543 }
 0x197   : > { %17119 = vst [vmem:[#allocation86_spill] sm:$0xff] %v13393_v22  ;;  %v13532_v22 = vld [vmem:[%s12770_s19 + $0x2d8] sm:$0xff] }
 0x198   : > { %2215 = vperm.xlu0 %12039, %v12791_v9   ;;  %2299 = vperm.xlu1 %11949, %v13124_v0   ;;  %17156 = vst [vmem:[#allocation123_spill] sm:$0xff] %v13532_v22 }
 0x199   : > { %v13397_v44 = vpop.permute.xlu1 %766 }
 0x19a   : > { %v13399_v10 = vpop.permute.xlu0 %1747 }
 0x19b   : > { %17120 = vst [vmem:[#allocation87_spill] sm:$0xff] %v13399_v10 }
 0x19c   : > { %2227 = vperm.xlu0 %12039, %v12800_v11   ;;  %2303 = vperm.xlu1 %11949, %v536_v33  }
 0x19d   : > { %v13402_v8 = vpop.permute.xlu1 %771 }
 0x19e   : > { %v13404_v18 = vpop.permute.xlu0 %1751 }
 0x19f   : > { %17121 = vst [vmem:[#allocation88_spill] sm:$0xff] %v13404_v18  ;;  %v13523_v18 = vld [vmem:[%s12770_s19 + $0x2c8] sm:$0xff] }
 0x1a0   : > { %2239 = vperm.xlu0 %12039, %v12909_v40   ;;  %11950 = vset.pattern.permute.xlu1 %v17057_v38  ;;  %17153 = vst [vmem:[#allocation120_spill] sm:$0xff] %v13523_v18 }
 0x1a1   : > { %1021 = vperm.xlu1 %11950, %v13133_v16  }
 0x1a2   : > { %v13409_v9 = vpop.permute.xlu1 %1515  ;;  %v13411_v0 = vpop.permute.xlu0 %1767 }
 0x1a3   : > { %17122 = vst [vmem:[#allocation89_spill] sm:$0xff] %v13411_v0 }
 0x1a4   : > { %2247 = vperm.xlu0 %12039, %v12807_v13   ;;  %v584_v13 = vld [vmem:[%s12770_s19 + $0x278] sm:$0xff] }
 0x1a5   : > { %11951 = vset.pattern.permute.xlu1 %v17054_v55 }
 0x1a6   : > { %1711 = vperm.xlu1 %11951, %v12857_v23   ;;  %v13416_v11 = vpop.permute.xlu0 %1551 }
 0x1a7   : > { %17123 = vst [vmem:[#allocation90_spill] sm:$0xff] %v13416_v11  ;;  %v13418_v1 = vpop.permute.xlu1 %2275 }
 0x1a8   : > { %2259 = vperm.xlu0 %12039, %v12819_v15  }
 0x1aa   : > { %11952 = vset.pattern.permute.xlu1 %v17057_v38  ;;  %v13422_v40 = vpop.permute.xlu0 %1559 }
 0x1ab   : > { %17124 = vst [vmem:[#allocation91_spill] sm:$0xff] %v13422_v40  ;;  %1026 = vperm.xlu1 %11952, %v13143_v24   ;;  %v13425_v33 = vpop.permute.xlu1 %2283 }
 0x1ac   : > { %2271 = vperm.xlu0 %12039, %v13042_v59  }
 0x1ae   : > { %v13429_v0 = vpop.permute.xlu0 %1779 }
 0x1af   : > { %17125 = vst [vmem:[#allocation92_spill] sm:$0xff] %v13429_v0  ;;  %1031 = vperm.xlu1 %11952, %v584_v13   ;;  %v13431_v23 = vpop.permute.xlu1 %2287  ;;  %v585_v0 = vld [vmem:[%s12770_s19 + $0x280] sm:$0xff] }
 0x1b0   : > { %2439 = vperm.xlu0 %12039, %v12828_v17  }
 0x1b2   : > { %v13434_v15 = vpop.permute.xlu0 %1783 }
 0x1b3   : > { %17126 = vst [vmem:[#allocation93_spill] sm:$0xff] %v13434_v15  ;;  %11953 = vset.pattern.permute.xlu1 %v17054_v55 }
 0x1b4   : > { %2447 = vperm.xlu0 %12039, %v13103_v14   ;;  %1723 = vperm.xlu1 %11953, %v584_v13   ;;  %v13438_v40 = vpop.permute.xlu1 %981 }
 0x1b5   : > { %17127 = vst [vmem:[#allocation94_spill] sm:$0xff] %v13438_v40  ;;  %v17201_v40 = vld [vmem:[#allocation53_spill] sm:$0xff] }
 0x1b6   : > { %v13440_v11 = vpop.permute.xlu0 %1799 }
 0x1b7   : > { %17128 = vst [vmem:[#allocation95_spill] sm:$0xff] %v13440_v11  ;;  %v13507_v11 = vld [vmem:[%s12770_s19 + $0x2a0] sm:$0xff] }
 0x1b8   : > { %2279 = vperm.xlu0 %12039, %v13146_v43   ;;  %11954 = vset.pattern.permute.xlu1 %v17061_v54 }
 0x1b9   : > { %2487 = vperm.xlu1 %11954, %v13133_v16   ;;  %v13445_v59 = vpop.permute.xlu1 %1679 }
 0x1ba   : > { %17129 = vst [vmem:[#allocation96_spill] sm:$0xff] %v13445_v59  ;;  %v13447_v17 = vpop.permute.xlu0 %1567  ;;  %v17196_v59 = vld [vmem:[#allocation34_spill] sm:$0xff] }
 0x1bb   : > { %17130 = vst [vmem:[#allocation97_spill] sm:$0xff] %v13447_v17 }
 0x1bc   : > { %2451 = vperm.xlu0 %12039, %v12841_v20  }
 0x1bd   : > { %2491 = vperm.xlu1 %11954, %v13143_v24  }
 0x1be   : > { %v13451_v14 = vpop.permute.xlu1 %986  ;;  %v13453_v15 = vpop.permute.xlu0 %1575 }
 0x1bf   : > { %17131 = vst [vmem:[#allocation98_spill] sm:$0xff] %v13451_v14  ;;  %17132 = vst [vmem:[#allocation99_spill] sm:$0xff] %v13453_v15  ;;  %v17200_v14 = vld [vmem:[#allocation45_spill] sm:$0xff] }
 0x1c0   : > { %2463 = vperm.xlu0 %12039, %v13252_v30  }
 0x1c1   : > { %11955 = vset.pattern.permute.xlu1 %v17057_v38 }
 0x1c2   : > { %1036 = vperm.xlu1 %11955, %v585_v0   ;;  %v13458_v16 = vpop.permute.xlu1 %991  ;;  %v13460_v43 = vpop.permute.xlu0 %1811 }
 0x1c3   : > { %17133 = vst [vmem:[#allocation100_spill] sm:$0xff] %v13458_v16  ;;  %17134 = vst [vmem:[#allocation101_spill] sm:$0xff] %v13460_v43  ;;  %v588_v43 = vld [vmem:[%s12770_s19 + $0x298] sm:$0xff] }
 0x1c4   : > { %2471 = vperm.xlu0 %12039, %v12846_v21  }
 0x1c6   : > { %11956 = vset.pattern.permute.xlu1 %v17054_v55  ;;  %v13464_v20 = vpop.permute.xlu0 %1815 }
 0x1c7   : > { %17135 = vst [vmem:[#allocation102_spill] sm:$0xff] %v13464_v20  ;;  %1727 = vperm.xlu1 %11956, %v585_v0   ;;  %v13466_v24 = vpop.permute.xlu1 %1691  ;;  %v12045_v20 = vld [vmem:[%s12770_s19 + $0x260] sm:$0xff] }
 0x1c8   : > { %17136 = vst [vmem:[#allocation103_spill] sm:$0xff] %v13466_v24  ;;  %2479 = vperm.xlu0 %12039, %v13309_v5   ;;  %v17179_v24 = vld [vmem:[#allocation15_spill] sm:$0xff] }
 0x1ca   : > { %v13469_v30 = vpop.permute.xlu0 %1831 }
 0x1cb   : > { %17137 = vst [vmem:[#allocation104_spill] sm:$0xff] %v13469_v30  ;;  %1731 = vperm.xlu1 %11956, %v12863_v25   ;;  %v12046_v30 = vld [vmem:[%s12770_s19 + $0x288] sm:$0xff] }
 0x1cc   : > { %2295 = vperm.xlu0 %12039, %v13342_v41   ;;  %v13473_v15 = vpop.permute.xlu1 %2455 }
 0x1cd   : > { %17138 = vst [vmem:[#allocation105_spill] sm:$0xff] %v13473_v15  ;;  %v17197_v15 = vld [vmem:[#allocation56_spill] sm:$0xff] }
 0x1ce   : > { %v13476_v21 = vpop.permute.xlu0 %1583 }
 0x1cf   : > { %17139 = vst [vmem:[#allocation106_spill] sm:$0xff] %v13476_v21  ;;  %11957 = vset.pattern.permute.xlu1 %v17057_v38 }
 0x1d0   : > { %2483 = vperm.xlu0 %12039, %v12045_v20   ;;  %1051 = vperm.xlu1 %11957, %v588_v43   ;;  %v13480_v17 = vpop.permute.xlu1 %2459 }
 0x1d1   : > { %17140 = vst [vmem:[#allocation107_spill] sm:$0xff] %v13480_v17 }
 0x1d2   : > { %v13482_v5 = vpop.permute.xlu0 %1591 }
 0x1d3   : > { %17141 = vst [vmem:[#allocation108_spill] sm:$0xff] %v13482_v5 }
 0x1d4   : > { %2495 = vperm.xlu0 %12039, %v584_v13   ;;  %11958 = vset.pattern.permute.xlu1 %v17054_v55 }
 0x1d5   : > { %1739 = vperm.xlu1 %11958, %v588_v43   ;;  %v13485_v25 = vpop.permute.xlu1 %996 }
 0x1d6   : > { %17142 = vst [vmem:[#allocation109_spill] sm:$0xff] %v13485_v25  ;;  %v13487_v41 = vpop.permute.xlu0 %1843 }
 0x1d7   : > { %17143 = vst [vmem:[#allocation110_spill] sm:$0xff] %v13487_v41  ;;  %v538_v41 = vld [vmem:[%s12770_s19 + $0x108] sm:$0xff] }
 0x1d8   : > { %2503 = vperm.xlu0 %12039, %v12046_v30  }
 0x1d9   : > { %11959 = vset.pattern.permute.xlu1 %v17061_v54 }
 0x1da   : > { %2499 = vperm.xlu1 %11959, %v585_v0   ;;  %v13491_v20 = vpop.permute.xlu1 %1695  ;;  %v13493_v21 = vpop.permute.xlu0 %1847 }
 0x1db   : > { %17144 = vst [vmem:[#allocation111_spill] sm:$0xff] %v13491_v20  ;;  %17145 = vst [vmem:[#allocation112_spill] sm:$0xff] %v13493_v21  ;;  %v17193_v20 = vld [vmem:[#allocation30_spill] sm:$0xff] }
 0x1dc   : > { %2511 = vperm.xlu0 %12039, %v588_v43  }
 0x1de   : > { %11960 = vset.pattern.permute.xlu1 %v17057_v38  ;;  %v13496_v13 = vpop.permute.xlu1 %1699  ;;  %v13498_v5 = vpop.permute.xlu0 %1599 }
 0x1df   : > { %17146 = vst [vmem:[#allocation113_spill] sm:$0xff] %v13496_v13  ;;  %17147 = vst [vmem:[#allocation114_spill] sm:$0xff] %v13498_v5  ;;  %796 = vperm.xlu1 %11960, %v13162_v7   ;;  %v13514_v5 = vld [vmem:[%s12770_s19 + $0x2b8] sm:$0xff]  ;;  %v12050_v13 = vld [vmem:[%s12770_s19 + $0x2e0] sm:$0xff] }
 0x1e0   : > { %2311 = vperm.xlu0 %12039, %v538_v41  }
 0x1e2   : > { %v13502_v30 = vpop.permute.xlu0 %1859 }
 0x1e3   : > { %17148 = vst [vmem:[#allocation115_spill] sm:$0xff] %v13502_v30  ;;  %801 = vperm.xlu1 %11960, %v538_v41   ;;  %v13504_v0 = vpop.permute.xlu1 %1011 }
 0x1e4   : > { %17149 = vst [vmem:[#allocation116_spill] sm:$0xff] %v13504_v0  ;;  %2515 = vperm.xlu0 %12039, %v13507_v11   ;;  %v540_v0 = vld [vmem:[%s12770_s19 + $0x118] sm:$0xff] }
 0x1e6   : > { %v13510_v43 = vpop.permute.xlu0 %1607 }
 0x1e7   : > { %17150 = vst [vmem:[#allocation117_spill] sm:$0xff] %v13510_v43  ;;  %11961 = vset.pattern.permute.xlu1 %v17054_v55  ;;  %v12049_v43 = vld [vmem:[%s12770_s19 + $0x290] sm:$0xff] }
 0x1e8   : > { %1539 = vperm.xlu1 %11961, %v538_v41   ;;  %v13516_v21 = vpop.permute.xlu1 %1707  ;;  %2527 = vperm.xlu0 %12039, %v13514_v5  }
 0x1e9   : > { %17151 = vst [vmem:[#allocation118_spill] sm:$0xff] %v13516_v21  ;;  %v13543_v21 = vld [vmem:[%s12770_s19 + $0x128] sm:$0xff] }
 0x1ea   : > { %v13519_v30 = vpop.permute.xlu0 %1867  ;;  %17159 = vst [vmem:[#allocation126_spill] sm:$0xff] %v13543_v21 }
 0x1eb   : > { %17152 = vst [vmem:[#allocation119_spill] sm:$0xff] %v13519_v30 }
 0x1ec   : > { %11962 = vset.pattern.permute.xlu1 %v17061_v54  ;;  %2535 = vperm.xlu0 %12039, %v13523_v18  }
 0x1ed   : > { %2507 = vperm.xlu1 %11962, %v12049_v43   ;;  %v13527_v10 = vpop.permute.xlu1 %2467 }
 0x1ee   : > { %17154 = vst [vmem:[#allocation121_spill] sm:$0xff] %v13527_v10  ;;  %v13529_v41 = vpop.permute.xlu0 %1619 }
 0x1ef   : > { %17155 = vst [vmem:[#allocation122_spill] sm:$0xff] %v13529_v41 }
 0x1f0   : > { %2543 = vperm.xlu0 %12039, %v13532_v22  }
 0x1f1   : > { %11963 = vset.pattern.permute.xlu1 %v17057_v38 }
 0x1f2   : > { %806 = vperm.xlu1 %11963, %v13169_v57   ;;  %v13537_v30 = vpop.permute.xlu1 %776  ;;  %v13539_v39 = vpop.permute.xlu0 %1627 }
 0x1f3   : > { %17157 = vst [vmem:[#allocation124_spill] sm:$0xff] %v13537_v30  ;;  %17158 = vst [vmem:[#allocation125_spill] sm:$0xff] %v13539_v39  ;;  %v1930_v39 = vmul.f32 %v12945_v61, %v13062_v32  ;;  %v1282_v32 = vmul.f32 %v12940_v58, %v12962_v31  ;;  %v1290_v31 = vmul.f32 %v12940_v58, %v12987_v6 }
 0x1f4   : > { %2327 = vperm.xlu0 %12039, %v13543_v21   ;;  %v1933_v21 = vmul.f32 %v12945_v61, %v13086_v51  ;;  %v1289_v51 = vmul.f32 %v12940_v58, %v13077_v52 }
 0x1f6   : > { %811 = vperm.xlu1 %11963, %v540_v0   ;;  %v13546_v43 = vpop.permute.xlu1 %781  ;;  %v13548_v41 = vpop.permute.xlu0 %1631  ;;  %v2061_v52 = vadd.f32 %v1933_v21, %v1289_v51 }
 0x1f7   : > { %17160 = vst [vmem:[#allocation127_spill] sm:$0xff] %v13546_v43  ;;  %17161 = vst [vmem:[#allocation128_spill] sm:$0xff] %v13548_v41  ;;  %v2702_v41 = vmul.f32 %v12948_v62, %v13098_v4  ;;  %v2705_v43 = vmul.f32 %v12948_v62, %v13118_v46  ;;  %v1283_v46 = vmul.f32 %v12940_v58, %v12992_v28 }
 0x1f8   : > { %2547 = vperm.xlu0 %12039, %v12050_v13   ;;  %v1286_v13 = vmul.f32 %v12940_v58, %v13055_v35  ;;  %v1287_v35 = vmul.f32 %v12940_v58, %v12974_v45  ;;  %v13594_v45 = vmul.f32 %v12940_v58, %v12994_v29  ;;  %v1927_v28 = vmul.f32 %v12945_v61, %v13263_v12  ;;  %v17169_v29 = vld [vmem:[#allocation8_spill] sm:$0xff] }
 0x1f9   : > { %v2833_v21 = vadd.f32 %v2705_v43, %v2061_v52  ;;  %v17174_v52 = vld [vmem:[#allocation13_spill] sm:$0xff] }
 0x1fa   : > { %11964 = vset.pattern.permute.xlu1 %v17054_v55  ;;  %v13552_v16 = vpop.permute.xlu0 %1891  ;;  %v2058_v4 = vadd.f32 %v1930_v39, %v1286_v13  ;;  %v13598_v39 = vmul.f32 %v12940_v58, %v13002_v36  ;;  %v17167_v13 = vld [vmem:[#allocation11_spill] sm:$0xff]  ;;  %v17170_v36 = vld [vmem:[#allocation9_spill] sm:$0xff] }
 0x1fb   : > { %17162 = vst [vmem:[#allocation129_spill] sm:$0xff] %v13552_v16  ;;  %1547 = vperm.xlu1 %11964, %v540_v0   ;;  %v13554_v30 = vpop.permute.xlu1 %1523 }
 0x1fc   : > { %17163 = vst [vmem:[#allocation130_spill] sm:$0xff] %v13554_v30 }
 0x1fe   : > { %v13558_v22 = vpop.permute.xlu0 %1639 }
 0x1ff   : > { %17164 = vst [vmem:[#allocation131_spill] sm:$0xff] %v13558_v22  ;;  %11965 = vset.pattern.permute.xlu1 %v17061_v54  ;;  %v1926_v22 = vmul.f32 %v12945_v61, %v13000_v34  ;;  %v1929_v34 = vmul.f32 %v12945_v61, %v13032_v50  ;;  %v1285_v50 = vmul.f32 %v12940_v58, %v17167_v13 }
 0x200   : > { %2307 = vperm.xlu1 %11965, %v13162_v7   ;;  %v13568_v16 = vpop.permute.xlu1 %2475  ;;  %v13584_v7 = vmul.f32 %v12940_v58, %v12981_v56  ;;  %v2830_v56 = vadd.f32 %v2702_v41, %v2058_v4  ;;  %v1284_v41 = vmul.f32 %v12940_v58, %v17170_v36  ;;  %v17171_v4 = vld [vmem:[#allocation10_spill] sm:$0xff]  ;;  %v13629_v13 = vmul.f32 %v12940_v58, %v17174_v52  ;;  %v17177_v36 = vld [vmem:[#allocation21_spill] sm:$0xff]  ;;  %v17182_v52 = vld [vmem:[#allocation16_spill] sm:$0xff] }
 0x201   : > { %17165 = vst [vmem:[#allocation132_spill] sm:$0xff] %v13568_v16  ;;  %v13601_v6 = vadd.f32 %v1926_v22, %v1282_v32  ;;  %v17172_v22 = vld [vmem:[#allocation12_spill] sm:$0xff]  ;;  %v13625_v12 = vadd.f32 %v1929_v34, %v1285_v50  ;;  %v1931_v16 = vmul.f32 %v12945_v61, %v17177_v36  ;;  %v17181_v34 = vld [vmem:[#allocation49_spill] sm:$0xff]  ;;  %v13651_v36 = vadd.f32 %v12970_v42, %v2833_v21 }
 0x202   : > { %v13580_v30 = vpop.permute.xlu0 %1899  ;;  %v13621_v32 = vmul.f32 %v12940_v58, %v17172_v22  ;;  %17175 = vst [vmem:[#allocation9_spill] sm:$0xff] %v13629_v13  ;;  %v13640_v22 = vmul.f32 %v12940_v58, %v17179_v24  ;;  %v1938_v50 = vmul.f32 %v12945_v61, %v17181_v34  ;;  %v17183_v13 = vld [vmem:[#allocation32_spill] sm:$0xff]  ;;  %v2055_v24 = vadd.f32 %v1927_v28, %v1283_v46  ;;  %v17191_v28 = vld [vmem:[#allocation38_spill] sm:$0xff] }
 0x203   : > { %17166 = vst [vmem:[#allocation133_spill] sm:$0xff] %v13580_v30  ;;  %v13611_v30 = vmul.f32 %v12940_v58, %v17169_v29  ;;  %v17176_v29 = vld [vmem:[#allocation14_spill] sm:$0xff]  ;;  %v1934_v10 = vmul.f32 %v12945_v61, %v17183_v13  ;;  %v13671_v46 = vadd.f32 %v1931_v16, %v1287_v35  ;;  %v1937_v13 = vmul.f32 %v12945_v61, %v17191_v28  ;;  %v12051_v16 = vld [vmem:[%s12770_s19 + $0x308] sm:$0xff] }
 0x204   : > { %2315 = vperm.xlu1 %11965, %v13169_v57   ;;  %v13617_v57 = vmul.f32 %v12940_v58, %v17171_v4  ;;  %v13636_v4 = vld [vmem:[%s12770_s19 + $0x2f8] sm:$0xff]  ;;  %17180 = vst [vmem:[#allocation12_spill] sm:$0xff] %v13640_v22 }
 0x205   : > { %v13607_v51 = vpop.permute.xlu1 %786  ;;  %17178 = vst [vmem:[#allocation10_spill] sm:$0xff] %v13636_v4  ;;  %2559 = vperm.xlu0 %12039, %v13636_v4   ;;  %v17188_v4 = vld [vmem:[#allocation47_spill] sm:$0xff]  ;;  %v13687_v28 = vadd.f32 %v1934_v10, %v1290_v31  ;;  %v17199_v31 = vld [vmem:[#allocation42_spill] sm:$0xff] }
 0x206   : > { %17168 = vst [vmem:[#allocation11_spill] sm:$0xff] %v13607_v51  ;;  %v13623_v43 = vpop.permute.xlu0 %1651  ;;  %v2699_v51 = vmul.f32 %v12948_v62, %v17176_v29  ;;  %v2700_v29 = vmul.f32 %v12948_v62, %v17182_v52  ;;  %v1294_v52 = vmul.f32 %v12940_v58, %v17188_v4 }
 0x207   : > { %17173 = vst [vmem:[#allocation8_spill] sm:$0xff] %v13623_v43  ;;  %v13643_v43 = vadd.f32 %v12970_v42, %v2830_v56  ;;  %v17185_v56 = vld [vmem:[#allocation17_spill] sm:$0xff]  ;;  %v17189_v42 = vld [vmem:[#allocation58_spill] sm:$0xff] }
 0x208   : > { %2319 = vperm.xlu1 %11965, %v540_v0   ;;  %v13659_v25 = vmul.f32 %v12940_v58, %v17185_v56  ;;  %v17186_v0 = vld [vmem:[#allocation18_spill] sm:$0xff]  ;;  %v2710_v21 = vmul.f32 %v12948_v62, %v17189_v42  ;;  %v1928_v56 = vmul.f32 %v12945_v61, %v13271_v53  ;;  %v1291_v42 = vmul.f32 %v12940_v58, %v17193_v20  ;;  %v17194_v53 = vld [vmem:[#allocation36_spill] sm:$0xff] }
 0x209   : > { %v13655_v22 = vpop.permute.xlu1 %791  ;;  %v13663_v34 = vmul.f32 %v12940_v58, %v17186_v0  ;;  %v1932_v0 = vmul.f32 %v12945_v61, %v13279_v26  ;;  %2567 = vperm.xlu0 %12039, %v12051_v16   ;;  %v1293_v26 = vmul.f32 %v12940_v58, %v17194_v53  ;;  %v2827_v17 = vadd.f32 %v2699_v51, %v2055_v24 }
 0x20a   : > { %17184 = vst [vmem:[#allocation13_spill] sm:$0xff] %v13655_v22  ;;  %v13669_v18 = vpop.permute.xlu0 %1659  ;;  %v17192_v22 = vld [vmem:[#allocation26_spill] sm:$0xff]  ;;  %v1941_v20 = vmul.f32 %v12945_v61, %v17197_v15  ;;  %v2707_v53 = vmul.f32 %v12948_v62, %v17199_v31  ;;  %v2056_v51 = vadd.f32 %v1928_v56, %v1284_v41  ;;  %v13717_v41 = vld [vmem:[%s16948_s2] ss:$0 sm:$0xff] }
 0x20b   : > { %17187 = vst [vmem:[#allocation14_spill] sm:$0xff] %v13663_v34  ;;  %17190 = vst [vmem:[#allocation21_spill] sm:$0xff] %v13669_v18  ;;  %v2704_v4 = vmul.f32 %v12948_v62, %v17192_v22  ;;  %v2066_v18 = vadd.f32 %v1938_v50, %v1294_v52  ;;  %v17195_v34 = vld [vmem:[#allocation40_spill] sm:$0xff]  ;;  %v1292_v22 = vmul.f32 %v12940_v58, %v17196_v59 }
 0x20c   : > { %11966 = vset.pattern.permute.xlu1 %v17057_v38  ;;  %v1940_v52 = vmul.f32 %v12945_v61, %v13296_v48  ;;  %v13700_v10 = vadd.f32 %v1937_v13, %v1293_v26  ;;  %v2060_v24 = vadd.f32 %v1932_v0, %v13584_v7  ;;  %v2708_v59 = vmul.f32 %v12948_v62, %v17200_v14  ;;  %v17203_v26 = vld [vmem:[#allocation60_spill] sm:$0xff] }
 0x20d   : > { %1061 = vperm.xlu1 %11966, %v17195_v34   ;;  %v2838_v50 = vadd.f32 %v2710_v21, %v2066_v18  ;;  %v1297_v18 = vmul.f32 %v12940_v58, %v17201_v40  ;;  %v2713_v48 = vmul.f32 %v12948_v62, %v13258_v60  ;;  %v17202_v21 = vld [vmem:[#allocation51_spill] sm:$0xff]  ;;  %v2962_v7 = vadd.f32 %v13717_v41, %v2827_v17 }
 0x20e   : > { %v13698_v16 = vpop.permute.xlu1 %1531  ;;  %v1939_v13 = vmul.f32 %v12945_v61, %v17202_v21  ;;  %v1935_v14 = vmul.f32 %v12945_v61, %v13284_v63  ;;  %v1936_v40 = vmul.f32 %v12945_v61, %v13291_v2  ;;  %v2068_v0 = vadd.f32 %v1940_v52, %v13598_v39  ;;  %v17205_v52 = vld [vmem:[#allocation61_spill] sm:$0xff] }
 0x20f   : > { %17198 = vst [vmem:[#allocation15_spill] sm:$0xff] %v13698_v16  ;;  %v2196_v35 = vpop.permute.xlu0 %2195  ;;  %v2069_v60 = vadd.f32 %v1941_v20, %v1297_v18  ;;  %v13726_v56 = vadd.f32 %v13717_v41, %v2838_v50  ;;  %v2712_v17 = vmul.f32 %v12948_v62, %v17203_v26  ;;  %v2828_v31 = vadd.f32 %v2700_v29, %v2056_v51  ;;  %v17204_v50 = vld [vmem:[#allocation67_spill] sm:$0xff] }
 0x210   : > { %v2698_v15 = vmul.f32 %v12948_v62, %v2196_v35  ;;  %v2832_v63 = vadd.f32 %v2704_v4, %v2060_v24  ;;  %v1943_v2 = vmul.f32 %v12945_v61, %v13302_v3  ;;  %v1944_v18 = vmul.f32 %v12945_v61, %v17204_v50  ;;  %v17206_v51 = vld [vmem:[#allocation63_spill] sm:$0xff] }
 0x211   : > { %11967 = vset.pattern.permute.xlu1 %v17054_v55  ;;  %v2841_v20 = vadd.f32 %v2713_v48, %v2069_v60  ;;  %v2063_v29 = vadd.f32 %v1935_v14, %v1291_v42  ;;  %v2064_v4 = vadd.f32 %v1936_v40, %v1292_v22  ;;  %v1300_v3 = vmul.f32 %v12940_v58, %v17206_v51  ;;  %v17208_v42 = vld [vmem:[#allocation43_spill] sm:$0xff]  ;;  %v17209_v40 = vld [vmem:[#allocation68_spill] sm:$0xff] }
 0x212   : > { %v2826_v35 = vadd.f32 %v2698_v15, %v13601_v6  ;;  %1743 = vperm.xlu1 %11967, %v13507_v11   ;;  %v3090_v11 = vmax.f32 %v2962_v7, 0.0  ;;  %v1299_v15 = vmul.f32 %v12940_v58, %v17205_v52  ;;  %v2840_v24 = vadd.f32 %v2712_v17, %v2068_v0  ;;  %v17207_v7 = vld [vmem:[#allocation66_spill] sm:$0xff] }
 0x213   : > { %v2208_v21 = vpop.permute.xlu0 %2207  ;;  %v13735_v16 = vpop.permute.xlu1 %2291  ;;  %v2963_v60 = vadd.f32 %v13717_v41, %v2828_v31  ;;  %v2715_v50 = vmul.f32 %v12948_v62, %v17207_v7  ;;  %v2072_v14 = vadd.f32 %v1944_v18, %v1300_v3  ;;  %v2716_v0 = vmul.f32 %v12948_v62, %v17209_v40 }
 0x214   : > { %v2961_v39 = vadd.f32 %v13717_v41, %v2826_v35  ;;  %v2701_v6 = vmul.f32 %v12948_v62, %v2208_v21  ;;  %v2967_v35 = vadd.f32 %v13717_v41, %v2832_v63  ;;  %v2071_v21 = vadd.f32 %v1943_v2, %v1299_v15 }
 0x215   : > { %v13759_v31 = vadd.f32 %v1939_v13, %v13594_v45  ;;  %v2835_v63 = vadd.f32 %v2707_v53, %v2063_v29  ;;  %v2836_v2 = vadd.f32 %v2708_v59, %v2064_v4  ;;  %v2975_v51 = vadd.f32 %v13717_v41, %v2840_v24 }
 0x216   : > { %v3089_v26 = vmax.f32 %v2961_v39, 0.0  ;;  %v2829_v48 = vadd.f32 %v2701_v6, %v13625_v12  ;;  %11968 = vset.pattern.permute.xlu1 %v17057_v38  ;;  %v17210_v6 = vld [vmem:[#allocation62_spill] sm:$0xff]  ;;  %v3101_v3 = vmax.f32 %v13726_v56, 0.0  ;;  %v3091_v40 = vmax.f32 %v2963_v60, 0.0 }
 0x217   : > { %v2216_v52 = vpop.permute.xlu0 %2215  ;;  %1066 = vperm.xlu1 %11968, %v17208_v42   ;;  %v13752_v22 = vpop.permute.xlu1 %2299  ;;  %v1942_v15 = vmul.f32 %v12945_v61, %v17210_v6  ;;  %v3095_v59 = vmax.f32 %v2967_v35, 0.0  ;;  %v2844_v13 = vadd.f32 %v2716_v0, %v2072_v14  ;;  %v13775_v4 = vadd.f32 %v13717_v41, %v2836_v2  ;;  %v17212_v0 = vld [vmem:[#allocation64_spill] sm:$0xff] }
 0x218   : > { %v2964_v12 = vadd.f32 %v13717_v41, %v2829_v48  ;;  %v2703_v17 = vmul.f32 %v12948_v62, %v2216_v52  ;;  %v3215_v39 = vpack.c.bf16 %v3090_v11, %v3089_v26  ;;  %v2976_v48 = vadd.f32 %v13717_v41, %v2841_v20  ;;  %v17211_v20 = vld [vmem:[#allocation65_spill] sm:$0xff] }
 0x219   : > { %v2843_v52 = vadd.f32 %v2715_v50, %v2071_v21  ;;  %v1945_v24 = vmul.f32 %v12945_v61, %v17211_v20  ;;  %v13780_v60 = vadd.f32 %v1942_v15, %v13611_v30  ;;  %v3103_v21 = vmax.f32 %v2975_v51, 0.0  ;;  %v11109_v51 = vld [vmem:[%s16950_s4] ss:$0 sm:$0xff] }
 0x21a   : > { %v3092_v7 = vmax.f32 %v2964_v12, 0.0  ;;  %v2831_v18 = vadd.f32 %v2703_v17, %v13671_v46  ;;  %11683 = vmatprep.mubr.msk.bf16.mxu0 %vm3316_vm0, %v3215_v39  ;;  %v2970_v46 = vadd.f32 %v13717_v41, %v2835_v63  ;;  %v3104_v14 = vmax.f32 %v2976_v48, 0.0  ;;  %v17213_v63 = vld [vmem:[#allocation69_spill] sm:$0xff] }
 0x21b   : > { %v2228_v45 = vpop.permute.xlu0 %2227  ;;  %1071 = vperm.xlu1 %11968, %v13514_v5   ;;  %v13769_v53 = vpop.permute.xlu1 %2303  ;;  %v1301_v12 = vmul.f32 %v12940_v58, %v17212_v0  ;;  %v13786_v17 = vadd.f32 %v13717_v41, %v2843_v52  ;;  %v1988_v2 = vmul.f32 %v12945_v61, %v17213_v63  ;;  %v13793_v30 = vadd.f32 %v13717_v41, %v2844_v13 }
 0x21c   : > { %v2966_v11 = vadd.f32 %v13717_v41, %v2831_v18  ;;  %v2706_v29 = vmul.f32 %v12948_v62, %v2228_v45  ;;  %v3216_v26 = vpack.c.bf16 %v3092_v7, %v3091_v40  ;;  %v17214_v7 = vmax.f32 %v13643_v43, 0.0 }
 0x21d   : > { %v3098_v48 = vmax.f32 %v2970_v46, 0.0  ;;  %v3099_v40 = vmax.f32 %v13775_v4, 0.0  ;;  %v13806_v52 = vadd.f32 %v1945_v24, %v1301_v12  ;;  %v17215_v45 = vmax.f32 %v13651_v36, 0.0  ;;  %v17217_v24 = vld [vmem:[#allocation70_spill] sm:$0xff] }
 0x21e   : > { %v3094_v50 = vmax.f32 %v2966_v11, 0.0  ;;  %v2834_v35 = vadd.f32 %v2706_v29, %v13687_v28  ;;  %11684 = vmatmul.mubr.msk.bf16.gmra.mrb[4].mxu0 %vm3316_vm0, %v3216_v26  ;;  %v17216_v11 = vld [vmem:[#allocation72_spill] sm:$0xff]  ;;  %v3106_v43 = vmax.f32 %v13786_v17, 0.0  ;;  %v13818_v46 = vadd.f32 %v1988_v2, %v13621_v32 }
 0x21f   : > { %v2240_v39 = vpop.permute.xlu0 %2239  ;;  %11969 = vset.pattern.permute.xlu1 %v17054_v55  ;;  %v3218_v13 = vpack.c.bf16 %v17215_v45, %v3095_v59  ;;  %v1342_v36 = vmul.f32 %v12940_v58, %v17217_v24  ;;  %v3107_v12 = vmax.f32 %v13793_v30, 0.0  ;;  %v2758_v32 = vmul.f32 %v12948_v62, %v13362_v37  ;;  %v17219_v45 = vld [vmem:[#allocation73_spill] sm:$0xff]  ;;  %v17220_v24 = vld [vmem:[#allocation74_spill] sm:$0xff] }
 0x220   : > { %v2969_v28 = vadd.f32 %v13717_v41, %v2834_v35  ;;  %v2709_v6 = vmul.f32 %v12948_v62, %v2240_v39  ;;  %1755 = vperm.xlu1 %11969, %v13514_v5   ;;  %v13798_v15 = vpop.permute.xlu1 %1021  ;;  %v3217_v18 = vpack.c.bf16 %v3094_v50, %v17214_v7  ;;  %v1986_v5 = vmul.f32 %v12945_v61, %v17216_v11  ;;  %v17221_v37 = vld [vmem:[#allocation78_spill] sm:$0xff] }
 0x221   : > { %v13814_v35 = vpack.c.bf16 %v3104_v14, %v3103_v21  ;;  %v17218_v21 = vld [vmem:[#allocation71_spill] sm:$0xff]  ;;  %v1948_v11 = vmul.f32 %v12945_v61, %v17219_v45 }
 0x222   : > { %v3097_v29 = vmax.f32 %v2969_v28, 0.0  ;;  %v2837_v20 = vadd.f32 %v2709_v6, %v13700_v10  ;;  %v11681_v26 = vpop.f32.mrb[0].mxu0  ;;  %11687 = vmatprep.mubr.msk.bf16.mxu0 %vm3316_vm0, %v3217_v18  ;;  %v1946_v14 = vmul.f32 %v12945_v61, %v17218_v21 }
 0x223   : > { %v3552_v59 = vadd.f32 %v11681_v26, %v11109_v51  ;;  %v2248_v50 = vpop.permute.xlu0 %2247  ;;  %v3543_v0 = vpop.f32.mrb[1].mxu0 }
 0x224   : > { %v3219_v63 = vpack.c.bf16 %v3098_v48, %v3097_v29  ;;  %v2711_v10 = vmul.f32 %v12948_v62, %v2248_v50  ;;  %v3544_v39 = vadd.f32 %v11109_v51, %v3543_v0  ;;  %v11682_v28 = vpop.f32.mrb[2].mxu0  ;;  %11970 = vset.pattern.permute.xlu1 %v17061_v54  ;;  %v2972_v2 = vadd.f32 %v13717_v41, %v2837_v20 }
 0x225   : > { %v3555_v6 = vadd.f32 %v11682_v28, %v11109_v51  ;;  %v3546_v7 = vpop.f32.mrb[3].mxu0  ;;  %2519 = vperm.xlu1 %11970, %v17195_v34   ;;  %v13831_v18 = vpop.permute.xlu1 %1711  ;;  %v2114_v48 = vadd.f32 %v1986_v5, %v1342_v36  ;;  %v1987_v50 = vmul.f32 %v12945_v61, %v17220_v24  ;;  %v1996_v20 = vmul.f32 %v12945_v61, %v17221_v37  ;;  %v13870_v37 = vld [vmem:[%s12770_s19 + $0x2c0] sm:$0xff] }
 0x226   : > { %v2839_v29 = vadd.f32 %v2711_v10, %v13759_v31  ;;  %v3547_v26 = vadd.f32 %v11109_v51, %v3546_v7  ;;  %v4056_v0 = vmax.f32 %v3552_v59, 0.0  ;;  %11688 = vmatmul.mubr.msk.bf16.gmra.mrb[8].mxu0 %vm3316_vm0, %v3218_v13  ;;  %v4054_v5 = vmax.f32 %v3544_v39, 0.0  ;;  %v13845_v31 = vld [vmem:[%s12770_s19 + $0x318] sm:$0xff] }
 0x227   : > { %v4057_v28 = vmax.f32 %v3555_v6, 0.0  ;;  %v2260_v34 = vpop.permute.xlu0 %2259  ;;  %11691 = vmatprep.mubr.msk.bf16.mxu0 %vm3316_vm0, %v3219_v63  ;;  %v17222_v51 = vld [vmem:[#allocation79_spill] sm:$0xff]  ;;  %v2886_v7 = vadd.f32 %v2758_v32, %v2114_v48  ;;  %v3100_v59 = vmax.f32 %v2972_v2, 0.0  ;;  %2575 = vperm.xlu0 %12039, %v13845_v31   ;;  %v1302_v13 = vmul.f32 %v12940_v58, %v13369_v49 }
 0x228   : > { %v2974_v21 = vadd.f32 %v13717_v41, %v2839_v29  ;;  %v4055_v36 = vmax.f32 %v3547_v26, 0.0  ;;  %v2714_v45 = vmul.f32 %v12948_v62, %v2260_v34  ;;  %v1989_v10 = vmul.f32 %v12945_v61, %v17222_v51  ;;  %v17223_v32 = vld [vmem:[#allocation75_spill] sm:$0xff] }
 0x229   : > { %v13849_v6 = vpack.c.bf16 %v4057_v28, %v4056_v0  ;;  %2523 = vperm.xlu1 %11970, %v17208_v42   ;;  %v2115_v24 = vadd.f32 %v1987_v50, %v13617_v57  ;;  %v13863_v2 = vmul.f32 %v12945_v61, %v17223_v32  ;;  %v2760_v42 = vmul.f32 %v12948_v62, %v13391_v27  ;;  %v17224_v0 = vld [vmem:[#allocation76_spill] sm:$0xff]  ;;  %v17225_v28 = vld [vmem:[#allocation77_spill] sm:$0xff] }
 0x22a   : > { %v3102_v39 = vmax.f32 %v2974_v21, 0.0  ;;  %v13855_v29 = vpack.c.bf16 %v4055_v36, %v4054_v5  ;;  %v2842_v63 = vadd.f32 %v2714_v45, %v13780_v60  ;;  %v13858_v26 = vpop.permute.xlu1 %1026  ;;  %v1304_v48 = vmul.f32 %v12940_v58, %v13397_v44 }
 0x22b   : > { %v2272_v49 = vpop.permute.xlu0 %2271  ;;  %v13874_v60 = vmul.f32 %v12945_v61, %v17224_v0  ;;  %v1345_v57 = vmul.f32 %v12940_v58, %v17225_v28  ;;  %v2718_v50 = vmul.f32 %v12948_v62, %v13418_v1  ;;  %v13883_v27 = vadd.f32 %v1996_v20, %v13659_v25  ;;  %v17226_v20 = vld [vmem:[#allocation80_spill] sm:$0xff] }
 0x22c   : > { %v3221_v34 = vpack.c.bf16 %v3102_v39, %v3101_v3  ;;  %v2720_v44 = vmul.f32 %v12948_v62, %v13425_v33  ;;  %v3220_v21 = vpack.c.bf16 %v3100_v59, %v3099_v40  ;;  %v2717_v5 = vmul.f32 %v12948_v62, %v2272_v49 }
 0x22d   : > { %11971 = vset.pattern.permute.xlu1 %v17057_v38  ;;  %v2117_v36 = vadd.f32 %v1989_v10, %v1345_v57  ;;  %v2074_v45 = vadd.f32 %v1946_v14, %v1302_v13  ;;  %v2977_v1 = vadd.f32 %v13717_v41, %v2842_v63  ;;  %v3021_v25 = vadd.f32 %v13717_v41, %v2886_v7  ;;  %v17227_v13 = vld [vmem:[#allocation81_spill] sm:$0xff]  ;;  %v17228_v63 = vld [vmem:[#allocation82_spill] sm:$0xff] }
 0x22e   : > { %1076 = vperm.xlu1 %11971, %v13870_v37   ;;  %v13893_v56 = vpop.permute.xlu1 %1031  ;;  %v1947_v33 = vmul.f32 %v12945_v61, %v13383_v19  ;;  %v2888_v3 = vadd.f32 %v2760_v42, %v13818_v46  ;;  %v2076_v4 = vadd.f32 %v1948_v11, %v1304_v48  ;;  %v1949_v40 = vmul.f32 %v12945_v61, %v13409_v9  ;;  %v17229_v57 = vld [vmem:[#allocation94_spill] sm:$0xff] }
 0x22f   : > { %11692 = vmatmul.mubr.msk.bf16.gmra.mrb[12].mxu0 %vm3316_vm0, %v3220_v21  ;;  %v2440_v14 = vpop.permute.xlu0 %2439  ;;  %v13904_v51 = vmul.f32 %v12945_v61, %v17226_v20  ;;  %v1303_v10 = vmul.f32 %v12940_v58, %v13375_v47  ;;  %v2846_v7 = vadd.f32 %v2718_v50, %v2074_v45  ;;  %v1305_v19 = vmul.f32 %v12940_v58, %v13402_v8  ;;  %v17232_v20 = vld [vmem:[#allocation96_spill] sm:$0xff] }
 0x230   : > { %v2759_v59 = vmul.f32 %v12948_v62, %v2440_v14  ;;  %11695 = vmatprep.mubr.msk.bf16.mxu0 %vm3316_vm0, %v3221_v34  ;;  %v2848_v46 = vadd.f32 %v2720_v44, %v2076_v4  ;;  %v2721_v9 = vmul.f32 %v12948_v62, %v13431_v23  ;;  %v2845_v11 = vadd.f32 %v2717_v5, %v13806_v52  ;;  %v17230_v5 = vld [vmem:[#allocation98_spill] sm:$0xff] }
 0x231   : > { %v13917_v39 = vmul.f32 %v12945_v61, %v17227_v13  ;;  %v13921_v47 = vmul.f32 %v12945_v61, %v17228_v63  ;;  %v3105_v32 = vmax.f32 %v2977_v1, 0.0  ;;  %v2075_v48 = vadd.f32 %v1947_v33, %v1303_v10 }
 0x232   : > { %v2887_v42 = vadd.f32 %v2759_v59, %v2115_v24  ;;  %11972 = vset.pattern.permute.xlu1 %v17054_v55  ;;  %v3023_v8 = vadd.f32 %v13717_v41, %v2888_v3  ;;  %v2077_v49 = vadd.f32 %v1949_v40, %v1305_v19  ;;  %v3149_v52 = vmax.f32 %v3021_v25, 0.0  ;;  %v17231_v25 = vld [vmem:[#allocation105_spill] sm:$0xff]  ;;  %v17234_v19 = vld [vmem:[#allocation111_spill] sm:$0xff] }
 0x233   : > { %v2448_v0 = vpop.permute.xlu0 %2447  ;;  %1759 = vperm.xlu1 %11972, %v13870_v37   ;;  %v13926_v23 = vpop.permute.xlu1 %1723  ;;  %v13929_v28 = vadd.f32 %v13717_v41, %v2846_v7  ;;  %v1347_v50 = vmul.f32 %v12940_v58, %v17229_v57  ;;  %v13936_v44 = vadd.f32 %v13717_v41, %v2848_v46  ;;  %v1348_v45 = vmul.f32 %v12940_v58, %v17230_v5  ;;  %v17233_v7 = vld [vmem:[#allocation107_spill] sm:$0xff] }
 0x234   : > { %v2761_v24 = vmul.f32 %v12948_v62, %v2448_v0  ;;  %v3022_v34 = vadd.f32 %v13717_v41, %v2887_v42  ;;  %v2849_v21 = vadd.f32 %v2721_v9, %v2077_v49  ;;  %v2980_v1 = vadd.f32 %v13717_v41, %v2845_v11  ;;  %v17235_v11 = vld [vmem:[#allocation120_spill] sm:$0xff] }
 0x235   : > { %v2763_v33 = vmul.f32 %v12948_v62, %v17231_v25  ;;  %v3223_v3 = vpack.c.bf16 %v3106_v43, %v3105_v32  ;;  %v3151_v14 = vmax.f32 %v3023_v8, 0.0  ;;  %v1990_v10 = vmul.f32 %v12945_v61, %v17232_v20 }
 0x236   : > { %v2889_v4 = vadd.f32 %v2761_v24, %v2117_v36  ;;  %v3150_v40 = vmax.f32 %v3022_v34, 0.0  ;;  %v2764_v59 = vmul.f32 %v12948_v62, %v17233_v7  ;;  %v1994_v46 = vmul.f32 %v12945_v61, %v17234_v19  ;;  %v17238_v34 = vld [vmem:[#allocation9_spill] sm:$0xff] }
 0x237   : > { %11696 = vmatmul.mubr.msk.bf16.gmra.mrb[16].mxu0 %vm3316_vm0, %v13814_v35  ;;  %v2280_v9 = vpop.permute.xlu0 %2279  ;;  %1763 = vperm.xlu1 %11972, %v17235_v11   ;;  %v2119_v17 = vadd.f32 %v13863_v2, %v1347_v50  ;;  %v2984_v32 = vadd.f32 %v13717_v41, %v2849_v21  ;;  %v2120_v42 = vadd.f32 %v13874_v60, %v1348_v45  ;;  %v17236_v35 = vld [vmem:[#allocation109_spill] sm:$0xff]  ;;  %v3108_v49 = vmax.f32 %v2980_v1, 0.0 }
 0x238   : > { %v3024_v43 = vadd.f32 %v13717_v41, %v2889_v4  ;;  %v2719_v36 = vmul.f32 %v12948_v62, %v2280_v9  ;;  %11699 = vmatprep.mubr.msk.bf16.mxu0 %vm3316_vm0, %v3223_v3  ;;  %v13958_v13 = vpop.permute.xlu1 %2487  ;;  %v3245_v63 = vpack.c.bf16 %v3150_v40, %v3149_v52  ;;  %v1350_v8 = vmul.f32 %v12940_v58, %v17236_v35  ;;  %v17237_v2 = vld [vmem:[#allocation121_spill] sm:$0xff]  ;;  %v17239_v52 = vld [vmem:[#allocation103_spill] sm:$0xff] }
 0x239   : > { %v2891_v0 = vadd.f32 %v2763_v33, %v2119_v17  ;;  %v2766_v57 = vmul.f32 %v12948_v62, %v17237_v2  ;;  %v2118_v5 = vadd.f32 %v1990_v10, %v17238_v34  ;;  %v1993_v25 = vmul.f32 %v12945_v61, %v17239_v52  ;;  %v13972_v45 = vld [vmem:[%s12770_s19 + $0x148] sm:$0xff]  ;;  %v17240_v40 = vld [vmem:[#allocation123_spill] sm:$0xff]  ;;  %v17245_v2 = vld [vmem:[#allocation116_spill] sm:$0xff] }
 0x23a   : > { %v3152_v50 = vmax.f32 %v3024_v43, 0.0  ;;  %v2847_v24 = vadd.f32 %v2719_v36, %v2075_v48  ;;  %11743 = vmatprep.mubr.msk.bf16.mxu1 %vm3316_vm0, %v3245_v63  ;;  %v2892_v21 = vadd.f32 %v2764_v59, %v2120_v42  ;;  %v2122_v3 = vadd.f32 %v1994_v46, %v1350_v8  ;;  %2343 = vperm.xlu0 %12039, %v13972_v45   ;;  %v17241_v59 = vld [vmem:[#allocation100_spill] sm:$0xff]  ;;  %v17242_v36 = vld [vmem:[#allocation113_spill] sm:$0xff]  ;;  %v17243_v63 = vld [vmem:[#allocation118_spill] sm:$0xff] }
 0x23b   : > { %v2452_v60 = vpop.permute.xlu0 %2451  ;;  %11973 = vset.pattern.permute.xlu1 %v17057_v38  ;;  %v3109_v1 = vmax.f32 %v13929_v28, 0.0  ;;  %v3111_v10 = vmax.f32 %v13936_v44, 0.0  ;;  %v3112_v7 = vmax.f32 %v2984_v32, 0.0  ;;  %v1349_v19 = vmul.f32 %v12940_v58, %v17241_v59  ;;  %v13998_v8 = vld [vmem:[%s12770_s19 + $0x320] sm:$0xff] }
 0x23c   : > { %v3246_v33 = vpack.c.bf16 %v3152_v50, %v3151_v14  ;;  %v2982_v4 = vadd.f32 %v13717_v41, %v2847_v24  ;;  %v2762_v48 = vmul.f32 %v12948_v62, %v2452_v60  ;;  %1091 = vperm.xlu1 %11973, %v17240_v40   ;;  %v13978_v20 = vpop.permute.xlu1 %2491  ;;  %v3224_v28 = vpack.c.bf16 %v3108_v49, %v3107_v12  ;;  %v17244_v49 = vld [vmem:[#allocation83_spill] sm:$0xff]  ;;  %v17246_v50 = vld [vmem:[#allocation132_spill] sm:$0xff] }
 0x23d   : > { %v3026_v14 = vadd.f32 %v13717_v41, %v2891_v0  ;;  %v2894_v46 = vadd.f32 %v2766_v57, %v2122_v3  ;;  %v2121_v17 = vadd.f32 %v1993_v25, %v1349_v19  ;;  %v3027_v43 = vadd.f32 %v13717_v41, %v2892_v21 }
 0x23e   : > { %v3110_v9 = vmax.f32 %v2982_v4, 0.0  ;;  %v2890_v11 = vadd.f32 %v2762_v48, %v2118_v5  ;;  %11744 = vmatmul.mubr.msk.bf16.vlgmr.msra.gmra.mrb[0].mxu1 %vm3316_vm0, %v3246_v33  ;;  %v1995_v44 = vmul.f32 %v12945_v61, %v17242_v36  ;;  %v1997_v32 = vmul.f32 %v12945_v61, %v17243_v63  ;;  %2579 = vperm.xlu0 %12039, %v13998_v8   ;;  %v17248_v48 = vld [vmem:[#allocation15_spill] sm:$0xff] }
 0x23f   : > { %11700 = vmatmul.mubr.msk.bf16.gmra.mrb[20].mxu0 %vm3316_vm0, %v3224_v28  ;;  %v2464_v30 = vpop.permute.xlu0 %2463  ;;  %v14003_v0 = vmul.f32 %v12945_v61, %v17244_v49  ;;  %v1353_v57 = vmul.f32 %v12940_v58, %v17245_v2  ;;  %v2768_v24 = vmul.f32 %v12948_v62, %v17246_v50  ;;  %v3226_v5 = vpack.c.bf16 %v3112_v7, %v3111_v10  ;;  %v17249_v28 = vld [vmem:[#allocation124_spill] sm:$0xff] }
 0x240   : > { %v3225_v12 = vpack.c.bf16 %v3110_v9, %v3109_v1  ;;  %v3025_v42 = vadd.f32 %v13717_v41, %v2890_v11  ;;  %v2765_v35 = vmul.f32 %v12948_v62, %v2464_v30  ;;  %11974 = vset.pattern.permute.xlu1 %v17054_v55  ;;  %v3154_v52 = vmax.f32 %v3026_v14, 0.0  ;;  %v17247_v1 = vld [vmem:[#allocation12_spill] sm:$0xff] }
 0x241   : > { %1771 = vperm.xlu1 %11974, %v17240_v40   ;;  %v14010_v34 = vpop.permute.xlu1 %1036  ;;  %v3029_v25 = vadd.f32 %v13717_v41, %v2894_v46  ;;  %v3155_v60 = vmax.f32 %v3027_v43, 0.0  ;;  %v2123_v33 = vadd.f32 %v1995_v44, %v17247_v1  ;;  %v2125_v4 = vadd.f32 %v1997_v32, %v1353_v57  ;;  %v17250_v46 = vld [vmem:[#allocation11_spill] sm:$0xff] }
 0x242   : > { %v3153_v21 = vmax.f32 %v3025_v42, 0.0  ;;  %v2893_v3 = vadd.f32 %v2765_v35, %v2121_v17  ;;  %11703 = vmatprep.mubr.msk.bf16.mxu0 %vm3316_vm0, %v3225_v12  ;;  %v1953_v59 = vmul.f32 %v12945_v61, %v17248_v48  ;;  %v1306_v40 = vmul.f32 %v12940_v58, %v17249_v28  ;;  %v17251_v17 = vld [vmem:[#allocation13_spill] sm:$0xff]  ;;  %v17252_v12 = vld [vmem:[#allocation130_spill] sm:$0xff] }
 0x243   : > { %v2472_v19 = vpop.permute.xlu0 %2471  ;;  %v2896_v14 = vadd.f32 %v2768_v24, %v13883_v27  ;;  %v1308_v11 = vmul.f32 %v12940_v58, %v17250_v46  ;;  %v1309_v43 = vmul.f32 %v12940_v58, %v17251_v17  ;;  %v2725_v36 = vmul.f32 %v12948_v62, %v13769_v53  ;;  %v17253_v24 = vld [vmem:[#allocation127_spill] sm:$0xff] }
 0x244   : > { %v3247_v9 = vpack.c.bf16 %v3154_v52, %v3153_v21  ;;  %v3028_v10 = vadd.f32 %v13717_v41, %v2893_v3  ;;  %v2767_v7 = vmul.f32 %v12948_v62, %v2472_v19  ;;  %v3157_v44 = vmax.f32 %v3029_v25, 0.0  ;;  %v14057_v19 = vld [vmem:[%s12770_s19 + $0x120] sm:$0xff] }
 0x245   : > { %11975 = vset.pattern.permute.xlu1 %v17061_v54  ;;  %v2722_v63 = vmul.f32 %v12948_v62, %v13735_v16  ;;  %v1951_v42 = vmul.f32 %v12945_v61, %v17252_v12  ;;  %v2081_v35 = vadd.f32 %v1953_v59, %v1309_v43  ;;  %v2724_v53 = vmul.f32 %v12948_v62, %v13752_v22 }
 0x246   : > { %v3156_v32 = vmax.f32 %v3028_v10, 0.0  ;;  %v2895_v30 = vadd.f32 %v2767_v7, %v2123_v33  ;;  %11747 = vmatprep.mubr.msk.bf16.mxu1 %vm3316_vm0, %v3247_v9  ;;  %2531 = vperm.xlu1 %11975, %v13870_v37   ;;  %v14033_v27 = vpop.permute.xlu1 %1727  ;;  %v1355_v49 = vmul.f32 %v12940_v58, %v13798_v15  ;;  %v2078_v2 = vadd.f32 %v13904_v51, %v1306_v40 }
 0x247   : > { %11704 = vmatmul.mubr.msk.bf16.gmra.mrb[24].mxu0 %vm3316_vm0, %v3226_v5  ;;  %v2480_v16 = vpop.permute.xlu0 %2479  ;;  %v1307_v52 = vmul.f32 %v12940_v58, %v17253_v24  ;;  %v3031_v25 = vadd.f32 %v13717_v41, %v2896_v14  ;;  %v2080_v22 = vadd.f32 %v13917_v39, %v1308_v11  ;;  %v2853_v21 = vadd.f32 %v2725_v36, %v2081_v35  ;;  %v17254_v36 = vld [vmem:[#allocation126_spill] sm:$0xff] }
 0x248   : > { %v3248_v57 = vpack.c.bf16 %v3156_v32, %v3155_v60  ;;  %v3030_v37 = vadd.f32 %v13717_v41, %v2895_v30  ;;  %v2769_v50 = vmul.f32 %v12948_v62, %v2480_v16  ;;  %v2850_v15 = vadd.f32 %v2722_v63, %v2078_v2  ;;  %v17256_v2 = vld [vmem:[#allocation19_spill] sm:$0xff] }
 0x249   : > { %v2771_v5 = vmul.f32 %v12948_v62, %v13958_v13  ;;  %v2079_v1 = vadd.f32 %v1951_v42, %v1307_v52  ;;  %v2852_v33 = vadd.f32 %v2724_v53, %v2080_v22  ;;  %v2127_v48 = vadd.f32 %v13921_v47, %v1355_v49 }
 0x24a   : > { %v3158_v3 = vmax.f32 %v3030_v37, 0.0  ;;  %v2897_v51 = vadd.f32 %v2769_v50, %v2125_v4  ;;  %11748 = vmatmul.mubr.msk.bf16.gmra.mrb[4].mxu1 %vm3316_vm0, %v3248_v57  ;;  %11976 = vset.pattern.permute.xlu1 %v17057_v38  ;;  %v1732_v60 = vpop.permute.xlu1 %1731  ;;  %v1356_v59 = vmul.f32 %v12940_v58, %v13858_v26  ;;  %v1998_v13 = vmul.f32 %v12945_v61, %v13831_v18 }
 0x24b   : > { %v2296_v39 = vpop.permute.xlu0 %2295  ;;  %816 = vperm.xlu1 %11976, %v14057_v19   ;;  %v3159_v9 = vmax.f32 %v3031_v25, 0.0  ;;  %v2988_v10 = vadd.f32 %v13717_v41, %v2853_v21  ;;  %v2772_v47 = vmul.f32 %v12948_v62, %v13978_v20  ;;  %v2985_v26 = vadd.f32 %v13717_v41, %v2850_v15  ;;  %v17255_v20 = vld [vmem:[#allocation14_spill] sm:$0xff] }
 0x24c   : > { %v3249_v4 = vpack.c.bf16 %v3158_v3, %v3157_v44  ;;  %v3032_v28 = vadd.f32 %v13717_v41, %v2897_v51  ;;  %v2723_v40 = vmul.f32 %v12948_v62, %v2296_v39  ;;  %v2899_v7 = vadd.f32 %v2771_v5, %v2127_v48 }
 0x24d   : > { %v2987_v18 = vadd.f32 %v13717_v41, %v2852_v33  ;;  %v2128_v11 = vadd.f32 %v14003_v0, %v1356_v59  ;;  %v2001_v17 = vmul.f32 %v12945_v61, %v13926_v23  ;;  %v2126_v63 = vadd.f32 %v1998_v13, %v17255_v20 }
 0x24e   : > { %v3160_v14 = vmax.f32 %v3032_v28, 0.0  ;;  %v2851_v46 = vadd.f32 %v2723_v40, %v2079_v1  ;;  %11751 = vmatprep.mubr.msk.bf16.mxu1 %vm3316_vm0, %v3249_v4  ;;  %v3116_v42 = vmax.f32 %v2988_v10, 0.0  ;;  %v1357_v35 = vmul.f32 %v12940_v58, %v13893_v56  ;;  %v12055_v28 = vld [vmem:[%s12770_s19 + $0x2d0] sm:$0xff] }
 0x24f   : > { %v2484_v43 = vpop.permute.xlu0 %2483  ;;  %821 = vperm.xlu1 %11976, %v17254_v36   ;;  %v14074_v44 = vpop.permute.xlu1 %1051  ;;  %v2900_v0 = vadd.f32 %v2772_v47, %v2128_v11  ;;  %v3113_v53 = vmax.f32 %v2985_v26, 0.0  ;;  %v3034_v23 = vadd.f32 %v13717_v41, %v2899_v7  ;;  %v1359_v57 = vmul.f32 %v12940_v58, %v17256_v2 }
 0x250   : > { %v3250_v32 = vpack.c.bf16 %v3160_v14, %v3159_v9  ;;  %v2986_v30 = vadd.f32 %v13717_v41, %v2851_v46  ;;  %v2770_v12 = vmul.f32 %v12948_v62, %v2484_v43  ;;  %v3115_v37 = vmax.f32 %v2987_v18, 0.0  ;;  %v12056_v18 = vld [vmem:[%s12770_s19 + $0x130] sm:$0xff] }
 0x251   : > { %v2129_v50 = vadd.f32 %v2001_v17, %v1357_v35  ;;  %v2003_v52 = vmul.f32 %v12945_v61, %v1732_v60  ;;  %v3035_v15 = vadd.f32 %v13717_v41, %v2900_v0  ;;  %v3162_v3 = vmax.f32 %v3034_v23, 0.0  ;;  %v544_v17 = vld [vmem:[%s12770_s19 + $0x138] sm:$0xff]  ;;  %v17258_v35 = vld [vmem:[#allocation84_spill] sm:$0xff] }
 0x252   : > { %v3114_v49 = vmax.f32 %v2986_v30, 0.0  ;;  %v2898_v16 = vadd.f32 %v2770_v12, %v2126_v63  ;;  %11752 = vmatmul.mubr.msk.bf16.gmra.mrb[8].mxu1 %vm3316_vm0, %v3250_v32  ;;  %v3228_v5 = vpack.c.bf16 %v3116_v42, %v3115_v37  ;;  %v2002_v51 = vmul.f32 %v12945_v61, %v14033_v27  ;;  %v17257_v12 = vld [vmem:[#allocation20_spill] sm:$0xff] }
 0x253   : > { %v2496_v24 = vpop.permute.xlu0 %2495  ;;  %11977 = vset.pattern.permute.xlu1 %v17054_v55  ;;  %v1358_v60 = vmul.f32 %v12940_v58, %v14010_v34  ;;  %v2131_v59 = vadd.f32 %v2003_v52, %v1359_v57  ;;  %v3163_v27 = vmax.f32 %v3035_v15, 0.0  ;;  %v1360_v42 = vmul.f32 %v12940_v58, %v17257_v12  ;;  %v17261_v12 = vld [vmem:[#allocation10_spill] sm:$0xff] }
 0x254   : > { %v3227_v25 = vpack.c.bf16 %v3114_v49, %v3113_v53  ;;  %v3033_v56 = vadd.f32 %v13717_v41, %v2898_v16  ;;  %v2773_v22 = vmul.f32 %v12948_v62, %v2496_v24  ;;  %1555 = vperm.xlu1 %11977, %v17254_v36   ;;  %v1740_v21 = vpop.permute.xlu1 %1739  ;;  %v2004_v0 = vmul.f32 %v12945_v61, %v17258_v35 }
 0x255   : > { %v2130_v9 = vadd.f32 %v2002_v51, %v1358_v60  ;;  %v2005_v30 = vmul.f32 %v12945_v61, %v1740_v21  ;;  %v1361_v53 = vmul.f32 %v12940_v58, %v14074_v44  ;;  %v14125_v21 = vld [vmem:[%s12770_s19 + $0x338] sm:$0xff] }
 0x256   : > { %v3161_v1 = vmax.f32 %v3033_v56, 0.0  ;;  %v2901_v33 = vadd.f32 %v2773_v22, %v2129_v50  ;;  %11707 = vmatprep.mubr.msk.bf16.mxu0 %vm3316_vm0, %v3227_v25  ;;  %v2132_v2 = vadd.f32 %v2004_v0, %v1360_v42  ;;  %2591 = vperm.xlu0 %12039, %v14125_v21  }
 0x257   : > { %v2504_v48 = vpop.permute.xlu0 %2503  ;;  %11708 = vmatmul.mubr.msk.bf16.gmra.mrb[28].mxu0 %vm3316_vm0, %v3228_v5  ;;  %v2133_v16 = vadd.f32 %v2005_v30, %v1361_v53 }
 0x258   : > { %v3251_v39 = vpack.c.bf16 %v3162_v3, %v3161_v1  ;;  %v3036_v13 = vadd.f32 %v13717_v41, %v2901_v33  ;;  %v2775_v4 = vmul.f32 %v12948_v62, %v2504_v48  ;;  %11978 = vset.pattern.permute.xlu1 %v17061_v54  ;;  %v14133_v1 = vld [vmem:[%s12770_s19 + $0x348] sm:$0xff] }
 0x259   : > { %2539 = vperm.xlu1 %11978, %v12055_v28   ;;  %v2500_v40 = vpop.permute.xlu1 %2499  ;;  %v12058_v33 = vld [vmem:[%s12770_s19 + $0x2e8] sm:$0xff]  ;;  %v12059_v28 = vld [vmem:[%s12770_s19 + $0x2e0] sm:$0xff] }
 0x25a   : > { %v3164_v10 = vmax.f32 %v3036_v13, 0.0  ;;  %v2903_v34 = vadd.f32 %v2775_v4, %v2131_v59  ;;  %v2774_v47 = vmul.f32 %v12948_v62, %v2500_v40  ;;  %11755 = vmatprep.mubr.msk.bf16.mxu1 %vm3316_vm0, %v3251_v39  ;;  %2599 = vperm.xlu0 %12039, %v14133_v1   ;;  %v17259_v39 = vld [vmem:[#allocation85_spill] sm:$0xff] }
 0x25b   : > { %v2512_v32 = vpop.permute.xlu0 %2511  ;;  %v1954_v13 = vmul.f32 %v12945_v61, %v17259_v39 }
 0x25c   : > { %v3252_v26 = vpack.c.bf16 %v3164_v10, %v3163_v27  ;;  %v3038_v7 = vadd.f32 %v13717_v41, %v2903_v34  ;;  %v2902_v14 = vadd.f32 %v2774_v47, %v2130_v9  ;;  %v2777_v23 = vmul.f32 %v12948_v62, %v2512_v32  ;;  %v17260_v9 = vld [vmem:[#allocation86_spill] sm:$0xff] }
 0x25d   : > { %11979 = vset.pattern.permute.xlu1 %v17057_v38  ;;  %v1956_v10 = vmul.f32 %v12945_v61, %v17260_v9  ;;  %v12061_v9 = vld [vmem:[%s12770_s19 + $0x308] sm:$0xff] }
 0x25e   : > { %v3037_v46 = vadd.f32 %v13717_v41, %v2902_v14  ;;  %826 = vperm.xlu1 %11979, %v12056_v18   ;;  %11756 = vmatmul.mubr.msk.bf16.gmra.mrb[12].mxu1 %vm3316_vm0, %v3252_v26  ;;  %v797_v11 = vpop.permute.xlu1 %796  ;;  %v3166_v43 = vmax.f32 %v3038_v7, 0.0  ;;  %v2905_v57 = vadd.f32 %v2777_v23, %v2133_v16 }
 0x25f   : > { %v2312_v3 = vpop.permute.xlu0 %2311  ;;  %v1310_v4 = vmul.f32 %v12940_v58, %v797_v11 }
 0x260   : > { %v3165_v36 = vmax.f32 %v3037_v46, 0.0  ;;  %v3040_v24 = vadd.f32 %v13717_v41, %v2905_v57  ;;  %v2727_v48 = vmul.f32 %v12948_v62, %v2312_v3  ;;  %v12060_v46 = vld [vmem:[%s12770_s19 + $0x2f0] sm:$0xff] }
 0x261   : > { %v2082_v34 = vadd.f32 %v1954_v13, %v1310_v4 }
 0x262   : > { %831 = vperm.xlu1 %11979, %v544_v17   ;;  %v802_v20 = vpop.permute.xlu1 %801  ;;  %v3253_v63 = vpack.c.bf16 %v3166_v43, %v3165_v36  ;;  %v3168_v56 = vmax.f32 %v3040_v24, 0.0 }
 0x263   : > { %v1311_v51 = vmul.f32 %v12940_v58, %v802_v20 }
 0x264   : > { %11759 = vmatprep.mubr.msk.bf16.mxu1 %vm3316_vm0, %v3253_v63 }
 0x266   : > { %11980 = vset.pattern.permute.xlu1 %v17054_v55 }
 0x267   : > { %1563 = vperm.xlu1 %11980, %v544_v17   ;;  %v1540_v49 = vpop.permute.xlu1 %1539 }
 0x268   : > { %v1955_v5 = vmul.f32 %v12945_v61, %v1540_v49 }
 0x26a   : > { %v2083_v60 = vadd.f32 %v1955_v5, %v1311_v51  ;;  %v2516_v5 = vpop.permute.xlu0 %2515 }
 0x26b   : > { %11981 = vset.pattern.permute.xlu1 %v17061_v54  ;;  %v2778_v51 = vmul.f32 %v12948_v62, %v2516_v5 }
 0x26c   : > { %2323 = vperm.xlu1 %11981, %v14057_v19   ;;  %v2508_v37 = vpop.permute.xlu1 %2507  ;;  %v2855_v27 = vadd.f32 %v2727_v48, %v2083_v60 }
 0x26d   : > { %v2776_v50 = vmul.f32 %v12948_v62, %v2508_v37 }
 0x26e   : > { %v2990_v7 = vadd.f32 %v13717_v41, %v2855_v27  ;;  %v2528_v48 = vpop.permute.xlu0 %2527 }
 0x26f   : > { %v2904_v52 = vadd.f32 %v2776_v50, %v2132_v2 }
 0x270   : > { %2331 = vperm.xlu1 %11981, %v12056_v18   ;;  %v3118_v20 = vmax.f32 %v2990_v7, 0.0 }
 0x271   : > { %v3039_v44 = vadd.f32 %v13717_v41, %v2904_v52  ;;  %v807_v25 = vpop.permute.xlu1 %806  ;;  %v14164_v52 = vld [vmem:[%s12770_s19 + $0x358] sm:$0xff] }
 0x272   : > { %v1312_v47 = vmul.f32 %v12940_v58, %v807_v25  ;;  %2607 = vperm.xlu0 %12039, %v14164_v52   ;;  %v601_v25 = vld [vmem:[%s12770_s19 + $0x300] sm:$0xff] }
 0x273   : > { %v3167_v22 = vmax.f32 %v3039_v44, 0.0 }
 0x274   : > { %2335 = vperm.xlu1 %11981, %v544_v17   ;;  %v2084_v11 = vadd.f32 %v1956_v10, %v1312_v47 }
 0x275   : > { %v812_v19 = vpop.permute.xlu1 %811  ;;  %v3254_v15 = vpack.c.bf16 %v3168_v56, %v3167_v22  ;;  %v17262_v22 = vld [vmem:[#allocation22_spill] sm:$0xff] }
 0x276   : > { %v1313_v63 = vmul.f32 %v12940_v58, %v812_v19  ;;  %v1362_v19 = vmul.f32 %v12940_v58, %v17262_v22 }
 0x277   : > { %11760 = vmatmul.mubr.msk.bf16.gmra.mrb[16].mxu1 %vm3316_vm0, %v3254_v15 }
 0x278   : > { %11982 = vset.pattern.permute.xlu1 %v17057_v38 }
 0x279   : > { %1101 = vperm.xlu1 %11982, %v12058_v33  }
 0x27a   : > { %v1548_v59 = vpop.permute.xlu1 %1547 }
 0x27b   : > { %v1957_v17 = vmul.f32 %v12945_v61, %v1548_v59  ;;  %v17263_v59 = vld [vmem:[#allocation87_spill] sm:$0xff] }
 0x27c   : > { %v2007_v39 = vmul.f32 %v12945_v61, %v17263_v59 }
 0x27d   : > { %11983 = vset.pattern.permute.xlu1 %v17054_v55  ;;  %v2085_v35 = vadd.f32 %v1957_v17, %v1313_v63 }
 0x27e   : > { %1775 = vperm.xlu1 %11983, %v12059_v28  }
 0x27f   : > { %v2308_v40 = vpop.permute.xlu1 %2307 }
 0x280   : > { %v2726_v26 = vmul.f32 %v12948_v62, %v2308_v40  ;;  %v2781_v40 = vmul.f32 %v12948_v62, %v2528_v48 }
 0x282   : > { %v2854_v14 = vadd.f32 %v2726_v26, %v2082_v34  ;;  %11984 = vset.pattern.permute.xlu1 %v17057_v38  ;;  %v17264_v34 = vld [vmem:[#allocation88_spill] sm:$0xff] }
 0x283   : > { %1106 = vperm.xlu1 %11984, %v12060_v46   ;;  %v2316_v18 = vpop.permute.xlu1 %2315  ;;  %v2008_v47 = vmul.f32 %v12945_v61, %v17264_v34 }
 0x284   : > { %v2989_v43 = vadd.f32 %v13717_v41, %v2854_v14  ;;  %v2728_v36 = vmul.f32 %v12948_v62, %v2316_v18 }
 0x286   : > { %v3117_v32 = vmax.f32 %v2989_v43, 0.0  ;;  %v2856_v30 = vadd.f32 %v2728_v36, %v2084_v11  ;;  %v14189_v43 = vld [vmem:[%s12770_s19 + $0x168] sm:$0xff] }
 0x287   : > { %1111 = vperm.xlu1 %11984, %v17261_v12   ;;  %v2320_v42 = vpop.permute.xlu1 %2319  ;;  %2359 = vperm.xlu0 %12039, %v14189_v43  }
 0x288   : > { %v2729_v0 = vmul.f32 %v12948_v62, %v2320_v42  ;;  %v3229_v53 = vpack.c.bf16 %v3118_v20, %v3117_v32  ;;  %v2991_v23 = vadd.f32 %v13717_v41, %v2856_v30  ;;  %v14197_v30 = vld [vmem:[%s16948_s2] ss:$0 sm:$0xff] }
 0x28a   : > { %v2857_v49 = vadd.f32 %v2729_v0, %v2085_v35  ;;  %11711 = vmatprep.mubr.msk.bf16.mxu0 %vm3316_vm0, %v3229_v53  ;;  %v3119_v57 = vmax.f32 %v2991_v23, 0.0  ;;  %v14204_v23 = vld [vmem:[%s12770_s19 + $0x360] sm:$0xff] }
 0x28b   : > { %11985 = vset.pattern.permute.xlu1 %v17054_v55  ;;  %2611 = vperm.xlu0 %12039, %v14204_v23  }
 0x28c   : > { %v2992_v16 = vadd.f32 %v13717_v41, %v2857_v49  ;;  %1787 = vperm.xlu1 %11985, %v17261_v12   ;;  %v1062_v2 = vpop.permute.xlu1 %1061 }
 0x28d   : > { %v1363_v13 = vmul.f32 %v12940_v58, %v1062_v2 }
 0x28e   : > { %v3120_v37 = vmax.f32 %v2992_v16, 0.0 }
 0x28f   : > { %v2135_v26 = vadd.f32 %v2007_v39, %v1363_v13 }
 0x290   : > { %11986 = vset.pattern.permute.xlu1 %v17061_v54  ;;  %v3230_v50 = vpack.c.bf16 %v3120_v37, %v3119_v57  ;;  %v12064_v37 = vld [vmem:[%s12770_s19 + $0x140] sm:$0xff] }
 0x291   : > { %2551 = vperm.xlu1 %11986, %v12058_v33   ;;  %v1744_v24 = vpop.permute.xlu1 %1743 }
 0x292   : > { %11712 = vmatmul.mubr.msk.bf16.gmra.mrb[32].mxu0 %vm3316_vm0, %v3230_v50  ;;  %v2006_v15 = vmul.f32 %v12945_v61, %v1744_v24 }
 0x294   : > { %v2134_v3 = vadd.f32 %v2006_v15, %v1362_v19 }
 0x295   : > { %2555 = vperm.xlu1 %11986, %v12060_v46  }
 0x296   : > { %v1067_v44 = vpop.permute.xlu1 %1066  ;;  %v2906_v27 = vadd.f32 %v2778_v51, %v2134_v3 }
 0x297   : > { %v1364_v7 = vmul.f32 %v12940_v58, %v1067_v44  ;;  %v2536_v44 = vpop.permute.xlu0 %2535 }
 0x298   : > { %v3041_v46 = vadd.f32 %v13717_v41, %v2906_v27  ;;  %v2783_v19 = vmul.f32 %v12948_v62, %v2536_v44  ;;  %v14251_v44 = vld [vmem:[%s12770_s19 + $0x328] sm:$0xff] }
 0x299   : > { %11987 = vset.pattern.permute.xlu1 %v17057_v38  ;;  %v2136_v36 = vadd.f32 %v2008_v47, %v1364_v7 }
 0x29a   : > { %1116 = vperm.xlu1 %11987, %v601_v25   ;;  %v1072_v56 = vpop.permute.xlu1 %1071  ;;  %v3169_v32 = vmax.f32 %v3041_v46, 0.0 }
 0x29b   : > { %v1365_v4 = vmul.f32 %v12940_v58, %v1072_v56  ;;  %v17265_v56 = vld [vmem:[#allocation23_spill] sm:$0xff] }
 0x29c   : > { %v1367_v22 = vmul.f32 %v12940_v58, %v17265_v56  ;;  %v14255_v56 = vld [vmem:[%s12770_s19 + $0x188] sm:$0xff] }
 0x29e   : > { %11988 = vset.pattern.permute.xlu1 %v17054_v55 }
 0x29f   : > { %1791 = vperm.xlu1 %11988, %v601_v25   ;;  %v1756_v33 = vpop.permute.xlu1 %1755 }
 0x2a0   : > { %v2009_v60 = vmul.f32 %v12945_v61, %v1756_v33  ;;  %v12065_v33 = vld [vmem:[%s12770_s19 + $0x310] sm:$0xff] }
 0x2a2   : > { %v2137_v28 = vadd.f32 %v2009_v60, %v1365_v4  ;;  %v12066_v4 = vld [vmem:[%s12770_s19 + $0x150] sm:$0xff] }
 0x2a3   : > { %1795 = vperm.xlu1 %11988, %v12061_v9  }
 0x2a4   : > { %v2520_v10 = vpop.permute.xlu1 %2519  ;;  %v2909_v18 = vadd.f32 %v2781_v40, %v2137_v28  ;;  %v548_v28 = vld [vmem:[%s12770_s19 + $0x158] sm:$0xff] }
 0x2a5   : > { %v2779_v14 = vmul.f32 %v12948_v62, %v2520_v10 }
 0x2a6   : > { %v3044_v12 = vadd.f32 %v14197_v30, %v2909_v18 }
 0x2a7   : > { %v2907_v11 = vadd.f32 %v2779_v14, %v2135_v26  ;;  %11989 = vset.pattern.permute.xlu1 %v17057_v38  ;;  %v2544_v26 = vpop.permute.xlu0 %2543 }
 0x2a8   : > { %1131 = vperm.xlu1 %11989, %v13845_v31   ;;  %v2524_v17 = vpop.permute.xlu1 %2523  ;;  %v3172_v49 = vmax.f32 %v3044_v12, 0.0  ;;  %v2785_v46 = vmul.f32 %v12948_v62, %v2544_v26 }
 0x2a9   : > { %v3042_v20 = vadd.f32 %v13717_v41, %v2907_v11  ;;  %v2780_v63 = vmul.f32 %v12948_v62, %v2524_v17  ;;  %v17266_v11 = vld [vmem:[#allocation24_spill] sm:$0xff] }
 0x2aa   : > { %v1368_v17 = vmul.f32 %v12940_v58, %v17266_v11  ;;  %v14288_v11 = vld [vmem:[%s16950_s4] ss:$0 sm:$0xff] }
 0x2ab   : > { %v3170_v42 = vmax.f32 %v3042_v20, 0.0  ;;  %v2908_v35 = vadd.f32 %v2780_v63, %v2136_v36  ;;  %v17267_v36 = vld [vmem:[#allocation89_spill] sm:$0xff] }
 0x2ac   : > { %11990 = vset.pattern.permute.xlu1 %v17054_v55  ;;  %v2012_v20 = vmul.f32 %v12945_v61, %v17267_v36 }
 0x2ad   : > { %v3043_v0 = vadd.f32 %v14197_v30, %v2908_v35  ;;  %1803 = vperm.xlu1 %11990, %v13845_v31   ;;  %v1077_v41 = vpop.permute.xlu1 %1076  ;;  %v3255_v53 = vpack.c.bf16 %v3170_v42, %v3169_v32 }
 0x2ae   : > { %v1366_v3 = vmul.f32 %v12940_v58, %v1077_v41  ;;  %v2140_v12 = vadd.f32 %v2012_v20, %v1368_v17 }
 0x2af   : > { %v3171_v16 = vmax.f32 %v3043_v0, 0.0  ;;  %11763 = vmatprep.mubr.msk.bf16.mxu1 %vm3316_vm0, %v3255_v53 }
 0x2b1   : > { %11991 = vset.pattern.permute.xlu1 %v17061_v54  ;;  %v3256_v2 = vpack.c.bf16 %v3172_v49, %v3171_v16 }
 0x2b2   : > { %2563 = vperm.xlu1 %11991, %v601_v25   ;;  %v1760_v57 = vpop.permute.xlu1 %1759 }
 0x2b3   : > { %11764 = vmatmul.mubr.msk.bf16.gmra.mrb[20].mxu1 %vm3316_vm0, %v3256_v2  ;;  %v2010_v5 = vmul.f32 %v12945_v61, %v1760_v57  ;;  %v14243_v2 = vld [vmem:[%s12770_s19 + $0x378] sm:$0xff] }
 0x2b4   : > { %2623 = vperm.xlu0 %12039, %v14243_v2  }
 0x2b5   : > { %v2138_v48 = vadd.f32 %v2010_v5, %v1366_v3 }
 0x2b6   : > { %11992 = vset.pattern.permute.xlu1 %v17057_v38  ;;  %v1764_v31 = vpop.permute.xlu1 %1763 }
 0x2b7   : > { %836 = vperm.xlu1 %11992, %v12064_v37   ;;  %v2011_v24 = vmul.f32 %v12945_v61, %v1764_v31 }
 0x2b8   : > { %2375 = vperm.xlu0 %12039, %v14255_v56  }
 0x2b9   : > { %v2139_v25 = vadd.f32 %v2011_v24, %v1367_v22 }
 0x2bb   : > { %841 = vperm.xlu1 %11992, %v13972_v45   ;;  %v1092_v50 = vpop.permute.xlu1 %1091  ;;  %v2911_v51 = vadd.f32 %v2783_v19, %v2139_v25 }
 0x2bc   : > { %v1369_v7 = vmul.f32 %v12940_v58, %v1092_v50  ;;  %v2328_v50 = vpop.permute.xlu0 %2327 }
 0x2bd   : > { %v3046_v39 = vadd.f32 %v14197_v30, %v2911_v51  ;;  %v2731_v25 = vmul.f32 %v12948_v62, %v2328_v50  ;;  %v14264_v51 = vld [vmem:[%s12770_s19 + $0x190] sm:$0xff] }
 0x2be   : > { %2379 = vperm.xlu0 %12039, %v14264_v51  }
 0x2bf   : > { %11993 = vset.pattern.permute.xlu1 %v17054_v55  ;;  %v3174_v40 = vmax.f32 %v3046_v39, 0.0 }
 0x2c0   : > { %1571 = vperm.xlu1 %11993, %v13972_v45   ;;  %v1772_v15 = vpop.permute.xlu1 %1771 }
 0x2c1   : > { %v2013_v47 = vmul.f32 %v12945_v61, %v1772_v15  ;;  %v17268_v15 = vld [vmem:[#allocation90_spill] sm:$0xff] }
 0x2c2   : > { %v1958_v5 = vmul.f32 %v12945_v61, %v17268_v15 }
 0x2c3   : > { %v2141_v14 = vadd.f32 %v2013_v47, %v1369_v7 }
 0x2c4   : > { %11994 = vset.pattern.permute.xlu1 %v17061_v54 }
 0x2c5   : > { %2571 = vperm.xlu1 %11994, %v12065_v33   ;;  %v2532_v60 = vpop.permute.xlu1 %2531  ;;  %v2913_v63 = vadd.f32 %v2785_v46, %v2141_v14 }
 0x2c6   : > { %v2782_v59 = vmul.f32 %v12948_v62, %v2532_v60 }
 0x2c7   : > { %v3048_v35 = vadd.f32 %v14197_v30, %v2913_v63 }
 0x2c8   : > { %v2910_v13 = vadd.f32 %v2782_v59, %v2138_v48  ;;  %v17269_v48 = vld [vmem:[#allocation91_spill] sm:$0xff] }
 0x2c9   : > { %11995 = vset.pattern.permute.xlu1 %v17057_v38  ;;  %v3176_v49 = vmax.f32 %v3048_v35, 0.0  ;;  %v1960_v59 = vmul.f32 %v12945_v61, %v17269_v48 }
 0x2ca   : > { %v3045_v45 = vadd.f32 %v14197_v30, %v2910_v13  ;;  %846 = vperm.xlu1 %11995, %v12066_v4   ;;  %v817_v27 = vpop.permute.xlu1 %816 }
 0x2cb   : > { %v1314_v3 = vmul.f32 %v12940_v58, %v817_v27 }
 0x2cc   : > { %v3173_v9 = vmax.f32 %v3045_v45, 0.0 }
 0x2cd   : > { %v2086_v39 = vadd.f32 %v1958_v5, %v1314_v3 }
 0x2ce   : > { %851 = vperm.xlu1 %11995, %v548_v28   ;;  %v822_v10 = vpop.permute.xlu1 %821  ;;  %v3257_v34 = vpack.c.bf16 %v3174_v40, %v3173_v9 }
 0x2cf   : > { %v1315_v24 = vmul.f32 %v12940_v58, %v822_v10 }
 0x2d0   : > { %11767 = vmatprep.mubr.msk.bf16.mxu1 %vm3316_vm0, %v3257_v34 }
 0x2d2   : > { %11996 = vset.pattern.permute.xlu1 %v17054_v55 }
 0x2d3   : > { %1579 = vperm.xlu1 %11996, %v548_v28   ;;  %v1556_v18 = vpop.permute.xlu1 %1555 }
 0x2d7   : > { %11997 = vset.pattern.permute.xlu1 %v17061_v54 }
 0x2d8   : > { %2339 = vperm.xlu1 %11997, %v12064_v37   ;;  %v2540_v32 = vpop.permute.xlu1 %2539  ;;  %v1959_v37 = vmul.f32 %v12945_v61, %v1556_v18  ;;  %v14283_v18 = vld [vmem:[%s12770_s19 + $0x390] sm:$0xff] }
 0x2d9   : > { %v2784_v42 = vmul.f32 %v12948_v62, %v2540_v32  ;;  %2635 = vperm.xlu0 %12039, %v14283_v18  }
 0x2da   : > { %v2087_v22 = vadd.f32 %v1959_v37, %v1315_v24  ;;  %v14301_v37 = vld [vmem:[%s12770_s19 + $0x1a0] sm:$0xff] }
 0x2db   : > { %v2912_v0 = vadd.f32 %v2784_v42, %v2140_v12 }
 0x2dc   : > { %2347 = vperm.xlu1 %11997, %v12066_v4   ;;  %v2859_v33 = vadd.f32 %v2731_v25, %v2087_v22 }
 0x2dd   : > { %v3047_v41 = vadd.f32 %v14197_v30, %v2912_v0  ;;  %v827_v53 = vpop.permute.xlu1 %826  ;;  %2387 = vperm.xlu0 %12039, %v14301_v37  }
 0x2de   : > { %v1316_v13 = vmul.f32 %v12940_v58, %v827_v53  ;;  %v2994_v4 = vadd.f32 %v14197_v30, %v2859_v33 }
 0x2df   : > { %v3175_v16 = vmax.f32 %v3047_v41, 0.0 }
 0x2e0   : > { %2351 = vperm.xlu1 %11997, %v548_v28   ;;  %v14275_v28 = vld [vmem:[%s12770_s19 + $0x330] sm:$0xff]  ;;  %v2088_v40 = vadd.f32 %v1960_v59, %v1316_v13  ;;  %v3122_v47 = vmax.f32 %v2994_v4, 0.0  ;;  %v14314_v59 = vld [vmem:[%s12770_s19 + $0x3a8] sm:$0xff] }
 0x2e1   : > { %v832_v57 = vpop.permute.xlu1 %831  ;;  %v3258_v31 = vpack.c.bf16 %v3176_v49, %v3175_v16  ;;  %2647 = vperm.xlu0 %12039, %v14314_v59  }
 0x2e2   : > { %v1317_v26 = vmul.f32 %v12940_v58, %v832_v57 }
 0x2e3   : > { %11768 = vmatmul.mubr.msk.bf16.gmra.mrb[24].mxu1 %vm3316_vm0, %v3258_v31 }
 0x2e4   : > { %11998 = vset.pattern.permute.xlu1 %v17057_v38 }
 0x2e5   : > { %1141 = vperm.xlu1 %11998, %v14251_v44  }
 0x2e6   : > { %v1564_v19 = vpop.permute.xlu1 %1563 }
 0x2e7   : > { %v1961_v9 = vmul.f32 %v12945_v61, %v1564_v19 }
 0x2e9   : > { %11999 = vset.pattern.permute.xlu1 %v17054_v55  ;;  %v2089_v63 = vadd.f32 %v1961_v9, %v1317_v26 }
 0x2ea   : > { %1807 = vperm.xlu1 %11999, %v13998_v8  }
 0x2eb   : > { %v2324_v60 = vpop.permute.xlu1 %2323 }
 0x2ec   : > { %v2730_v45 = vmul.f32 %v12948_v62, %v2324_v60 }
 0x2ee   : > { %v2858_v27 = vadd.f32 %v2730_v45, %v2086_v39  ;;  %12000 = vset.pattern.permute.xlu1 %v17057_v38 }
 0x2ef   : > { %1146 = vperm.xlu1 %12000, %v14275_v28   ;;  %v2332_v8 = vpop.permute.xlu1 %2331 }
 0x2f0   : > { %v2993_v10 = vadd.f32 %v14197_v30, %v2858_v27  ;;  %v2732_v34 = vmul.f32 %v12948_v62, %v2332_v8 }
 0x2f1   : > { %v11685_v46 = vpop.f32.mrb[4].mxu0 }
 0x2f2   : > { %v3121_v7 = vmax.f32 %v2993_v10, 0.0  ;;  %v2860_v14 = vadd.f32 %v2732_v34, %v2088_v40  ;;  %v3568_v17 = vadd.f32 %v14288_v11, %v11685_v46  ;;  %v3559_v36 = vpop.f32.mrb[5].mxu0  ;;  %v14324_v10 = vld [vmem:[%s12770_s19 + $0x1b8] sm:$0xff] }
 0x2f3   : > { %1151 = vperm.xlu1 %12000, %v14125_v21   ;;  %v2336_v20 = vpop.permute.xlu1 %2335  ;;  %v3560_v32 = vadd.f32 %v14288_v11, %v3559_v36  ;;  %v11686_v12 = vpop.f32.mrb[6].mxu0  ;;  %2399 = vperm.xlu0 %12039, %v14324_v10   ;;  %v14334_v36 = vld [vmem:[%s12770_s19 + $0x340] sm:$0xff] }
 0x2f4   : > { %v2733_v42 = vmul.f32 %v12948_v62, %v2336_v20  ;;  %v3231_v35 = vpack.c.bf16 %v3122_v47, %v3121_v7  ;;  %v3571_v0 = vadd.f32 %v14288_v11, %v11686_v12  ;;  %v3562_v41 = vpop.f32.mrb[7].mxu0  ;;  %v2995_v53 = vadd.f32 %v14197_v30, %v2860_v14  ;;  %v12075_v20 = vld [vmem:[%s12770_s19 + $0x3b8] sm:$0xff] }
 0x2f5   : > { %v3563_v16 = vadd.f32 %v14288_v11, %v3562_v41  ;;  %v4060_v57 = vmax.f32 %v3568_v17, 0.0  ;;  %v4058_v50 = vmax.f32 %v3560_v32, 0.0 }
 0x2f6   : > { %v2861_v49 = vadd.f32 %v2733_v42, %v2089_v63  ;;  %11715 = vmatprep.mubr.msk.bf16.mxu0 %vm3316_vm0, %v3231_v35  ;;  %v4061_v31 = vmax.f32 %v3571_v0, 0.0  ;;  %v3123_v15 = vmax.f32 %v2995_v53, 0.0  ;;  %v2548_v42 = vpop.permute.xlu0 %2547  ;;  %v17270_v0 = vld [vmem:[#allocation25_spill] sm:$0xff] }
 0x2f7   : > { %12001 = vset.pattern.permute.xlu1 %v17054_v55  ;;  %v4059_v22 = vmax.f32 %v3563_v16, 0.0  ;;  %2655 = vperm.xlu0 %12039, %v12075_v20   ;;  %v1370_v41 = vmul.f32 %v12940_v58, %v17270_v0 }
 0x2f8   : > { %v2996_v24 = vadd.f32 %v14197_v30, %v2861_v49  ;;  %1819 = vperm.xlu1 %12001, %v14125_v21   ;;  %v14306_v25 = vpop.permute.xlu1 %1101  ;;  %v14308_v19 = vpack.c.bf16 %v4061_v31, %v4060_v57  ;;  %v12076_v31 = vld [vmem:[%s12770_s19 + $0x1c8] sm:$0xff] }
 0x2f9   : > { %v14310_v3 = vpack.c.bf16 %v4059_v22, %v4058_v50  ;;  %v11689_v33 = vpop.f32.mrb[8].mxu0 }
 0x2fa   : > { %v3124_v5 = vmax.f32 %v2996_v24, 0.0  ;;  %v3584_v60 = vadd.f32 %v14288_v11, %v11689_v33  ;;  %v3575_v48 = vpop.f32.mrb[9].mxu0  ;;  %v2786_v24 = vmul.f32 %v12948_v62, %v2548_v42 }
 0x2fb   : > { %v3576_v39 = vadd.f32 %v14288_v11, %v3575_v48  ;;  %v11690_v21 = vpop.f32.mrb[10].mxu0  ;;  %2407 = vperm.xlu0 %12039, %v12076_v31  }
 0x2fc   : > { %12002 = vset.pattern.permute.xlu1 %v17061_v54  ;;  %v3232_v13 = vpack.c.bf16 %v3124_v5, %v3123_v15  ;;  %v3587_v45 = vadd.f32 %v14288_v11, %v11690_v21  ;;  %v3578_v4 = vpop.f32.mrb[11].mxu0  ;;  %v4064_v40 = vmax.f32 %v3584_v60, 0.0 }
 0x2fd   : > { %2583 = vperm.xlu1 %12002, %v14251_v44   ;;  %v1776_v27 = vpop.permute.xlu1 %1775  ;;  %v3579_v8 = vadd.f32 %v14288_v11, %v3578_v4  ;;  %v4062_v34 = vmax.f32 %v3576_v39, 0.0 }
 0x2fe   : > { %11716 = vmatmul.mubr.msk.bf16.gmra.mrb[36].mxu0 %vm3316_vm0, %v3232_v13  ;;  %v4065_v9 = vmax.f32 %v3587_v45, 0.0  ;;  %v2014_v63 = vmul.f32 %v12945_v61, %v1776_v27  ;;  %v12077_v13 = vld [vmem:[%s12770_s19 + $0x1d0] sm:$0xff] }
 0x2ff   : > { %v4063_v47 = vmax.f32 %v3579_v8, 0.0  ;;  %2411 = vperm.xlu0 %12039, %v12077_v13   ;;  %v2560_v8 = vpop.permute.xlu0 %2559 }
 0x300   : > { %v14327_v26 = vpack.c.bf16 %v4065_v9, %v4064_v40  ;;  %v2142_v50 = vadd.f32 %v2014_v63, %v1370_v41  ;;  %v17271_v40 = vld [vmem:[#allocation92_spill] sm:$0xff] }
 0x301   : > { %2587 = vperm.xlu1 %12002, %v14275_v28   ;;  %v14330_v44 = vpack.c.bf16 %v4063_v47, %v4062_v34  ;;  %v2015_v9 = vmul.f32 %v12945_v61, %v17271_v40  ;;  %v1371_v34 = vmul.f32 %v12940_v58, %v14306_v25 }
 0x302   : > { %v11693_v7 = vpop.f32.mrb[12].mxu0  ;;  %v1107_v14 = vpop.permute.xlu1 %1106  ;;  %v2914_v45 = vadd.f32 %v2786_v24, %v2142_v50 }
 0x303   : > { %v3600_v46 = vadd.f32 %v14288_v11, %v11693_v7  ;;  %v3591_v17 = vpop.f32.mrb[13].mxu0  ;;  %v1372_v0 = vmul.f32 %v12940_v58, %v1107_v14 }
 0x304   : > { %v3592_v32 = vadd.f32 %v14288_v11, %v3591_v17  ;;  %v11694_v12 = vpop.f32.mrb[14].mxu0  ;;  %v17272_v17 = vld [vmem:[#allocation93_spill] sm:$0xff]  ;;  %v3049_v25 = vadd.f32 %v14197_v30, %v2914_v45  ;;  %v12078_v45 = vld [vmem:[%s12770_s19 + $0x1e0] sm:$0xff] }
 0x305   : > { %v3603_v28 = vadd.f32 %v14288_v11, %v11694_v12  ;;  %v3594_v35 = vpop.f32.mrb[15].mxu0  ;;  %12003 = vset.pattern.permute.xlu1 %v17057_v38  ;;  %v4068_v16 = vmax.f32 %v3600_v46, 0.0  ;;  %v2016_v20 = vmul.f32 %v12945_v61, %v17272_v17 }
 0x306   : > { %v3595_v53 = vadd.f32 %v14288_v11, %v3594_v35  ;;  %1156 = vperm.xlu1 %12003, %v14334_v36   ;;  %v1112_v49 = vpop.permute.xlu1 %1111  ;;  %v4066_v22 = vmax.f32 %v3592_v32, 0.0  ;;  %v627_v32 = vld [vmem:[%s12770_s19 + $0x3d0] sm:$0xff]  ;;  %v2789_v35 = vmul.f32 %v12948_v62, %v2560_v8 }
 0x307   : > { %v4069_v57 = vmax.f32 %v3603_v28, 0.0  ;;  %v1373_v12 = vmul.f32 %v12940_v58, %v1112_v49  ;;  %2667 = vperm.xlu0 %12039, %v627_v32  }
 0x308   : > { %v4067_v15 = vmax.f32 %v3595_v53, 0.0 }
 0x309   : > { %v14347_v5 = vpack.c.bf16 %v4069_v57, %v4068_v16  ;;  %v2143_v57 = vadd.f32 %v2015_v9, %v1371_v34 }
 0x30a   : > { %v14349_v33 = vpack.c.bf16 %v4067_v15, %v4066_v22  ;;  %v11697_v60 = vpop.f32.mrb[16].mxu0  ;;  %12004 = vset.pattern.permute.xlu1 %v17054_v55 }
 0x30b   : > { %v3616_v48 = vadd.f32 %v14288_v11, %v11697_v60  ;;  %v3607_v39 = vpop.f32.mrb[17].mxu0  ;;  %1823 = vperm.xlu1 %12004, %v14334_v36   ;;  %v1788_v21 = vpop.permute.xlu1 %1787  ;;  %2419 = vperm.xlu0 %12039, %v12078_v45  }
 0x30c   : > { %v3608_v4 = vadd.f32 %v14288_v11, %v3607_v39  ;;  %v11698_v27 = vpop.f32.mrb[18].mxu0  ;;  %v2017_v7 = vmul.f32 %v12945_v61, %v1788_v21 }
 0x30d   : > { %v3619_v47 = vadd.f32 %v14288_v11, %v11698_v27  ;;  %v3610_v46 = vpop.f32.mrb[19].mxu0  ;;  %v4072_v42 = vmax.f32 %v3616_v48, 0.0  ;;  %v2144_v27 = vadd.f32 %v2016_v20, %v1372_v0 }
 0x30e   : > { %v3611_v63 = vadd.f32 %v14288_v11, %v3610_v46  ;;  %v4070_v41 = vmax.f32 %v3608_v4, 0.0  ;;  %v2145_v50 = vadd.f32 %v2017_v7, %v1373_v12  ;;  %v3177_v4 = vmax.f32 %v3049_v25, 0.0 }
 0x30f   : > { %v4073_v28 = vmax.f32 %v3619_v47, 0.0  ;;  %1827 = vperm.xlu1 %12004, %v14133_v1  }
 0x310   : > { %v4071_v53 = vmax.f32 %v3611_v63, 0.0  ;;  %v2552_v16 = vpop.permute.xlu1 %2551  ;;  %v2917_v47 = vadd.f32 %v2789_v35, %v2145_v50 }
 0x311   : > { %v14371_v31 = vpack.c.bf16 %v4073_v28, %v4072_v42  ;;  %v2787_v49 = vmul.f32 %v12948_v62, %v2552_v16  ;;  %v11745_v24 = vpop.f32.mrb[0].mxu1  ;;  %v12079_v16 = vld [vmem:[%s12770_s19 + $0x3e8] sm:$0xff] }
 0x312   : > { %v14374_v22 = vpack.c.bf16 %v4071_v53, %v4070_v41  ;;  %v11701_v15 = vpop.f32.mrb[20].mxu0  ;;  %v3808_v1 = vadd.f32 %v14288_v11, %v11745_v24  ;;  %v3799_v60 = vpop.f32.mrb[1].mxu1  ;;  %2679 = vperm.xlu0 %12039, %v12079_v16   ;;  %v3052_v24 = vadd.f32 %v14197_v30, %v2917_v47 }
 0x313   : > { %v2915_v48 = vadd.f32 %v2787_v49, %v2143_v57  ;;  %v3632_v14 = vadd.f32 %v14288_v11, %v11701_v15  ;;  %v3623_v39 = vpop.f32.mrb[21].mxu0  ;;  %v3800_v21 = vadd.f32 %v14288_v11, %v3799_v60  ;;  %v11746_v13 = vpop.f32.mrb[2].mxu1  ;;  %12005 = vset.pattern.permute.xlu1 %v17057_v38 }
 0x314   : > { %v3624_v8 = vadd.f32 %v14288_v11, %v3623_v39  ;;  %v11702_v40 = vpop.f32.mrb[22].mxu0  ;;  %v3811_v9 = vadd.f32 %v14288_v11, %v11746_v13  ;;  %v3802_v34 = vpop.f32.mrb[3].mxu1  ;;  %1171 = vperm.xlu1 %12005, %v14164_v52   ;;  %v4120_v46 = vmax.f32 %v3808_v1, 0.0 }
 0x315   : > { %v3050_v7 = vadd.f32 %v14197_v30, %v2915_v48  ;;  %v3635_v17 = vadd.f32 %v14288_v11, %v11702_v40  ;;  %v3626_v63 = vpop.f32.mrb[23].mxu0  ;;  %v2556_v32 = vpop.permute.xlu1 %2555  ;;  %v4076_v12 = vmax.f32 %v3632_v14, 0.0  ;;  %v3803_v28 = vadd.f32 %v14288_v11, %v3802_v34  ;;  %v12080_v40 = vld [vmem:[%s12770_s19 + $0x1f8] sm:$0xff] }
 0x316   : > { %v4121_v42 = vmax.f32 %v3811_v9, 0.0  ;;  %v3627_v20 = vadd.f32 %v14288_v11, %v3626_v63  ;;  %v4118_v0 = vmax.f32 %v3800_v21, 0.0  ;;  %v2788_v53 = vmul.f32 %v12948_v62, %v2556_v32  ;;  %2431 = vperm.xlu0 %12039, %v12080_v40  }
 0x317   : > { %v3178_v25 = vmax.f32 %v3050_v7, 0.0  ;;  %v4077_v41 = vmax.f32 %v3635_v17, 0.0  ;;  %v4074_v35 = vmax.f32 %v3624_v8, 0.0  ;;  %v4119_v49 = vmax.f32 %v3803_v28, 0.0 }
 0x318   : > { %v14390_v57 = vpack.c.bf16 %v4121_v42, %v4120_v46  ;;  %v4075_v50 = vmax.f32 %v3627_v20, 0.0  ;;  %12006 = vset.pattern.permute.xlu1 %v17054_v55  ;;  %v2916_v1 = vadd.f32 %v2788_v53, %v2144_v27  ;;  %v3180_v9 = vmax.f32 %v3052_v24, 0.0 }
 0x319   : > { %v14394_v15 = vpack.c.bf16 %v4077_v41, %v4076_v12  ;;  %1835 = vperm.xlu1 %12006, %v14164_v52   ;;  %v14397_v60 = vpop.permute.xlu1 %1116  ;;  %v3259_v48 = vpack.c.bf16 %v3178_v25, %v3177_v4  ;;  %v14401_v39 = vpack.c.bf16 %v4119_v49, %v4118_v0  ;;  %v12081_v0 = vld [vmem:[%s12770_s19 + $0x3f8] sm:$0xff] }
 0x31a   : > { %17273 = vst [vmem:[#allocation49_spill] sm:$0xff] %v14390_v57  ;;  %v14399_v14 = vpack.c.bf16 %v4075_v50, %v4074_v35  ;;  %v11705_v21 = vpop.f32.mrb[24].mxu0  ;;  %v3051_v13 = vadd.f32 %v14197_v30, %v2916_v1  ;;  %2687 = vperm.xlu0 %12039, %v12081_v0  }
 0x31b   : > { %17274 = vst [vmem:[#allocation16_spill] sm:$0xff] %v14401_v39  ;;  %v3648_v45 = vadd.f32 %v14288_v11, %v11705_v21  ;;  %v3639_v8 = vpop.f32.mrb[25].mxu0  ;;  %11771 = vmatprep.mubr.msk.bf16.mxu1 %vm3316_vm0, %v3259_v48 }
 0x31c   : > { %v3640_v27 = vadd.f32 %v14288_v11, %v3639_v8  ;;  %v11706_v52 = vpop.f32.mrb[26].mxu0  ;;  %v3179_v4 = vmax.f32 %v3051_v13, 0.0 }
 0x31d   : > { %v3651_v34 = vadd.f32 %v14288_v11, %v11706_v52  ;;  %v3642_v47 = vpop.f32.mrb[27].mxu0  ;;  %v11749_v7 = vpop.f32.mrb[4].mxu1  ;;  %12007 = vset.pattern.permute.xlu1 %v17061_v54  ;;  %v4080_v12 = vmax.f32 %v3648_v45, 0.0  ;;  %v14424_v45 = vld [vmem:[%s12770_s19 + $0x160] sm:$0xff] }
 0x31e   : > { %v3643_v46 = vadd.f32 %v14288_v11, %v3642_v47  ;;  %v3824_v17 = vadd.f32 %v14288_v11, %v11749_v7  ;;  %v3815_v63 = vpop.f32.mrb[5].mxu1  ;;  %2595 = vperm.xlu1 %12007, %v14334_v36   ;;  %v1792_v32 = vpop.permute.xlu1 %1791  ;;  %v3260_v25 = vpack.c.bf16 %v3180_v9, %v3179_v4  ;;  %v4078_v41 = vmax.f32 %v3640_v27, 0.0 }
 0x31f   : > { %v4081_v42 = vmax.f32 %v3651_v34, 0.0  ;;  %v3816_v20 = vadd.f32 %v14288_v11, %v3815_v63  ;;  %v11750_v28 = vpop.f32.mrb[6].mxu1  ;;  %v2568_v63 = vpop.permute.xlu0 %2567 }
 0x320   : > { %v4079_v53 = vmax.f32 %v3643_v46, 0.0  ;;  %v3827_v16 = vadd.f32 %v14288_v11, %v11750_v28  ;;  %v3818_v35 = vpop.f32.mrb[7].mxu1  ;;  %11772 = vmatmul.mubr.msk.bf16.gmra.mrb[28].mxu1 %vm3316_vm0, %v3260_v25  ;;  %v4124_v24 = vmax.f32 %v3824_v17, 0.0 }
 0x321   : > { %v14416_v50 = vpack.c.bf16 %v4081_v42, %v4080_v12  ;;  %v3819_v36 = vadd.f32 %v14288_v11, %v3818_v35  ;;  %v4122_v21 = vmax.f32 %v3816_v20, 0.0  ;;  %v17277_v42 = vld [vmem:[#allocation27_spill] sm:$0xff] }
 0x322   : > { %v14420_v49 = vpack.c.bf16 %v4079_v53, %v4078_v41  ;;  %v4125_v1 = vmax.f32 %v3827_v16, 0.0  ;;  %12008 = vset.pattern.permute.xlu1 %v17057_v38  ;;  %v1796_v48 = vpop.permute.xlu1 %1795  ;;  %v1375_v20 = vmul.f32 %v12940_v58, %v17277_v42 }
 0x323   : > { %v4123_v13 = vmax.f32 %v3819_v36, 0.0  ;;  %856 = vperm.xlu1 %12008, %v14424_v45   ;;  %v2019_v7 = vmul.f32 %v12945_v61, %v1796_v48 }
 0x324   : > { %v14427_v8 = vpack.c.bf16 %v4125_v1, %v4124_v24  ;;  %v2791_v24 = vmul.f32 %v12948_v62, %v2568_v63 }
 0x325   : > { %v14429_v40 = vpack.c.bf16 %v4123_v13, %v4122_v21  ;;  %v11753_v27 = vpop.f32.mrb[8].mxu1  ;;  %v2147_v36 = vadd.f32 %v2019_v7, %v1375_v20 }
 0x326   : > { %17275 = vst [vmem:[#allocation32_spill] sm:$0xff] %v14427_v8  ;;  %v3840_v52 = vadd.f32 %v14288_v11, %v11753_v27  ;;  %v3831_v9 = vpop.f32.mrb[9].mxu1 }
 0x327   : > { %17276 = vst [vmem:[#allocation17_spill] sm:$0xff] %v14429_v40  ;;  %v3832_v4 = vadd.f32 %v14288_v11, %v3831_v9  ;;  %v11754_v34 = vpop.f32.mrb[10].mxu1  ;;  %861 = vperm.xlu1 %12008, %v14189_v43   ;;  %v14434_v47 = vpop.permute.xlu1 %1131  ;;  %v2919_v63 = vadd.f32 %v2791_v24, %v2147_v36 }
 0x328   : > { %v3843_v46 = vadd.f32 %v14288_v11, %v11754_v34  ;;  %v3834_v17 = vpop.f32.mrb[11].mxu1  ;;  %v4128_v28 = vmax.f32 %v3840_v52, 0.0 }
 0x329   : > { %v3835_v12 = vadd.f32 %v14288_v11, %v3834_v17  ;;  %v4126_v41 = vmax.f32 %v3832_v4, 0.0  ;;  %v2018_v4 = vmul.f32 %v12945_v61, %v1792_v32  ;;  %v1374_v17 = vmul.f32 %v12940_v58, %v14397_v60 }
 0x32a   : > { %v4129_v25 = vmax.f32 %v3843_v46, 0.0  ;;  %v11709_v0 = vpop.f32.mrb[28].mxu0  ;;  %v3054_v36 = vadd.f32 %v14197_v30, %v2919_v63 }
 0x32b   : > { %v4127_v53 = vmax.f32 %v3835_v12, 0.0  ;;  %v3664_v16 = vadd.f32 %v14288_v11, %v11709_v0  ;;  %v3655_v35 = vpop.f32.mrb[29].mxu0  ;;  %12009 = vset.pattern.permute.xlu1 %v17054_v55  ;;  %v2146_v0 = vadd.f32 %v2018_v4, %v1374_v17 }
 0x32c   : > { %v14444_v1 = vpack.c.bf16 %v4129_v25, %v4128_v28  ;;  %v3656_v48 = vadd.f32 %v14288_v11, %v3655_v35  ;;  %v11710_v21 = vpop.f32.mrb[30].mxu0  ;;  %1587 = vperm.xlu1 %12009, %v14189_v43   ;;  %v1804_v13 = vpop.permute.xlu1 %1803  ;;  %v12083_v28 = vld [vmem:[%s12770_s19 + $0x350] sm:$0xff]  ;;  %v3182_v63 = vmax.f32 %v3054_v36, 0.0 }
 0x32d   : > { %v14448_v27 = vpack.c.bf16 %v4127_v53, %v4126_v41  ;;  %v3667_v52 = vadd.f32 %v14288_v11, %v11710_v21  ;;  %v3658_v9 = vpop.f32.mrb[31].mxu0  ;;  %v4084_v7 = vmax.f32 %v3664_v16, 0.0 }
 0x32e   : > { %17278 = vst [vmem:[#allocation18_spill] sm:$0xff] %v14444_v1  ;;  %v3659_v34 = vadd.f32 %v14288_v11, %v3658_v9  ;;  %v4082_v12 = vmax.f32 %v3656_v48, 0.0  ;;  %v17308_v1 = vld [vmem:[#allocation117_spill] sm:$0xff] }
 0x32f   : > { %17279 = vst [vmem:[#allocation47_spill] sm:$0xff] %v14448_v27  ;;  %v4085_v46 = vmax.f32 %v3667_v52, 0.0 }
 0x330   : > { %v4083_v42 = vmax.f32 %v3659_v34, 0.0  ;;  %12010 = vset.pattern.permute.xlu1 %v17061_v54 }
 0x331   : > { %v14456_v43 = vpack.c.bf16 %v4085_v46, %v4084_v7  ;;  %v11757_v20 = vpop.f32.mrb[12].mxu1  ;;  %2603 = vperm.xlu1 %12010, %v12083_v28   ;;  %v2564_v25 = vpop.permute.xlu1 %2563  ;;  %v12084_v7 = vld [vmem:[%s12770_s19 + $0x170] sm:$0xff] }
 0x332   : > { %v14459_v32 = vpack.c.bf16 %v4083_v42, %v4082_v12  ;;  %v3856_v41 = vadd.f32 %v14288_v11, %v11757_v20  ;;  %v2790_v53 = vmul.f32 %v12948_v62, %v2564_v25  ;;  %v3847_v60 = vpop.f32.mrb[13].mxu1  ;;  %v552_v42 = vld [vmem:[%s12770_s19 + $0x178] sm:$0xff] }
 0x333   : > { %v3848_v16 = vadd.f32 %v14288_v11, %v3847_v60  ;;  %v11758_v35 = vpop.f32.mrb[14].mxu1  ;;  %v2576_v60 = vpop.permute.xlu0 %2575 }
 0x334   : > { %v2918_v24 = vadd.f32 %v2790_v53, %v2146_v0  ;;  %v3859_v48 = vadd.f32 %v14288_v11, %v11758_v35  ;;  %v3850_v21 = vpop.f32.mrb[15].mxu1  ;;  %v4132_v9 = vmax.f32 %v3856_v41, 0.0  ;;  %v2021_v41 = vmul.f32 %v12945_v61, %v1804_v13 }
 0x335   : > { %v3851_v52 = vadd.f32 %v14288_v11, %v3850_v21  ;;  %12011 = vset.pattern.permute.xlu1 %v17057_v38  ;;  %v4130_v17 = vmax.f32 %v3848_v16, 0.0  ;;  %v1377_v35 = vmul.f32 %v12940_v58, %v14434_v47  ;;  %v2793_v36 = vmul.f32 %v12948_v62, %v2576_v60 }
 0x336   : > { %v3053_v4 = vadd.f32 %v14197_v30, %v2918_v24  ;;  %v4133_v34 = vmax.f32 %v3859_v48, 0.0  ;;  %866 = vperm.xlu1 %12011, %v12084_v7   ;;  %v14470_v46 = vpop.permute.xlu1 %836  ;;  %v17282_v48 = vld [vmem:[#allocation28_spill] sm:$0xff] }
 0x337   : > { %v4131_v12 = vmax.f32 %v3851_v52, 0.0  ;;  %v2149_v16 = vadd.f32 %v2021_v41, %v1377_v35  ;;  %v1376_v21 = vmul.f32 %v12940_v58, %v17282_v48  ;;  %v17283_v52 = vld [vmem:[#allocation95_spill] sm:$0xff] }
 0x338   : > { %v3181_v20 = vmax.f32 %v3053_v4, 0.0  ;;  %v14473_v28 = vpack.c.bf16 %v4133_v34, %v4132_v9  ;;  %v2020_v9 = vmul.f32 %v12945_v61, %v17283_v52 }
 0x339   : > { %v14475_v25 = vpack.c.bf16 %v4131_v12, %v4130_v17  ;;  %v2921_v13 = vadd.f32 %v2793_v36, %v2149_v16 }
 0x33a   : > { %17280 = vst [vmem:[#allocation58_spill] sm:$0xff] %v14473_v28  ;;  %871 = vperm.xlu1 %12011, %v552_v42   ;;  %v842_v0 = vpop.permute.xlu1 %841  ;;  %v3261_v53 = vpack.c.bf16 %v3182_v63, %v3181_v20  ;;  %v2148_v47 = vadd.f32 %v2020_v9, %v1376_v21 }
 0x33b   : > { %17281 = vst [vmem:[#allocation38_spill] sm:$0xff] %v14475_v25  ;;  %v3056_v17 = vadd.f32 %v14197_v30, %v2921_v13 }
 0x33c   : > { %11775 = vmatprep.mubr.msk.bf16.mxu1 %vm3316_vm0, %v3261_v53 }
 0x33d   : > { %v3184_v41 = vmax.f32 %v3056_v17, 0.0  ;;  %v1319_v17 = vmul.f32 %v12940_v58, %v842_v0  ;;  %v1318_v0 = vmul.f32 %v12940_v58, %v14470_v46  ;;  %v12086_v46 = vld [vmem:[%s12770_s19 + $0x370] sm:$0xff] }
 0x33e   : > { %12012 = vset.pattern.permute.xlu1 %v17054_v55 }
 0x33f   : > { %1595 = vperm.xlu1 %12012, %v552_v42   ;;  %v1572_v24 = vpop.permute.xlu1 %1571 }
 0x343   : > { %12013 = vset.pattern.permute.xlu1 %v17061_v54 }
 0x344   : > { %2355 = vperm.xlu1 %12013, %v14424_v45   ;;  %v2572_v4 = vpop.permute.xlu1 %2571 }
 0x345   : > { %v2792_v34 = vmul.f32 %v12948_v62, %v2572_v4  ;;  %v2344_v4 = vpop.permute.xlu0 %2343 }
 0x347   : > { %v2920_v12 = vadd.f32 %v2792_v34, %v2148_v47 }
 0x348   : > { %2363 = vperm.xlu1 %12013, %v12084_v7   ;;  %v1963_v7 = vmul.f32 %v12945_v61, %v1572_v24  ;;  %v2735_v24 = vmul.f32 %v12948_v62, %v2344_v4 }
 0x349   : > { %v3055_v63 = vadd.f32 %v14197_v30, %v2920_v12  ;;  %v847_v20 = vpop.permute.xlu1 %846 }
 0x34a   : > { %v11761_v53 = vpop.f32.mrb[16].mxu1 }
 0x34b   : > { %v3183_v60 = vmax.f32 %v3055_v63, 0.0  ;;  %v3872_v35 = vadd.f32 %v14288_v11, %v11761_v53  ;;  %v3863_v16 = vpop.f32.mrb[17].mxu1  ;;  %v12085_v53 = vld [vmem:[%s12770_s19 + $0x368] sm:$0xff] }
 0x34c   : > { %v3864_v36 = vadd.f32 %v14288_v11, %v3863_v16  ;;  %v11762_v45 = vpop.f32.mrb[18].mxu1  ;;  %2367 = vperm.xlu1 %12013, %v552_v42   ;;  %v17286_v16 = vld [vmem:[#allocation97_spill] sm:$0xff] }
 0x34d   : > { %v3875_v48 = vadd.f32 %v14288_v11, %v11762_v45  ;;  %v3866_v21 = vpop.f32.mrb[19].mxu1  ;;  %v852_v52 = vpop.permute.xlu1 %851  ;;  %v3262_v9 = vpack.c.bf16 %v3184_v41, %v3183_v60  ;;  %v4136_v47 = vmax.f32 %v3872_v35, 0.0  ;;  %v2091_v41 = vadd.f32 %v1963_v7, %v1319_v17 }
 0x34e   : > { %v3867_v13 = vadd.f32 %v14288_v11, %v3866_v21  ;;  %v4134_v12 = vmax.f32 %v3864_v36, 0.0  ;;  %v1962_v45 = vmul.f32 %v12945_v61, %v17286_v16  ;;  %v17287_v21 = vld [vmem:[#allocation99_spill] sm:$0xff] }
 0x34f   : > { %v4137_v34 = vmax.f32 %v3875_v48, 0.0  ;;  %11776 = vmatmul.mubr.msk.bf16.gmra.mrb[32].mxu1 %vm3316_vm0, %v3262_v9  ;;  %v2863_v36 = vadd.f32 %v2735_v24, %v2091_v41  ;;  %v1964_v9 = vmul.f32 %v12945_v61, %v17287_v21 }
 0x350   : > { %v4135_v63 = vmax.f32 %v3867_v13, 0.0  ;;  %12014 = vset.pattern.permute.xlu1 %v17057_v38  ;;  %v2090_v7 = vadd.f32 %v1962_v45, %v1318_v0  ;;  %v1320_v13 = vmul.f32 %v12940_v58, %v847_v20  ;;  %v1321_v20 = vmul.f32 %v12940_v58, %v852_v52 }
 0x351   : > { %v14500_v42 = vpack.c.bf16 %v4137_v34, %v4136_v47  ;;  %1181 = vperm.xlu1 %12014, %v12085_v53   ;;  %v2998_v47 = vadd.f32 %v14197_v30, %v2863_v36 }
 0x352   : > { %v14504_v60 = vpack.c.bf16 %v4135_v63, %v4134_v12  ;;  %v1580_v35 = vpop.permute.xlu1 %1579  ;;  %v2092_v12 = vadd.f32 %v1964_v9, %v1320_v13 }
 0x353   : > { %17284 = vst [vmem:[#allocation26_spill] sm:$0xff] %v14500_v42  ;;  %v3126_v24 = vmax.f32 %v2998_v47, 0.0 }
 0x354   : > { %17285 = vst [vmem:[#allocation30_spill] sm:$0xff] %v14504_v60 }
 0x355   : > { %12015 = vset.pattern.permute.xlu1 %v17054_v55 }
 0x356   : > { %1839 = vperm.xlu1 %12015, %v14204_v23   ;;  %v1965_v23 = vmul.f32 %v12945_v61, %v1580_v35 }
 0x357   : > { %v2340_v48 = vpop.permute.xlu1 %2339 }
 0x358   : > { %v2734_v4 = vmul.f32 %v12948_v62, %v2340_v48  ;;  %v2093_v36 = vadd.f32 %v1965_v23, %v1321_v20 }
 0x35a   : > { %v2862_v34 = vadd.f32 %v2734_v4, %v2090_v7  ;;  %12016 = vset.pattern.permute.xlu1 %v17057_v38 }
 0x35b   : > { %1186 = vperm.xlu1 %12016, %v12086_v46   ;;  %v2348_v17 = vpop.permute.xlu1 %2347 }
 0x35c   : > { %v2997_v63 = vadd.f32 %v14197_v30, %v2862_v34  ;;  %v2736_v41 = vmul.f32 %v12948_v62, %v2348_v17 }
 0x35e   : > { %v3125_v16 = vmax.f32 %v2997_v63, 0.0  ;;  %v2864_v45 = vadd.f32 %v2736_v41, %v2092_v12 }
 0x35f   : > { %1191 = vperm.xlu1 %12016, %v14243_v2   ;;  %v2352_v0 = vpop.permute.xlu1 %2351 }
 0x360   : > { %v2737_v48 = vmul.f32 %v12948_v62, %v2352_v0  ;;  %v3233_v21 = vpack.c.bf16 %v3126_v24, %v3125_v16  ;;  %v2999_v9 = vadd.f32 %v14197_v30, %v2864_v45 }
 0x362   : > { %v2865_v7 = vadd.f32 %v2737_v48, %v2093_v36  ;;  %11719 = vmatprep.mubr.msk.bf16.mxu0 %vm3316_vm0, %v3233_v21  ;;  %v3127_v4 = vmax.f32 %v2999_v9, 0.0  ;;  %v14542_v9 = vld [vmem:[%s12770_s19 + $0x180] sm:$0xff] }
 0x363   : > { %12017 = vset.pattern.permute.xlu1 %v17054_v55 }
 0x364   : > { %v3000_v35 = vadd.f32 %v14197_v30, %v2865_v7  ;;  %1851 = vperm.xlu1 %12017, %v14243_v2   ;;  %v1142_v52 = vpop.permute.xlu1 %1141 }
 0x365   : > { %v11713_v13 = vpop.f32.mrb[32].mxu0 }
 0x366   : > { %v3128_v47 = vmax.f32 %v3000_v35, 0.0  ;;  %v3680_v34 = vadd.f32 %v14288_v11, %v11713_v13  ;;  %v3671_v17 = vpop.f32.mrb[33].mxu0  ;;  %v14547_v35 = vld [vmem:[%s12770_s19 + $0x380] sm:$0xff]  ;;  %v2580_v13 = vpop.permute.xlu0 %2579 }
 0x367   : > { %v3672_v12 = vadd.f32 %v14288_v11, %v3671_v17  ;;  %v11714_v23 = vpop.f32.mrb[34].mxu0 }
 0x368   : > { %v3683_v63 = vadd.f32 %v14288_v11, %v11714_v23  ;;  %v3674_v41 = vpop.f32.mrb[35].mxu0  ;;  %12018 = vset.pattern.permute.xlu1 %v17061_v54  ;;  %v3234_v24 = vpack.c.bf16 %v3128_v47, %v3127_v4  ;;  %v4088_v20 = vmax.f32 %v3680_v34, 0.0  ;;  %v17288_v4 = vld [vmem:[#allocation29_spill] sm:$0xff]  ;;  %v2794_v34 = vmul.f32 %v12948_v62, %v2580_v13 }
 0x369   : > { %v3675_v30 = vadd.f32 %v14288_v11, %v3674_v41  ;;  %2615 = vperm.xlu1 %12018, %v12085_v53   ;;  %v1808_v2 = vpop.permute.xlu1 %1807  ;;  %v4086_v45 = vmax.f32 %v3672_v12, 0.0  ;;  %v1378_v47 = vmul.f32 %v12940_v58, %v17288_v4 }
 0x36a   : > { %v4089_v16 = vmax.f32 %v3683_v63, 0.0  ;;  %11720 = vmatmul.mubr.msk.bf16.gmra.mrb[40].mxu0 %vm3316_vm0, %v3234_v24  ;;  %v2022_v7 = vmul.f32 %v12945_v61, %v1808_v2  ;;  %v2592_v23 = vpop.permute.xlu0 %2591  ;;  %v1379_v63 = vmul.f32 %v12940_v58, %v1142_v52  ;;  %v14557_v24 = vld [vmem:[%s12770_s19 + $0x388] sm:$0xff]  ;;  %v17290_v52 = vld [vmem:[#allocation102_spill] sm:$0xff] }
 0x36b   : > { %v4087_v0 = vmax.f32 %v3675_v30, 0.0  ;;  %v17289_v30 = vld [vmem:[#allocation101_spill] sm:$0xff] }
 0x36c   : > { %v14536_v36 = vpack.c.bf16 %v4089_v16, %v4088_v20  ;;  %v2023_v2 = vmul.f32 %v12945_v61, %v17289_v30 }
 0x36d   : > { %v14538_v48 = vpack.c.bf16 %v4087_v0, %v4086_v45  ;;  %2619 = vperm.xlu1 %12018, %v12086_v46   ;;  %v2150_v46 = vadd.f32 %v2022_v7, %v1378_v47  ;;  %v2797_v45 = vmul.f32 %v12948_v62, %v2592_v23  ;;  %v14571_v47 = vld [vmem:[%s16948_s2] ss:$0 sm:$0xff] }
 0x36e   : > { %v1147_v21 = vpop.permute.xlu1 %1146  ;;  %v2151_v7 = vadd.f32 %v2023_v2, %v1379_v63 }
 0x36f   : > { %v2922_v20 = vadd.f32 %v2794_v34, %v2150_v46  ;;  %v1380_v13 = vmul.f32 %v12940_v58, %v1147_v21 }
 0x371   : > { %12019 = vset.pattern.permute.xlu1 %v17057_v38  ;;  %v3057_v46 = vadd.f32 %v14571_v47, %v2922_v20 }
 0x372   : > { %876 = vperm.xlu1 %12019, %v14542_v9   ;;  %v1152_v53 = vpop.permute.xlu1 %1151 }
 0x373   : > { %v1381_v41 = vmul.f32 %v12940_v58, %v1152_v53  ;;  %v2024_v53 = vmul.f32 %v12945_v61, %v17290_v52 }
 0x375   : > { %v2152_v21 = vadd.f32 %v2024_v53, %v1380_v13 }
 0x376   : > { %1196 = vperm.xlu1 %12019, %v14547_v35  }
 0x377   : > { %v1820_v17 = vpop.permute.xlu1 %1819 }
 0x378   : > { %v2025_v12 = vmul.f32 %v12945_v61, %v1820_v17 }
 0x37a   : > { %1201 = vperm.xlu1 %12019, %v14557_v24   ;;  %v2153_v16 = vadd.f32 %v2025_v12, %v1381_v41  ;;  %v3185_v41 = vmax.f32 %v3057_v46, 0.0 }
 0x37c   : > { %v2584_v0 = vpop.permute.xlu1 %2583  ;;  %v2925_v34 = vadd.f32 %v2797_v45, %v2153_v16 }
 0x37d   : > { %v2795_v4 = vmul.f32 %v12948_v62, %v2584_v0 }
 0x37e   : > { %12020 = vset.pattern.permute.xlu1 %v17054_v55  ;;  %v3060_v30 = vadd.f32 %v14571_v47, %v2925_v34 }
 0x37f   : > { %v2923_v17 = vadd.f32 %v2795_v4, %v2151_v7  ;;  %1603 = vperm.xlu1 %12020, %v14255_v56  }
 0x380   : > { %v2588_v12 = vpop.permute.xlu1 %2587  ;;  %v3188_v7 = vmax.f32 %v3060_v30, 0.0 }
 0x381   : > { %v3058_v23 = vadd.f32 %v14571_v47, %v2923_v17  ;;  %v2796_v63 = vmul.f32 %v12948_v62, %v2588_v12 }
 0x383   : > { %v3186_v2 = vmax.f32 %v3058_v23, 0.0  ;;  %v2924_v0 = vadd.f32 %v2796_v63, %v2152_v21  ;;  %1855 = vperm.xlu1 %12020, %v14547_v35  }
 0x385   : > { %v3059_v52 = vadd.f32 %v14571_v47, %v2924_v0  ;;  %v1157_v20 = vpop.permute.xlu1 %1156  ;;  %v3263_v16 = vpack.c.bf16 %v3186_v2, %v3185_v41 }
 0x386   : > { %v11765_v45 = vpop.f32.mrb[20].mxu1 }
 0x387   : > { %v3187_v56 = vmax.f32 %v3059_v52, 0.0  ;;  %v3888_v13 = vadd.f32 %v14288_v11, %v11765_v45  ;;  %v3879_v4 = vpop.f32.mrb[21].mxu1  ;;  %12021 = vset.pattern.permute.xlu1 %v17057_v38  ;;  %11779 = vmatprep.mubr.msk.bf16.mxu1 %vm3316_vm0, %v3263_v16  ;;  %v12090_v16 = vld [vmem:[%s12770_s19 + $0x398] sm:$0xff] }
 0x388   : > { %v3880_v53 = vadd.f32 %v14288_v11, %v3879_v4  ;;  %v11766_v46 = vpop.f32.mrb[22].mxu1  ;;  %886 = vperm.xlu1 %12021, %v14264_v51   ;;  %v17293_v4 = vld [vmem:[#allocation31_spill] sm:$0xff] }
 0x389   : > { %v3891_v34 = vadd.f32 %v14288_v11, %v11766_v46  ;;  %v3882_v17 = vpop.f32.mrb[23].mxu1  ;;  %v3264_v12 = vpack.c.bf16 %v3188_v7, %v3187_v56  ;;  %v4140_v63 = vmax.f32 %v3888_v13, 0.0  ;;  %v2600_v56 = vpop.permute.xlu0 %2599  ;;  %v12091_v13 = vld [vmem:[%s12770_s19 + $0x198] sm:$0xff] }
 0x38a   : > { %v3883_v21 = vadd.f32 %v14288_v11, %v3882_v17  ;;  %v1824_v23 = vpop.permute.xlu1 %1823  ;;  %v4138_v30 = vmax.f32 %v3880_v53, 0.0  ;;  %v1383_v53 = vmul.f32 %v12940_v58, %v17293_v4 }
 0x38b   : > { %v4141_v41 = vmax.f32 %v3891_v34, 0.0  ;;  %11780 = vmatmul.mubr.msk.bf16.gmra.mrb[36].mxu1 %vm3316_vm0, %v3264_v12  ;;  %v2799_v34 = vmul.f32 %v12948_v62, %v2600_v56  ;;  %v2026_v12 = vmul.f32 %v12945_v61, %v1824_v23 }
 0x38c   : > { %v4139_v2 = vmax.f32 %v3883_v21, 0.0  ;;  %1206 = vperm.xlu1 %12021, %v14283_v18   ;;  %v1382_v21 = vmul.f32 %v12940_v58, %v1157_v20 }
 0x38d   : > { %v14589_v0 = vpack.c.bf16 %v4141_v41, %v4140_v63 }
 0x38e   : > { %v14591_v52 = vpack.c.bf16 %v4139_v2, %v4138_v30  ;;  %v1828_v51 = vpop.permute.xlu1 %1827  ;;  %v2154_v30 = vadd.f32 %v2026_v12, %v1382_v21 }
 0x38f   : > { %17291 = vst [vmem:[#allocation36_spill] sm:$0xff] %v14589_v0  ;;  %v2027_v7 = vmul.f32 %v12945_v61, %v1828_v51 }
 0x390   : > { %17292 = vst [vmem:[#allocation40_spill] sm:$0xff] %v14591_v52  ;;  %1211 = vperm.xlu1 %12021, %v12090_v16  }
 0x391   : > { %v2155_v46 = vadd.f32 %v2027_v7, %v1383_v53 }
 0x393   : > { %v1172_v45 = vpop.permute.xlu1 %1171  ;;  %v2927_v63 = vadd.f32 %v2799_v34, %v2155_v46  ;;  %v2608_v34 = vpop.permute.xlu0 %2607 }
 0x394   : > { %12022 = vset.pattern.permute.xlu1 %v17054_v55 }
 0x395   : > { %1611 = vperm.xlu1 %12022, %v12091_v13   ;;  %v3062_v51 = vadd.f32 %v14571_v47, %v2927_v63  ;;  %v17294_v63 = vld [vmem:[#allocation33_spill] sm:$0xff] }
 0x397   : > { %v3190_v23 = vmax.f32 %v3062_v51, 0.0 }
 0x398   : > { %v1836_v17 = vpop.permute.xlu1 %1835 }
 0x399   : > { %1863 = vperm.xlu1 %12022, %v14283_v18   ;;  %v2029_v46 = vmul.f32 %v12945_v61, %v1836_v17 }
 0x39d   : > { %12023 = vset.pattern.permute.xlu1 %v17061_v54  ;;  %v2596_v41 = vpop.permute.xlu1 %2595 }
 0x39e   : > { %v2798_v2 = vmul.f32 %v12948_v62, %v2596_v41  ;;  %2371 = vperm.xlu1 %12023, %v14542_v9   ;;  %v1385_v9 = vmul.f32 %v12940_v58, %v1172_v45  ;;  %v1384_v41 = vmul.f32 %v12940_v58, %v17294_v63 }
 0x3a0   : > { %v2926_v7 = vadd.f32 %v2798_v2, %v2154_v30  ;;  %v2157_v12 = vadd.f32 %v2029_v46, %v1385_v9 }
 0x3a2   : > { %v3061_v56 = vadd.f32 %v14571_v47, %v2926_v7  ;;  %2627 = vperm.xlu1 %12023, %v14547_v35   ;;  %v857_v18 = vpop.permute.xlu1 %856  ;;  %v2801_v35 = vmul.f32 %v12948_v62, %v2608_v34 }
 0x3a4   : > { %v3189_v4 = vmax.f32 %v3061_v56, 0.0  ;;  %v2929_v17 = vadd.f32 %v2801_v35, %v2157_v12  ;;  %v14622_v56 = vld [vmem:[%s12770_s19 + $0x1a8] sm:$0xff] }
 0x3a6   : > { %2631 = vperm.xlu1 %12023, %v14557_v24   ;;  %v862_v20 = vpop.permute.xlu1 %861  ;;  %v3265_v53 = vpack.c.bf16 %v3190_v23, %v3189_v4  ;;  %v17295_v24 = vld [vmem:[#allocation104_spill] sm:$0xff]  ;;  %v3064_v45 = vadd.f32 %v14571_v47, %v2929_v17 }
 0x3a7   : > { %v2028_v30 = vmul.f32 %v12945_v61, %v17295_v24  ;;  %v14626_v23 = vld [vmem:[%s12770_s19 + $0x3a0] sm:$0xff] }
 0x3a8   : > { %11783 = vmatprep.mubr.msk.bf16.mxu1 %vm3316_vm0, %v3265_v53  ;;  %v3192_v46 = vmax.f32 %v3064_v45, 0.0 }
 0x3a9   : > { %v2156_v51 = vadd.f32 %v2028_v30, %v1384_v41 }
 0x3aa   : > { %2383 = vperm.xlu1 %12023, %v12091_v13  }
 0x3ab   : > { %v1588_v21 = vpop.permute.xlu1 %1587 }
 0x3ae   : > { %2639 = vperm.xlu1 %12023, %v12090_v16  }
 0x3b0   : > { %v2604_v2 = vpop.permute.xlu1 %2603 }
 0x3b1   : > { %v2800_v7 = vmul.f32 %v12948_v62, %v2604_v2  ;;  %v1967_v2 = vmul.f32 %v12945_v61, %v1588_v21 }
 0x3b2   : > { %12024 = vset.pattern.permute.xlu1 %v17057_v38 }
 0x3b3   : > { %v2928_v13 = vadd.f32 %v2800_v7, %v2156_v51  ;;  %901 = vperm.xlu1 %12024, %v14622_v56   ;;  %v2360_v7 = vpop.permute.xlu0 %2359 }
 0x3b4   : > { %v2739_v21 = vmul.f32 %v12948_v62, %v2360_v7 }
 0x3b5   : > { %v3063_v4 = vadd.f32 %v14571_v47, %v2928_v13  ;;  %v867_v53 = vpop.permute.xlu1 %866 }
 0x3b6   : > { %v11769_v16 = vpop.f32.mrb[24].mxu1 }
 0x3b7   : > { %v3191_v34 = vmax.f32 %v3063_v4, 0.0  ;;  %v3904_v9 = vadd.f32 %v14288_v11, %v11769_v16  ;;  %v3895_v12 = vpop.f32.mrb[25].mxu1  ;;  %1216 = vperm.xlu1 %12024, %v14626_v23   ;;  %v1323_v4 = vmul.f32 %v12940_v58, %v862_v20 }
 0x3b8   : > { %v3896_v35 = vadd.f32 %v14288_v11, %v3895_v12  ;;  %v11770_v63 = vpop.f32.mrb[26].mxu1 }
 0x3b9   : > { %v3907_v41 = vadd.f32 %v14288_v11, %v11770_v63  ;;  %v3898_v24 = vpop.f32.mrb[27].mxu1  ;;  %v872_v30 = vpop.permute.xlu1 %871  ;;  %v3266_v17 = vpack.c.bf16 %v3192_v46, %v3191_v34  ;;  %v4144_v45 = vmax.f32 %v3904_v9, 0.0  ;;  %v2095_v46 = vadd.f32 %v1967_v2, %v1323_v4  ;;  %v17299_v2 = vld [vmem:[#allocation108_spill] sm:$0xff] }
 0x3ba   : > { %v3899_v51 = vadd.f32 %v14288_v11, %v3898_v24  ;;  %v4142_v16 = vmax.f32 %v3896_v35, 0.0  ;;  %v1322_v9 = vmul.f32 %v12940_v58, %v857_v18  ;;  %v1968_v7 = vmul.f32 %v12945_v61, %v17299_v2 }
 0x3bb   : > { %v4145_v13 = vmax.f32 %v3907_v41, 0.0  ;;  %12025 = vset.pattern.permute.xlu1 %v17054_v55  ;;  %11784 = vmatmul.mubr.msk.bf16.gmra.mrb[40].mxu1 %vm3316_vm0, %v3266_v17  ;;  %v17298_v41 = vld [vmem:[#allocation106_spill] sm:$0xff]  ;;  %v2867_v20 = vadd.f32 %v2739_v21, %v2095_v46 }
 0x3bc   : > { %v4143_v12 = vmax.f32 %v3899_v51, 0.0  ;;  %1615 = vperm.xlu1 %12025, %v14301_v37   ;;  %v1966_v24 = vmul.f32 %v12945_v61, %v17298_v41  ;;  %v1324_v37 = vmul.f32 %v12940_v58, %v867_v53  ;;  %v14661_v41 = vld [vmem:[%s12770_s19 + $0x3b0] sm:$0xff] }
 0x3bd   : > { %v14639_v63 = vpack.c.bf16 %v4145_v13, %v4144_v45  ;;  %v3002_v18 = vadd.f32 %v14571_v47, %v2867_v20 }
 0x3be   : > { %v14642_v34 = vpack.c.bf16 %v4143_v12, %v4142_v16  ;;  %v1596_v11 = vpop.permute.xlu1 %1595  ;;  %v2094_v17 = vadd.f32 %v1966_v24, %v1322_v9  ;;  %v2096_v4 = vadd.f32 %v1968_v7, %v1324_v37 }
 0x3bf   : > { %17296 = vst [vmem:[#allocation34_spill] sm:$0xff] %v14639_v63  ;;  %v1969_v16 = vmul.f32 %v12945_v61, %v1596_v11  ;;  %v3130_v53 = vmax.f32 %v3002_v18, 0.0  ;;  %v14672_v18 = vld [vmem:[%s16950_s4] ss:$0 sm:$0xff] }
 0x3c0   : > { %17297 = vst [vmem:[#allocation56_spill] sm:$0xff] %v14642_v34  ;;  %1871 = vperm.xlu1 %12025, %v14626_v23  }
 0x3c3   : > { %v2356_v35 = vpop.permute.xlu1 %2355 }
 0x3c4   : > { %v2738_v51 = vmul.f32 %v12948_v62, %v2356_v35  ;;  %1875 = vperm.xlu1 %12025, %v14314_v59   ;;  %v1325_v59 = vmul.f32 %v12940_v58, %v872_v30 }
 0x3c6   : > { %v2866_v45 = vadd.f32 %v2738_v51, %v2094_v17  ;;  %v2097_v20 = vadd.f32 %v1969_v16, %v1325_v59 }
 0x3c7   : > { %v2364_v13 = vpop.permute.xlu1 %2363 }
 0x3c8   : > { %v3001_v12 = vadd.f32 %v14571_v47, %v2866_v45  ;;  %v2740_v46 = vmul.f32 %v12948_v62, %v2364_v13  ;;  %12026 = vset.pattern.permute.xlu1 %v17057_v38 }
 0x3c9   : > { %911 = vperm.xlu1 %12026, %v14324_v10  }
 0x3ca   : > { %v3129_v21 = vmax.f32 %v3001_v12, 0.0  ;;  %v2868_v9 = vadd.f32 %v2740_v46, %v2096_v4  ;;  %v12094_v4 = vld [vmem:[%s12770_s19 + $0x1b0] sm:$0xff] }
 0x3cb   : > { %v2368_v24 = vpop.permute.xlu1 %2367 }
 0x3cc   : > { %v2741_v11 = vmul.f32 %v12948_v62, %v2368_v24  ;;  %v3235_v35 = vpack.c.bf16 %v3130_v53, %v3129_v21  ;;  %v3003_v17 = vadd.f32 %v14571_v47, %v2868_v9 }
 0x3cd   : > { %1226 = vperm.xlu1 %12026, %v14661_v41  }
 0x3ce   : > { %v2869_v37 = vadd.f32 %v2741_v11, %v2097_v20  ;;  %11723 = vmatprep.mubr.msk.bf16.mxu0 %vm3316_vm0, %v3235_v35  ;;  %v3131_v2 = vmax.f32 %v3003_v17, 0.0 }
 0x3d0   : > { %v3004_v10 = vadd.f32 %v14571_v47, %v2869_v37  ;;  %v1182_v30 = vpop.permute.xlu1 %1181 }
 0x3d1   : > { %v11717_v51 = vpop.f32.mrb[36].mxu0  ;;  %12027 = vset.pattern.permute.xlu1 %v17054_v55 }
 0x3d2   : > { %v3132_v7 = vmax.f32 %v3004_v10, 0.0  ;;  %v3696_v45 = vadd.f32 %v14672_v18, %v11717_v51  ;;  %v3687_v13 = vpop.f32.mrb[37].mxu0  ;;  %1623 = vperm.xlu1 %12027, %v12094_v4   ;;  %v12095_v10 = vld [vmem:[%s12770_s19 + $0x3b8] sm:$0xff] }
 0x3d3   : > { %v3688_v16 = vadd.f32 %v14672_v18, %v3687_v13  ;;  %v11718_v12 = vpop.f32.mrb[38].mxu0  ;;  %v17300_v13 = vld [vmem:[#allocation35_spill] sm:$0xff] }
 0x3d4   : > { %v3699_v46 = vadd.f32 %v14672_v18, %v11718_v12  ;;  %v3690_v53 = vpop.f32.mrb[39].mxu0  ;;  %v3236_v59 = vpack.c.bf16 %v3132_v7, %v3131_v2  ;;  %v4092_v24 = vmax.f32 %v3696_v45, 0.0  ;;  %v2612_v45 = vpop.permute.xlu0 %2611  ;;  %v1386_v12 = vmul.f32 %v12940_v58, %v17300_v13 }
 0x3d5   : > { %v3691_v21 = vadd.f32 %v14672_v18, %v3690_v53  ;;  %v1840_v9 = vpop.permute.xlu1 %1839  ;;  %v4090_v11 = vmax.f32 %v3688_v16, 0.0 }
 0x3d6   : > { %v4093_v20 = vmax.f32 %v3699_v46, 0.0  ;;  %1879 = vperm.xlu1 %12027, %v14661_v41   ;;  %11724 = vmatmul.mubr.msk.bf16.gmra.mrb[44].mxu0 %vm3316_vm0, %v3236_v59  ;;  %v2030_v7 = vmul.f32 %v12945_v61, %v1840_v9  ;;  %v2802_v46 = vmul.f32 %v12948_v62, %v2612_v45  ;;  %v17301_v9 = vld [vmem:[#allocation110_spill] sm:$0xff] }
 0x3d7   : > { %v4091_v35 = vmax.f32 %v3691_v21, 0.0 }
 0x3d8   : > { %v14681_v17 = vpack.c.bf16 %v4093_v20, %v4092_v24  ;;  %v2158_v16 = vadd.f32 %v2030_v7, %v1386_v12  ;;  %v2624_v21 = vpop.permute.xlu0 %2623  ;;  %v1387_v24 = vmul.f32 %v12940_v58, %v1182_v30  ;;  %v17302_v12 = vld [vmem:[#allocation112_spill] sm:$0xff] }
 0x3d9   : > { %v14683_v37 = vpack.c.bf16 %v4091_v35, %v4090_v11  ;;  %v2032_v30 = vmul.f32 %v12945_v61, %v17302_v12 }
 0x3da   : > { %1883 = vperm.xlu1 %12027, %v12095_v10   ;;  %v1187_v51 = vpop.permute.xlu1 %1186  ;;  %v2930_v11 = vadd.f32 %v2802_v46, %v2158_v16  ;;  %v2805_v10 = vmul.f32 %v12948_v62, %v2624_v21 }
 0x3dc   : > { %v2376_v0 = vpop.permute.xlu0 %2375 }
 0x3dd   : > { %v2743_v52 = vmul.f32 %v12948_v62, %v2376_v0 }
 0x3de   : > { %12028 = vset.pattern.permute.xlu1 %v17061_v54  ;;  %v1192_v2 = vpop.permute.xlu1 %1191 }
 0x3df   : > { %2391 = vperm.xlu1 %12028, %v14622_v56   ;;  %v1389_v20 = vmul.f32 %v12940_v58, %v1192_v2  ;;  %v2031_v56 = vmul.f32 %v12945_v61, %v17301_v9  ;;  %v3065_v2 = vadd.f32 %v14571_v47, %v2930_v11  ;;  %v14710_v9 = vld [vmem:[%s12770_s19 + $0x1c0] sm:$0xff] }
 0x3e0   : > { %v2380_v42 = vpop.permute.xlu0 %2379 }
 0x3e1   : > { %v2159_v45 = vadd.f32 %v2031_v56, %v1387_v24 }
 0x3e3   : > { %2643 = vperm.xlu1 %12028, %v14626_v23   ;;  %v1852_v53 = vpop.permute.xlu1 %1851  ;;  %v1388_v23 = vmul.f32 %v12940_v58, %v1187_v51  ;;  %v3193_v51 = vmax.f32 %v3065_v2, 0.0 }
 0x3e4   : > { %v2033_v59 = vmul.f32 %v12945_v61, %v1852_v53 }
 0x3e5   : > { %v2160_v46 = vadd.f32 %v2032_v30, %v1388_v23 }
 0x3e6   : > { %v2161_v35 = vadd.f32 %v2033_v59, %v1389_v20 }
 0x3e7   : > { %2395 = vperm.xlu1 %12028, %v12094_v4  }
 0x3e8   : > { %v2616_v7 = vpop.permute.xlu1 %2615  ;;  %v2933_v53 = vadd.f32 %v2805_v10, %v2161_v35  ;;  %v14717_v35 = vld [vmem:[%s12770_s19 + $0x3c0] sm:$0xff] }
 0x3e9   : > { %v2803_v13 = vmul.f32 %v12948_v62, %v2616_v7 }
 0x3ea   : > { %v3068_v21 = vadd.f32 %v14571_v47, %v2933_v53 }
 0x3eb   : > { %v2931_v63 = vadd.f32 %v2803_v13, %v2159_v45  ;;  %2651 = vperm.xlu1 %12028, %v14661_v41  }
 0x3ec   : > { %v2620_v16 = vpop.permute.xlu1 %2619 }
 0x3ed   : > { %v3066_v4 = vadd.f32 %v14571_v47, %v2931_v63  ;;  %v2804_v59 = vmul.f32 %v12948_v62, %v2620_v16  ;;  %v3196_v63 = vmax.f32 %v3068_v21, 0.0 }
 0x3ef   : > { %v3194_v24 = vmax.f32 %v3066_v4, 0.0  ;;  %v2932_v20 = vadd.f32 %v2804_v59, %v2160_v46  ;;  %12029 = vset.pattern.permute.xlu1 %v17057_v38  ;;  %v14729_v4 = vld [vmem:[%s12770_s19 + $0x3c8] sm:$0xff] }
 0x3f0   : > { %916 = vperm.xlu1 %12029, %v14710_v9  }
 0x3f1   : > { %v3067_v56 = vadd.f32 %v14571_v47, %v2932_v20  ;;  %v14714_v41 = vpop.permute.xlu1 %876  ;;  %v3267_v11 = vpack.c.bf16 %v3194_v24, %v3193_v51 }
 0x3f3   : > { %v3195_v10 = vmax.f32 %v3067_v56, 0.0  ;;  %11787 = vmatprep.mubr.msk.bf16.mxu1 %vm3316_vm0, %v3267_v11  ;;  %v11773_v7 = vpop.f32.mrb[28].mxu1  ;;  %v4246_v56 = vld [vmem:[%s16951_s5] sm:$0xff] }
 0x3f4   : > { %1236 = vperm.xlu1 %12029, %v14717_v35   ;;  %v3920_v45 = vadd.f32 %v14672_v18, %v11773_v7  ;;  %v3911_v23 = vpop.f32.mrb[29].mxu1  ;;  %v4250_v11 = vld [vmem:[%s16951_s5 + $0x20] sm:$0xff] }
 0x3f5   : > { %v14722_v13 = vpop.permute.xlu1 %1196  ;;  %v3268_v12 = vpack.c.bf16 %v3196_v63, %v3195_v10  ;;  %v3912_v30 = vadd.f32 %v14672_v18, %v3911_v23  ;;  %v11774_v2 = vpop.f32.mrb[30].mxu1  ;;  %v4247_v63 = vld [vmem:[%s16951_s5 + $0x8] sm:$0xff]  ;;  %v11178_v7 = vcombine.low %v4246_v56, %v4250_v11 }
 0x3f6   : > { %v3923_v53 = vadd.f32 %v14672_v18, %v11774_v2  ;;  %v3914_v16 = vpop.f32.mrb[31].mxu1  ;;  %v4148_v59 = vmax.f32 %v3920_v45, 0.0  ;;  %v11179_v45 = vcombine.high %v4246_v56, %v4250_v11  ;;  %v4251_v23 = vld [vmem:[%s16951_s5 + $0x28] sm:$0xff]  ;;  %v14759_v56 = vld [vmem:[%s12770_s19 + $0x3d8] sm:$0xff]  ;;  %v4254_v11 = vld [vmem:[%s16951_s5 + $0x40] sm:$0xff] }
 0x3f7   : > { %11788 = vmatmul.mubr.msk.bf16.gmra.mrb[44].mxu1 %vm3316_vm0, %v3268_v12  ;;  %v3915_v46 = vadd.f32 %v14672_v18, %v3914_v16  ;;  %v4146_v24 = vmax.f32 %v3912_v30, 0.0  ;;  %v11180_v30 = vcombine.low %v4247_v63, %v4251_v23  ;;  %v11181_v2 = vcombine.high %v4247_v63, %v4251_v23  ;;  %v4258_v63 = vld [vmem:[%s16951_s5 + $0x60] sm:$0xff] }
 0x3f8   : > { %1241 = vperm.xlu1 %12029, %v14729_v4   ;;  %v4149_v51 = vmax.f32 %v3923_v53, 0.0  ;;  %v12098_v53 = vld [vmem:[%s12770_s19 + $0x1c8] sm:$0xff]  ;;  %4630 = vmatprep.subr.bf16.mxu1 %v11179_v45  ;;  %v11186_v23 = vcombine.low %v4254_v11, %v4258_v63 }
 0x3f9   : > { %v14732_v21 = vpop.permute.xlu1 %1201  ;;  %v4147_v20 = vmax.f32 %v3915_v46, 0.0  ;;  %5303 = vmatprep.subr.bf16.mxu0 %v11181_v2  ;;  %4631 = vmatpush1.bf16.msra.mxu1 %v11178_v7  ;;  %v4255_v7 = vld [vmem:[%s16951_s5 + $0x48] sm:$0xff] }
 0x3fa   : > { %v14743_v10 = vpack.c.bf16 %v4149_v51, %v4148_v59  ;;  %5304 = vmatpush1.bf16.msra.mxu0 %v11180_v30  ;;  %v12099_v59 = vld [vmem:[%s12770_s19 + $0x1d0] sm:$0xff]  ;;  %v11187_v30 = vcombine.high %v4254_v11, %v4258_v63  ;;  %v4259_v2 = vld [vmem:[%s16951_s5 + $0x68] sm:$0xff] }
 0x3fb   : > { %v14748_v12 = vpack.c.bf16 %v4147_v20, %v4146_v24  ;;  %v12100_v24 = vld [vmem:[%s12770_s19 + $0x3d0] sm:$0xff]  ;;  %v17305_v11 = vld [vmem:[#allocation37_spill] sm:$0xff] }
 0x3fc   : > { %17303 = vst [vmem:[#allocation42_spill] sm:$0xff] %v14743_v10  ;;  %12030 = vset.pattern.permute.xlu1 %v17054_v55  ;;  %4632 = vmatprep.subr.bf16.mxu1 %v11187_v30  ;;  %v1327_v63 = vmul.f32 %v12940_v58, %v17305_v11 }
 0x3fd   : > { %17304 = vst [vmem:[#allocation45_spill] sm:$0xff] %v14748_v12  ;;  %1635 = vperm.xlu1 %12030, %v12098_v53   ;;  %v11188_v53 = vcombine.low %v4255_v7, %v4259_v2  ;;  %v14779_v12 = vld [vmem:[%s12770_s19 + $0x1d8] sm:$0xff]  ;;  %4633 = vmatpush1.bf16.msra.mxu1 %v11186_v23 }
 0x3fe   : > { %v1604_v16 = vpop.permute.xlu1 %1603 }
 0x3ff   : > { %v1971_v10 = vmul.f32 %v12945_v61, %v1604_v16 }
 0x401   : > { %1887 = vperm.xlu1 %12030, %v14717_v35  }
 0x402   : > { %v1856_v46 = vpop.permute.xlu1 %1855 }
 0x405   : > { %12031 = vset.pattern.permute.xlu1 %v17057_v38 }
 0x406   : > { %926 = vperm.xlu1 %12031, %v12099_v59   ;;  %v11189_v59 = vcombine.high %v4255_v7, %v4259_v2  ;;  %v2099_v7 = vadd.f32 %v1971_v10, %v1327_v63  ;;  %v1326_v2 = vmul.f32 %v12940_v58, %v14714_v41  ;;  %v2034_v10 = vmul.f32 %v12945_v61, %v1856_v46  ;;  %v4266_v41 = vld [vmem:[%s16951_s5 + $0xa0] sm:$0xff]  ;;  %v4267_v46 = vld [vmem:[%s16951_s5 + $0xa8] sm:$0xff] }
 0x407   : > { %v887_v51 = vpop.permute.xlu1 %886 }
 0x408   : > { %5305 = vmatprep.subr.bf16.mxu0 %v11189_v59  ;;  %v2871_v16 = vadd.f32 %v2743_v52, %v2099_v7  ;;  %v17306_v59 = vld [vmem:[#allocation114_spill] sm:$0xff]  ;;  %v4262_v52 = vld [vmem:[%s16951_s5 + $0x80] sm:$0xff] }
 0x409   : > { %5306 = vmatpush1.bf16.msra.mxu0 %v11188_v53  ;;  %v1970_v23 = vmul.f32 %v12945_v61, %v17306_v59  ;;  %v11194_v7 = vcombine.low %v4262_v52, %v4266_v41 }
 0x40a   : > { %1246 = vperm.xlu1 %12031, %v12100_v24   ;;  %v3006_v0 = vadd.f32 %v14571_v47, %v2871_v16  ;;  %v17307_v16 = vld [vmem:[#allocation39_spill] sm:$0xff] }
 0x40b   : > { %v14756_v20 = vpop.permute.xlu1 %1206  ;;  %v2098_v11 = vadd.f32 %v1970_v23, %v1326_v2  ;;  %v11195_v2 = vcombine.high %v4262_v52, %v4266_v41  ;;  %v1329_v59 = vmul.f32 %v12940_v58, %v17307_v16  ;;  %v1390_v23 = vmul.f32 %v12940_v58, %v14722_v13 }
 0x40c   : > { %v1391_v41 = vmul.f32 %v12940_v58, %v14732_v21  ;;  %v3134_v16 = vmax.f32 %v3006_v0, 0.0 }
 0x40d   : > { %4634 = vmatprep.subr.bf16.mxu1 %v11195_v2  ;;  %v2162_v27 = vadd.f32 %v2034_v10, %v1390_v23  ;;  %v17309_v2 = vld [vmem:[#allocation115_spill] sm:$0xff] }
 0x40e   : > { %1251 = vperm.xlu1 %12031, %v14759_v56   ;;  %4635 = vmatpush1.bf16.msra.mxu1 %v11194_v7  ;;  %v2035_v21 = vmul.f32 %v12945_v61, %v17309_v2 }
 0x40f   : > { %v14771_v45 = vpop.permute.xlu1 %1211 }
 0x412   : > { %12032 = vset.pattern.permute.xlu1 %v17054_v55 }
 0x413   : > { %1643 = vperm.xlu1 %12032, %v14779_v12  }
 0x414   : > { %v1612_v34 = vpop.permute.xlu1 %1611 }
 0x417   : > { %1895 = vperm.xlu1 %12032, %v12100_v24   ;;  %v1328_v24 = vmul.f32 %v12940_v58, %v887_v51 }
 0x418   : > { %v1864_v30 = vpop.permute.xlu1 %1863 }
 0x41b   : > { %12033 = vset.pattern.permute.xlu1 %v17061_v54 }
 0x41c   : > { %2403 = vperm.xlu1 %12033, %v14710_v9   ;;  %v4263_v9 = vld [vmem:[%s16951_s5 + $0x88] sm:$0xff] }
 0x41d   : > { %v2372_v53 = vpop.permute.xlu1 %2371  ;;  %v11196_v28 = vcombine.low %v4263_v9, %v4267_v46  ;;  %v11197_v25 = vcombine.high %v4263_v9, %v4267_v46  ;;  %v2636_v9 = vpop.permute.xlu0 %2635 }
 0x41e   : > { %v2742_v60 = vmul.f32 %v12948_v62, %v2372_v53  ;;  %v2808_v0 = vmul.f32 %v12948_v62, %v2636_v9 }
 0x41f   : > { %5307 = vmatprep.subr.bf16.mxu0 %v11197_v25 }
 0x420   : > { %v2870_v63 = vadd.f32 %v2742_v60, %v2098_v11  ;;  %2659 = vperm.xlu1 %12033, %v14717_v35   ;;  %v1972_v60 = vmul.f32 %v12945_v61, %v17308_v1  ;;  %v2744_v35 = vmul.f32 %v12948_v62, %v2380_v42  ;;  %v2036_v42 = vmul.f32 %v12945_v61, %v1864_v30 }
 0x421   : > { %v2628_v53 = vpop.permute.xlu1 %2627  ;;  %5308 = vmatpush1.bf16.msra.mxu0 %v11196_v28  ;;  %v1392_v30 = vmul.f32 %v12940_v58, %v14756_v20 }
 0x422   : > { %v3005_v51 = vadd.f32 %v14571_v47, %v2870_v63  ;;  %v2806_v11 = vmul.f32 %v12948_v62, %v2628_v53  ;;  %v11777_v52 = vpop.f32.mrb[32].mxu1  ;;  %v2100_v1 = vadd.f32 %v1972_v60, %v1328_v24  ;;  %v1973_v24 = vmul.f32 %v12945_v61, %v1612_v34 }
 0x423   : > { %v3936_v13 = vadd.f32 %v14672_v18, %v11777_v52  ;;  %v3927_v8 = vpop.f32.mrb[33].mxu1  ;;  %v2164_v9 = vadd.f32 %v2036_v42, %v1392_v30  ;;  %v17312_v42 = vld [vmem:[#allocation119_spill] sm:$0xff] }
 0x424   : > { %v3133_v46 = vmax.f32 %v3005_v51, 0.0  ;;  %v3928_v63 = vadd.f32 %v14672_v18, %v3927_v8  ;;  %v11778_v53 = vpop.f32.mrb[34].mxu1  ;;  %2663 = vperm.xlu1 %12033, %v14729_v4   ;;  %v2934_v10 = vadd.f32 %v2806_v11, %v2162_v27  ;;  %v2163_v4 = vadd.f32 %v2035_v21, %v1391_v41 }
 0x425   : > { %v3939_v25 = vadd.f32 %v14672_v18, %v11778_v53  ;;  %v3930_v7 = vpop.f32.mrb[35].mxu1  ;;  %v2632_v23 = vpop.permute.xlu1 %2631  ;;  %v4152_v28 = vmax.f32 %v3936_v13, 0.0  ;;  %v2872_v2 = vadd.f32 %v2744_v35, %v2100_v1  ;;  %v1393_v41 = vmul.f32 %v12940_v58, %v14771_v45 }
 0x426   : > { %v3237_v8 = vpack.c.bf16 %v3134_v16, %v3133_v46  ;;  %v3931_v60 = vadd.f32 %v14672_v18, %v3930_v7  ;;  %v2807_v52 = vmul.f32 %v12948_v62, %v2632_v23  ;;  %v4150_v27 = vmax.f32 %v3928_v63, 0.0 }
 0x427   : > { %v4153_v51 = vmax.f32 %v3939_v25, 0.0  ;;  %v3069_v20 = vadd.f32 %v14571_v47, %v2934_v10  ;;  %v2101_v13 = vadd.f32 %v1973_v24, %v1329_v59  ;;  %v3007_v63 = vadd.f32 %v14571_v47, %v2872_v2 }
 0x428   : > { %v4151_v11 = vmax.f32 %v3931_v60, 0.0  ;;  %2415 = vperm.xlu1 %12033, %v14779_v12   ;;  %11727 = vmatprep.mubr.msk.bf16.mxu0 %vm3316_vm0, %v3237_v8  ;;  %v2935_v34 = vadd.f32 %v2807_v52, %v2163_v4  ;;  %v2037_v12 = vmul.f32 %v12945_v61, %v17312_v42  ;;  %v2936_v21 = vadd.f32 %v2808_v0, %v2164_v9  ;;  %v4274_v0 = vld [vmem:[%s16951_s5 + $0xe0] sm:$0xff]  ;;  %v14862_v52 = vld [vmem:[%s12770_s19 + $0x1e8] sm:$0xff] }
 0x429   : > { %v14835_v53 = vpack.c.bf16 %v4153_v51, %v4152_v28  ;;  %v2384_v16 = vpop.permute.xlu1 %2383  ;;  %v3197_v25 = vmax.f32 %v3069_v20, 0.0  ;;  %v3135_v8 = vmax.f32 %v3007_v63, 0.0  ;;  %v4271_v51 = vld [vmem:[%s16951_s5 + $0xc8] sm:$0xff]  ;;  %v12104_v63 = vld [vmem:[%s12770_s19 + $0x1e0] sm:$0xff] }
 0x42a   : > { %v14839_v46 = vpack.c.bf16 %v4151_v11, %v4150_v27  ;;  %v2745_v35 = vmul.f32 %v12948_v62, %v2384_v16  ;;  %v3070_v1 = vadd.f32 %v14571_v47, %v2935_v34  ;;  %v2165_v59 = vadd.f32 %v2037_v12, %v1393_v41  ;;  %v4275_v27 = vld [vmem:[%s16951_s5 + $0xe8] sm:$0xff]  ;;  %v14872_v16 = vld [vmem:[%s12770_s19 + $0x3e0] sm:$0xff] }
 0x42b   : > { %17310 = vst [vmem:[#allocation53_spill] sm:$0xff] %v14835_v53  ;;  %v3071_v60 = vadd.f32 %v14571_v47, %v2936_v21  ;;  %v11204_v41 = vcombine.low %v4271_v51, %v4275_v27 }
 0x42c   : > { %17311 = vst [vmem:[#allocation51_spill] sm:$0xff] %v14839_v46  ;;  %v2873_v10 = vadd.f32 %v2745_v35, %v2101_v13  ;;  %2671 = vperm.xlu1 %12033, %v14759_v56   ;;  %v3198_v7 = vmax.f32 %v3070_v1, 0.0  ;;  %v4270_v56 = vld [vmem:[%s16951_s5 + $0xc0] sm:$0xff]  ;;  %v11205_v13 = vcombine.high %v4271_v51, %v4275_v27  ;;  %v4279_v51 = vld [vmem:[%s16951_s5 + $0x108] sm:$0xff] }
 0x42d   : > { %v2640_v45 = vpop.permute.xlu1 %2639  ;;  %v11202_v2 = vcombine.low %v4270_v56, %v4274_v0  ;;  %v11203_v9 = vcombine.high %v4270_v56, %v4274_v0  ;;  %v3199_v35 = vmax.f32 %v3071_v60, 0.0  ;;  %v4278_v56 = vld [vmem:[%s16951_s5 + $0x100] sm:$0xff] }
 0x42e   : > { %v3008_v23 = vadd.f32 %v14571_v47, %v2873_v10  ;;  %v2809_v30 = vmul.f32 %v12948_v62, %v2640_v45  ;;  %v3269_v24 = vpack.c.bf16 %v3198_v7, %v3197_v25  ;;  %5309 = vmatprep.subr.bf16.mxu0 %v11205_v13  ;;  %v4282_v0 = vld [vmem:[%s16951_s5 + $0x120] sm:$0xff] }
 0x42f   : > { %4636 = vmatprep.subr.bf16.mxu1 %v11203_v9  ;;  %5310 = vmatpush1.bf16.msra.mxu0 %v11204_v41  ;;  %v4283_v41 = vld [vmem:[%s16951_s5 + $0x128] sm:$0xff] }
 0x430   : > { %v3136_v4 = vmax.f32 %v3008_v23, 0.0  ;;  %v2937_v28 = vadd.f32 %v2809_v30, %v2165_v59  ;;  %12034 = vset.pattern.permute.xlu1 %v17057_v38  ;;  %11791 = vmatprep.mubr.msk.bf16.mxu1 %vm3316_vm0, %v3269_v24 }
 0x431   : > { %941 = vperm.xlu1 %12034, %v14862_v52   ;;  %4637 = vmatpush1.bf16.msra.mxu1 %v11202_v2 }
 0x432   : > { %v3238_v11 = vpack.c.bf16 %v3136_v4, %v3135_v8  ;;  %v3072_v20 = vadd.f32 %v14571_v47, %v2937_v28  ;;  %v14869_v34 = vpop.permute.xlu1 %901  ;;  %v12105_v28 = vld [vmem:[%s12770_s19 + $0x3e8] sm:$0xff] }
 0x434   : > { %v3200_v1 = vmax.f32 %v3072_v20, 0.0  ;;  %11728 = vmatmul.mubr.msk.bf16.gmra.mrb[48].mxu0 %vm3316_vm0, %v3238_v11  ;;  %v11210_v11 = vcombine.low %v4278_v56, %v4282_v0  ;;  %v11211_v20 = vcombine.high %v4278_v56, %v4282_v0 }
 0x435   : > { %1256 = vperm.xlu1 %12034, %v14872_v16  }
 0x436   : > { %v3270_v42 = vpack.c.bf16 %v3200_v1, %v3199_v35  ;;  %v14876_v12 = vpop.permute.xlu1 %1216  ;;  %v11212_v35 = vcombine.low %v4279_v51, %v4283_v41  ;;  %4638 = vmatprep.subr.bf16.mxu1 %v11211_v20 }
 0x437   : > { %4639 = vmatpush1.bf16.msra.mxu1 %v11210_v11 }
 0x438   : > { %11792 = vmatmul.mubr.msk.bf16.gmra.mrb[48].mxu1 %vm3316_vm0, %v3270_v42  ;;  %v11213_v42 = vcombine.high %v4279_v51, %v4283_v41  ;;  %v17315_v41 = vld [vmem:[#allocation44_spill] sm:$0xff] }
 0x439   : > { %12035 = vset.pattern.permute.xlu1 %v17054_v55 }
 0x43a   : > { %1647 = vperm.xlu1 %12035, %v12104_v63   ;;  %v12106_v63 = vld [vmem:[%s12770_s19 + $0x1f8] sm:$0xff]  ;;  %5311 = vmatprep.subr.bf16.mxu0 %v11213_v42 }
 0x43b   : > { %v1616_v21 = vpop.permute.xlu1 %1615  ;;  %5312 = vmatpush1.bf16.msra.mxu0 %v11212_v35  ;;  %v1395_v35 = vmul.f32 %v12940_v58, %v17315_v41 }
 0x43d   : > { %v11721_v10 = vpop.f32.mrb[40].mxu0 }
 0x43e   : > { %v3712_v25 = vadd.f32 %v14672_v18, %v11721_v10  ;;  %v3703_v7 = vpop.f32.mrb[41].mxu0  ;;  %1903 = vperm.xlu1 %12035, %v14872_v16  }
 0x43f   : > { %v3704_v45 = vadd.f32 %v14672_v18, %v3703_v7  ;;  %v11722_v59 = vpop.f32.mrb[42].mxu0  ;;  %v14884_v23 = vpop.permute.xlu1 %1871 }
 0x440   : > { %v3715_v30 = vadd.f32 %v14672_v18, %v11722_v59  ;;  %v3706_v24 = vpop.f32.mrb[43].mxu0  ;;  %v4096_v60 = vmax.f32 %v3712_v25, 0.0  ;;  %v14908_v25 = vld [vmem:[%s12770_s19 + $0x3f0] sm:$0xff]  ;;  %v4290_v59 = vld [vmem:[%s16951_s5 + $0x160] sm:$0xff] }
 0x441   : > { %v3707_v8 = vadd.f32 %v14672_v18, %v3706_v24  ;;  %v4094_v2 = vmax.f32 %v3704_v45, 0.0  ;;  %v4286_v45 = vld [vmem:[%s16951_s5 + $0x140] sm:$0xff]  ;;  %v1974_v24 = vmul.f32 %v12945_v61, %v1616_v21 }
 0x442   : > { %v4097_v4 = vmax.f32 %v3715_v30, 0.0  ;;  %1907 = vperm.xlu1 %12035, %v12105_v28   ;;  %v4287_v30 = vld [vmem:[%s16951_s5 + $0x148] sm:$0xff]  ;;  %v2388_v28 = vpop.permute.xlu0 %2387 }
 0x443   : > { %v4095_v9 = vmax.f32 %v3707_v8, 0.0  ;;  %v1876_v27 = vpop.permute.xlu1 %1875  ;;  %v14925_v8 = vld [vmem:[%s12770_s19 + $0x1f0] sm:$0xff]  ;;  %v2746_v42 = vmul.f32 %v12948_v62, %v2388_v28 }
 0x444   : > { %v14901_v13 = vpack.c.bf16 %v4097_v4, %v4096_v60  ;;  %v11218_v60 = vcombine.low %v4286_v45, %v4290_v59  ;;  %v4291_v4 = vld [vmem:[%s16951_s5 + $0x168] sm:$0xff]  ;;  %v2039_v11 = vmul.f32 %v12945_v61, %v1876_v27  ;;  %v1331_v27 = vmul.f32 %v12940_v58, %v14869_v34  ;;  %v17317_v34 = vld [vmem:[#allocation46_spill] sm:$0xff] }
 0x445   : > { %v14903_v1 = vpack.c.bf16 %v4095_v9, %v4094_v2  ;;  %v11220_v0 = vcombine.low %v4287_v30, %v4291_v4  ;;  %v11221_v51 = vcombine.high %v4287_v30, %v4291_v4  ;;  %v17314_v2 = vld [vmem:[#allocation41_spill] sm:$0xff]  ;;  %v12108_v30 = vld [vmem:[%s12770_s19 + $0x3f8] sm:$0xff] }
 0x446   : > { %17313 = vst [vmem:[#allocation60_spill] sm:$0xff] %v14901_v13  ;;  %12036 = vset.pattern.permute.xlu1 %v17057_v38  ;;  %v1330_v9 = vmul.f32 %v12940_v58, %v17314_v2 }
 0x447   : > { %951 = vperm.xlu1 %12036, %v12106_v63   ;;  %5313 = vmatprep.subr.bf16.mxu0 %v11221_v51  ;;  %v2648_v63 = vpop.permute.xlu0 %2647  ;;  %v17316_v51 = vld [vmem:[#allocation122_spill] sm:$0xff] }
 0x448   : > { %v912_v10 = vpop.permute.xlu1 %911  ;;  %v2102_v21 = vadd.f32 %v1974_v24, %v1330_v9  ;;  %5314 = vmatpush1.bf16.msra.mxu0 %v11220_v0  ;;  %v2811_v24 = vmul.f32 %v12948_v62, %v2648_v63  ;;  %v1975_v2 = vmul.f32 %v12945_v61, %v17316_v51 }
 0x449   : > { %v1333_v28 = vmul.f32 %v12940_v58, %v912_v10 }
 0x44b   : > { %1266 = vperm.xlu1 %12036, %v14908_v25   ;;  %v2400_v9 = vpop.permute.xlu0 %2399 }
 0x44c   : > { %v14911_v7 = vpop.permute.xlu1 %1226 }
 0x44f   : > { %12038 = vset.pattern.permute.xlu1 %v17054_v55  ;;  %v11219_v55 = vcombine.high %v4286_v45, %v4290_v59  ;;  %v2874_v45 = vadd.f32 %v2746_v42, %v2102_v21  ;;  %v2167_v59 = vadd.f32 %v2039_v11, %v1395_v35  ;;  %v1394_v21 = vmul.f32 %v12940_v58, %v14876_v12  ;;  %v17318_v11 = vld [vmem:[#allocation48_spill] sm:$0xff]  ;;  %v17319_v35 = vld [vmem:[#allocation125_spill] sm:$0xff] }
 0x450   : > { %1655 = vperm.xlu1 %12038, %v14925_v8   ;;  %v1397_v41 = vmul.f32 %v12940_v58, %v17318_v11  ;;  %v1977_v10 = vmul.f32 %v12945_v61, %v17319_v35 }
 0x451   : > { %v1624_v56 = vpop.permute.xlu1 %1623  ;;  %4640 = vmatprep.subr.bf16.mxu1 %v11219_v55  ;;  %v14947_v4 = vadd.f32 %v14571_v47, %v2874_v45  ;;  %v2939_v0 = vadd.f32 %v2811_v24, %v2167_v59  ;;  %v2103_v45 = vadd.f32 %v1975_v2, %v1331_v27  ;;  %v4298_v27 = vld [vmem:[%s16951_s5 + $0x1a0] sm:$0xff] }
 0x452   : > { %4641 = vmatpush1.bf16.msra.mxu1 %v11218_v60  ;;  %v2038_v60 = vmul.f32 %v12945_v61, %v14884_v23  ;;  %v1332_v23 = vmul.f32 %v12940_v58, %v17317_v34  ;;  %v2105_v34 = vadd.f32 %v1977_v10, %v1333_v28  ;;  %v1976_v35 = vmul.f32 %v12945_v61, %v1624_v56 }
 0x453   : > { %v3137_v24 = vmax.f32 %v14947_v4, 0.0  ;;  %v3074_v51 = vadd.f32 %v14571_v47, %v2939_v0 }
 0x454   : > { %1911 = vperm.xlu1 %12038, %v14908_v25   ;;  %v2166_v59 = vadd.f32 %v2038_v60, %v1394_v21  ;;  %v4295_v60 = vld [vmem:[%s16951_s5 + $0x188] sm:$0xff] }
 0x455   : > { %v14935_v20 = vpop.permute.xlu1 %1879  ;;  %v4299_v21 = vld [vmem:[%s16951_s5 + $0x1a8] sm:$0xff] }
 0x456   : > { %v11229_v56 = vcombine.high %v4295_v60, %v4299_v21 }
 0x458   : > { %1915 = vperm.xlu1 %12038, %v12108_v30   ;;  %5315 = vmatprep.subr.bf16.mxu0 %v11229_v56 }
 0x459   : > { %v1884_v55 = vpop.permute.xlu1 %1883 }
 0x45a   : > { %v2041_v4 = vmul.f32 %v12945_v61, %v1884_v55  ;;  %v14988_v55 = vld [vmem:[%s16948_s2] ss:$0 sm:$0xff] }
 0x45c   : > { %12040 = vset.pattern.permute.xlu1 %v17061_v54  ;;  %v2749_v54 = vmul.f32 %v12948_v62, %v2400_v9  ;;  %v4294_v9 = vld [vmem:[%s16951_s5 + $0x180] sm:$0xff] }
 0x45d   : > { %2423 = vperm.xlu1 %12040, %v14862_v52   ;;  %v11226_v28 = vcombine.low %v4294_v9, %v4298_v27 }
 0x45e   : > { %v11781_v42 = vpop.f32.mrb[36].mxu1  ;;  %v2392_v63 = vpop.permute.xlu1 %2391  ;;  %v2877_v46 = vadd.f32 %v2749_v54, %v2105_v34  ;;  %v2040_v54 = vmul.f32 %v12945_v61, %v14935_v20 }
 0x45f   : > { %v3952_v30 = vadd.f32 %v14672_v18, %v11781_v42  ;;  %v2747_v12 = vmul.f32 %v12948_v62, %v2392_v63  ;;  %v3943_v52 = vpop.f32.mrb[37].mxu1 }
 0x460   : > { %v3944_v11 = vadd.f32 %v14672_v18, %v3943_v52  ;;  %v11782_v53 = vpop.f32.mrb[38].mxu1  ;;  %v11227_v52 = vcombine.high %v4294_v9, %v4298_v27 }
 0x461   : > { %v2875_v2 = vadd.f32 %v2747_v12, %v2103_v45  ;;  %v3955_v47 = vadd.f32 %v14672_v18, %v11782_v53  ;;  %v3946_v0 = vpop.f32.mrb[39].mxu1  ;;  %2675 = vperm.xlu1 %12040, %v14872_v16   ;;  %v4156_v10 = vmax.f32 %v3952_v30, 0.0  ;;  %v11228_v12 = vcombine.low %v4295_v60, %v4299_v21  ;;  %v2656_v30 = vpop.permute.xlu0 %2655 }
 0x462   : > { %v3947_v42 = vadd.f32 %v14672_v18, %v3946_v0  ;;  %v2644_v63 = vpop.permute.xlu1 %2643  ;;  %v4154_v40 = vmax.f32 %v3944_v11, 0.0  ;;  %4642 = vmatprep.subr.bf16.mxu1 %v11227_v52  ;;  %v2169_v0 = vadd.f32 %v2041_v4, %v1397_v41  ;;  %v3012_v60 = vadd.f32 %v14988_v55, %v2877_v46 }
 0x463   : > { %v3010_v53 = vadd.f32 %v14988_v55, %v2875_v2  ;;  %v4157_v16 = vmax.f32 %v3955_v47, 0.0  ;;  %v2810_v45 = vmul.f32 %v12948_v62, %v2644_v63  ;;  %4643 = vmatpush1.bf16.msra.mxu1 %v11226_v28  ;;  %v2813_v2 = vmul.f32 %v12948_v62, %v2656_v30  ;;  %5316 = vmatpush1.bf16.msra.mxu0 %v11228_v12  ;;  %v4307_v30 = vld [vmem:[%s16951_s5 + $0x1e8] sm:$0xff] }
 0x464   : > { %v4155_v57 = vmax.f32 %v3947_v42, 0.0  ;;  %v2104_v47 = vadd.f32 %v1976_v35, %v1332_v23 }
 0x465   : > { %v3138_v39 = vmax.f32 %v3010_v53, 0.0  ;;  %v14992_v9 = vpack.c.bf16 %v4157_v16, %v4156_v10  ;;  %v2938_v27 = vadd.f32 %v2810_v45, %v2166_v59  ;;  %2427 = vperm.xlu1 %12040, %v14925_v8   ;;  %v3202_v59 = vmax.f32 %v3074_v51, 0.0  ;;  %v4302_v53 = vld [vmem:[%s16951_s5 + $0x1c0] sm:$0xff]  ;;  %v4303_v45 = vld [vmem:[%s16951_s5 + $0x1c8] sm:$0xff] }
 0x466   : > { %v14996_v13 = vpack.c.bf16 %v4155_v57, %v4154_v40  ;;  %v2396_v63 = vpop.permute.xlu1 %2395  ;;  %v1396_v8 = vmul.f32 %v12940_v58, %v14911_v7  ;;  %v2941_v23 = vadd.f32 %v2813_v2, %v2169_v0  ;;  %v3140_v51 = vmax.f32 %v3012_v60, 0.0  ;;  %v4306_v16 = vld [vmem:[%s16951_s5 + $0x1e0] sm:$0xff] }
 0x467   : > { %17320 = vst [vmem:[#allocation67_spill] sm:$0xff] %v14992_v9  ;;  %v3239_v34 = vpack.c.bf16 %v3138_v39, %v3137_v24  ;;  %v3073_v41 = vadd.f32 %v14988_v55, %v2938_v27  ;;  %v2748_v11 = vmul.f32 %v12948_v62, %v2396_v63  ;;  %v11234_v12 = vcombine.low %v4302_v53, %v4306_v16 }
 0x468   : > { %17321 = vst [vmem:[#allocation61_spill] sm:$0xff] %v14996_v13  ;;  %v2168_v39 = vadd.f32 %v2040_v54, %v1396_v8  ;;  %v3076_v21 = vadd.f32 %v14988_v55, %v2941_v23  ;;  %v11235_v56 = vcombine.high %v4302_v53, %v4306_v16  ;;  %v11236_v2 = vcombine.low %v4303_v45, %v4307_v30  ;;  %v15029_v54 = vld [vmem:[%s16951_s5 + $0x10] sm:$0xff]  ;;  %v15048_v8 = vld [vmem:[%s16951_s5 + $0x38] sm:$0xff] }
 0x469   : > { %v3201_v57 = vmax.f32 %v3073_v41, 0.0  ;;  %v2876_v40 = vadd.f32 %v2748_v11, %v2104_v47  ;;  %2683 = vperm.xlu1 %12040, %v14908_v25   ;;  %11731 = vmatprep.mubr.msk.bf16.mxu0 %vm3316_vm0, %v3239_v34  ;;  %v11237_v47 = vcombine.high %v4303_v45, %v4307_v30  ;;  %v15034_v34 = vld [vmem:[%s16951_s5 + $0x30] sm:$0xff]  ;;  %v15039_v41 = vld [vmem:[%s16951_s5 + $0x18] sm:$0xff] }
 0x46a   : > { %v2652_v20 = vpop.permute.xlu1 %2651  ;;  %v3204_v42 = vmax.f32 %v3076_v21, 0.0  ;;  %4644 = vmatprep.subr.bf16.mxu1 %v11235_v56  ;;  %v11185_v23 = vcombine.high %v15039_v41, %v15048_v8  ;;  %v17322_v45 = vld [vmem:[#allocation50_spill] sm:$0xff] }
 0x46b   : > { %v3271_v24 = vpack.c.bf16 %v3202_v59, %v3201_v57  ;;  %v3011_v4 = vadd.f32 %v14988_v55, %v2876_v40  ;;  %v2812_v28 = vmul.f32 %v12948_v62, %v2652_v20  ;;  %5317 = vmatprep.subr.bf16.mxu0 %v11237_v47  ;;  %4645 = vmatpush1.bf16.msra.mxu1 %v11234_v12 }
 0x46c   : > { %5318 = vmatpush1.bf16.msra.mxu0 %v11236_v2  ;;  %v11183_v59 = vcombine.high %v15029_v54, %v15034_v34  ;;  %v1335_v12 = vmul.f32 %v12940_v58, %v17322_v45 }
 0x46d   : > { %v3139_v7 = vmax.f32 %v3011_v4, 0.0  ;;  %v2940_v35 = vadd.f32 %v2812_v28, %v2168_v39  ;;  %11795 = vmatprep.mubr.msk.bf16.mxu1 %vm3316_vm0, %v3271_v24  ;;  %6649 = vmatprep.subr.bf16.mxu0 %v11185_v23  ;;  %v2408_v23 = vpop.permute.xlu0 %2407 }
 0x46e   : > { %5976 = vmatprep.subr.bf16.mxu1 %v11183_v59 }
 0x46f   : > { %v3240_v46 = vpack.c.bf16 %v3140_v51, %v3139_v7  ;;  %v3075_v10 = vadd.f32 %v14988_v55, %v2940_v35  ;;  %v917_v25 = vpop.permute.xlu1 %916 }
 0x471   : > { %v3203_v52 = vmax.f32 %v3075_v10, 0.0  ;;  %11732 = vmatmul.mubr.msk.bf16.gmra.mrb[52].mxu0 %vm3316_vm0, %v3240_v46 }
 0x473   : > { %v3272_v0 = vpack.c.bf16 %v3204_v42, %v3203_v52  ;;  %v1237_v27 = vpop.permute.xlu1 %1236 }
 0x475   : > { %11796 = vmatmul.mubr.msk.bf16.gmra.mrb[52].mxu1 %vm3316_vm0, %v3272_v0 }
 0x477   : > { %v1242_v63 = vpop.permute.xlu1 %1241 }
 0x47c   : > { %v1636_v57 = vpop.permute.xlu1 %1635 }
 0x47d   : > { %v1979_v10 = vmul.f32 %v12945_v61, %v1636_v57  ;;  %v1334_v57 = vmul.f32 %v12940_v58, %v917_v25 }
 0x47f   : > { %v2107_v2 = vadd.f32 %v1979_v10, %v1335_v12  ;;  %v17326_v12 = vld [vmem:[#allocation131_spill] sm:$0xff] }
 0x480   : > { %v1888_v40 = vpop.permute.xlu1 %1887  ;;  %v1980_v25 = vmul.f32 %v12945_v61, %v17326_v12 }
 0x485   : > { %v927_v20 = vpop.permute.xlu1 %926 }
 0x486   : > { %v1336_v10 = vmul.f32 %v12940_v58, %v927_v20 }
 0x489   : > { %v1247_v39 = vpop.permute.xlu1 %1246 }
 0x48d   : > { %v15054_v24 = vpop.permute.xlu1 %1251 }
 0x48e   : > { %v11785_v4 = vpop.f32.mrb[40].mxu1 }
 0x48f   : > { %v3968_v28 = vadd.f32 %v14672_v18, %v11785_v4  ;;  %v3959_v51 = vpop.f32.mrb[41].mxu1  ;;  %v2751_v4 = vmul.f32 %v12948_v62, %v2408_v23 }
 0x490   : > { %v3960_v21 = vadd.f32 %v14672_v18, %v3959_v51  ;;  %v11786_v7 = vpop.f32.mrb[42].mxu1  ;;  %v17325_v51 = vld [vmem:[#allocation128_spill] sm:$0xff] }
 0x491   : > { %v3971_v35 = vadd.f32 %v14672_v18, %v11786_v7  ;;  %v3962_v46 = vpop.f32.mrb[43].mxu1  ;;  %v4160_v53 = vmax.f32 %v3968_v28, 0.0  ;;  %v1978_v28 = vmul.f32 %v12945_v61, %v17325_v51  ;;  %v2879_v7 = vadd.f32 %v2751_v4, %v2107_v2  ;;  %v2412_v51 = vpop.permute.xlu0 %2411 }
 0x492   : > { %v3963_v42 = vadd.f32 %v14672_v18, %v3962_v46  ;;  %v1644_v52 = vpop.permute.xlu1 %1643  ;;  %v4158_v56 = vmax.f32 %v3960_v21, 0.0  ;;  %v2042_v21 = vmul.f32 %v12945_v61, %v1888_v40  ;;  %v2108_v4 = vadd.f32 %v1980_v25, %v1336_v10  ;;  %v17328_v25 = vld [vmem:[#allocation52_spill] sm:$0xff] }
 0x493   : > { %v4161_v16 = vmax.f32 %v3971_v35, 0.0  ;;  %v2106_v46 = vadd.f32 %v1978_v28, %v1334_v57  ;;  %v17327_v57 = vld [vmem:[#allocation129_spill] sm:$0xff]  ;;  %v1400_v10 = vmul.f32 %v12940_v58, %v1247_v39 }
 0x494   : > { %v4159_v30 = vmax.f32 %v3963_v42, 0.0  ;;  %v2043_v20 = vmul.f32 %v12945_v61, %v17327_v57 }
 0x495   : > { %v15063_v0 = vpack.c.bf16 %v4161_v16, %v4160_v53  ;;  %v1398_v53 = vmul.f32 %v12940_v58, %v1237_v27  ;;  %v3014_v16 = vadd.f32 %v14988_v55, %v2879_v7 }
 0x496   : > { %v15065_v47 = vpack.c.bf16 %v4159_v30, %v4158_v56  ;;  %v1896_v59 = vpop.permute.xlu1 %1895  ;;  %v1399_v30 = vmul.f32 %v12940_v58, %v1242_v63  ;;  %v1981_v63 = vmul.f32 %v12945_v61, %v1644_v52 }
 0x497   : > { %17323 = vst [vmem:[#allocation63_spill] sm:$0xff] %v15063_v0  ;;  %v2170_v2 = vadd.f32 %v2042_v21, %v1398_v53  ;;  %v3142_v27 = vmax.f32 %v3014_v16, 0.0 }
 0x498   : > { %17324 = vst [vmem:[#allocation66_spill] sm:$0xff] %v15065_v47  ;;  %v2171_v12 = vadd.f32 %v2043_v20, %v1399_v30  ;;  %v1401_v20 = vmul.f32 %v12940_v58, %v15054_v24 }
 0x49b   : > { %v2404_v35 = vpop.permute.xlu1 %2403 }
 0x49c   : > { %v2750_v42 = vmul.f32 %v12948_v62, %v2404_v35  ;;  %v2752_v35 = vmul.f32 %v12948_v62, %v2412_v51 }
 0x49e   : > { %v2878_v45 = vadd.f32 %v2750_v42, %v2106_v46  ;;  %v2044_v46 = vmul.f32 %v12945_v61, %v1896_v59 }
 0x49f   : > { %v2660_v56 = vpop.permute.xlu1 %2659 }
 0x4a0   : > { %v3013_v23 = vadd.f32 %v14988_v55, %v2878_v45  ;;  %v2814_v40 = vmul.f32 %v12948_v62, %v2660_v56  ;;  %v2880_v45 = vadd.f32 %v2752_v35, %v2108_v4  ;;  %v1337_v56 = vmul.f32 %v12940_v58, %v17328_v25 }
 0x4a2   : > { %v3141_v28 = vmax.f32 %v3013_v23, 0.0  ;;  %v2942_v7 = vadd.f32 %v2814_v40, %v2170_v2  ;;  %v2172_v23 = vadd.f32 %v2044_v46, %v1400_v10  ;;  %v2668_v40 = vpop.permute.xlu0 %2667  ;;  %v2109_v30 = vadd.f32 %v1981_v63, %v1337_v56 }
 0x4a3   : > { %v2664_v42 = vpop.permute.xlu1 %2663  ;;  %v2816_v4 = vmul.f32 %v12948_v62, %v2668_v40  ;;  %v3015_v39 = vadd.f32 %v14988_v55, %v2880_v45 }
 0x4a4   : > { %v3241_v21 = vpack.c.bf16 %v3142_v27, %v3141_v28  ;;  %v2815_v53 = vmul.f32 %v12948_v62, %v2664_v42  ;;  %v3077_v16 = vadd.f32 %v14988_v55, %v2942_v7  ;;  %v17329_v42 = vld [vmem:[#allocation133_spill] sm:$0xff] }
 0x4a5   : > { %v2944_v63 = vadd.f32 %v2816_v4, %v2172_v23 }
 0x4a6   : > { %v2943_v2 = vadd.f32 %v2815_v53, %v2171_v12  ;;  %11735 = vmatprep.mubr.msk.bf16.mxu0 %vm3316_vm0, %v3241_v21  ;;  %v3205_v27 = vmax.f32 %v3077_v16, 0.0  ;;  %v2045_v12 = vmul.f32 %v12945_v61, %v17329_v42  ;;  %v15104_v21 = vld [vmem:[%s16950_s4] ss:$0 sm:$0xff] }
 0x4a7   : > { %v2416_v59 = vpop.permute.xlu1 %2415 }
 0x4a8   : > { %v3078_v52 = vadd.f32 %v14988_v55, %v2943_v2  ;;  %v2753_v57 = vmul.f32 %v12948_v62, %v2416_v59  ;;  %v2173_v16 = vadd.f32 %v2045_v12, %v1401_v20  ;;  %v3143_v59 = vmax.f32 %v3015_v39, 0.0 }
 0x4a9   : > { %v11725_v51 = vpop.f32.mrb[44].mxu0 }
 0x4aa   : > { %v3206_v28 = vmax.f32 %v3078_v52, 0.0  ;;  %v2881_v7 = vadd.f32 %v2753_v57, %v2109_v30  ;;  %v3728_v35 = vadd.f32 %v14672_v18, %v11725_v51  ;;  %v3719_v46 = vpop.f32.mrb[45].mxu0  ;;  %v3079_v57 = vadd.f32 %v14988_v55, %v2944_v63 }
 0x4ab   : > { %v3720_v53 = vadd.f32 %v15104_v21, %v3719_v46  ;;  %v11726_v45 = vpop.f32.mrb[46].mxu0  ;;  %v2672_v24 = vpop.permute.xlu1 %2671 }
 0x4ac   : > { %v3273_v10 = vpack.c.bf16 %v3206_v28, %v3205_v27  ;;  %v3016_v25 = vadd.f32 %v14988_v55, %v2881_v7  ;;  %v3731_v56 = vadd.f32 %v15104_v21, %v11726_v45  ;;  %v3722_v18 = vpop.f32.mrb[47].mxu0  ;;  %v2817_v2 = vmul.f32 %v12948_v62, %v2672_v24 }
 0x4ad   : > { %v3723_v23 = vadd.f32 %v15104_v21, %v3722_v18  ;;  %v4100_v30 = vmax.f32 %v3728_v35, 0.0  ;;  %v4098_v4 = vmax.f32 %v3720_v53, 0.0  ;;  %v3207_v39 = vmax.f32 %v3079_v57, 0.0 }
 0x4ae   : > { %v3144_v40 = vmax.f32 %v3016_v25, 0.0  ;;  %v4101_v52 = vmax.f32 %v3731_v56, 0.0  ;;  %11799 = vmatprep.mubr.msk.bf16.mxu1 %vm3316_vm0, %v3273_v10  ;;  %v2945_v51 = vadd.f32 %v2817_v2, %v2173_v16 }
 0x4af   : > { %v4099_v27 = vmax.f32 %v3723_v23, 0.0 }
 0x4b0   : > { %v3242_v28 = vpack.c.bf16 %v3144_v40, %v3143_v59  ;;  %v15113_v7 = vpack.c.bf16 %v4101_v52, %v4100_v30  ;;  %v942_v46 = vpop.permute.xlu1 %941  ;;  %v3080_v20 = vadd.f32 %v14988_v55, %v2945_v51  ;;  %v2420_v52 = vpop.permute.xlu0 %2419 }
 0x4b1   : > { %v15116_v42 = vpack.c.bf16 %v4099_v27, %v4098_v4 }
 0x4b2   : > { %11736 = vmatmul.mubr.msk.bf16.gmra.mrb[56].mxu0 %vm3316_vm0, %v3242_v28  ;;  %v3208_v35 = vmax.f32 %v3080_v20, 0.0 }
 0x4b4   : > { %v1257_v12 = vpop.permute.xlu1 %1256  ;;  %v3274_v45 = vpack.c.bf16 %v3208_v35, %v3207_v39 }
 0x4b6   : > { %11800 = vmatmul.mubr.msk.bf16.gmra.mrb[56].mxu1 %vm3316_vm0, %v3274_v45 }
 0x4b9   : > { %v1648_v63 = vpop.permute.xlu1 %1647 }
 0x4ba   : > { %v1982_v39 = vmul.f32 %v12945_v61, %v1648_v63 }
 0x4bd   : > { %v1904_v53 = vpop.permute.xlu1 %1903 }
 0x4c1   : > { %v1908_v24 = vpop.permute.xlu1 %1907 }
 0x4c6   : > { %v952_v10 = vpop.permute.xlu1 %951 }
 0x4ca   : > { %v11789_v25 = vpop.f32.mrb[44].mxu1  ;;  %v15120_v56 = vpop.permute.xlu1 %1266 }
 0x4cb   : > { %v3984_v18 = vadd.f32 %v15104_v21, %v11789_v25  ;;  %v3975_v16 = vpop.f32.mrb[45].mxu1  ;;  %v17332_v25 = vld [vmem:[#allocation54_spill] sm:$0xff] }
 0x4cc   : > { %v3976_v2 = vadd.f32 %v15104_v21, %v3975_v16  ;;  %v11790_v23 = vpop.f32.mrb[46].mxu1  ;;  %v1338_v16 = vmul.f32 %v12940_v58, %v17332_v25  ;;  %v1341_v25 = vmul.f32 %v12940_v58, %v952_v10 }
 0x4cd   : > { %v3987_v59 = vadd.f32 %v15104_v21, %v11790_v23  ;;  %v3978_v40 = vpop.f32.mrb[47].mxu1  ;;  %v4164_v57 = vmax.f32 %v3984_v18, 0.0  ;;  %v2680_v23 = vpop.permute.xlu0 %2679  ;;  %v17333_v18 = vld [vmem:[#allocation55_spill] sm:$0xff] }
 0x4ce   : > { %v3979_v30 = vadd.f32 %v15104_v21, %v3978_v40  ;;  %v4162_v27 = vmax.f32 %v3976_v2, 0.0  ;;  %v2110_v11 = vadd.f32 %v1982_v39, %v1338_v16  ;;  %v2047_v40 = vmul.f32 %v12945_v61, %v1908_v24  ;;  %v17335_v24 = vld [vmem:[#allocation21_spill] sm:$0xff] }
 0x4cf   : > { %v4165_v4 = vmax.f32 %v3987_v59, 0.0  ;;  %v1656_v51 = vpop.permute.xlu1 %1655  ;;  %v1403_v59 = vmul.f32 %v12940_v58, %v17333_v18  ;;  %v2754_v2 = vmul.f32 %v12948_v62, %v2420_v52  ;;  %v2819_v39 = vmul.f32 %v12948_v62, %v2680_v23 }
 0x4d0   : > { %v4163_v28 = vmax.f32 %v3979_v30, 0.0  ;;  %v1339_v30 = vmul.f32 %v12940_v58, %v942_v46  ;;  %v2046_v18 = vmul.f32 %v12945_v61, %v1904_v53  ;;  %v1984_v0 = vmul.f32 %v12945_v61, %v1656_v51 }
 0x4d1   : > { %v15126_v20 = vpack.c.bf16 %v4165_v4, %v4164_v57  ;;  %v2882_v57 = vadd.f32 %v2754_v2, %v2110_v11  ;;  %v2175_v63 = vadd.f32 %v2047_v40, %v1403_v59  ;;  %v17334_v4 = vld [vmem:[#allocation8_spill] sm:$0xff]  ;;  %v1402_v40 = vmul.f32 %v12940_v58, %v1257_v12 }
 0x4d2   : > { %v15129_v35 = vpack.c.bf16 %v4163_v28, %v4162_v27  ;;  %v1983_v27 = vmul.f32 %v12945_v61, %v17334_v4  ;;  %v2432_v28 = vpop.permute.xlu0 %2431  ;;  %v17336_v4 = vld [vmem:[#allocation59_spill] sm:$0xff] }
 0x4d3   : > { %17330 = vst [vmem:[#allocation43_spill] sm:$0xff] %v15126_v20  ;;  %v1912_v45 = vpop.permute.xlu1 %1911  ;;  %v1985_v20 = vmul.f32 %v12945_v61, %v17335_v24  ;;  %v3017_v11 = vadd.f32 %v14988_v55, %v2882_v57  ;;  %v2947_v46 = vadd.f32 %v2819_v39, %v2175_v63  ;;  %v1405_v23 = vmul.f32 %v12940_v58, %v17336_v4  ;;  %v17337_v63 = vld [vmem:[#allocation57_spill] sm:$0xff] }
 0x4d4   : > { %17331 = vst [vmem:[#allocation68_spill] sm:$0xff] %v15129_v35  ;;  %v2111_v35 = vadd.f32 %v1983_v27, %v1339_v30  ;;  %v2757_v30 = vmul.f32 %v12948_v62, %v2432_v28  ;;  %v2174_v27 = vadd.f32 %v2046_v18, %v1402_v40  ;;  %v1340_v12 = vmul.f32 %v12940_v58, %v17337_v63 }
 0x4d5   : > { %v2113_v59 = vadd.f32 %v1985_v20, %v1341_v25  ;;  %v3145_v20 = vmax.f32 %v3017_v11, 0.0  ;;  %v2048_v18 = vmul.f32 %v12945_v61, %v1912_v45  ;;  %v1404_v11 = vmul.f32 %v12940_v58, %v15120_v56 }
 0x4d6   : > { %v2688_v53 = vpop.permute.xlu0 %2687  ;;  %v2112_v4 = vadd.f32 %v1984_v0, %v1340_v12 }
 0x4d7   : > { %v1916_v60 = vpop.permute.xlu1 %1915  ;;  %v2821_v51 = vmul.f32 %v12948_v62, %v2688_v53 }
 0x4d8   : > { %v2049_v2 = vmul.f32 %v12945_v61, %v1916_v60  ;;  %v3082_v60 = vadd.f32 %v14988_v55, %v2947_v46 }
 0x4da   : > { %v2177_v25 = vadd.f32 %v2049_v2, %v1405_v23  ;;  %v3210_v47 = vmax.f32 %v3082_v60, 0.0  ;;  %v4261_v60 = vld [vmem:[%s16951_s5 + $0x78] sm:$0xff] }
 0x4dc   : > { %v2424_v16 = vpop.permute.xlu1 %2423 }
 0x4dd   : > { %v2755_v52 = vmul.f32 %v12948_v62, %v2424_v16 }
 0x4df   : > { %v2883_v10 = vadd.f32 %v2755_v52, %v2111_v35  ;;  %v2885_v35 = vadd.f32 %v2757_v30, %v2113_v59  ;;  %v2949_v59 = vadd.f32 %v2821_v51, %v2177_v25  ;;  %v2176_v30 = vadd.f32 %v2048_v18, %v1404_v11  ;;  %v4260_v25 = vld [vmem:[%s16951_s5 + $0x70] sm:$0xff]  ;;  %v4269_v51 = vld [vmem:[%s16951_s5 + $0xb8] sm:$0xff] }
 0x4e0   : > { %v2676_v24 = vpop.permute.xlu1 %2675  ;;  %v4264_v18 = vld [vmem:[%s16951_s5 + $0x90] sm:$0xff] }
 0x4e1   : > { %v3018_v16 = vadd.f32 %v14988_v55, %v2883_v10  ;;  %v2818_v57 = vmul.f32 %v12948_v62, %v2676_v24  ;;  %v3020_v46 = vadd.f32 %v14988_v55, %v2885_v35  ;;  %v4256_v35 = vld [vmem:[%s16951_s5 + $0x50] sm:$0xff] }
 0x4e3   : > { %v3146_v39 = vmax.f32 %v3018_v16, 0.0  ;;  %v2946_v52 = vadd.f32 %v2818_v57, %v2174_v27  ;;  %v3148_v27 = vmax.f32 %v3020_v46, 0.0  ;;  %v3084_v16 = vadd.f32 %v14988_v55, %v2949_v59 }
 0x4e4   : > { %v2428_v28 = vpop.permute.xlu1 %2427 }
 0x4e5   : > { %v3243_v40 = vpack.c.bf16 %v3146_v39, %v3145_v20  ;;  %v3081_v10 = vadd.f32 %v14988_v55, %v2946_v52  ;;  %v2756_v24 = vmul.f32 %v12948_v62, %v2428_v28  ;;  %v3212_v12 = vmax.f32 %v3084_v16, 0.0  ;;  %v4265_v39 = vld [vmem:[%s16951_s5 + $0x98] sm:$0xff] }
 0x4e6   : > { %v17338_v52 = vcombine.low %v15039_v41, %v15048_v8  ;;  %v17339_v41 = vcombine.low %v15029_v54, %v15034_v34  ;;  %v11190_v8 = vcombine.low %v4256_v35, %v4260_v25  ;;  %v11200_v11 = vcombine.low %v4265_v39, %v4269_v51 }
 0x4e7   : > { %v3209_v2 = vmax.f32 %v3081_v10, 0.0  ;;  %v2884_v23 = vadd.f32 %v2756_v24, %v2112_v4  ;;  %11739 = vmatprep.mubr.msk.bf16.mxu0 %vm3316_vm0, %v3243_v40  ;;  %v11191_v4 = vcombine.high %v4256_v35, %v4260_v25  ;;  %v4268_v40 = vld [vmem:[%s16951_s5 + $0xb0] sm:$0xff]  ;;  %v11201_v10 = vcombine.high %v4265_v39, %v4269_v51 }
 0x4e8   : > { %v2684_v0 = vpop.permute.xlu1 %2683  ;;  %v11199_v24 = vcombine.high %v4264_v18, %v4268_v40  ;;  %v11198_v46 = vcombine.low %v4264_v18, %v4268_v40  ;;  %v4276_v18 = vld [vmem:[%s16951_s5 + $0xf0] sm:$0xff]  ;;  %v4273_v40 = vld [vmem:[%s16951_s5 + $0xd8] sm:$0xff] }
 0x4e9   : > { %v3275_v53 = vpack.c.bf16 %v3210_v47, %v3209_v2  ;;  %v3019_v61 = vadd.f32 %v14988_v55, %v2884_v23  ;;  %v2820_v45 = vmul.f32 %v12948_v62, %v2684_v0  ;;  %v4257_v62 = vld [vmem:[%s16951_s5 + $0x58] sm:$0xff] }
 0x4ea   : > { %v11192_v28 = vcombine.low %v4257_v62, %v4261_v60 }
 0x4eb   : > { %v3147_v57 = vmax.f32 %v3019_v61, 0.0  ;;  %v2948_v63 = vadd.f32 %v2820_v45, %v2176_v30  ;;  %11803 = vmatprep.mubr.msk.bf16.mxu1 %vm3316_vm0, %v3275_v53 }
 0x4ed   : > { %v3244_v58 = vpack.c.bf16 %v3148_v27, %v3147_v57  ;;  %v3083_v56 = vadd.f32 %v14988_v55, %v2948_v63  ;;  %v11193_v55 = vcombine.high %v4257_v62, %v4261_v60 }
 0x4ef   : > { %v3211_v20 = vmax.f32 %v3083_v56, 0.0  ;;  %11740 = vmatmul.mubr.msk.bf16.gmra.mrb[60].mxu0 %vm3316_vm0, %v3244_v58 }
 0x4f0   : > { %5335 = vmatprep.mubr.bf16.mxu0 %v17057_v38 }
 0x4f1   : > { %v3276_v47 = vpack.c.bf16 %v3212_v12, %v3211_v20 }
 0x4f3   : > { %11804 = vmatmul.mubr.msk.bf16.gmra.mrb[60].mxu1 %vm3316_vm0, %v3276_v47 }
 0x4f4   : > { %4662 = vmatprep.mubr.bf16.mxu1 %v17057_v38 }
 0x4f7   : > { %5336 = vmatmul.mubr.bf16.vlgmr.msra.gmra.mrb[64].mxu0 %v13855_v29 }
 0x4f8   : > { %6650 = vmatpush1.bf16.msra.mxu0 %v17338_v52  ;;  %5345 = vmatprep.mubr.bf16.mxu0 %v17057_v38 }
 0x4f9   : > { %6651 = vmatprep.subr.bf16.mxu0 %v11193_v55 }
 0x4fb   : > { %4663 = vmatmul.mubr.bf16.vlgmr.msra.gmra.mrb[64].mxu1 %v13855_v29 }
 0x4fc   : > { %5977 = vmatpush1.bf16.msra.mxu1 %v17339_v41  ;;  %4672 = vmatprep.mubr.bf16.mxu1 %v17057_v38 }
 0x4fd   : > { %5978 = vmatprep.subr.bf16.mxu1 %v11191_v4  ;;  %6652 = vmatpush1.bf16.msra.mxu0 %v11192_v28  ;;  %v4272_v28 = vld [vmem:[%s16951_s5 + $0xd0] sm:$0xff] }
 0x4fe   : > { %6653 = vmatprep.subr.bf16.mxu0 %v11201_v10  ;;  %v11206_v10 = vcombine.low %v4272_v28, %v4276_v18  ;;  %v11207_v41 = vcombine.high %v4272_v28, %v4276_v18 }
 0x4ff   : > { %5346 = vmatmul.mubr.bf16.gmra.mrb[68].mxu0 %v13849_v6 }
 0x500   : > { %5355 = vmatprep.mubr.bf16.mxu0 %v17057_v38  ;;  %5979 = vmatpush1.bf16.msra.mxu1 %v11190_v8  ;;  %v4277_v8 = vld [vmem:[%s16951_s5 + $0xf8] sm:$0xff] }
 0x501   : > { %5980 = vmatprep.subr.bf16.mxu1 %v11199_v24  ;;  %6654 = vmatpush1.bf16.msra.mxu0 %v11200_v11  ;;  %v11208_v24 = vcombine.low %v4273_v40, %v4277_v8  ;;  %v11209_v11 = vcombine.high %v4273_v40, %v4277_v8  ;;  %v4281_v8 = vld [vmem:[%s16951_s5 + $0x118] sm:$0xff] }
 0x503   : > { %4673 = vmatmul.mubr.bf16.gmra.mrb[68].mxu1 %v13849_v6  ;;  %6655 = vmatprep.subr.bf16.mxu0 %v11209_v11 }
 0x504   : > { %4682 = vmatprep.mubr.bf16.mxu1 %v17057_v38  ;;  %5981 = vmatpush1.bf16.msra.mxu1 %v11198_v46 }
 0x505   : > { %5982 = vmatprep.subr.bf16.mxu1 %v11207_v41  ;;  %6656 = vmatpush1.bf16.msra.mxu0 %v11208_v24  ;;  %v4284_v41 = vld [vmem:[%s16951_s5 + $0x130] sm:$0xff] }
 0x507   : > { %v11729_v54 = vpop.f32.mrb[48].mxu0  ;;  %5356 = vmatmul.mubr.bf16.gmra.mrb[72].mxu0 %v14310_v3 }
 0x508   : > { %v3744_v34 = vadd.f32 %v15104_v21, %v11729_v54  ;;  %v3735_v59 = vpop.f32.mrb[49].mxu0  ;;  %5365 = vmatprep.mubr.bf16.mxu0 %v17057_v38  ;;  %5983 = vmatpush1.bf16.msra.mxu1 %v11206_v10  ;;  %v4280_v10 = vld [vmem:[%s16951_s5 + $0x110] sm:$0xff] }
 0x509   : > { %v3736_v2 = vadd.f32 %v15104_v21, %v3735_v59  ;;  %v11730_v23 = vpop.f32.mrb[50].mxu0  ;;  %v11214_v24 = vcombine.low %v4280_v10, %v4284_v41  ;;  %v11215_v11 = vcombine.high %v4280_v10, %v4284_v41 }
 0x50a   : > { %v3747_v0 = vadd.f32 %v15104_v21, %v11730_v23  ;;  %v3738_v30 = vpop.f32.mrb[51].mxu0  ;;  %v4104_v45 = vmax.f32 %v3744_v34, 0.0 }
 0x50b   : > { %v3739_v53 = vadd.f32 %v15104_v21, %v3738_v30  ;;  %v11793_v61 = vpop.f32.mrb[48].mxu1  ;;  %4683 = vmatmul.mubr.bf16.gmra.mrb[72].mxu1 %v14310_v3  ;;  %v4102_v63 = vmax.f32 %v3736_v2, 0.0  ;;  %5984 = vmatprep.subr.bf16.mxu1 %v11215_v11 }
 0x50c   : > { %v4105_v27 = vmax.f32 %v3747_v0, 0.0  ;;  %v4000_v16 = vadd.f32 %v15104_v21, %v11793_v61  ;;  %v3991_v57 = vpop.f32.mrb[49].mxu1  ;;  %4692 = vmatprep.mubr.bf16.mxu1 %v17057_v38  ;;  %5985 = vmatpush1.bf16.msra.mxu1 %v11214_v24 }
 0x50d   : > { %v4103_v58 = vmax.f32 %v3739_v53, 0.0  ;;  %v3992_v56 = vadd.f32 %v15104_v21, %v3991_v57  ;;  %v11794_v12 = vpop.f32.mrb[50].mxu1 }
 0x50e   : > { %v15223_v20 = vpack.c.bf16 %v4105_v27, %v4104_v45  ;;  %v4003_v47 = vadd.f32 %v15104_v21, %v11794_v12  ;;  %v3994_v62 = vpop.f32.mrb[51].mxu1  ;;  %v4168_v35 = vmax.f32 %v4000_v16, 0.0 }
 0x50f   : > { %v15226_v60 = vpack.c.bf16 %v4103_v58, %v4102_v63  ;;  %v3995_v55 = vadd.f32 %v15104_v21, %v3994_v62  ;;  %5366 = vmatmul.mubr.bf16.gmra.mrb[76].mxu0 %v14308_v19  ;;  %v4166_v39 = vmax.f32 %v3992_v56, 0.0 }
 0x510   : > { %v4169_v25 = vmax.f32 %v4003_v47, 0.0  ;;  %5375 = vmatprep.mubr.bf16.mxu0 %v17057_v38 }
 0x511   : > { %v4167_v52 = vmax.f32 %v3995_v55, 0.0 }
 0x512   : > { %v15231_v51 = vpack.c.bf16 %v4169_v25, %v4168_v35 }
 0x513   : > { %v15233_v4 = vpack.c.bf16 %v4167_v52, %v4166_v39  ;;  %4693 = vmatmul.mubr.bf16.gmra.mrb[76].mxu1 %v14308_v19 }
 0x514   : > { %4702 = vmatprep.mubr.bf16.mxu1 %v17057_v38 }
 0x517   : > { %5376 = vmatmul.mubr.bf16.gmra.mrb[80].mxu0 %v14330_v44 }
 0x518   : > { %5385 = vmatprep.mubr.bf16.mxu0 %v17057_v38 }
 0x51b   : > { %4703 = vmatmul.mubr.bf16.gmra.mrb[80].mxu1 %v14330_v44 }
 0x51c   : > { %4712 = vmatprep.mubr.bf16.mxu1 %v17057_v38 }
 0x51f   : > { %5386 = vmatmul.mubr.bf16.gmra.mrb[84].mxu0 %v14327_v26 }
 0x520   : > { %5395 = vmatprep.mubr.bf16.mxu0 %v17057_v38 }
 0x523   : > { %4713 = vmatmul.mubr.bf16.gmra.mrb[84].mxu1 %v14327_v26 }
 0x524   : > { %4722 = vmatprep.mubr.bf16.mxu1 %v17057_v38 }
 0x527   : > { %5396 = vmatmul.mubr.bf16.gmra.mrb[88].mxu0 %v14349_v33 }
 0x528   : > { %5405 = vmatprep.mubr.bf16.mxu0 %v17057_v38 }
 0x52b   : > { %4723 = vmatmul.mubr.bf16.gmra.mrb[88].mxu1 %v14349_v33 }
 0x52c   : > { %4732 = vmatprep.mubr.bf16.mxu1 %v17057_v38 }
 0x52f   : > { %5406 = vmatmul.mubr.bf16.gmra.mrb[92].mxu0 %v14347_v5 }
 0x530   : > { %5415 = vmatprep.mubr.bf16.mxu0 %v17057_v38 }
 0x533   : > { %4733 = vmatmul.mubr.bf16.gmra.mrb[92].mxu1 %v14347_v5 }
 0x534   : > { %4742 = vmatprep.mubr.bf16.mxu1 %v17057_v38 }
 0x537   : > { %5416 = vmatmul.mubr.bf16.gmra.mrb[96].mxu0 %v14374_v22 }
 0x538   : > { %5425 = vmatprep.mubr.bf16.mxu0 %v17057_v38 }
 0x53b   : > { %4743 = vmatmul.mubr.bf16.gmra.mrb[96].mxu1 %v14374_v22 }
 0x53c   : > { %4752 = vmatprep.mubr.bf16.mxu1 %v17057_v38 }
 0x53f   : > { %5426 = vmatmul.mubr.bf16.gmra.mrb[100].mxu0 %v14371_v31 }
 0x540   : > { %5435 = vmatprep.mubr.bf16.mxu0 %v17057_v38 }
 0x543   : > { %4753 = vmatmul.mubr.bf16.gmra.mrb[100].mxu1 %v14371_v31 }
 0x544   : > { %v11733_v46 = vpop.f32.mrb[52].mxu0  ;;  %4762 = vmatprep.mubr.bf16.mxu1 %v17057_v38 }
 0x545   : > { %v3760_v54 = vadd.f32 %v15104_v21, %v11733_v46  ;;  %v3751_v34 = vpop.f32.mrb[53].mxu0  ;;  %v4285_v46 = vld [vmem:[%s16951_s5 + $0x138] sm:$0xff] }
 0x546   : > { %v3752_v59 = vadd.f32 %v15104_v21, %v3751_v34  ;;  %v11734_v2 = vpop.f32.mrb[54].mxu0  ;;  %v11217_v34 = vcombine.high %v4281_v8, %v4285_v46 }
 0x547   : > { %v3763_v23 = vadd.f32 %v15104_v21, %v11734_v2  ;;  %v3754_v0 = vpop.f32.mrb[55].mxu0  ;;  %5436 = vmatmul.mubr.bf16.gmra.mrb[104].mxu0 %v14399_v14  ;;  %v4108_v61 = vmax.f32 %v3760_v54, 0.0  ;;  %v11216_v54 = vcombine.low %v4281_v8, %v4285_v46 }
 0x548   : > { %v3755_v30 = vadd.f32 %v15104_v21, %v3754_v0  ;;  %v11797_v53 = vpop.f32.mrb[52].mxu1  ;;  %5445 = vmatprep.mubr.bf16.mxu0 %v17057_v38  ;;  %v4106_v57 = vmax.f32 %v3752_v59, 0.0  ;;  %6657 = vmatprep.subr.bf16.mxu0 %v11217_v34  ;;  %v17340_v34 = vld [vmem:[#allocation60_spill] sm:$0xff] }
 0x549   : > { %v4109_v45 = vmax.f32 %v3763_v23, 0.0  ;;  %v4016_v27 = vadd.f32 %v15104_v21, %v11797_v53  ;;  %v4007_v16 = vpop.f32.mrb[53].mxu1  ;;  %6658 = vmatpush1.bf16.msra.mxu0 %v11216_v54 }
 0x54a   : > { %v4107_v63 = vmax.f32 %v3755_v30, 0.0  ;;  %v4008_v58 = vadd.f32 %v15104_v21, %v4007_v16  ;;  %v11798_v56 = vpop.f32.mrb[54].mxu1 }
 0x54b   : > { %v15281_v12 = vpack.c.bf16 %v4109_v45, %v4108_v61  ;;  %v4019_v47 = vadd.f32 %v15104_v21, %v11798_v56  ;;  %v4010_v62 = vpop.f32.mrb[55].mxu1  ;;  %4763 = vmatmul.mubr.bf16.gmra.mrb[104].mxu1 %v14399_v14  ;;  %v4172_v25 = vmax.f32 %v4016_v27, 0.0 }
 0x54c   : > { %v15285_v55 = vpack.c.bf16 %v4107_v63, %v4106_v57  ;;  %v4011_v35 = vadd.f32 %v15104_v21, %v4010_v62  ;;  %4772 = vmatprep.mubr.bf16.mxu1 %v17057_v38  ;;  %v4170_v52 = vmax.f32 %v4008_v58, 0.0 }
 0x54d   : > { %v4173_v39 = vmax.f32 %v4019_v47, 0.0 }
 0x54e   : > { %v4171_v28 = vmax.f32 %v4011_v35, 0.0 }
 0x54f   : > { %v15289_v18 = vpack.c.bf16 %v4173_v39, %v4172_v25  ;;  %5446 = vmatmul.mubr.bf16.gmra.mrb[108].mxu0 %v14394_v15 }
 0x550   : > { %v15292_v40 = vpack.c.bf16 %v4171_v28, %v4170_v52  ;;  %5455 = vmatprep.mubr.bf16.mxu0 %v17057_v38 }
 0x553   : > { %4773 = vmatmul.mubr.bf16.gmra.mrb[108].mxu1 %v14394_v15 }
 0x554   : > { %4782 = vmatprep.mubr.bf16.mxu1 %v17057_v38 }
 0x557   : > { %5456 = vmatmul.mubr.bf16.gmra.mrb[112].mxu0 %v14420_v49 }
 0x558   : > { %5465 = vmatprep.mubr.bf16.mxu0 %v17057_v38 }
 0x55b   : > { %4783 = vmatmul.mubr.bf16.gmra.mrb[112].mxu1 %v14420_v49 }
 0x55c   : > { %4792 = vmatprep.mubr.bf16.mxu1 %v17057_v38 }
 0x55f   : > { %5466 = vmatmul.mubr.bf16.gmra.mrb[116].mxu0 %v14416_v50 }
 0x560   : > { %5475 = vmatprep.mubr.bf16.mxu0 %v17057_v38 }
 0x563   : > { %4793 = vmatmul.mubr.bf16.gmra.mrb[116].mxu1 %v14416_v50 }
 0x564   : > { %4802 = vmatprep.mubr.bf16.mxu1 %v17057_v38 }
 0x567   : > { %5476 = vmatmul.mubr.bf16.gmra.mrb[120].mxu0 %v14459_v32 }
 0x568   : > { %5485 = vmatprep.mubr.bf16.mxu0 %v17057_v38 }
 0x56b   : > { %4803 = vmatmul.mubr.bf16.gmra.mrb[120].mxu1 %v14459_v32 }
 0x56c   : > { %4812 = vmatprep.mubr.bf16.mxu1 %v17057_v38 }
 0x56f   : > { %5486 = vmatmul.mubr.bf16.gmra.mrb[124].mxu0 %v14456_v43 }
 0x570   : > { %5495 = vmatprep.mubr.bf16.mxu0 %v17057_v38 }
 0x573   : > { %4813 = vmatmul.mubr.bf16.gmra.mrb[124].mxu1 %v14456_v43 }
 0x574   : > { %4822 = vmatprep.mubr.bf16.mxu1 %v17057_v38 }
 0x577   : > { %5496 = vmatmul.mubr.bf16.gmra.mrb[128].mxu0 %v14538_v48 }
 0x578   : > { %5505 = vmatprep.mubr.bf16.mxu0 %v17057_v38 }
 0x57b   : > { %4823 = vmatmul.mubr.bf16.gmra.mrb[128].mxu1 %v14538_v48 }
 0x57c   : > { %4832 = vmatprep.mubr.bf16.mxu1 %v17057_v38 }
 0x57f   : > { %5506 = vmatmul.mubr.bf16.gmra.mrb[132].mxu0 %v14536_v36 }
 0x580   : > { %5515 = vmatprep.mubr.bf16.mxu0 %v17057_v38 }
 0x583   : > { %4833 = vmatmul.mubr.bf16.gmra.mrb[132].mxu1 %v14536_v36 }
 0x584   : > { %4842 = vmatprep.mubr.bf16.mxu1 %v17057_v38 }
 0x585   : > { %v11737_v59 = vpop.f32.mrb[56].mxu0 }
 0x586   : > { %v3776_v2 = vadd.f32 %v15104_v21, %v11737_v59  ;;  %v3767_v23 = vpop.f32.mrb[57].mxu0  ;;  %v4288_v59 = vld [vmem:[%s16951_s5 + $0x150] sm:$0xff] }
 0x587   : > { %v3768_v0 = vadd.f32 %v15104_v21, %v3767_v23  ;;  %v11738_v30 = vpop.f32.mrb[58].mxu0  ;;  %5516 = vmatmul.mubr.bf16.gmra.mrb[136].mxu0 %v14683_v37  ;;  %v4289_v23 = vld [vmem:[%s16951_s5 + $0x158] sm:$0xff] }
 0x588   : > { %v3779_v53 = vadd.f32 %v15104_v21, %v11738_v30  ;;  %v3770_v61 = vpop.f32.mrb[59].mxu0  ;;  %5525 = vmatprep.mubr.bf16.mxu0 %v17057_v38  ;;  %v4112_v27 = vmax.f32 %v3776_v2, 0.0  ;;  %v4292_v2 = vld [vmem:[%s16951_s5 + $0x170] sm:$0xff] }
 0x589   : > { %v3771_v45 = vadd.f32 %v15104_v21, %v3770_v61  ;;  %v11801_v57 = vpop.f32.mrb[56].mxu1  ;;  %v4110_v63 = vmax.f32 %v3768_v0, 0.0  ;;  %v11222_v0 = vcombine.low %v4288_v59, %v4292_v2  ;;  %v11223_v30 = vcombine.high %v4288_v59, %v4292_v2 }
 0x58a   : > { %v4113_v16 = vmax.f32 %v3779_v53, 0.0  ;;  %v4032_v56 = vadd.f32 %v15104_v21, %v11801_v57  ;;  %v4023_v47 = vpop.f32.mrb[57].mxu1  ;;  %v4293_v53 = vld [vmem:[%s16951_s5 + $0x178] sm:$0xff] }
 0x58b   : > { %v4111_v58 = vmax.f32 %v3771_v45, 0.0  ;;  %4843 = vmatmul.mubr.bf16.gmra.mrb[136].mxu1 %v14683_v37  ;;  %v4024_v35 = vadd.f32 %v15104_v21, %v4023_v47  ;;  %v11802_v25 = vpop.f32.mrb[58].mxu1  ;;  %v11224_v61 = vcombine.low %v4289_v23, %v4293_v53  ;;  %v11225_v45 = vcombine.high %v4289_v23, %v4293_v53  ;;  %5986 = vmatprep.subr.bf16.mxu1 %v11223_v30 }
 0x58c   : > { %v15341_v62 = vpack.c.bf16 %v4113_v16, %v4112_v27  ;;  %4852 = vmatprep.mubr.bf16.mxu1 %v17057_v38  ;;  %v4035_v52 = vadd.f32 %v15104_v21, %v11802_v25  ;;  %v4026_v28 = vpop.f32.mrb[59].mxu1  ;;  %v4176_v41 = vmax.f32 %v4032_v56, 0.0  ;;  %5987 = vmatpush1.bf16.msra.mxu1 %v11222_v0 }
 0x58d   : > { %v15345_v39 = vpack.c.bf16 %v4111_v58, %v4110_v63  ;;  %v4027_v10 = vadd.f32 %v15104_v21, %v4026_v28  ;;  %v4174_v24 = vmax.f32 %v4024_v35, 0.0  ;;  %6659 = vmatprep.subr.bf16.mxu0 %v11225_v45 }
 0x58e   : > { %v4177_v8 = vmax.f32 %v4035_v52, 0.0  ;;  %6660 = vmatpush1.bf16.msra.mxu0 %v11224_v61 }
 0x58f   : > { %5526 = vmatmul.mubr.bf16.gmra.mrb[140].mxu0 %v14681_v17  ;;  %v4175_v11 = vmax.f32 %v4027_v10, 0.0 }
 0x590   : > { %5535 = vmatprep.mubr.bf16.mxu0 %v17057_v38  ;;  %v15351_v46 = vpack.c.bf16 %v4177_v8, %v4176_v41 }
 0x591   : > { %v15353_v54 = vpack.c.bf16 %v4175_v11, %v4174_v24 }
 0x593   : > { %4853 = vmatmul.mubr.bf16.gmra.mrb[140].mxu1 %v14681_v17 }
 0x594   : > { %4862 = vmatprep.mubr.bf16.mxu1 %v17057_v38 }
 0x597   : > { %5536 = vmatmul.mubr.bf16.gmra.mrb[144].mxu0 %v14903_v1 }
 0x598   : > { %5545 = vmatprep.mubr.bf16.mxu0 %v17057_v38 }
 0x59b   : > { %4863 = vmatmul.mubr.bf16.gmra.mrb[144].mxu1 %v14903_v1 }
 0x59c   : > { %4872 = vmatprep.mubr.bf16.mxu1 %v17057_v38 }
 0x59f   : > { %5546 = vmatmul.mubr.bf16.gmra.mrb[148].mxu0 %v17340_v34 }
 0x5a0   : > { %5555 = vmatprep.mubr.bf16.mxu0 %v17057_v38 }
 0x5a3   : > { %4873 = vmatmul.mubr.bf16.gmra.mrb[148].mxu1 %v17340_v34 }
 0x5a4   : > { %4882 = vmatprep.mubr.bf16.mxu1 %v17057_v38 }
 0x5a7   : > { %5556 = vmatmul.mubr.bf16.gmra.mrb[152].mxu0 %v15116_v42 }
 0x5a8   : > { %5565 = vmatprep.mubr.bf16.mxu0 %v17057_v38 }
 0x5ab   : > { %4883 = vmatmul.mubr.bf16.gmra.mrb[152].mxu1 %v15116_v42 }
 0x5ac   : > { %4892 = vmatprep.mubr.bf16.mxu1 %v17057_v38 }
 0x5af   : > { %5566 = vmatmul.mubr.bf16.gmra.mrb[156].mxu0 %v15113_v7 }
 0x5b0   : > { %5575 = vmatprep.mubr.bf16.mxu0 %v17057_v38 }
 0x5b3   : > { %4893 = vmatmul.mubr.bf16.gmra.mrb[156].mxu1 %v15113_v7 }
 0x5b4   : > { %4902 = vmatprep.mubr.bf16.mxu1 %v17057_v38 }
 0x5b7   : > { %5576 = vmatmul.mubr.bf16.gmra.mrb[160].mxu0 %v15226_v60 }
 0x5b8   : > { %5585 = vmatprep.mubr.bf16.mxu0 %v17057_v38 }
 0x5bb   : > { %4903 = vmatmul.mubr.bf16.gmra.mrb[160].mxu1 %v15226_v60 }
 0x5bc   : > { %4912 = vmatprep.mubr.bf16.mxu1 %v17057_v38 }
 0x5bf   : > { %5586 = vmatmul.mubr.bf16.gmra.mrb[164].mxu0 %v15223_v20 }
 0x5c0   : > { %5595 = vmatprep.mubr.bf16.mxu0 %v17057_v38 }
 0x5c2   : > { %v11741_v27 = vpop.f32.mrb[60].mxu0 }
 0x5c3   : > { %v3792_v16 = vadd.f32 %v15104_v21, %v11741_v27  ;;  %v3783_v57 = vpop.f32.mrb[61].mxu0  ;;  %4913 = vmatmul.mubr.bf16.gmra.mrb[164].mxu1 %v15223_v20 }
 0x5c4   : > { %v3784_v63 = vadd.f32 %v15104_v21, %v3783_v57  ;;  %v11742_v58 = vpop.f32.mrb[62].mxu0  ;;  %4922 = vmatprep.mubr.bf16.mxu1 %v17057_v38 }
 0x5c5   : > { %v3795_v56 = vadd.f32 %v15104_v21, %v11742_v58  ;;  %v3786_v47 = vpop.f32.mrb[63].mxu0  ;;  %v4116_v52 = vmax.f32 %v3792_v16, 0.0 }
 0x5c6   : > { %v3787_v35 = vadd.f32 %v15104_v21, %v3786_v47  ;;  %v11805_v25 = vpop.f32.mrb[60].mxu1  ;;  %v4114_v8 = vmax.f32 %v3784_v63, 0.0 }
 0x5c7   : > { %v4117_v28 = vmax.f32 %v3795_v56, 0.0  ;;  %v4048_v10 = vadd.f32 %v15104_v21, %v11805_v25  ;;  %v4039_v41 = vpop.f32.mrb[61].mxu1  ;;  %5596 = vmatmul.mubr.bf16.gmra.mrb[168].mxu0 %v15285_v55 }
 0x5c8   : > { %v4115_v24 = vmax.f32 %v3787_v35, 0.0  ;;  %v4040_v11 = vadd.f32 %v15104_v21, %v4039_v41  ;;  %v11806_v59 = vpop.f32.mrb[62].mxu1  ;;  %5605 = vmatprep.mubr.bf16.mxu0 %v17057_v38 }
 0x5c9   : > { %v15401_v2 = vpack.c.bf16 %v4117_v28, %v4116_v52  ;;  %v4051_v23 = vadd.f32 %v15104_v21, %v11806_v59  ;;  %v4042_v0 = vpop.f32.mrb[63].mxu1  ;;  %v4180_v45 = vmax.f32 %v4048_v10, 0.0 }
 0x5ca   : > { %v15404_v30 = vpack.c.bf16 %v4115_v24, %v4114_v8  ;;  %v4043_v53 = vadd.f32 %v15104_v21, %v4042_v0  ;;  %v5337_v61 = vpop.f32.mrb[64].mxu0  ;;  %v4178_v57 = vmax.f32 %v4040_v11, 0.0 }
 0x5cb   : > { %17341 = vst [vmem:[#allocation62_spill] sm:$0xff] %v15401_v2  ;;  %v4181_v27 = vmax.f32 %v4051_v23, 0.0  ;;  %4923 = vmatmul.mubr.bf16.gmra.mrb[168].mxu1 %v15285_v55  ;;  %v5339_v16 = vpop.f32.mrb[65].mxu0 }
 0x5cc   : > { %17342 = vst [vmem:[#allocation65_spill] sm:$0xff] %v15404_v30  ;;  %v4179_v63 = vmax.f32 %v4043_v53, 0.0  ;;  %v5341_v58 = vpop.f32.mrb[66].mxu0  ;;  %4932 = vmatprep.mubr.bf16.mxu1 %v17057_v38 }
 0x5cd   : > { %v15409_v56 = vpack.c.bf16 %v4181_v27, %v4180_v45  ;;  %v7576_v47 = vmax.f32 %v5337_v61, %v5341_v58  ;;  %v5343_v35 = vpop.f32.mrb[67].mxu0 }
 0x5ce   : > { %v15411_v25 = vpack.c.bf16 %v4179_v63, %v4178_v57  ;;  %v7703_v52 = vmax.f32 %v5339_v16, %v5343_v35  ;;  %v4664_v28 = vpop.f32.mrb[64].mxu1 }
 0x5cf   : > { %v4666_v21 = vpop.f32.mrb[65].mxu1  ;;  %5606 = vmatmul.mubr.bf16.gmra.mrb[172].mxu0 %v15281_v12 }
 0x5d0   : > { %v4668_v10 = vpop.f32.mrb[66].mxu1  ;;  %5615 = vmatprep.mubr.bf16.mxu0 %v17057_v38 }
 0x5d1   : > { %v7322_v41 = vmax.f32 %v4664_v28, %v4668_v10  ;;  %v4670_v8 = vpop.f32.mrb[67].mxu1 }
 0x5d2   : > { %v7449_v24 = vmax.f32 %v4666_v21, %v4670_v8  ;;  %v5347_v11 = vpop.f32.mrb[68].mxu0 }
 0x5d3   : > { %v7577_v59 = vmax.f32 %v7576_v47, %v5347_v11  ;;  %4933 = vmatmul.mubr.bf16.gmra.mrb[172].mxu1 %v15281_v12  ;;  %v5349_v23 = vpop.f32.mrb[69].mxu0 }
 0x5d4   : > { %v7704_v0 = vmax.f32 %v7703_v52, %v5349_v23  ;;  %v5351_v53 = vpop.f32.mrb[70].mxu0  ;;  %4942 = vmatprep.mubr.bf16.mxu1 %v17057_v38 }
 0x5d5   : > { %v7578_v61 = vmax.f32 %v7577_v59, %v5351_v53  ;;  %v5353_v45 = vpop.f32.mrb[71].mxu0 }
 0x5d6   : > { %v7705_v27 = vmax.f32 %v7704_v0, %v5353_v45  ;;  %v4674_v16 = vpop.f32.mrb[68].mxu1 }
 0x5d7   : > { %v7323_v57 = vmax.f32 %v7322_v41, %v4674_v16  ;;  %v4676_v63 = vpop.f32.mrb[69].mxu1  ;;  %5616 = vmatmul.mubr.bf16.gmra.mrb[176].mxu0 %v15345_v39 }
 0x5d8   : > { %v7450_v58 = vmax.f32 %v7449_v24, %v4676_v63  ;;  %v4678_v35 = vpop.f32.mrb[70].mxu1  ;;  %5625 = vmatprep.mubr.bf16.mxu0 %v17057_v38 }
 0x5d9   : > { %v7324_v47 = vmax.f32 %v7323_v57, %v4678_v35  ;;  %v4680_v28 = vpop.f32.mrb[71].mxu1 }
 0x5da   : > { %v7451_v21 = vmax.f32 %v7450_v58, %v4680_v28  ;;  %v5357_v10 = vpop.f32.mrb[72].mxu0 }
 0x5db   : > { %v7579_v52 = vmax.f32 %v7578_v61, %v5357_v10  ;;  %4943 = vmatmul.mubr.bf16.gmra.mrb[176].mxu1 %v15345_v39  ;;  %v5359_v8 = vpop.f32.mrb[73].mxu0 }
 0x5dc   : > { %v7706_v11 = vmax.f32 %v7705_v27, %v5359_v8  ;;  %v5361_v59 = vpop.f32.mrb[74].mxu0  ;;  %4952 = vmatprep.mubr.bf16.mxu1 %v17057_v38 }
 0x5dd   : > { %v7580_v41 = vmax.f32 %v7579_v52, %v5361_v59  ;;  %v5363_v23 = vpop.f32.mrb[75].mxu0 }
 0x5de   : > { %v7707_v0 = vmax.f32 %v7706_v11, %v5363_v23  ;;  %v4684_v53 = vpop.f32.mrb[72].mxu1 }
 0x5df   : > { %v7325_v24 = vmax.f32 %v7324_v47, %v4684_v53  ;;  %v4686_v45 = vpop.f32.mrb[73].mxu1  ;;  %5626 = vmatmul.mubr.bf16.gmra.mrb[180].mxu0 %v15341_v62 }
 0x5e0   : > { %v7452_v16 = vmax.f32 %v7451_v21, %v4686_v45  ;;  %v4688_v57 = vpop.f32.mrb[74].mxu1  ;;  %5635 = vmatprep.mubr.bf16.mxu0 %v17057_v38 }
 0x5e1   : > { %v7326_v61 = vmax.f32 %v7325_v24, %v4688_v57  ;;  %v4690_v63 = vpop.f32.mrb[75].mxu1 }
 0x5e2   : > { %v7453_v58 = vmax.f32 %v7452_v16, %v4690_v63  ;;  %v5367_v35 = vpop.f32.mrb[76].mxu0 }
 0x5e3   : > { %v7581_v27 = vmax.f32 %v7580_v41, %v5367_v35  ;;  %4953 = vmatmul.mubr.bf16.gmra.mrb[180].mxu1 %v15341_v62  ;;  %v5369_v28 = vpop.f32.mrb[77].mxu0 }
 0x5e4   : > { %v7708_v10 = vmax.f32 %v7707_v0, %v5369_v28  ;;  %v5371_v52 = vpop.f32.mrb[78].mxu0  ;;  %4962 = vmatprep.mubr.bf16.mxu1 %v17057_v38 }
 0x5e5   : > { %v7582_v47 = vmax.f32 %v7581_v27, %v5371_v52  ;;  %v5373_v8 = vpop.f32.mrb[79].mxu0 }
 0x5e6   : > { %v7709_v11 = vmax.f32 %v7708_v10, %v5373_v8  ;;  %v4694_v59 = vpop.f32.mrb[76].mxu1 }
 0x5e7   : > { %v7327_v21 = vmax.f32 %v7326_v61, %v4694_v59  ;;  %v4696_v23 = vpop.f32.mrb[77].mxu1  ;;  %5636 = vmatmul.mubr.bf16.gmra.mrb[184].mxu0 %v15404_v30 }
 0x5e8   : > { %v7454_v53 = vmax.f32 %v7453_v58, %v4696_v23  ;;  %v4698_v24 = vpop.f32.mrb[78].mxu1  ;;  %5645 = vmatprep.mubr.bf16.mxu0 %v17057_v38 }
 0x5e9   : > { %v7328_v41 = vmax.f32 %v7327_v21, %v4698_v24  ;;  %v4700_v45 = vpop.f32.mrb[79].mxu1 }
 0x5ea   : > { %v7455_v16 = vmax.f32 %v7454_v53, %v4700_v45  ;;  %v5377_v57 = vpop.f32.mrb[80].mxu0 }
 0x5eb   : > { %v7583_v0 = vmax.f32 %v7582_v47, %v5377_v57  ;;  %4963 = vmatmul.mubr.bf16.gmra.mrb[184].mxu1 %v15404_v30  ;;  %v5379_v63 = vpop.f32.mrb[81].mxu0 }
 0x5ec   : > { %v7710_v35 = vmax.f32 %v7709_v11, %v5379_v63  ;;  %v5381_v27 = vpop.f32.mrb[82].mxu0  ;;  %4972 = vmatprep.mubr.bf16.mxu1 %v17057_v38 }
 0x5ed   : > { %v7584_v61 = vmax.f32 %v7583_v0, %v5381_v27  ;;  %v5383_v28 = vpop.f32.mrb[83].mxu0 }
 0x5ee   : > { %v7711_v10 = vmax.f32 %v7710_v35, %v5383_v28  ;;  %v4704_v52 = vpop.f32.mrb[80].mxu1 }
 0x5ef   : > { %v7329_v58 = vmax.f32 %v7328_v41, %v4704_v52  ;;  %v4706_v8 = vpop.f32.mrb[81].mxu1  ;;  %5646 = vmatmul.mubr.bf16.gmra.mrb[188].mxu0 %v15401_v2  ;;  %v17343_v52 = vld [vmem:[#allocation16_spill] sm:$0xff] }
 0x5f0   : > { %v7456_v59 = vmax.f32 %v7455_v16, %v4706_v8  ;;  %v4708_v21 = vpop.f32.mrb[82].mxu1  ;;  %5655 = vmatprep.mubr.bf16.mxu0 %v17057_v38 }
 0x5f1   : > { %v7330_v47 = vmax.f32 %v7329_v58, %v4708_v21  ;;  %v4710_v23 = vpop.f32.mrb[83].mxu1 }
 0x5f2   : > { %v7457_v53 = vmax.f32 %v7456_v59, %v4710_v23  ;;  %v5387_v24 = vpop.f32.mrb[84].mxu0 }
 0x5f3   : > { %v7585_v11 = vmax.f32 %v7584_v61, %v5387_v24  ;;  %4973 = vmatmul.mubr.bf16.gmra.mrb[188].mxu1 %v15401_v2  ;;  %v5389_v45 = vpop.f32.mrb[85].mxu0  ;;  %v17344_v2 = vld [vmem:[#allocation49_spill] sm:$0xff] }
 0x5f4   : > { %v7712_v57 = vmax.f32 %v7711_v10, %v5389_v45  ;;  %v5391_v0 = vpop.f32.mrb[86].mxu0  ;;  %4982 = vmatprep.mubr.bf16.mxu1 %v17057_v38 }
 0x5f5   : > { %v7586_v41 = vmax.f32 %v7585_v11, %v5391_v0  ;;  %v5393_v63 = vpop.f32.mrb[87].mxu0  ;;  %v4296_v11 = vld [vmem:[%s16951_s5 + $0x190] sm:$0xff] }
 0x5f6   : > { %v7713_v35 = vmax.f32 %v7712_v57, %v5393_v63  ;;  %v4714_v27 = vpop.f32.mrb[84].mxu1  ;;  %v4301_v63 = vld [vmem:[%s16951_s5 + $0x1b8] sm:$0xff] }
 0x5f7   : > { %v7331_v16 = vmax.f32 %v7330_v47, %v4714_v27  ;;  %v4716_v28 = vpop.f32.mrb[85].mxu1  ;;  %5656 = vmatmul.mubr.bf16.gmra.mrb[192].mxu0 %v17343_v52  ;;  %v4300_v47 = vld [vmem:[%s16951_s5 + $0x1b0] sm:$0xff] }
 0x5f8   : > { %v7458_v58 = vmax.f32 %v7457_v53, %v4716_v28  ;;  %v4718_v8 = vpop.f32.mrb[86].mxu1  ;;  %5665 = vmatprep.mubr.bf16.mxu0 %v17057_v38  ;;  %v4297_v53 = vld [vmem:[%s16951_s5 + $0x198] sm:$0xff]  ;;  %v11230_v0 = vcombine.low %v4296_v11, %v4300_v47 }
 0x5f9   : > { %v7332_v61 = vmax.f32 %v7331_v16, %v4718_v8  ;;  %v4720_v59 = vpop.f32.mrb[87].mxu1  ;;  %v11232_v28 = vcombine.low %v4297_v53, %v4301_v63 }
 0x5fa   : > { %v7459_v21 = vmax.f32 %v7458_v58, %v4720_v59  ;;  %v5397_v23 = vpop.f32.mrb[88].mxu0  ;;  %v11233_v58 = vcombine.high %v4297_v53, %v4301_v63 }
 0x5fb   : > { %v7587_v10 = vmax.f32 %v7586_v41, %v5397_v23  ;;  %4983 = vmatmul.mubr.bf16.gmra.mrb[192].mxu1 %v17343_v52  ;;  %v5399_v24 = vpop.f32.mrb[89].mxu0  ;;  %v11231_v41 = vcombine.high %v4296_v11, %v4300_v47 }
 0x5fc   : > { %v7714_v45 = vmax.f32 %v7713_v35, %v5399_v24  ;;  %v5401_v57 = vpop.f32.mrb[90].mxu0  ;;  %4992 = vmatprep.mubr.bf16.mxu1 %v17057_v38  ;;  %6661 = vmatprep.subr.bf16.mxu0 %v11233_v58 }
 0x5fd   : > { %v7588_v27 = vmax.f32 %v7587_v10, %v5401_v57  ;;  %v5403_v16 = vpop.f32.mrb[91].mxu0  ;;  %5988 = vmatprep.subr.bf16.mxu1 %v11231_v41  ;;  %6662 = vmatpush1.bf16.msra.mxu0 %v11232_v28 }
 0x5fe   : > { %v7715_v8 = vmax.f32 %v7714_v45, %v5403_v16  ;;  %v4724_v59 = vpop.f32.mrb[88].mxu1  ;;  %5989 = vmatpush1.bf16.msra.mxu1 %v11230_v0  ;;  %v17345_v0 = vld [vmem:[#allocation17_spill] sm:$0xff] }
 0x5ff   : > { %v7333_v23 = vmax.f32 %v7332_v61, %v4724_v59  ;;  %v4726_v52 = vpop.f32.mrb[89].mxu1  ;;  %5666 = vmatmul.mubr.bf16.gmra.mrb[196].mxu0 %v17344_v2 }
 0x600   : > { %v7460_v35 = vmax.f32 %v7459_v21, %v4726_v52  ;;  %v4728_v24 = vpop.f32.mrb[90].mxu1  ;;  %5675 = vmatprep.mubr.bf16.mxu0 %v17057_v38 }
 0x601   : > { %v7334_v11 = vmax.f32 %v7333_v23, %v4728_v24  ;;  %v4730_v47 = vpop.f32.mrb[91].mxu1 }
 0x602   : > { %v7461_v10 = vmax.f32 %v7460_v35, %v4730_v47  ;;  %v5407_v57 = vpop.f32.mrb[92].mxu0 }
 0x603   : > { %v7589_v30 = vmax.f32 %v7588_v27, %v5407_v57  ;;  %4993 = vmatmul.mubr.bf16.gmra.mrb[196].mxu1 %v17344_v2  ;;  %v5409_v53 = vpop.f32.mrb[93].mxu0 }
 0x604   : > { %v7716_v45 = vmax.f32 %v7715_v8, %v5409_v53  ;;  %v5411_v61 = vpop.f32.mrb[94].mxu0  ;;  %5002 = vmatprep.mubr.bf16.mxu1 %v17057_v38 }
 0x605   : > { %v7590_v41 = vmax.f32 %v7589_v30, %v5411_v61  ;;  %v5413_v63 = vpop.f32.mrb[95].mxu0 }
 0x606   : > { %v7717_v52 = vmax.f32 %v7716_v45, %v5413_v63  ;;  %v4734_v21 = vpop.f32.mrb[92].mxu1 }
 0x607   : > { %v7335_v16 = vmax.f32 %v7334_v11, %v4734_v21  ;;  %v4736_v58 = vpop.f32.mrb[93].mxu1  ;;  %5676 = vmatmul.mubr.bf16.gmra.mrb[200].mxu0 %v17345_v0  ;;  %v17346_v21 = vld [vmem:[#allocation32_spill] sm:$0xff] }
 0x608   : > { %v7462_v59 = vmax.f32 %v7461_v10, %v4736_v58  ;;  %v4738_v28 = vpop.f32.mrb[94].mxu1  ;;  %5685 = vmatprep.mubr.bf16.mxu0 %v17057_v38 }
 0x609   : > { %v7336_v27 = vmax.f32 %v7335_v16, %v4738_v28  ;;  %v4740_v23 = vpop.f32.mrb[95].mxu1 }
 0x60a   : > { %v7463_v35 = vmax.f32 %v7462_v59, %v4740_v23  ;;  %v5417_v24 = vpop.f32.mrb[96].mxu0 }
 0x60b   : > { %v7591_v8 = vmax.f32 %v7590_v41, %v5417_v24  ;;  %5003 = vmatmul.mubr.bf16.gmra.mrb[200].mxu1 %v17345_v0  ;;  %v5419_v47 = vpop.f32.mrb[97].mxu0  ;;  %v17352_v0 = vld [vmem:[#allocation26_spill] sm:$0xff] }
 0x60c   : > { %v7718_v30 = vmax.f32 %v7717_v52, %v5419_v47  ;;  %v5421_v57 = vpop.f32.mrb[98].mxu0  ;;  %5012 = vmatprep.mubr.bf16.mxu1 %v17057_v38 }
 0x60d   : > { %v7592_v11 = vmax.f32 %v7591_v8, %v5421_v57  ;;  %v5423_v53 = vpop.f32.mrb[99].mxu0 }
 0x60e   : > { %v7719_v45 = vmax.f32 %v7718_v30, %v5423_v53  ;;  %v4744_v61 = vpop.f32.mrb[96].mxu1 }
 0x60f   : > { %v7337_v10 = vmax.f32 %v7336_v27, %v4744_v61  ;;  %v4746_v63 = vpop.f32.mrb[97].mxu1  ;;  %5686 = vmatmul.mubr.bf16.gmra.mrb[204].mxu0 %v17346_v21 }
 0x610   : > { %v7464_v16 = vmax.f32 %v7463_v35, %v4746_v63  ;;  %v4748_v58 = vpop.f32.mrb[98].mxu1  ;;  %5695 = vmatprep.mubr.bf16.mxu0 %v17057_v38  ;;  %v17347_v63 = vld [vmem:[#allocation47_spill] sm:$0xff] }
 0x611   : > { %v7338_v41 = vmax.f32 %v7337_v10, %v4748_v58  ;;  %v4750_v59 = vpop.f32.mrb[99].mxu1 }
 0x612   : > { %v7465_v28 = vmax.f32 %v7464_v16, %v4750_v59  ;;  %v5427_v23 = vpop.f32.mrb[100].mxu0 }
 0x613   : > { %v7593_v52 = vmax.f32 %v7592_v11, %v5427_v23  ;;  %5013 = vmatmul.mubr.bf16.gmra.mrb[204].mxu1 %v17346_v21  ;;  %v5429_v24 = vpop.f32.mrb[101].mxu0  ;;  %v17348_v21 = vld [vmem:[#allocation18_spill] sm:$0xff] }
 0x614   : > { %v7720_v8 = vmax.f32 %v7719_v45, %v5429_v24  ;;  %v5431_v47 = vpop.f32.mrb[102].mxu0  ;;  %5022 = vmatprep.mubr.bf16.mxu1 %v17057_v38 }
 0x615   : > { %v7594_v27 = vmax.f32 %v7593_v52, %v5431_v47  ;;  %v5433_v30 = vpop.f32.mrb[103].mxu0 }
 0x616   : > { %v7721_v57 = vmax.f32 %v7720_v8, %v5433_v30  ;;  %v4754_v53 = vpop.f32.mrb[100].mxu1 }
 0x617   : > { %v7339_v35 = vmax.f32 %v7338_v41, %v4754_v53  ;;  %v4756_v61 = vpop.f32.mrb[101].mxu1  ;;  %5696 = vmatmul.mubr.bf16.gmra.mrb[208].mxu0 %v17347_v63 }
 0x618   : > { %v7466_v10 = vmax.f32 %v7465_v28, %v4756_v61  ;;  %v4758_v58 = vpop.f32.mrb[102].mxu1  ;;  %5705 = vmatprep.mubr.bf16.mxu0 %v17057_v38 }
 0x619   : > { %v7340_v11 = vmax.f32 %v7339_v35, %v4758_v58  ;;  %v4760_v16 = vpop.f32.mrb[103].mxu1 }
 0x61a   : > { %v7467_v59 = vmax.f32 %v7466_v10, %v4760_v16  ;;  %v5437_v23 = vpop.f32.mrb[104].mxu0 }
 0x61b   : > { %v7595_v45 = vmax.f32 %v7594_v27, %v5437_v23  ;;  %5023 = vmatmul.mubr.bf16.gmra.mrb[208].mxu1 %v17347_v63  ;;  %v5439_v24 = vpop.f32.mrb[105].mxu0  ;;  %v17349_v63 = vld [vmem:[#allocation38_spill] sm:$0xff] }
 0x61c   : > { %v7722_v52 = vmax.f32 %v7721_v57, %v5439_v24  ;;  %v5441_v47 = vpop.f32.mrb[106].mxu0  ;;  %5032 = vmatprep.mubr.bf16.mxu1 %v17057_v38 }
 0x61d   : > { %v7596_v41 = vmax.f32 %v7595_v45, %v5441_v47  ;;  %v5443_v8 = vpop.f32.mrb[107].mxu0 }
 0x61e   : > { %v7723_v30 = vmax.f32 %v7722_v52, %v5443_v8  ;;  %v4764_v53 = vpop.f32.mrb[104].mxu1 }
 0x61f   : > { %v7341_v28 = vmax.f32 %v7340_v11, %v4764_v53  ;;  %v4766_v61 = vpop.f32.mrb[105].mxu1  ;;  %5706 = vmatmul.mubr.bf16.gmra.mrb[212].mxu0 %v17348_v21 }
 0x620   : > { %v7468_v35 = vmax.f32 %v7467_v59, %v4766_v61  ;;  %v4768_v58 = vpop.f32.mrb[106].mxu1  ;;  %5715 = vmatprep.mubr.bf16.mxu0 %v17057_v38 }
 0x621   : > { %v7342_v27 = vmax.f32 %v7341_v28, %v4768_v58  ;;  %v4770_v10 = vpop.f32.mrb[107].mxu1 }
 0x622   : > { %v7469_v16 = vmax.f32 %v7468_v35, %v4770_v10  ;;  %v5447_v23 = vpop.f32.mrb[108].mxu0 }
 0x623   : > { %v7597_v57 = vmax.f32 %v7596_v41, %v5447_v23  ;;  %5033 = vmatmul.mubr.bf16.gmra.mrb[212].mxu1 %v17348_v21  ;;  %v5449_v24 = vpop.f32.mrb[109].mxu0  ;;  %v17350_v21 = vld [vmem:[#allocation58_spill] sm:$0xff] }
 0x624   : > { %v7724_v45 = vmax.f32 %v7723_v30, %v5449_v24  ;;  %v5451_v47 = vpop.f32.mrb[110].mxu0  ;;  %5042 = vmatprep.mubr.bf16.mxu1 %v17057_v38 }
 0x625   : > { %v7598_v11 = vmax.f32 %v7597_v57, %v5451_v47  ;;  %v5453_v52 = vpop.f32.mrb[111].mxu0 }
 0x626   : > { %v7725_v8 = vmax.f32 %v7724_v45, %v5453_v52  ;;  %v4774_v53 = vpop.f32.mrb[108].mxu1 }
 0x627   : > { %v7343_v59 = vmax.f32 %v7342_v27, %v4774_v53  ;;  %v4776_v61 = vpop.f32.mrb[109].mxu1  ;;  %5716 = vmatmul.mubr.bf16.gmra.mrb[216].mxu0 %v17349_v63 }
 0x628   : > { %v7470_v28 = vmax.f32 %v7469_v16, %v4776_v61  ;;  %v4778_v58 = vpop.f32.mrb[110].mxu1  ;;  %5725 = vmatprep.mubr.bf16.mxu0 %v17057_v38 }
 0x629   : > { %v7344_v41 = vmax.f32 %v7343_v59, %v4778_v58  ;;  %v4780_v35 = vpop.f32.mrb[111].mxu1 }
 0x62a   : > { %v7471_v10 = vmax.f32 %v7470_v28, %v4780_v35  ;;  %v5457_v23 = vpop.f32.mrb[112].mxu0 }
 0x62b   : > { %v7599_v30 = vmax.f32 %v7598_v11, %v5457_v23  ;;  %5043 = vmatmul.mubr.bf16.gmra.mrb[216].mxu1 %v17349_v63  ;;  %v5459_v24 = vpop.f32.mrb[113].mxu0  ;;  %v17351_v63 = vld [vmem:[#allocation30_spill] sm:$0xff] }
 0x62c   : > { %v7726_v57 = vmax.f32 %v7725_v8, %v5459_v24  ;;  %v5461_v47 = vpop.f32.mrb[114].mxu0  ;;  %5052 = vmatprep.mubr.bf16.mxu1 %v17057_v38 }
 0x62d   : > { %v7600_v27 = vmax.f32 %v7599_v30, %v5461_v47  ;;  %v5463_v45 = vpop.f32.mrb[115].mxu0 }
 0x62e   : > { %v7727_v52 = vmax.f32 %v7726_v57, %v5463_v45  ;;  %v4784_v53 = vpop.f32.mrb[112].mxu1 }
 0x62f   : > { %v7345_v16 = vmax.f32 %v7344_v41, %v4784_v53  ;;  %v4786_v61 = vpop.f32.mrb[113].mxu1  ;;  %5726 = vmatmul.mubr.bf16.gmra.mrb[220].mxu0 %v17350_v21 }
 0x630   : > { %v7472_v59 = vmax.f32 %v7471_v10, %v4786_v61  ;;  %v4788_v58 = vpop.f32.mrb[114].mxu1  ;;  %5735 = vmatprep.mubr.bf16.mxu0 %v17057_v38 }
 0x631   : > { %v7346_v11 = vmax.f32 %v7345_v16, %v4788_v58  ;;  %v4790_v28 = vpop.f32.mrb[115].mxu1 }
 0x632   : > { %v7473_v35 = vmax.f32 %v7472_v59, %v4790_v28  ;;  %v5467_v23 = vpop.f32.mrb[116].mxu0 }
 0x633   : > { %v7601_v8 = vmax.f32 %v7600_v27, %v5467_v23  ;;  %5053 = vmatmul.mubr.bf16.gmra.mrb[220].mxu1 %v17350_v21  ;;  %v5469_v24 = vpop.f32.mrb[117].mxu0 }
 0x634   : > { %v7728_v30 = vmax.f32 %v7727_v52, %v5469_v24  ;;  %v5471_v47 = vpop.f32.mrb[118].mxu0  ;;  %5062 = vmatprep.mubr.bf16.mxu1 %v17057_v38 }
 0x635   : > { %v7602_v41 = vmax.f32 %v7601_v8, %v5471_v47  ;;  %v5473_v57 = vpop.f32.mrb[119].mxu0  ;;  %v4304_v8 = vld [vmem:[%s16951_s5 + $0x1d0] sm:$0xff] }
 0x636   : > { %v7729_v45 = vmax.f32 %v7728_v30, %v5473_v57  ;;  %v4794_v53 = vpop.f32.mrb[116].mxu1 }
 0x637   : > { %v7347_v10 = vmax.f32 %v7346_v11, %v4794_v53  ;;  %v4796_v61 = vpop.f32.mrb[117].mxu1  ;;  %5736 = vmatmul.mubr.bf16.gmra.mrb[224].mxu0 %v17351_v63  ;;  %v4308_v11 = vld [vmem:[%s16951_s5 + $0x1f0] sm:$0xff]  ;;  %v4309_v53 = vld [vmem:[%s16951_s5 + $0x1f8] sm:$0xff] }
 0x638   : > { %v7474_v16 = vmax.f32 %v7473_v35, %v4796_v61  ;;  %v4798_v58 = vpop.f32.mrb[118].mxu1  ;;  %5745 = vmatprep.mubr.bf16.mxu0 %v17057_v38  ;;  %v4305_v35 = vld [vmem:[%s16951_s5 + $0x1d8] sm:$0xff]  ;;  %v11239_v57 = vcombine.high %v4304_v8, %v4308_v11 }
 0x639   : > { %v7348_v27 = vmax.f32 %v7347_v10, %v4798_v58  ;;  %v4800_v59 = vpop.f32.mrb[119].mxu1  ;;  %v11241_v58 = vcombine.high %v4305_v35, %v4309_v53 }
 0x63a   : > { %v7475_v28 = vmax.f32 %v7474_v16, %v4800_v59  ;;  %v5477_v23 = vpop.f32.mrb[120].mxu0  ;;  %v11240_v16 = vcombine.low %v4305_v35, %v4309_v53  ;;  %5990 = vmatprep.subr.bf16.mxu1 %v11239_v57 }
 0x63b   : > { %v7603_v52 = vmax.f32 %v7602_v41, %v5477_v23  ;;  %5063 = vmatmul.mubr.bf16.gmra.mrb[224].mxu1 %v17351_v63  ;;  %v5479_v24 = vpop.f32.mrb[121].mxu0  ;;  %v11238_v41 = vcombine.low %v4304_v8, %v4308_v11  ;;  %6663 = vmatprep.subr.bf16.mxu0 %v11241_v58 }
 0x63c   : > { %v7730_v30 = vmax.f32 %v7729_v45, %v5479_v24  ;;  %v5481_v47 = vpop.f32.mrb[122].mxu0  ;;  %5072 = vmatprep.mubr.bf16.mxu1 %v17057_v38  ;;  %6664 = vmatpush1.bf16.msra.mxu0 %v11240_v16 }
 0x63d   : > { %v7604_v10 = vmax.f32 %v7603_v52, %v5481_v47  ;;  %v5483_v61 = vpop.f32.mrb[123].mxu0  ;;  %5991 = vmatpush1.bf16.msra.mxu1 %v11238_v41  ;;  %v17353_v41 = vld [vmem:[#allocation40_spill] sm:$0xff] }
 0x63e   : > { %v7731_v59 = vmax.f32 %v7730_v30, %v5483_v61  ;;  %v4804_v23 = vpop.f32.mrb[120].mxu1 }
 0x63f   : > { %v7349_v63 = vmax.f32 %v7348_v27, %v4804_v23  ;;  %v4806_v21 = vpop.f32.mrb[121].mxu1  ;;  %5746 = vmatmul.mubr.bf16.gmra.mrb[228].mxu0 %v17352_v0 }
 0x640   : > { %v7476_v45 = vmax.f32 %v7475_v28, %v4806_v21  ;;  %v4808_v24 = vpop.f32.mrb[122].mxu1  ;;  %5755 = vmatprep.mubr.bf16.mxu0 %v17057_v38 }
 0x641   : > { %v7350_v8 = vmax.f32 %v7349_v63, %v4808_v24  ;;  %v4810_v11 = vpop.f32.mrb[123].mxu1 }
 0x642   : > { %v7477_v52 = vmax.f32 %v7476_v45, %v4810_v11  ;;  %v5487_v47 = vpop.f32.mrb[124].mxu0 }
 0x643   : > { %v7605_v2 = vmax.f32 %v7604_v10, %v5487_v47  ;;  %5073 = vmatmul.mubr.bf16.gmra.mrb[228].mxu1 %v17352_v0  ;;  %v5489_v35 = vpop.f32.mrb[125].mxu0 }
 0x644   : > { %v7732_v30 = vmax.f32 %v7731_v59, %v5489_v35  ;;  %v5491_v27 = vpop.f32.mrb[126].mxu0  ;;  %5082 = vmatprep.mubr.bf16.mxu1 %v17057_v38 }
 0x645   : > { %v7606_v57 = vmax.f32 %v7605_v2, %v5491_v27  ;;  %v5493_v53 = vpop.f32.mrb[127].mxu0 }
 0x646   : > { %v7733_v21 = vmax.f32 %v7732_v30, %v5493_v53  ;;  %v4814_v28 = vpop.f32.mrb[124].mxu1 }
 0x647   : > { %v7351_v61 = vmax.f32 %v7350_v8, %v4814_v28  ;;  %v4816_v58 = vpop.f32.mrb[125].mxu1  ;;  %5756 = vmatmul.mubr.bf16.gmra.mrb[232].mxu0 %v17353_v41  ;;  %v17354_v28 = vld [vmem:[#allocation36_spill] sm:$0xff] }
 0x648   : > { %v7478_v63 = vmax.f32 %v7477_v52, %v4816_v58  ;;  %v4818_v16 = vpop.f32.mrb[126].mxu1  ;;  %5765 = vmatprep.mubr.bf16.mxu0 %v17057_v38 }
 0x649   : > { %v7352_v10 = vmax.f32 %v7351_v61, %v4818_v16  ;;  %v4820_v23 = vpop.f32.mrb[127].mxu1 }
 0x64a   : > { %v7479_v45 = vmax.f32 %v7478_v63, %v4820_v23  ;;  %v5497_v24 = vpop.f32.mrb[128].mxu0 }
 0x64b   : > { %v7607_v59 = vmax.f32 %v7606_v57, %v5497_v24  ;;  %5083 = vmatmul.mubr.bf16.gmra.mrb[232].mxu1 %v17353_v41  ;;  %v5499_v11 = vpop.f32.mrb[129].mxu0 }
 0x64c   : > { %v7734_v2 = vmax.f32 %v7733_v21, %v5499_v11  ;;  %v5501_v47 = vpop.f32.mrb[130].mxu0  ;;  %5092 = vmatprep.mubr.bf16.mxu1 %v17057_v38 }
 0x64d   : > { %v7608_v8 = vmax.f32 %v7607_v59, %v5501_v47  ;;  %v5503_v35 = vpop.f32.mrb[131].mxu0 }
 0x64e   : > { %v7735_v30 = vmax.f32 %v7734_v2, %v5503_v35  ;;  %v4824_v27 = vpop.f32.mrb[128].mxu1 }
 0x64f   : > { %v7353_v52 = vmax.f32 %v7352_v10, %v4824_v27  ;;  %v4826_v53 = vpop.f32.mrb[129].mxu1  ;;  %5766 = vmatmul.mubr.bf16.gmra.mrb[236].mxu0 %v17354_v28 }
 0x650   : > { %v7480_v61 = vmax.f32 %v7479_v45, %v4826_v53  ;;  %v4828_v58 = vpop.f32.mrb[130].mxu1  ;;  %5775 = vmatprep.mubr.bf16.mxu0 %v17057_v38  ;;  %v17355_v53 = vld [vmem:[#allocation56_spill] sm:$0xff] }
 0x651   : > { %v7354_v57 = vmax.f32 %v7353_v52, %v4828_v58  ;;  %v4830_v63 = vpop.f32.mrb[131].mxu1 }
 0x652   : > { %v7481_v16 = vmax.f32 %v7480_v61, %v4830_v63  ;;  %v5507_v23 = vpop.f32.mrb[132].mxu0 }
 0x653   : > { %v7609_v21 = vmax.f32 %v7608_v8, %v5507_v23  ;;  %5093 = vmatmul.mubr.bf16.gmra.mrb[236].mxu1 %v17354_v28  ;;  %v5509_v24 = vpop.f32.mrb[133].mxu0  ;;  %v17356_v28 = vld [vmem:[#allocation34_spill] sm:$0xff] }
 0x654   : > { %v7736_v59 = vmax.f32 %v7735_v30, %v5509_v24  ;;  %v5511_v11 = vpop.f32.mrb[134].mxu0  ;;  %5102 = vmatprep.mubr.bf16.mxu1 %v17057_v38 }
 0x655   : > { %v7610_v10 = vmax.f32 %v7609_v21, %v5511_v11  ;;  %v5513_v2 = vpop.f32.mrb[135].mxu0 }
 0x656   : > { %v7737_v47 = vmax.f32 %v7736_v59, %v5513_v2  ;;  %v4834_v35 = vpop.f32.mrb[132].mxu1 }
 0x657   : > { %v7355_v45 = vmax.f32 %v7354_v57, %v4834_v35  ;;  %v4836_v27 = vpop.f32.mrb[133].mxu1  ;;  %5776 = vmatmul.mubr.bf16.gmra.mrb[240].mxu0 %v17355_v53 }
 0x658   : > { %v7482_v52 = vmax.f32 %v7481_v16, %v4836_v27  ;;  %v4838_v58 = vpop.f32.mrb[134].mxu1  ;;  %5785 = vmatprep.mubr.bf16.mxu0 %v17057_v38 }
 0x659   : > { %v7356_v8 = vmax.f32 %v7355_v45, %v4838_v58  ;;  %v4840_v61 = vpop.f32.mrb[135].mxu1 }
 0x65a   : > { %v7483_v63 = vmax.f32 %v7482_v52, %v4840_v61  ;;  %v5517_v23 = vpop.f32.mrb[136].mxu0 }
 0x65b   : > { %v7611_v30 = vmax.f32 %v7610_v10, %v5517_v23  ;;  %5103 = vmatmul.mubr.bf16.gmra.mrb[240].mxu1 %v17355_v53  ;;  %v5519_v24 = vpop.f32.mrb[137].mxu0  ;;  %v17357_v53 = vld [vmem:[#allocation45_spill] sm:$0xff] }
 0x65c   : > { %v7738_v21 = vmax.f32 %v7737_v47, %v5519_v24  ;;  %v5521_v11 = vpop.f32.mrb[138].mxu0  ;;  %5112 = vmatprep.mubr.bf16.mxu1 %v17057_v38 }
 0x65d   : > { %v7612_v57 = vmax.f32 %v7611_v30, %v5521_v11  ;;  %v5523_v59 = vpop.f32.mrb[139].mxu0 }
 0x65e   : > { %v7739_v2 = vmax.f32 %v7738_v21, %v5523_v59  ;;  %v4844_v35 = vpop.f32.mrb[136].mxu1 }
 0x65f   : > { %v7357_v16 = vmax.f32 %v7356_v8, %v4844_v35  ;;  %v4846_v27 = vpop.f32.mrb[137].mxu1  ;;  %5786 = vmatmul.mubr.bf16.gmra.mrb[244].mxu0 %v17356_v28 }
 0x660   : > { %v7484_v45 = vmax.f32 %v7483_v63, %v4846_v27  ;;  %v4848_v58 = vpop.f32.mrb[138].mxu1  ;;  %5795 = vmatprep.mubr.bf16.mxu0 %v17057_v38 }
 0x661   : > { %v7358_v10 = vmax.f32 %v7357_v16, %v4848_v58  ;;  %v4850_v52 = vpop.f32.mrb[139].mxu1 }
 0x662   : > { %v7485_v61 = vmax.f32 %v7484_v45, %v4850_v52  ;;  %v5527_v23 = vpop.f32.mrb[140].mxu0 }
 0x663   : > { %v7613_v47 = vmax.f32 %v7612_v57, %v5527_v23  ;;  %5113 = vmatmul.mubr.bf16.gmra.mrb[244].mxu1 %v17356_v28  ;;  %v5529_v24 = vpop.f32.mrb[141].mxu0  ;;  %v17358_v28 = vld [vmem:[#allocation42_spill] sm:$0xff] }
 0x664   : > { %v7740_v30 = vmax.f32 %v7739_v2, %v5529_v24  ;;  %v5531_v11 = vpop.f32.mrb[142].mxu0  ;;  %5122 = vmatprep.mubr.bf16.mxu1 %v17057_v38 }
 0x665   : > { %v7614_v8 = vmax.f32 %v7613_v47, %v5531_v11  ;;  %v5533_v21 = vpop.f32.mrb[143].mxu0 }
 0x666   : > { %v7741_v59 = vmax.f32 %v7740_v30, %v5533_v21  ;;  %v4854_v35 = vpop.f32.mrb[140].mxu1 }
 0x667   : > { %v7359_v63 = vmax.f32 %v7358_v10, %v4854_v35  ;;  %v4856_v27 = vpop.f32.mrb[141].mxu1  ;;  %5796 = vmatmul.mubr.bf16.gmra.mrb[248].mxu0 %v17357_v53 }
 0x668   : > { %v7486_v16 = vmax.f32 %v7485_v61, %v4856_v27  ;;  %v4858_v58 = vpop.f32.mrb[142].mxu1  ;;  %5805 = vmatprep.mubr.bf16.mxu0 %v17057_v38 }
 0x669   : > { %v7360_v57 = vmax.f32 %v7359_v63, %v4858_v58  ;;  %v4860_v45 = vpop.f32.mrb[143].mxu1 }
 0x66a   : > { %v7487_v52 = vmax.f32 %v7486_v16, %v4860_v45  ;;  %v5537_v23 = vpop.f32.mrb[144].mxu0 }
 0x66b   : > { %v7615_v2 = vmax.f32 %v7614_v8, %v5537_v23  ;;  %5123 = vmatmul.mubr.bf16.gmra.mrb[248].mxu1 %v17357_v53  ;;  %v5539_v24 = vpop.f32.mrb[145].mxu0  ;;  %v17359_v53 = vld [vmem:[#allocation51_spill] sm:$0xff] }
 0x66c   : > { %v7742_v47 = vmax.f32 %v7741_v59, %v5539_v24  ;;  %v5541_v11 = vpop.f32.mrb[146].mxu0  ;;  %5132 = vmatprep.mubr.bf16.mxu1 %v17057_v38 }
 0x66d   : > { %v7616_v10 = vmax.f32 %v7615_v2, %v5541_v11  ;;  %v5543_v30 = vpop.f32.mrb[147].mxu0 }
 0x66e   : > { %v7743_v21 = vmax.f32 %v7742_v47, %v5543_v30  ;;  %v4864_v35 = vpop.f32.mrb[144].mxu1 }
 0x66f   : > { %v7361_v61 = vmax.f32 %v7360_v57, %v4864_v35  ;;  %v4866_v27 = vpop.f32.mrb[145].mxu1  ;;  %5806 = vmatmul.mubr.bf16.gmra.mrb[252].mxu0 %v17358_v28 }
 0x670   : > { %v7488_v63 = vmax.f32 %v7487_v52, %v4866_v27  ;;  %v4868_v58 = vpop.f32.mrb[146].mxu1  ;;  %5815 = vmatprep.mubr.bf16.mxu0 %v17057_v38 }
 0x671   : > { %v7362_v8 = vmax.f32 %v7361_v61, %v4868_v58  ;;  %v4870_v16 = vpop.f32.mrb[147].mxu1 }
 0x672   : > { %v7489_v45 = vmax.f32 %v7488_v63, %v4870_v16  ;;  %v5547_v23 = vpop.f32.mrb[148].mxu0 }
 0x673   : > { %v7617_v59 = vmax.f32 %v7616_v10, %v5547_v23  ;;  %5133 = vmatmul.mubr.bf16.gmra.mrb[252].mxu1 %v17358_v28  ;;  %v5549_v24 = vpop.f32.mrb[149].mxu0  ;;  %v17360_v28 = vld [vmem:[#allocation53_spill] sm:$0xff] }
 0x674   : > { %v7744_v2 = vmax.f32 %v7743_v21, %v5549_v24  ;;  %v5551_v11 = vpop.f32.mrb[150].mxu0  ;;  %5142 = vmatprep.mubr.bf16.mxu1 %v17057_v38 }
 0x675   : > { %v7618_v57 = vmax.f32 %v7617_v59, %v5551_v11  ;;  %v5553_v47 = vpop.f32.mrb[151].mxu0 }
 0x676   : > { %v7745_v30 = vmax.f32 %v7744_v2, %v5553_v47  ;;  %v4874_v35 = vpop.f32.mrb[148].mxu1 }
 0x677   : > { %v7363_v52 = vmax.f32 %v7362_v8, %v4874_v35  ;;  %v4876_v27 = vpop.f32.mrb[149].mxu1  ;;  %5816 = vmatmul.mubr.bf16.gmra.mrb[0].mxu0 %v17359_v53 }
 0x678   : > { %v7490_v61 = vmax.f32 %v7489_v45, %v4876_v27  ;;  %v4878_v58 = vpop.f32.mrb[150].mxu1  ;;  %5825 = vmatprep.mubr.bf16.mxu0 %v17057_v38 }
 0x679   : > { %v7364_v10 = vmax.f32 %v7363_v52, %v4878_v58  ;;  %v4880_v63 = vpop.f32.mrb[151].mxu1 }
 0x67a   : > { %v7491_v16 = vmax.f32 %v7490_v61, %v4880_v63  ;;  %v5557_v23 = vpop.f32.mrb[152].mxu0 }
 0x67b   : > { %v7619_v21 = vmax.f32 %v7618_v57, %v5557_v23  ;;  %5143 = vmatmul.mubr.bf16.gmra.mrb[0].mxu1 %v17359_v53  ;;  %v5559_v24 = vpop.f32.mrb[153].mxu0 }
 0x67c   : > { %v7746_v59 = vmax.f32 %v7745_v30, %v5559_v24  ;;  %v5561_v11 = vpop.f32.mrb[154].mxu0  ;;  %5152 = vmatprep.mubr.bf16.mxu1 %v17057_v38 }
 0x67d   : > { %v7620_v8 = vmax.f32 %v7619_v21, %v5561_v11  ;;  %v5563_v2 = vpop.f32.mrb[155].mxu0 }
 0x67e   : > { %v7747_v47 = vmax.f32 %v7746_v59, %v5563_v2  ;;  %v4884_v35 = vpop.f32.mrb[152].mxu1 }
 0x67f   : > { %v7365_v45 = vmax.f32 %v7364_v10, %v4884_v35  ;;  %v4886_v27 = vpop.f32.mrb[153].mxu1  ;;  %5826 = vmatmul.mubr.bf16.gmra.mrb[4].mxu0 %v17360_v28 }
 0x680   : > { %v7492_v52 = vmax.f32 %v7491_v16, %v4886_v27  ;;  %v4888_v58 = vpop.f32.mrb[154].mxu1  ;;  %5835 = vmatprep.mubr.bf16.mxu0 %v17057_v38 }
 0x681   : > { %v7366_v57 = vmax.f32 %v7365_v45, %v4888_v58  ;;  %v4890_v61 = vpop.f32.mrb[155].mxu1 }
 0x682   : > { %v7493_v63 = vmax.f32 %v7492_v52, %v4890_v61  ;;  %v5567_v23 = vpop.f32.mrb[156].mxu0 }
 0x683   : > { %v7621_v30 = vmax.f32 %v7620_v8, %v5567_v23  ;;  %5153 = vmatmul.mubr.bf16.gmra.mrb[4].mxu1 %v17360_v28  ;;  %v5569_v24 = vpop.f32.mrb[157].mxu0 }
 0x684   : > { %v7748_v21 = vmax.f32 %v7747_v47, %v5569_v24  ;;  %v5571_v11 = vpop.f32.mrb[158].mxu0  ;;  %5162 = vmatprep.mubr.bf16.mxu1 %v17057_v38 }
 0x685   : > { %v7622_v10 = vmax.f32 %v7621_v30, %v5571_v11  ;;  %v5573_v59 = vpop.f32.mrb[159].mxu0 }
 0x686   : > { %v7749_v2 = vmax.f32 %v7748_v21, %v5573_v59  ;;  %v4894_v35 = vpop.f32.mrb[156].mxu1 }
 0x687   : > { %v7367_v16 = vmax.f32 %v7366_v57, %v4894_v35  ;;  %v4896_v27 = vpop.f32.mrb[157].mxu1  ;;  %5836 = vmatmul.mubr.bf16.gmra.mrb[8].mxu0 %v14996_v13 }
 0x688   : > { %v7494_v45 = vmax.f32 %v7493_v63, %v4896_v27  ;;  %v4898_v58 = vpop.f32.mrb[158].mxu1  ;;  %5845 = vmatprep.mubr.bf16.mxu0 %v17057_v38 }
 0x689   : > { %v7368_v8 = vmax.f32 %v7367_v16, %v4898_v58  ;;  %v4900_v52 = vpop.f32.mrb[159].mxu1 }
 0x68a   : > { %v7495_v61 = vmax.f32 %v7494_v45, %v4900_v52  ;;  %v5577_v23 = vpop.f32.mrb[160].mxu0 }
 0x68b   : > { %v7623_v47 = vmax.f32 %v7622_v10, %v5577_v23  ;;  %5163 = vmatmul.mubr.bf16.gmra.mrb[8].mxu1 %v14996_v13  ;;  %v5579_v24 = vpop.f32.mrb[161].mxu0  ;;  %v17361_v13 = vld [vmem:[#allocation66_spill] sm:$0xff] }
 0x68c   : > { %v7750_v30 = vmax.f32 %v7749_v2, %v5579_v24  ;;  %v5581_v11 = vpop.f32.mrb[162].mxu0  ;;  %5172 = vmatprep.mubr.bf16.mxu1 %v17057_v38 }
 0x68d   : > { %v7624_v57 = vmax.f32 %v7623_v47, %v5581_v11  ;;  %v5583_v21 = vpop.f32.mrb[163].mxu0 }
 0x68e   : > { %v7751_v59 = vmax.f32 %v7750_v30, %v5583_v21  ;;  %v4904_v35 = vpop.f32.mrb[160].mxu1 }
 0x68f   : > { %v7369_v63 = vmax.f32 %v7368_v8, %v4904_v35  ;;  %v4906_v27 = vpop.f32.mrb[161].mxu1  ;;  %5846 = vmatmul.mubr.bf16.gmra.mrb[12].mxu0 %v14992_v9 }
 0x690   : > { %v7496_v16 = vmax.f32 %v7495_v61, %v4906_v27  ;;  %v4908_v58 = vpop.f32.mrb[162].mxu1  ;;  %5855 = vmatprep.mubr.bf16.mxu0 %v17057_v38 }
 0x691   : > { %v7370_v10 = vmax.f32 %v7369_v63, %v4908_v58  ;;  %v4910_v45 = vpop.f32.mrb[163].mxu1 }
 0x692   : > { %v7497_v52 = vmax.f32 %v7496_v16, %v4910_v45  ;;  %v5587_v23 = vpop.f32.mrb[164].mxu0 }
 0x693   : > { %v7625_v2 = vmax.f32 %v7624_v57, %v5587_v23  ;;  %5173 = vmatmul.mubr.bf16.gmra.mrb[12].mxu1 %v14992_v9  ;;  %v5589_v24 = vpop.f32.mrb[165].mxu0  ;;  %v17362_v9 = vld [vmem:[#allocation63_spill] sm:$0xff] }
 0x694   : > { %v7752_v47 = vmax.f32 %v7751_v59, %v5589_v24  ;;  %v5591_v11 = vpop.f32.mrb[166].mxu0  ;;  %5182 = vmatprep.mubr.bf16.mxu1 %v17057_v38 }
 0x695   : > { %v7626_v8 = vmax.f32 %v7625_v2, %v5591_v11  ;;  %v5593_v30 = vpop.f32.mrb[167].mxu0 }
 0x696   : > { %v7753_v21 = vmax.f32 %v7752_v47, %v5593_v30  ;;  %v4914_v35 = vpop.f32.mrb[164].mxu1 }
 0x697   : > { %v7371_v61 = vmax.f32 %v7370_v10, %v4914_v35  ;;  %v4916_v27 = vpop.f32.mrb[165].mxu1  ;;  %5856 = vmatmul.mubr.bf16.gmra.mrb[16].mxu0 %v17361_v13 }
 0x698   : > { %v7498_v63 = vmax.f32 %v7497_v52, %v4916_v27  ;;  %v4918_v58 = vpop.f32.mrb[166].mxu1  ;;  %5865 = vmatprep.mubr.bf16.mxu0 %v17057_v38 }
 0x699   : > { %v7372_v57 = vmax.f32 %v7371_v61, %v4918_v58  ;;  %v4920_v16 = vpop.f32.mrb[167].mxu1 }
 0x69a   : > { %v7499_v45 = vmax.f32 %v7498_v63, %v4920_v16  ;;  %v5597_v23 = vpop.f32.mrb[168].mxu0 }
 0x69b   : > { %v7627_v59 = vmax.f32 %v7626_v8, %v5597_v23  ;;  %5183 = vmatmul.mubr.bf16.gmra.mrb[16].mxu1 %v17361_v13  ;;  %v5599_v24 = vpop.f32.mrb[169].mxu0  ;;  %v17363_v13 = vld [vmem:[#allocation68_spill] sm:$0xff] }
 0x69c   : > { %v7754_v2 = vmax.f32 %v7753_v21, %v5599_v24  ;;  %v5601_v11 = vpop.f32.mrb[170].mxu0  ;;  %5192 = vmatprep.mubr.bf16.mxu1 %v17057_v38 }
 0x69d   : > { %v7628_v10 = vmax.f32 %v7627_v59, %v5601_v11  ;;  %v5603_v47 = vpop.f32.mrb[171].mxu0 }
 0x69e   : > { %v7755_v30 = vmax.f32 %v7754_v2, %v5603_v47  ;;  %v4924_v35 = vpop.f32.mrb[168].mxu1 }
 0x69f   : > { %v7373_v52 = vmax.f32 %v7372_v57, %v4924_v35  ;;  %v4926_v27 = vpop.f32.mrb[169].mxu1  ;;  %5866 = vmatmul.mubr.bf16.gmra.mrb[20].mxu0 %v17362_v9 }
 0x6a0   : > { %v7500_v61 = vmax.f32 %v7499_v45, %v4926_v27  ;;  %v4928_v58 = vpop.f32.mrb[170].mxu1  ;;  %5875 = vmatprep.mubr.bf16.mxu0 %v17057_v38 }
 0x6a1   : > { %v7374_v8 = vmax.f32 %v7373_v52, %v4928_v58  ;;  %v4930_v63 = vpop.f32.mrb[171].mxu1 }
 0x6a2   : > { %v7501_v16 = vmax.f32 %v7500_v61, %v4930_v63  ;;  %v5607_v23 = vpop.f32.mrb[172].mxu0 }
 0x6a3   : > { %v7629_v21 = vmax.f32 %v7628_v10, %v5607_v23  ;;  %5193 = vmatmul.mubr.bf16.gmra.mrb[20].mxu1 %v17362_v9  ;;  %v5609_v24 = vpop.f32.mrb[173].mxu0  ;;  %v17364_v9 = vld [vmem:[#allocation43_spill] sm:$0xff] }
 0x6a4   : > { %v7756_v59 = vmax.f32 %v7755_v30, %v5609_v24  ;;  %v5611_v11 = vpop.f32.mrb[174].mxu0  ;;  %5202 = vmatprep.mubr.bf16.mxu1 %v17057_v38 }
 0x6a5   : > { %v7630_v57 = vmax.f32 %v7629_v21, %v5611_v11  ;;  %v5613_v2 = vpop.f32.mrb[175].mxu0 }
 0x6a6   : > { %v7757_v47 = vmax.f32 %v7756_v59, %v5613_v2  ;;  %v4934_v35 = vpop.f32.mrb[172].mxu1 }
 0x6a7   : > { %v7375_v45 = vmax.f32 %v7374_v8, %v4934_v35  ;;  %v4936_v27 = vpop.f32.mrb[173].mxu1  ;;  %5876 = vmatmul.mubr.bf16.gmra.mrb[24].mxu0 %v17363_v13 }
 0x6a8   : > { %v7502_v52 = vmax.f32 %v7501_v16, %v4936_v27  ;;  %v4938_v58 = vpop.f32.mrb[174].mxu1  ;;  %5885 = vmatprep.mubr.bf16.mxu0 %v17057_v38 }
 0x6a9   : > { %v7376_v10 = vmax.f32 %v7375_v45, %v4938_v58  ;;  %v4940_v61 = vpop.f32.mrb[175].mxu1 }
 0x6aa   : > { %v7503_v63 = vmax.f32 %v7502_v52, %v4940_v61  ;;  %v5617_v23 = vpop.f32.mrb[176].mxu0 }
 0x6ab   : > { %v7631_v30 = vmax.f32 %v7630_v57, %v5617_v23  ;;  %5203 = vmatmul.mubr.bf16.gmra.mrb[24].mxu1 %v17363_v13  ;;  %v5619_v24 = vpop.f32.mrb[177].mxu0 }
 0x6ac   : > { %v7758_v21 = vmax.f32 %v7757_v47, %v5619_v24  ;;  %v5621_v11 = vpop.f32.mrb[178].mxu0  ;;  %5212 = vmatprep.mubr.bf16.mxu1 %v17057_v38 }
 0x6ad   : > { %v7632_v8 = vmax.f32 %v7631_v30, %v5621_v11  ;;  %v5623_v59 = vpop.f32.mrb[179].mxu0 }
 0x6ae   : > { %v7759_v2 = vmax.f32 %v7758_v21, %v5623_v59  ;;  %v4944_v35 = vpop.f32.mrb[176].mxu1 }
 0x6af   : > { %v7377_v16 = vmax.f32 %v7376_v10, %v4944_v35  ;;  %v4946_v27 = vpop.f32.mrb[177].mxu1  ;;  %5886 = vmatmul.mubr.bf16.gmra.mrb[28].mxu0 %v17364_v9 }
 0x6b0   : > { %v7504_v45 = vmax.f32 %v7503_v63, %v4946_v27  ;;  %v4948_v58 = vpop.f32.mrb[178].mxu1  ;;  %5895 = vmatprep.mubr.bf16.mxu0 %v17057_v38 }
 0x6b1   : > { %v7378_v57 = vmax.f32 %v7377_v16, %v4948_v58  ;;  %v4950_v52 = vpop.f32.mrb[179].mxu1 }
 0x6b2   : > { %v7505_v61 = vmax.f32 %v7504_v45, %v4950_v52  ;;  %v5627_v23 = vpop.f32.mrb[180].mxu0 }
 0x6b3   : > { %v7633_v47 = vmax.f32 %v7632_v8, %v5627_v23  ;;  %5213 = vmatmul.mubr.bf16.gmra.mrb[28].mxu1 %v17364_v9  ;;  %v5629_v24 = vpop.f32.mrb[181].mxu0 }
 0x6b4   : > { %v7760_v30 = vmax.f32 %v7759_v2, %v5629_v24  ;;  %v5631_v11 = vpop.f32.mrb[182].mxu0  ;;  %5222 = vmatprep.mubr.bf16.mxu1 %v17057_v38 }
 0x6b5   : > { %v7634_v10 = vmax.f32 %v7633_v47, %v5631_v11  ;;  %v5633_v21 = vpop.f32.mrb[183].mxu0 }
 0x6b6   : > { %v7761_v59 = vmax.f32 %v7760_v30, %v5633_v21  ;;  %v4954_v35 = vpop.f32.mrb[180].mxu1 }
 0x6b7   : > { %v7379_v63 = vmax.f32 %v7378_v57, %v4954_v35  ;;  %v4956_v27 = vpop.f32.mrb[181].mxu1  ;;  %5896 = vmatmul.mubr.bf16.gmra.mrb[32].mxu0 %v15233_v4 }
 0x6b8   : > { %v7506_v16 = vmax.f32 %v7505_v61, %v4956_v27  ;;  %v4958_v58 = vpop.f32.mrb[182].mxu1  ;;  %5905 = vmatprep.mubr.bf16.mxu0 %v17057_v38 }
 0x6b9   : > { %v7380_v8 = vmax.f32 %v7379_v63, %v4958_v58  ;;  %v4960_v45 = vpop.f32.mrb[183].mxu1 }
 0x6ba   : > { %v7507_v52 = vmax.f32 %v7506_v16, %v4960_v45  ;;  %v5637_v23 = vpop.f32.mrb[184].mxu0 }
 0x6bb   : > { %v7635_v2 = vmax.f32 %v7634_v10, %v5637_v23  ;;  %5223 = vmatmul.mubr.bf16.gmra.mrb[32].mxu1 %v15233_v4  ;;  %v5639_v24 = vpop.f32.mrb[185].mxu0 }
 0x6bc   : > { %v7762_v47 = vmax.f32 %v7761_v59, %v5639_v24  ;;  %v5641_v11 = vpop.f32.mrb[186].mxu0  ;;  %5232 = vmatprep.mubr.bf16.mxu1 %v17057_v38 }
 0x6bd   : > { %v7636_v57 = vmax.f32 %v7635_v2, %v5641_v11  ;;  %v5643_v30 = vpop.f32.mrb[187].mxu0 }
 0x6be   : > { %v7763_v21 = vmax.f32 %v7762_v47, %v5643_v30  ;;  %v4964_v35 = vpop.f32.mrb[184].mxu1 }
 0x6bf   : > { %v7381_v61 = vmax.f32 %v7380_v8, %v4964_v35  ;;  %v4966_v27 = vpop.f32.mrb[185].mxu1  ;;  %5906 = vmatmul.mubr.bf16.gmra.mrb[36].mxu0 %v15231_v51 }
 0x6c0   : > { %v7508_v63 = vmax.f32 %v7507_v52, %v4966_v27  ;;  %v4968_v58 = vpop.f32.mrb[186].mxu1  ;;  %5915 = vmatprep.mubr.bf16.mxu0 %v17057_v38 }
 0x6c1   : > { %v7382_v10 = vmax.f32 %v7381_v61, %v4968_v58  ;;  %v4970_v16 = vpop.f32.mrb[187].mxu1 }
 0x6c2   : > { %v7509_v45 = vmax.f32 %v7508_v63, %v4970_v16  ;;  %v5647_v23 = vpop.f32.mrb[188].mxu0 }
 0x6c3   : > { %v7637_v59 = vmax.f32 %v7636_v57, %v5647_v23  ;;  %5233 = vmatmul.mubr.bf16.gmra.mrb[36].mxu1 %v15231_v51  ;;  %v5649_v24 = vpop.f32.mrb[189].mxu0 }
 0x6c4   : > { %v7764_v2 = vmax.f32 %v7763_v21, %v5649_v24  ;;  %v5651_v11 = vpop.f32.mrb[190].mxu0  ;;  %5242 = vmatprep.mubr.bf16.mxu1 %v17057_v38 }
 0x6c5   : > { %v7638_v8 = vmax.f32 %v7637_v59, %v5651_v11  ;;  %v5653_v47 = vpop.f32.mrb[191].mxu0 }
 0x6c6   : > { %v7765_v30 = vmax.f32 %v7764_v2, %v5653_v47  ;;  %v4974_v35 = vpop.f32.mrb[188].mxu1 }
 0x6c7   : > { %v7383_v52 = vmax.f32 %v7382_v10, %v4974_v35  ;;  %v4976_v27 = vpop.f32.mrb[189].mxu1  ;;  %5916 = vmatmul.mubr.bf16.gmra.mrb[40].mxu0 %v15292_v40 }
 0x6c8   : > { %v7510_v61 = vmax.f32 %v7509_v45, %v4976_v27  ;;  %v4978_v58 = vpop.f32.mrb[190].mxu1  ;;  %5925 = vmatprep.mubr.bf16.mxu0 %v17057_v38 }
 0x6c9   : > { %v7384_v57 = vmax.f32 %v7383_v52, %v4978_v58  ;;  %v4980_v63 = vpop.f32.mrb[191].mxu1 }
 0x6ca   : > { %v7511_v16 = vmax.f32 %v7510_v61, %v4980_v63  ;;  %v5657_v23 = vpop.f32.mrb[192].mxu0 }
 0x6cb   : > { %v7639_v21 = vmax.f32 %v7638_v8, %v5657_v23  ;;  %5243 = vmatmul.mubr.bf16.gmra.mrb[40].mxu1 %v15292_v40  ;;  %v5659_v24 = vpop.f32.mrb[193].mxu0 }
 0x6cc   : > { %v7766_v59 = vmax.f32 %v7765_v30, %v5659_v24  ;;  %v5661_v11 = vpop.f32.mrb[194].mxu0  ;;  %5252 = vmatprep.mubr.bf16.mxu1 %v17057_v38 }
 0x6cd   : > { %v7640_v10 = vmax.f32 %v7639_v21, %v5661_v11  ;;  %v5663_v2 = vpop.f32.mrb[195].mxu0 }
 0x6ce   : > { %v7767_v47 = vmax.f32 %v7766_v59, %v5663_v2  ;;  %v4984_v35 = vpop.f32.mrb[192].mxu1 }
 0x6cf   : > { %v7385_v45 = vmax.f32 %v7384_v57, %v4984_v35  ;;  %v4986_v27 = vpop.f32.mrb[193].mxu1  ;;  %5926 = vmatmul.mubr.bf16.gmra.mrb[44].mxu0 %v15289_v18 }
 0x6d0   : > { %v7512_v52 = vmax.f32 %v7511_v16, %v4986_v27  ;;  %v4988_v58 = vpop.f32.mrb[194].mxu1  ;;  %5935 = vmatprep.mubr.bf16.mxu0 %v17057_v38 }
 0x6d1   : > { %v7386_v8 = vmax.f32 %v7385_v45, %v4988_v58  ;;  %v4990_v61 = vpop.f32.mrb[195].mxu1 }
 0x6d2   : > { %v7513_v63 = vmax.f32 %v7512_v52, %v4990_v61  ;;  %v5667_v23 = vpop.f32.mrb[196].mxu0 }
 0x6d3   : > { %v7641_v30 = vmax.f32 %v7640_v10, %v5667_v23  ;;  %5253 = vmatmul.mubr.bf16.gmra.mrb[44].mxu1 %v15289_v18  ;;  %v5669_v24 = vpop.f32.mrb[197].mxu0 }
 0x6d4   : > { %v7768_v21 = vmax.f32 %v7767_v47, %v5669_v24  ;;  %v5671_v11 = vpop.f32.mrb[198].mxu0  ;;  %5262 = vmatprep.mubr.bf16.mxu1 %v17057_v38 }
 0x6d5   : > { %v7642_v57 = vmax.f32 %v7641_v30, %v5671_v11  ;;  %v5673_v59 = vpop.f32.mrb[199].mxu0 }
 0x6d6   : > { %v7769_v2 = vmax.f32 %v7768_v21, %v5673_v59  ;;  %v4994_v35 = vpop.f32.mrb[196].mxu1 }
 0x6d7   : > { %v7387_v16 = vmax.f32 %v7386_v8, %v4994_v35  ;;  %v4996_v27 = vpop.f32.mrb[197].mxu1  ;;  %5936 = vmatmul.mubr.bf16.gmra.mrb[48].mxu0 %v15353_v54 }
 0x6d8   : > { %v7514_v45 = vmax.f32 %v7513_v63, %v4996_v27  ;;  %v4998_v58 = vpop.f32.mrb[198].mxu1  ;;  %5945 = vmatprep.mubr.bf16.mxu0 %v17057_v38 }
 0x6d9   : > { %v7388_v10 = vmax.f32 %v7387_v16, %v4998_v58  ;;  %v5000_v52 = vpop.f32.mrb[199].mxu1 }
 0x6da   : > { %v7515_v61 = vmax.f32 %v7514_v45, %v5000_v52  ;;  %v5677_v23 = vpop.f32.mrb[200].mxu0 }
 0x6db   : > { %v7643_v47 = vmax.f32 %v7642_v57, %v5677_v23  ;;  %5263 = vmatmul.mubr.bf16.gmra.mrb[48].mxu1 %v15353_v54  ;;  %v5679_v24 = vpop.f32.mrb[201].mxu0 }
 0x6dc   : > { %v7770_v30 = vmax.f32 %v7769_v2, %v5679_v24  ;;  %v5681_v11 = vpop.f32.mrb[202].mxu0  ;;  %5272 = vmatprep.mubr.bf16.mxu1 %v17057_v38 }
 0x6dd   : > { %v7644_v8 = vmax.f32 %v7643_v47, %v5681_v11  ;;  %v5683_v21 = vpop.f32.mrb[203].mxu0 }
 0x6de   : > { %v7771_v59 = vmax.f32 %v7770_v30, %v5683_v21  ;;  %v5004_v35 = vpop.f32.mrb[200].mxu1 }
 0x6df   : > { %v7389_v63 = vmax.f32 %v7388_v10, %v5004_v35  ;;  %v5006_v27 = vpop.f32.mrb[201].mxu1  ;;  %5946 = vmatmul.mubr.bf16.gmra.mrb[52].mxu0 %v15351_v46 }
 0x6e0   : > { %v7516_v16 = vmax.f32 %v7515_v61, %v5006_v27  ;;  %v5008_v58 = vpop.f32.mrb[202].mxu1  ;;  %5955 = vmatprep.mubr.bf16.mxu0 %v17057_v38 }
 0x6e1   : > { %v7390_v57 = vmax.f32 %v7389_v63, %v5008_v58  ;;  %v5010_v45 = vpop.f32.mrb[203].mxu1 }
 0x6e2   : > { %v7517_v52 = vmax.f32 %v7516_v16, %v5010_v45  ;;  %v5687_v23 = vpop.f32.mrb[204].mxu0 }
 0x6e3   : > { %v7645_v2 = vmax.f32 %v7644_v8, %v5687_v23  ;;  %5273 = vmatmul.mubr.bf16.gmra.mrb[52].mxu1 %v15351_v46  ;;  %v5689_v24 = vpop.f32.mrb[205].mxu0 }
 0x6e4   : > { %v7772_v47 = vmax.f32 %v7771_v59, %v5689_v24  ;;  %v5691_v11 = vpop.f32.mrb[206].mxu0  ;;  %5282 = vmatprep.mubr.bf16.mxu1 %v17057_v38 }
 0x6e5   : > { %v7646_v10 = vmax.f32 %v7645_v2, %v5691_v11  ;;  %v5693_v30 = vpop.f32.mrb[207].mxu0 }
 0x6e6   : > { %v7773_v21 = vmax.f32 %v7772_v47, %v5693_v30  ;;  %v5014_v35 = vpop.f32.mrb[204].mxu1 }
 0x6e7   : > { %v7391_v61 = vmax.f32 %v7390_v57, %v5014_v35  ;;  %v5016_v27 = vpop.f32.mrb[205].mxu1  ;;  %5956 = vmatmul.mubr.bf16.gmra.mrb[56].mxu0 %v15411_v25 }
 0x6e8   : > { %v7518_v63 = vmax.f32 %v7517_v52, %v5016_v27  ;;  %v5018_v58 = vpop.f32.mrb[206].mxu1  ;;  %5965 = vmatprep.mubr.bf16.mxu0 %v17057_v38 }
 0x6e9   : > { %v7392_v8 = vmax.f32 %v7391_v61, %v5018_v58  ;;  %v5020_v16 = vpop.f32.mrb[207].mxu1 }
 0x6ea   : > { %v7519_v45 = vmax.f32 %v7518_v63, %v5020_v16  ;;  %v5697_v23 = vpop.f32.mrb[208].mxu0 }
 0x6eb   : > { %v7647_v59 = vmax.f32 %v7646_v10, %v5697_v23  ;;  %5283 = vmatmul.mubr.bf16.gmra.mrb[56].mxu1 %v15411_v25  ;;  %v5699_v24 = vpop.f32.mrb[209].mxu0 }
 0x6ec   : > { %v7774_v2 = vmax.f32 %v7773_v21, %v5699_v24  ;;  %v5701_v11 = vpop.f32.mrb[210].mxu0  ;;  %5292 = vmatprep.mubr.bf16.mxu1 %v17057_v38 }
 0x6ed   : > { %v7648_v57 = vmax.f32 %v7647_v59, %v5701_v11  ;;  %v5703_v47 = vpop.f32.mrb[211].mxu0 }
 0x6ee   : > { %v7775_v30 = vmax.f32 %v7774_v2, %v5703_v47  ;;  %v5024_v35 = vpop.f32.mrb[208].mxu1 }
 0x6ef   : > { %v7393_v52 = vmax.f32 %v7392_v8, %v5024_v35  ;;  %v5026_v27 = vpop.f32.mrb[209].mxu1  ;;  %5966 = vmatmul.mubr.bf16.gmra.mrb[60].mxu0 %v15409_v56 }
 0x6f0   : > { %v7520_v61 = vmax.f32 %v7519_v45, %v5026_v27  ;;  %v5028_v58 = vpop.f32.mrb[210].mxu1  ;;  %6681 = vmatprep.mubr.bf16.mxu0 %v17057_v38 }
 0x6f1   : > { %v7394_v10 = vmax.f32 %v7393_v52, %v5028_v58  ;;  %v5030_v63 = vpop.f32.mrb[211].mxu1 }
 0x6f2   : > { %v7521_v16 = vmax.f32 %v7520_v61, %v5030_v63  ;;  %v5707_v23 = vpop.f32.mrb[212].mxu0 }
 0x6f3   : > { %v7649_v21 = vmax.f32 %v7648_v57, %v5707_v23  ;;  %5293 = vmatmul.mubr.bf16.gmra.mrb[60].mxu1 %v15409_v56  ;;  %v5709_v24 = vpop.f32.mrb[213].mxu0 }
 0x6f4   : > { %v7776_v59 = vmax.f32 %v7775_v30, %v5709_v24  ;;  %v5711_v11 = vpop.f32.mrb[214].mxu0  ;;  %6008 = vmatprep.mubr.bf16.mxu1 %v17057_v38 }
 0x6f5   : > { %v7650_v8 = vmax.f32 %v7649_v21, %v5711_v11  ;;  %v5713_v2 = vpop.f32.mrb[215].mxu0 }
 0x6f6   : > { %v7777_v47 = vmax.f32 %v7776_v59, %v5713_v2  ;;  %v5034_v35 = vpop.f32.mrb[212].mxu1 }
 0x6f7   : > { %v7395_v45 = vmax.f32 %v7394_v10, %v5034_v35  ;;  %v5036_v27 = vpop.f32.mrb[213].mxu1  ;;  %6682 = vmatmul.mubr.bf16.vlgmr.msra.gmra.mrb[64].mxu0 %v13855_v29 }
 0x6f8   : > { %v7522_v52 = vmax.f32 %v7521_v16, %v5036_v27  ;;  %v5038_v58 = vpop.f32.mrb[214].mxu1  ;;  %6691 = vmatprep.mubr.bf16.mxu0 %v17057_v38 }
 0x6f9   : > { %v7396_v57 = vmax.f32 %v7395_v45, %v5038_v58  ;;  %v5040_v61 = vpop.f32.mrb[215].mxu1 }
 0x6fa   : > { %v7523_v63 = vmax.f32 %v7522_v52, %v5040_v61  ;;  %v5717_v23 = vpop.f32.mrb[216].mxu0 }
 0x6fb   : > { %v7651_v30 = vmax.f32 %v7650_v8, %v5717_v23  ;;  %v5719_v24 = vpop.f32.mrb[217].mxu0  ;;  %6009 = vmatmul.mubr.bf16.vlgmr.msra.gmra.mrb[64].mxu1 %v13855_v29 }
 0x6fc   : > { %v7778_v21 = vmax.f32 %v7777_v47, %v5719_v24  ;;  %v5721_v11 = vpop.f32.mrb[218].mxu0  ;;  %6018 = vmatprep.mubr.bf16.mxu1 %v17057_v38 }
 0x6fd   : > { %v7652_v10 = vmax.f32 %v7651_v30, %v5721_v11  ;;  %v5723_v59 = vpop.f32.mrb[219].mxu0 }
 0x6fe   : > { %v7779_v2 = vmax.f32 %v7778_v21, %v5723_v59  ;;  %v5044_v35 = vpop.f32.mrb[216].mxu1 }
 0x6ff   : > { %v7397_v16 = vmax.f32 %v7396_v57, %v5044_v35  ;;  %v5046_v27 = vpop.f32.mrb[217].mxu1  ;;  %6692 = vmatmul.mubr.bf16.gmra.mrb[68].mxu0 %v13849_v6 }
 0x700   : > { %v7524_v45 = vmax.f32 %v7523_v63, %v5046_v27  ;;  %v5048_v58 = vpop.f32.mrb[218].mxu1  ;;  %6701 = vmatprep.mubr.bf16.mxu0 %v17057_v38 }
 0x701   : > { %v7398_v8 = vmax.f32 %v7397_v16, %v5048_v58  ;;  %v5050_v52 = vpop.f32.mrb[219].mxu1 }
 0x702   : > { %v7525_v61 = vmax.f32 %v7524_v45, %v5050_v52  ;;  %v5727_v29 = vpop.f32.mrb[220].mxu0 }
 0x703   : > { %v7653_v47 = vmax.f32 %v7652_v10, %v5727_v29  ;;  %v5729_v23 = vpop.f32.mrb[221].mxu0  ;;  %6019 = vmatmul.mubr.bf16.gmra.mrb[68].mxu1 %v13849_v6 }
 0x704   : > { %v7780_v30 = vmax.f32 %v7779_v2, %v5729_v23  ;;  %v5731_v24 = vpop.f32.mrb[222].mxu0  ;;  %6028 = vmatprep.mubr.bf16.mxu1 %v17057_v38 }
 0x705   : > { %v7654_v57 = vmax.f32 %v7653_v47, %v5731_v24  ;;  %v5733_v21 = vpop.f32.mrb[223].mxu0 }
 0x706   : > { %v7781_v11 = vmax.f32 %v7780_v30, %v5733_v21  ;;  %v5054_v59 = vpop.f32.mrb[220].mxu1 }
 0x707   : > { %v7399_v63 = vmax.f32 %v7398_v8, %v5054_v59  ;;  %v5056_v35 = vpop.f32.mrb[221].mxu1  ;;  %6702 = vmatmul.mubr.bf16.gmra.mrb[72].mxu0 %v14310_v3 }
 0x708   : > { %v7526_v16 = vmax.f32 %v7525_v61, %v5056_v35  ;;  %v5058_v27 = vpop.f32.mrb[222].mxu1  ;;  %6711 = vmatprep.mubr.bf16.mxu0 %v17057_v38 }
 0x709   : > { %v7400_v10 = vmax.f32 %v7399_v63, %v5058_v27  ;;  %v5060_v45 = vpop.f32.mrb[223].mxu1 }
 0x70a   : > { %v7527_v58 = vmax.f32 %v7526_v16, %v5060_v45  ;;  %v5737_v6 = vpop.f32.mrb[224].mxu0 }
 0x70b   : > { %v7655_v2 = vmax.f32 %v7654_v57, %v5737_v6  ;;  %v5739_v52 = vpop.f32.mrb[225].mxu0  ;;  %6029 = vmatmul.mubr.bf16.gmra.mrb[72].mxu1 %v14310_v3 }
 0x70c   : > { %v7782_v29 = vmax.f32 %v7781_v11, %v5739_v52  ;;  %v5741_v47 = vpop.f32.mrb[226].mxu0  ;;  %6038 = vmatprep.mubr.bf16.mxu1 %v17057_v38 }
 0x70d   : > { %v7656_v8 = vmax.f32 %v7655_v2, %v5741_v47  ;;  %v5743_v23 = vpop.f32.mrb[227].mxu0 }
 0x70e   : > { %v7783_v30 = vmax.f32 %v7782_v29, %v5743_v23  ;;  %v5064_v24 = vpop.f32.mrb[224].mxu1 }
 0x70f   : > { %v7401_v61 = vmax.f32 %v7400_v10, %v5064_v24  ;;  %v5066_v21 = vpop.f32.mrb[225].mxu1  ;;  %6712 = vmatmul.mubr.bf16.gmra.mrb[76].mxu0 %v14308_v19 }
 0x710   : > { %v7528_v59 = vmax.f32 %v7527_v58, %v5066_v21  ;;  %v5068_v63 = vpop.f32.mrb[226].mxu1  ;;  %6721 = vmatprep.mubr.bf16.mxu0 %v17057_v38 }
 0x711   : > { %v7402_v57 = vmax.f32 %v7401_v61, %v5068_v63  ;;  %v5070_v35 = vpop.f32.mrb[227].mxu1 }
 0x712   : > { %v7529_v16 = vmax.f32 %v7528_v59, %v5070_v35  ;;  %v5747_v3 = vpop.f32.mrb[228].mxu0 }
 0x713   : > { %v7657_v11 = vmax.f32 %v7656_v8, %v5747_v3  ;;  %v5749_v27 = vpop.f32.mrb[229].mxu0  ;;  %6039 = vmatmul.mubr.bf16.gmra.mrb[76].mxu1 %v14308_v19 }
 0x714   : > { %v7784_v45 = vmax.f32 %v7783_v30, %v5749_v27  ;;  %v5751_v6 = vpop.f32.mrb[230].mxu0  ;;  %6048 = vmatprep.mubr.bf16.mxu1 %v17057_v38 }
 0x715   : > { %v7658_v10 = vmax.f32 %v7657_v11, %v5751_v6  ;;  %v5753_v2 = vpop.f32.mrb[231].mxu0 }
 0x716   : > { %v7785_v52 = vmax.f32 %v7784_v45, %v5753_v2  ;;  %v5074_v29 = vpop.f32.mrb[228].mxu1 }
 0x717   : > { %v7403_v58 = vmax.f32 %v7402_v57, %v5074_v29  ;;  %v5076_v47 = vpop.f32.mrb[229].mxu1  ;;  %6722 = vmatmul.mubr.bf16.gmra.mrb[80].mxu0 %v14330_v44 }
 0x718   : > { %v7530_v23 = vmax.f32 %v7529_v16, %v5076_v47  ;;  %v5078_v24 = vpop.f32.mrb[230].mxu1  ;;  %6731 = vmatprep.mubr.bf16.mxu0 %v17057_v38 }
 0x719   : > { %v7404_v8 = vmax.f32 %v7403_v58, %v5078_v24  ;;  %v5080_v61 = vpop.f32.mrb[231].mxu1 }
 0x71a   : > { %v7531_v21 = vmax.f32 %v7530_v23, %v5080_v61  ;;  %v5757_v19 = vpop.f32.mrb[232].mxu0 }
 0x71b   : > { %v7659_v30 = vmax.f32 %v7658_v10, %v5757_v19  ;;  %v5759_v59 = vpop.f32.mrb[233].mxu0  ;;  %6049 = vmatmul.mubr.bf16.gmra.mrb[80].mxu1 %v14330_v44 }
 0x71c   : > { %v7786_v63 = vmax.f32 %v7785_v52, %v5759_v59  ;;  %v5761_v35 = vpop.f32.mrb[234].mxu0  ;;  %6058 = vmatprep.mubr.bf16.mxu1 %v17057_v38 }
 0x71d   : > { %v7660_v57 = vmax.f32 %v7659_v30, %v5761_v35  ;;  %v5763_v3 = vpop.f32.mrb[235].mxu0 }
 0x71e   : > { %v7787_v11 = vmax.f32 %v7786_v63, %v5763_v3  ;;  %v5084_v27 = vpop.f32.mrb[232].mxu1 }
 0x71f   : > { %v7405_v16 = vmax.f32 %v7404_v8, %v5084_v27  ;;  %v5086_v45 = vpop.f32.mrb[233].mxu1  ;;  %6732 = vmatmul.mubr.bf16.gmra.mrb[84].mxu0 %v14327_v26 }
 0x720   : > { %v7532_v6 = vmax.f32 %v7531_v21, %v5086_v45  ;;  %v5088_v2 = vpop.f32.mrb[234].mxu1  ;;  %6741 = vmatprep.mubr.bf16.mxu0 %v17057_v38 }
 0x721   : > { %v7406_v10 = vmax.f32 %v7405_v16, %v5088_v2  ;;  %v5090_v29 = vpop.f32.mrb[235].mxu1 }
 0x722   : > { %v7533_v58 = vmax.f32 %v7532_v6, %v5090_v29  ;;  %v5767_v44 = vpop.f32.mrb[236].mxu0 }
 0x723   : > { %v7661_v52 = vmax.f32 %v7660_v57, %v5767_v44  ;;  %v5769_v47 = vpop.f32.mrb[237].mxu0  ;;  %6059 = vmatmul.mubr.bf16.gmra.mrb[84].mxu1 %v14327_v26 }
 0x724   : > { %v7788_v23 = vmax.f32 %v7787_v11, %v5769_v47  ;;  %v5771_v24 = vpop.f32.mrb[238].mxu0  ;;  %6068 = vmatprep.mubr.bf16.mxu1 %v17057_v38 }
 0x725   : > { %v7662_v8 = vmax.f32 %v7661_v52, %v5771_v24  ;;  %v5773_v61 = vpop.f32.mrb[239].mxu0 }
 0x726   : > { %v7789_v19 = vmax.f32 %v7788_v23, %v5773_v61  ;;  %v5094_v30 = vpop.f32.mrb[236].mxu1 }
 0x727   : > { %v7407_v21 = vmax.f32 %v7406_v10, %v5094_v30  ;;  %v5096_v59 = vpop.f32.mrb[237].mxu1  ;;  %6742 = vmatmul.mubr.bf16.gmra.mrb[88].mxu0 %v14349_v33 }
 0x728   : > { %v7534_v63 = vmax.f32 %v7533_v58, %v5096_v59  ;;  %v5098_v35 = vpop.f32.mrb[238].mxu1  ;;  %6751 = vmatprep.mubr.bf16.mxu0 %v17057_v38 }
 0x729   : > { %v7408_v57 = vmax.f32 %v7407_v21, %v5098_v35  ;;  %v5100_v3 = vpop.f32.mrb[239].mxu1 }
 0x72a   : > { %v7535_v27 = vmax.f32 %v7534_v63, %v5100_v3  ;;  %v5777_v26 = vpop.f32.mrb[240].mxu0 }
 0x72b   : > { %v7663_v11 = vmax.f32 %v7662_v8, %v5777_v26  ;;  %v5779_v16 = vpop.f32.mrb[241].mxu0  ;;  %6069 = vmatmul.mubr.bf16.gmra.mrb[88].mxu1 %v14349_v33 }
 0x72c   : > { %v7790_v45 = vmax.f32 %v7789_v19, %v5779_v16  ;;  %v5781_v6 = vpop.f32.mrb[242].mxu0  ;;  %6078 = vmatprep.mubr.bf16.mxu1 %v17057_v38 }
 0x72d   : > { %v7664_v2 = vmax.f32 %v7663_v11, %v5781_v6  ;;  %v5783_v10 = vpop.f32.mrb[243].mxu0 }
 0x72e   : > { %v7791_v29 = vmax.f32 %v7790_v45, %v5783_v10  ;;  %v5104_v44 = vpop.f32.mrb[240].mxu1 }
 0x72f   : > { %v7409_v58 = vmax.f32 %v7408_v57, %v5104_v44  ;;  %v5106_v52 = vpop.f32.mrb[241].mxu1  ;;  %6752 = vmatmul.mubr.bf16.gmra.mrb[92].mxu0 %v14347_v5 }
 0x730   : > { %v7536_v47 = vmax.f32 %v7535_v27, %v5106_v52  ;;  %v5108_v23 = vpop.f32.mrb[242].mxu1  ;;  %6761 = vmatprep.mubr.bf16.mxu0 %v17057_v38 }
 0x731   : > { %v7410_v24 = vmax.f32 %v7409_v58, %v5108_v23  ;;  %v5110_v8 = vpop.f32.mrb[243].mxu1 }
 0x732   : > { %v7537_v61 = vmax.f32 %v7536_v47, %v5110_v8  ;;  %v5787_v33 = vpop.f32.mrb[244].mxu0 }
 0x733   : > { %v7665_v19 = vmax.f32 %v7664_v2, %v5787_v33  ;;  %v5789_v30 = vpop.f32.mrb[245].mxu0  ;;  %6079 = vmatmul.mubr.bf16.gmra.mrb[92].mxu1 %v14347_v5 }
 0x734   : > { %v7792_v21 = vmax.f32 %v7791_v29, %v5789_v30  ;;  %v5791_v59 = vpop.f32.mrb[246].mxu0  ;;  %6088 = vmatprep.mubr.bf16.mxu1 %v17057_v38 }
 0x735   : > { %v7666_v63 = vmax.f32 %v7665_v19, %v5791_v59  ;;  %v5793_v35 = vpop.f32.mrb[247].mxu0 }
 0x736   : > { %v7793_v57 = vmax.f32 %v7792_v21, %v5793_v35  ;;  %v5114_v3 = vpop.f32.mrb[244].mxu1 }
 0x737   : > { %v7411_v27 = vmax.f32 %v7410_v24, %v5114_v3  ;;  %v5116_v26 = vpop.f32.mrb[245].mxu1  ;;  %6762 = vmatmul.mubr.bf16.gmra.mrb[96].mxu0 %v14374_v22 }
 0x738   : > { %v7538_v11 = vmax.f32 %v7537_v61, %v5116_v26  ;;  %v5118_v16 = vpop.f32.mrb[246].mxu1  ;;  %6771 = vmatprep.mubr.bf16.mxu0 %v17057_v38 }
 0x739   : > { %v7412_v45 = vmax.f32 %v7411_v27, %v5118_v16  ;;  %v5120_v6 = vpop.f32.mrb[247].mxu1 }
 0x73a   : > { %v7539_v2 = vmax.f32 %v7538_v11, %v5120_v6  ;;  %v5797_v5 = vpop.f32.mrb[248].mxu0 }
 0x73b   : > { %v7667_v10 = vmax.f32 %v7666_v63, %v5797_v5  ;;  %v5799_v29 = vpop.f32.mrb[249].mxu0  ;;  %6089 = vmatmul.mubr.bf16.gmra.mrb[96].mxu1 %v14374_v22 }
 0x73c   : > { %v7794_v44 = vmax.f32 %v7793_v57, %v5799_v29  ;;  %v5801_v58 = vpop.f32.mrb[250].mxu0  ;;  %6098 = vmatprep.mubr.bf16.mxu1 %v17057_v38 }
 0x73d   : > { %v7668_v52 = vmax.f32 %v7667_v10, %v5801_v58  ;;  %v5803_v47 = vpop.f32.mrb[251].mxu0 }
 0x73e   : > { %v7795_v23 = vmax.f32 %v7794_v44, %v5803_v47  ;;  %v5124_v24 = vpop.f32.mrb[248].mxu1 }
 0x73f   : > { %v7413_v8 = vmax.f32 %v7412_v45, %v5124_v24  ;;  %v5126_v61 = vpop.f32.mrb[249].mxu1  ;;  %6772 = vmatmul.mubr.bf16.gmra.mrb[100].mxu0 %v14371_v31 }
 0x740   : > { %v7540_v33 = vmax.f32 %v7539_v2, %v5126_v61  ;;  %v5128_v19 = vpop.f32.mrb[250].mxu1  ;;  %6781 = vmatprep.mubr.bf16.mxu0 %v17057_v38 }
 0x741   : > { %v7414_v30 = vmax.f32 %v7413_v8, %v5128_v19  ;;  %v5130_v21 = vpop.f32.mrb[251].mxu1 }
 0x742   : > { %v7541_v59 = vmax.f32 %v7540_v33, %v5130_v21  ;;  %v5807_v22 = vpop.f32.mrb[252].mxu0 }
 0x743   : > { %v7669_v63 = vmax.f32 %v7668_v52, %v5807_v22  ;;  %v5809_v35 = vpop.f32.mrb[253].mxu0  ;;  %6099 = vmatmul.mubr.bf16.gmra.mrb[100].mxu1 %v14371_v31 }
 0x744   : > { %v7796_v57 = vmax.f32 %v7795_v23, %v5809_v35  ;;  %v5811_v3 = vpop.f32.mrb[254].mxu0  ;;  %6108 = vmatprep.mubr.bf16.mxu1 %v17057_v38 }
 0x745   : > { %v7670_v27 = vmax.f32 %v7669_v63, %v5811_v3  ;;  %v5813_v26 = vpop.f32.mrb[255].mxu0 }
 0x746   : > { %v7797_v11 = vmax.f32 %v7796_v57, %v5813_v26  ;;  %v5134_v16 = vpop.f32.mrb[252].mxu1 }
 0x747   : > { %v7415_v45 = vmax.f32 %v7414_v30, %v5134_v16  ;;  %v5136_v6 = vpop.f32.mrb[253].mxu1  ;;  %6782 = vmatmul.mubr.bf16.gmra.mrb[104].mxu0 %v14399_v14 }
 0x748   : > { %v7542_v2 = vmax.f32 %v7541_v59, %v5136_v6  ;;  %v5138_v5 = vpop.f32.mrb[254].mxu1  ;;  %6791 = vmatprep.mubr.bf16.mxu0 %v17057_v38 }
 0x749   : > { %v7416_v10 = vmax.f32 %v7415_v45, %v5138_v5  ;;  %v5140_v29 = vpop.f32.mrb[255].mxu1 }
 0x74a   : > { %v7543_v44 = vmax.f32 %v7542_v2, %v5140_v29  ;;  %v5817_v31 = vpop.f32.mrb[0].mxu0 }
 0x74b   : > { %v7671_v58 = vmax.f32 %v7670_v27, %v5817_v31  ;;  %v5819_v52 = vpop.f32.mrb[1].mxu0  ;;  %6109 = vmatmul.mubr.bf16.gmra.mrb[104].mxu1 %v14399_v14 }
 0x74c   : > { %v7798_v47 = vmax.f32 %v7797_v11, %v5819_v52  ;;  %v5821_v23 = vpop.f32.mrb[2].mxu0  ;;  %6118 = vmatprep.mubr.bf16.mxu1 %v17057_v38 }
 0x74d   : > { %v7672_v24 = vmax.f32 %v7671_v58, %v5821_v23  ;;  %v5823_v8 = vpop.f32.mrb[3].mxu0 }
 0x74e   : > { %v7799_v61 = vmax.f32 %v7798_v47, %v5823_v8  ;;  %v5144_v33 = vpop.f32.mrb[0].mxu1 }
 0x74f   : > { %v7417_v19 = vmax.f32 %v7416_v10, %v5144_v33  ;;  %v5146_v30 = vpop.f32.mrb[1].mxu1  ;;  %6792 = vmatmul.mubr.bf16.gmra.mrb[108].mxu0 %v14394_v15 }
 0x750   : > { %v7544_v21 = vmax.f32 %v7543_v44, %v5146_v30  ;;  %v5148_v59 = vpop.f32.mrb[2].mxu1  ;;  %6801 = vmatprep.mubr.bf16.mxu0 %v17057_v38 }
 0x751   : > { %v7418_v22 = vmax.f32 %v7417_v19, %v5148_v59  ;;  %v5150_v63 = vpop.f32.mrb[3].mxu1 }
 0x752   : > { %v7545_v35 = vmax.f32 %v7544_v21, %v5150_v63  ;;  %v5827_v14 = vpop.f32.mrb[4].mxu0 }
 0x753   : > { %v7673_v57 = vmax.f32 %v7672_v24, %v5827_v14  ;;  %v5829_v3 = vpop.f32.mrb[5].mxu0  ;;  %6119 = vmatmul.mubr.bf16.gmra.mrb[108].mxu1 %v14394_v15 }
 0x754   : > { %v7800_v27 = vmax.f32 %v7799_v61, %v5829_v3  ;;  %v5831_v26 = vpop.f32.mrb[6].mxu0  ;;  %6128 = vmatprep.mubr.bf16.mxu1 %v17057_v38 }
 0x755   : > { %v7674_v11 = vmax.f32 %v7673_v57, %v5831_v26  ;;  %v5833_v16 = vpop.f32.mrb[7].mxu0 }
 0x756   : > { %v7801_v45 = vmax.f32 %v7800_v27, %v5833_v16  ;;  %v5154_v6 = vpop.f32.mrb[4].mxu1 }
 0x757   : > { %v7419_v2 = vmax.f32 %v7418_v22, %v5154_v6  ;;  %v5156_v5 = vpop.f32.mrb[5].mxu1  ;;  %6802 = vmatmul.mubr.bf16.gmra.mrb[112].mxu0 %v14420_v49 }
 0x758   : > { %v7546_v10 = vmax.f32 %v7545_v35, %v5156_v5  ;;  %v5158_v29 = vpop.f32.mrb[6].mxu1  ;;  %6811 = vmatprep.mubr.bf16.mxu0 %v17057_v38 }
 0x759   : > { %v7420_v44 = vmax.f32 %v7419_v2, %v5158_v29  ;;  %v5160_v31 = vpop.f32.mrb[7].mxu1 }
 0x75a   : > { %v7547_v58 = vmax.f32 %v7546_v10, %v5160_v31  ;;  %v5837_v15 = vpop.f32.mrb[8].mxu0 }
 0x75b   : > { %v7675_v52 = vmax.f32 %v7674_v11, %v5837_v15  ;;  %v5839_v47 = vpop.f32.mrb[9].mxu0  ;;  %6129 = vmatmul.mubr.bf16.gmra.mrb[112].mxu1 %v14420_v49 }
 0x75c   : > { %v7802_v23 = vmax.f32 %v7801_v45, %v5839_v47  ;;  %v5841_v24 = vpop.f32.mrb[10].mxu0  ;;  %6138 = vmatprep.mubr.bf16.mxu1 %v17057_v38 }
 0x75d   : > { %v7676_v8 = vmax.f32 %v7675_v52, %v5841_v24  ;;  %v5843_v61 = vpop.f32.mrb[11].mxu0 }
 0x75e   : > { %v7803_v33 = vmax.f32 %v7802_v23, %v5843_v61  ;;  %v5164_v19 = vpop.f32.mrb[8].mxu1 }
 0x75f   : > { %v7421_v30 = vmax.f32 %v7420_v44, %v5164_v19  ;;  %v5166_v21 = vpop.f32.mrb[9].mxu1  ;;  %6812 = vmatmul.mubr.bf16.gmra.mrb[116].mxu0 %v14416_v50 }
 0x760   : > { %v7548_v59 = vmax.f32 %v7547_v58, %v5166_v21  ;;  %v5168_v22 = vpop.f32.mrb[10].mxu1  ;;  %6821 = vmatprep.mubr.bf16.mxu0 %v17057_v38 }
 0x761   : > { %v7422_v63 = vmax.f32 %v7421_v30, %v5168_v22  ;;  %v5170_v35 = vpop.f32.mrb[11].mxu1 }
 0x762   : > { %v7549_v14 = vmax.f32 %v7548_v59, %v5170_v35  ;;  %v5847_v49 = vpop.f32.mrb[12].mxu0 }
 0x763   : > { %v7677_v57 = vmax.f32 %v7676_v8, %v5847_v49  ;;  %v5849_v3 = vpop.f32.mrb[13].mxu0  ;;  %6139 = vmatmul.mubr.bf16.gmra.mrb[116].mxu1 %v14416_v50 }
 0x764   : > { %v7804_v27 = vmax.f32 %v7803_v33, %v5849_v3  ;;  %v5851_v26 = vpop.f32.mrb[14].mxu0  ;;  %6148 = vmatprep.mubr.bf16.mxu1 %v17057_v38 }
 0x765   : > { %v7678_v11 = vmax.f32 %v7677_v57, %v5851_v26  ;;  %v5853_v16 = vpop.f32.mrb[15].mxu0 }
 0x766   : > { %v7805_v45 = vmax.f32 %v7804_v27, %v5853_v16  ;;  %v5174_v6 = vpop.f32.mrb[12].mxu1 }
 0x767   : > { %v7423_v2 = vmax.f32 %v7422_v63, %v5174_v6  ;;  %v5176_v5 = vpop.f32.mrb[13].mxu1  ;;  %6822 = vmatmul.mubr.bf16.gmra.mrb[120].mxu0 %v14459_v32 }
 0x768   : > { %v7550_v10 = vmax.f32 %v7549_v14, %v5176_v5  ;;  %v5178_v29 = vpop.f32.mrb[14].mxu1  ;;  %6831 = vmatprep.mubr.bf16.mxu0 %v17057_v38 }
 0x769   : > { %v7424_v44 = vmax.f32 %v7423_v2, %v5178_v29  ;;  %v5180_v31 = vpop.f32.mrb[15].mxu1 }
 0x76a   : > { %v7551_v58 = vmax.f32 %v7550_v10, %v5180_v31  ;;  %v5857_v50 = vpop.f32.mrb[16].mxu0 }
 0x76b   : > { %v7679_v15 = vmax.f32 %v7678_v11, %v5857_v50  ;;  %v5859_v52 = vpop.f32.mrb[17].mxu0  ;;  %6149 = vmatmul.mubr.bf16.gmra.mrb[120].mxu1 %v14459_v32 }
 0x76c   : > { %v7806_v47 = vmax.f32 %v7805_v45, %v5859_v52  ;;  %v5861_v23 = vpop.f32.mrb[18].mxu0  ;;  %6158 = vmatprep.mubr.bf16.mxu1 %v17057_v38 }
 0x76d   : > { %v7680_v24 = vmax.f32 %v7679_v15, %v5861_v23  ;;  %v5863_v8 = vpop.f32.mrb[19].mxu0 }
 0x76e   : > { %v7807_v61 = vmax.f32 %v7806_v47, %v5863_v8  ;;  %v5184_v33 = vpop.f32.mrb[16].mxu1 }
 0x76f   : > { %v7425_v19 = vmax.f32 %v7424_v44, %v5184_v33  ;;  %v5186_v30 = vpop.f32.mrb[17].mxu1  ;;  %6832 = vmatmul.mubr.bf16.gmra.mrb[124].mxu0 %v14456_v43 }
 0x770   : > { %v7552_v21 = vmax.f32 %v7551_v58, %v5186_v30  ;;  %v5188_v59 = vpop.f32.mrb[18].mxu1  ;;  %6841 = vmatprep.mubr.bf16.mxu0 %v17057_v38 }
 0x771   : > { %v7426_v22 = vmax.f32 %v7425_v19, %v5188_v59  ;;  %v5190_v63 = vpop.f32.mrb[19].mxu1 }
 0x772   : > { %v7553_v35 = vmax.f32 %v7552_v21, %v5190_v63  ;;  %v5867_v32 = vpop.f32.mrb[20].mxu0 }
 0x773   : > { %v7681_v14 = vmax.f32 %v7680_v24, %v5867_v32  ;;  %v5869_v49 = vpop.f32.mrb[21].mxu0  ;;  %6159 = vmatmul.mubr.bf16.gmra.mrb[124].mxu1 %v14456_v43 }
 0x774   : > { %v7808_v57 = vmax.f32 %v7807_v61, %v5869_v49  ;;  %v5871_v3 = vpop.f32.mrb[22].mxu0  ;;  %6168 = vmatprep.mubr.bf16.mxu1 %v17057_v38 }
 0x775   : > { %v7682_v27 = vmax.f32 %v7681_v14, %v5871_v3  ;;  %v5873_v26 = vpop.f32.mrb[23].mxu0 }
 0x776   : > { %v7809_v11 = vmax.f32 %v7808_v57, %v5873_v26  ;;  %v5194_v16 = vpop.f32.mrb[20].mxu1 }
 0x777   : > { %v7427_v45 = vmax.f32 %v7426_v22, %v5194_v16  ;;  %v5196_v6 = vpop.f32.mrb[21].mxu1  ;;  %6842 = vmatmul.mubr.bf16.gmra.mrb[128].mxu0 %v14538_v48 }
 0x778   : > { %v7554_v2 = vmax.f32 %v7553_v35, %v5196_v6  ;;  %v5198_v5 = vpop.f32.mrb[22].mxu1  ;;  %6851 = vmatprep.mubr.bf16.mxu0 %v17057_v38 }
 0x779   : > { %v7428_v10 = vmax.f32 %v7427_v45, %v5198_v5  ;;  %v5200_v29 = vpop.f32.mrb[23].mxu1 }
 0x77a   : > { %v7555_v44 = vmax.f32 %v7554_v2, %v5200_v29  ;;  %v5877_v43 = vpop.f32.mrb[24].mxu0 }
 0x77b   : > { %v7683_v31 = vmax.f32 %v7682_v27, %v5877_v43  ;;  %v5879_v58 = vpop.f32.mrb[25].mxu0  ;;  %6169 = vmatmul.mubr.bf16.gmra.mrb[128].mxu1 %v14538_v48 }
 0x77c   : > { %v7810_v50 = vmax.f32 %v7809_v11, %v5879_v58  ;;  %v5881_v15 = vpop.f32.mrb[26].mxu0  ;;  %6178 = vmatprep.mubr.bf16.mxu1 %v17057_v38 }
 0x77d   : > { %v7684_v52 = vmax.f32 %v7683_v31, %v5881_v15  ;;  %v5883_v47 = vpop.f32.mrb[27].mxu0 }
 0x77e   : > { %v7811_v23 = vmax.f32 %v7810_v50, %v5883_v47  ;;  %v5204_v24 = vpop.f32.mrb[24].mxu1 }
 0x77f   : > { %v7429_v8 = vmax.f32 %v7428_v10, %v5204_v24  ;;  %v5206_v61 = vpop.f32.mrb[25].mxu1  ;;  %6852 = vmatmul.mubr.bf16.gmra.mrb[132].mxu0 %v14536_v36 }
 0x780   : > { %v7556_v33 = vmax.f32 %v7555_v44, %v5206_v61  ;;  %v5208_v19 = vpop.f32.mrb[26].mxu1  ;;  %6861 = vmatprep.mubr.bf16.mxu0 %v17057_v38 }
 0x781   : > { %v7430_v30 = vmax.f32 %v7429_v8, %v5208_v19  ;;  %v5210_v21 = vpop.f32.mrb[27].mxu1 }
 0x782   : > { %v7557_v59 = vmax.f32 %v7556_v33, %v5210_v21  ;;  %v5887_v48 = vpop.f32.mrb[28].mxu0 }
 0x783   : > { %v7685_v22 = vmax.f32 %v7684_v52, %v5887_v48  ;;  %v5889_v63 = vpop.f32.mrb[29].mxu0  ;;  %6179 = vmatmul.mubr.bf16.gmra.mrb[132].mxu1 %v14536_v36 }
 0x784   : > { %v7812_v35 = vmax.f32 %v7811_v23, %v5889_v63  ;;  %v5891_v32 = vpop.f32.mrb[30].mxu0  ;;  %6188 = vmatprep.mubr.bf16.mxu1 %v17057_v38 }
 0x785   : > { %v7686_v14 = vmax.f32 %v7685_v22, %v5891_v32  ;;  %v5893_v49 = vpop.f32.mrb[31].mxu0 }
 0x786   : > { %v7813_v57 = vmax.f32 %v7812_v35, %v5893_v49  ;;  %v5214_v3 = vpop.f32.mrb[28].mxu1 }
 0x787   : > { %v7431_v27 = vmax.f32 %v7430_v30, %v5214_v3  ;;  %v5216_v26 = vpop.f32.mrb[29].mxu1  ;;  %6862 = vmatmul.mubr.bf16.gmra.mrb[136].mxu0 %v14683_v37 }
 0x788   : > { %v7558_v11 = vmax.f32 %v7557_v59, %v5216_v26  ;;  %v5218_v16 = vpop.f32.mrb[30].mxu1  ;;  %6871 = vmatprep.mubr.bf16.mxu0 %v17057_v38 }
 0x789   : > { %v7432_v45 = vmax.f32 %v7431_v27, %v5218_v16  ;;  %v5220_v6 = vpop.f32.mrb[31].mxu1 }
 0x78a   : > { %v7559_v2 = vmax.f32 %v7558_v11, %v5220_v6  ;;  %v5897_v36 = vpop.f32.mrb[32].mxu0 }
 0x78b   : > { %v7687_v5 = vmax.f32 %v7686_v14, %v5897_v36  ;;  %v5899_v10 = vpop.f32.mrb[33].mxu0  ;;  %6189 = vmatmul.mubr.bf16.gmra.mrb[136].mxu1 %v14683_v37 }
 0x78c   : > { %v7814_v29 = vmax.f32 %v7813_v57, %v5899_v10  ;;  %v5901_v44 = vpop.f32.mrb[34].mxu0  ;;  %6198 = vmatprep.mubr.bf16.mxu1 %v17057_v38 }
 0x78d   : > { %v7688_v43 = vmax.f32 %v7687_v5, %v5901_v44  ;;  %v5903_v31 = vpop.f32.mrb[35].mxu0 }
 0x78e   : > { %v7815_v58 = vmax.f32 %v7814_v29, %v5903_v31  ;;  %v5224_v50 = vpop.f32.mrb[32].mxu1 }
 0x78f   : > { %v7433_v15 = vmax.f32 %v7432_v45, %v5224_v50  ;;  %v5226_v52 = vpop.f32.mrb[33].mxu1  ;;  %6872 = vmatmul.mubr.bf16.gmra.mrb[140].mxu0 %v14681_v17 }
 0x790   : > { %v7560_v47 = vmax.f32 %v7559_v2, %v5226_v52  ;;  %v5228_v23 = vpop.f32.mrb[34].mxu1  ;;  %6881 = vmatprep.mubr.bf16.mxu0 %v17057_v38 }
 0x791   : > { %v7434_v24 = vmax.f32 %v7433_v15, %v5228_v23  ;;  %v5230_v8 = vpop.f32.mrb[35].mxu1 }
 0x792   : > { %v7561_v61 = vmax.f32 %v7560_v47, %v5230_v8  ;;  %v5907_v37 = vpop.f32.mrb[36].mxu0 }
 0x793   : > { %v7689_v33 = vmax.f32 %v7688_v43, %v5907_v37  ;;  %v5909_v19 = vpop.f32.mrb[37].mxu0  ;;  %6199 = vmatmul.mubr.bf16.gmra.mrb[140].mxu1 %v14681_v17 }
 0x794   : > { %v7816_v30 = vmax.f32 %v7815_v58, %v5909_v19  ;;  %v5911_v21 = vpop.f32.mrb[38].mxu0  ;;  %6208 = vmatprep.mubr.bf16.mxu1 %v17057_v38 }
 0x795   : > { %v7690_v59 = vmax.f32 %v7689_v33, %v5911_v21  ;;  %v5913_v48 = vpop.f32.mrb[39].mxu0 }
 0x796   : > { %v7817_v22 = vmax.f32 %v7816_v30, %v5913_v48  ;;  %v5234_v63 = vpop.f32.mrb[36].mxu1 }
 0x797   : > { %v7435_v35 = vmax.f32 %v7434_v24, %v5234_v63  ;;  %v5236_v32 = vpop.f32.mrb[37].mxu1  ;;  %6882 = vmatmul.mubr.bf16.gmra.mrb[144].mxu0 %v14903_v1 }
 0x798   : > { %v7562_v14 = vmax.f32 %v7561_v61, %v5236_v32  ;;  %v5238_v49 = vpop.f32.mrb[38].mxu1  ;;  %6891 = vmatprep.mubr.bf16.mxu0 %v17057_v38 }
 0x799   : > { %v7436_v57 = vmax.f32 %v7435_v35, %v5238_v49  ;;  %v5240_v3 = vpop.f32.mrb[39].mxu1 }
 0x79a   : > { %v7563_v27 = vmax.f32 %v7562_v14, %v5240_v3  ;;  %v5917_v17 = vpop.f32.mrb[40].mxu0 }
 0x79b   : > { %v7691_v26 = vmax.f32 %v7690_v59, %v5917_v17  ;;  %v5919_v11 = vpop.f32.mrb[41].mxu0  ;;  %6209 = vmatmul.mubr.bf16.gmra.mrb[144].mxu1 %v14903_v1 }
 0x79c   : > { %v7818_v16 = vmax.f32 %v7817_v22, %v5919_v11  ;;  %v5921_v45 = vpop.f32.mrb[42].mxu0  ;;  %6218 = vmatprep.mubr.bf16.mxu1 %v17057_v38 }
 0x79d   : > { %v7692_v6 = vmax.f32 %v7691_v26, %v5921_v45  ;;  %v5923_v2 = vpop.f32.mrb[43].mxu0 }
 0x79e   : > { %v7819_v36 = vmax.f32 %v7818_v16, %v5923_v2  ;;  %v5244_v5 = vpop.f32.mrb[40].mxu1 }
 0x79f   : > { %v7437_v10 = vmax.f32 %v7436_v57, %v5244_v5  ;;  %v5246_v29 = vpop.f32.mrb[41].mxu1  ;;  %6892 = vmatmul.mubr.bf16.gmra.mrb[148].mxu0 %v17340_v34 }
 0x7a0   : > { %v7564_v44 = vmax.f32 %v7563_v27, %v5246_v29  ;;  %v5248_v43 = vpop.f32.mrb[42].mxu1  ;;  %6901 = vmatprep.mubr.bf16.mxu0 %v17057_v38 }
 0x7a1   : > { %v7438_v31 = vmax.f32 %v7437_v10, %v5248_v43  ;;  %v5250_v58 = vpop.f32.mrb[43].mxu1 }
 0x7a2   : > { %v7565_v50 = vmax.f32 %v7564_v44, %v5250_v58  ;;  %v5927_v1 = vpop.f32.mrb[44].mxu0 }
 0x7a3   : > { %v7693_v15 = vmax.f32 %v7692_v6, %v5927_v1  ;;  %v5929_v52 = vpop.f32.mrb[45].mxu0  ;;  %6219 = vmatmul.mubr.bf16.gmra.mrb[148].mxu1 %v17340_v34 }
 0x7a4   : > { %v7820_v47 = vmax.f32 %v7819_v36, %v5929_v52  ;;  %v5931_v23 = vpop.f32.mrb[46].mxu0  ;;  %6228 = vmatprep.mubr.bf16.mxu1 %v17057_v38 }
 0x7a5   : > { %v7694_v24 = vmax.f32 %v7693_v15, %v5931_v23  ;;  %v5933_v8 = vpop.f32.mrb[47].mxu0 }
 0x7a6   : > { %v7821_v61 = vmax.f32 %v7820_v47, %v5933_v8  ;;  %v5254_v37 = vpop.f32.mrb[44].mxu1 }
 0x7a7   : > { %v7439_v33 = vmax.f32 %v7438_v31, %v5254_v37  ;;  %v5256_v19 = vpop.f32.mrb[45].mxu1  ;;  %6902 = vmatmul.mubr.bf16.gmra.mrb[152].mxu0 %v15116_v42 }
 0x7a8   : > { %v7566_v30 = vmax.f32 %v7565_v50, %v5256_v19  ;;  %v5258_v21 = vpop.f32.mrb[46].mxu1  ;;  %6911 = vmatprep.mubr.bf16.mxu0 %v17057_v38 }
 0x7a9   : > { %v7440_v59 = vmax.f32 %v7439_v33, %v5258_v21  ;;  %v5260_v48 = vpop.f32.mrb[47].mxu1 }
 0x7aa   : > { %v7567_v22 = vmax.f32 %v7566_v30, %v5260_v48  ;;  %v5937_v34 = vpop.f32.mrb[48].mxu0 }
 0x7ab   : > { %v7695_v63 = vmax.f32 %v7694_v24, %v5937_v34  ;;  %v5939_v35 = vpop.f32.mrb[49].mxu0  ;;  %6229 = vmatmul.mubr.bf16.gmra.mrb[152].mxu1 %v15116_v42 }
 0x7ac   : > { %v7822_v32 = vmax.f32 %v7821_v61, %v5939_v35  ;;  %v5941_v14 = vpop.f32.mrb[50].mxu0  ;;  %6238 = vmatprep.mubr.bf16.mxu1 %v17057_v38 }
 0x7ad   : > { %v7696_v49 = vmax.f32 %v7695_v63, %v5941_v14  ;;  %v5943_v57 = vpop.f32.mrb[51].mxu0 }
 0x7ae   : > { %v7823_v3 = vmax.f32 %v7822_v32, %v5943_v57  ;;  %v5264_v27 = vpop.f32.mrb[48].mxu1 }
 0x7af   : > { %v7441_v17 = vmax.f32 %v7440_v59, %v5264_v27  ;;  %v5266_v26 = vpop.f32.mrb[49].mxu1  ;;  %6912 = vmatmul.mubr.bf16.gmra.mrb[156].mxu0 %v15113_v7 }
 0x7b0   : > { %v7568_v11 = vmax.f32 %v7567_v22, %v5266_v26  ;;  %v5268_v16 = vpop.f32.mrb[50].mxu1  ;;  %6921 = vmatprep.mubr.bf16.mxu0 %v17057_v38 }
 0x7b1   : > { %v7442_v45 = vmax.f32 %v7441_v17, %v5268_v16  ;;  %v5270_v6 = vpop.f32.mrb[51].mxu1  ;;  %v8340_v17 = vld [vmem:[#allocation2 + $0x10] sm:$0xff]  ;;  %v8341_v16 = vld [vmem:[#allocation2 + $0x18] sm:$0xff] }
 0x7b2   : > { %v7569_v2 = vmax.f32 %v7568_v11, %v5270_v6  ;;  %v5947_v42 = vpop.f32.mrb[52].mxu0 }
 0x7b3   : > { %v7697_v36 = vmax.f32 %v7696_v49, %v5947_v42  ;;  %v5949_v5 = vpop.f32.mrb[53].mxu0  ;;  %6239 = vmatmul.mubr.bf16.gmra.mrb[156].mxu1 %v15113_v7 }
 0x7b4   : > { %v7824_v10 = vmax.f32 %v7823_v3, %v5949_v5  ;;  %v5951_v29 = vpop.f32.mrb[54].mxu0  ;;  %6248 = vmatprep.mubr.bf16.mxu1 %v17057_v38 }
 0x7b5   : > { %v7698_v44 = vmax.f32 %v7697_v36, %v5951_v29  ;;  %v5953_v43 = vpop.f32.mrb[55].mxu0 }
 0x7b6   : > { %v7825_v31 = vmax.f32 %v7824_v10, %v5953_v43  ;;  %v5274_v58 = vpop.f32.mrb[52].mxu1 }
 0x7b7   : > { %v7443_v50 = vmax.f32 %v7442_v45, %v5274_v58  ;;  %v5276_v1 = vpop.f32.mrb[53].mxu1  ;;  %6922 = vmatmul.mubr.bf16.gmra.mrb[160].mxu0 %v15226_v60 }
 0x7b8   : > { %v7570_v15 = vmax.f32 %v7569_v2, %v5276_v1  ;;  %v5278_v52 = vpop.f32.mrb[54].mxu1  ;;  %6931 = vmatprep.mubr.bf16.mxu0 %v17057_v38 }
 0x7b9   : > { %v7444_v47 = vmax.f32 %v7443_v50, %v5278_v52  ;;  %v5280_v23 = vpop.f32.mrb[55].mxu1 }
 0x7ba   : > { %v7571_v24 = vmax.f32 %v7570_v15, %v5280_v23  ;;  %v5957_v7 = vpop.f32.mrb[56].mxu0 }
 0x7bb   : > { %v7699_v8 = vmax.f32 %v7698_v44, %v5957_v7  ;;  %v5959_v61 = vpop.f32.mrb[57].mxu0  ;;  %6249 = vmatmul.mubr.bf16.gmra.mrb[160].mxu1 %v15226_v60  ;;  %v8338_v44 = vld [vmem:[#allocation2] sm:$0xff] }
 0x7bc   : > { %v7826_v37 = vmax.f32 %v7825_v31, %v5959_v61  ;;  %v5961_v33 = vpop.f32.mrb[58].mxu0  ;;  %6258 = vmatprep.mubr.bf16.mxu1 %v17057_v38  ;;  %v8339_v31 = vld [vmem:[#allocation2 + $0x8] sm:$0xff] }
 0x7bd   : > { %v7700_v19 = vmax.f32 %v7699_v8, %v5961_v33  ;;  %v5963_v30 = vpop.f32.mrb[59].mxu0 }
 0x7be   : > { %v7827_v21 = vmax.f32 %v7826_v37, %v5963_v30  ;;  %v5284_v59 = vpop.f32.mrb[56].mxu1 }
 0x7bf   : > { %v7445_v48 = vmax.f32 %v7444_v47, %v5284_v59  ;;  %v5286_v22 = vpop.f32.mrb[57].mxu1  ;;  %6932 = vmatmul.mubr.bf16.gmra.mrb[164].mxu0 %v15223_v20 }
 0x7c0   : > { %v7572_v34 = vmax.f32 %v7571_v24, %v5286_v22  ;;  %v5288_v63 = vpop.f32.mrb[58].mxu1  ;;  %6941 = vmatprep.mubr.bf16.mxu0 %v17057_v38 }
 0x7c1   : > { %v7446_v35 = vmax.f32 %v7445_v48, %v5288_v63  ;;  %v5290_v32 = vpop.f32.mrb[59].mxu1 }
 0x7c2   : > { %v7573_v14 = vmax.f32 %v7572_v34, %v5290_v32  ;;  %v5967_v60 = vpop.f32.mrb[60].mxu0 }
 0x7c3   : > { %v7701_v49 = vmax.f32 %v7700_v19, %v5967_v60  ;;  %v5969_v57 = vpop.f32.mrb[61].mxu0  ;;  %6259 = vmatmul.mubr.bf16.gmra.mrb[164].mxu1 %v15223_v20 }
 0x7c4   : > { %v7828_v3 = vmax.f32 %v7827_v21, %v5969_v57  ;;  %v5971_v27 = vpop.f32.mrb[62].mxu0  ;;  %6268 = vmatprep.mubr.bf16.mxu1 %v17057_v38 }
 0x7c5   : > { %v7702_v26 = vmax.f32 %v7701_v49, %v5971_v27  ;;  %v5973_v11 = vpop.f32.mrb[63].mxu0 }
 0x7c6   : > { %v7829_v45 = vmax.f32 %v7828_v3, %v5973_v11  ;;  %v5294_v6 = vpop.f32.mrb[60].mxu1 }
 0x7c7   : > { %v8348_v2 = vmax.f32 %v8340_v17, %v7702_v26  ;;  %v7447_v42 = vmax.f32 %v7446_v35, %v5294_v6  ;;  %v5296_v36 = vpop.f32.mrb[61].mxu1  ;;  %6942 = vmatmul.mubr.bf16.gmra.mrb[168].mxu0 %v15285_v55 }
 0x7c8   : > { %v8349_v5 = vmax.f32 %v8341_v16, %v7829_v45  ;;  %v7574_v10 = vmax.f32 %v7573_v14, %v5296_v36  ;;  %v5298_v29 = vpop.f32.mrb[62].mxu1  ;;  %6951 = vmatprep.mubr.bf16.mxu0 %v17057_v38 }
 0x7c9   : > { %8356 = vst [vmem:[#allocation2 + $0x10] sm:$0xff] %v8348_v2  ;;  %v7448_v20 = vmax.f32 %v7447_v42, %v5298_v29  ;;  %v5300_v43 = vpop.f32.mrb[63].mxu1 }
 0x7ca   : > { %8357 = vst [vmem:[#allocation2 + $0x18] sm:$0xff] %v8349_v5  ;;  %v7575_v58 = vmax.f32 %v7574_v10, %v5300_v43  ;;  %v6683_v50 = vpop.f32.mrb[64].mxu0 }
 0x7cb   : > { %v8346_v1 = vmax.f32 %v8338_v44, %v7448_v20  ;;  %6269 = vmatmul.mubr.bf16.gmra.mrb[168].mxu1 %v15285_v55  ;;  %v6685_v15 = vpop.f32.mrb[65].mxu0 }
 0x7cc   : > { %v8347_v52 = vmax.f32 %v8339_v31, %v7575_v58  ;;  %v6687_v47 = vpop.f32.mrb[66].mxu0  ;;  %6278 = vmatprep.mubr.bf16.mxu1 %v17057_v38 }
 0x7cd   : > { %8354 = vst [vmem:[#allocation2] sm:$0xff] %v8346_v1  ;;  %v8084_v23 = vmax.f32 %v6683_v50, %v6687_v47  ;;  %v6689_v24 = vpop.f32.mrb[67].mxu0 }
 0x7ce   : > { %8355 = vst [vmem:[#allocation2 + $0x8] sm:$0xff] %v8347_v52  ;;  %v8211_v7 = vmax.f32 %v6685_v15, %v6689_v24  ;;  %v6010_v8 = vpop.f32.mrb[64].mxu1 }
 0x7cf   : > { %v6012_v61 = vpop.f32.mrb[65].mxu1  ;;  %6952 = vmatmul.mubr.bf16.gmra.mrb[172].mxu0 %v15281_v12 }
 0x7d0   : > { %v6014_v37 = vpop.f32.mrb[66].mxu1  ;;  %6961 = vmatprep.mubr.bf16.mxu0 %v17057_v38 }
 0x7d1   : > { %v7830_v33 = vmax.f32 %v6010_v8, %v6014_v37  ;;  %v6016_v19 = vpop.f32.mrb[67].mxu1 }
 0x7d2   : > { %v7957_v55 = vmax.f32 %v6012_v61, %v6016_v19  ;;  %v6693_v30 = vpop.f32.mrb[68].mxu0  ;;  %v17365_v61 = vld [vmem:[#allocation65_spill] sm:$0xff] }
 0x7d3   : > { %v8085_v21 = vmax.f32 %v8084_v23, %v6693_v30  ;;  %6279 = vmatmul.mubr.bf16.gmra.mrb[172].mxu1 %v15281_v12  ;;  %v6695_v59 = vpop.f32.mrb[69].mxu0 }
 0x7d4   : > { %v8212_v48 = vmax.f32 %v8211_v7, %v6695_v59  ;;  %v6697_v22 = vpop.f32.mrb[70].mxu0  ;;  %6288 = vmatprep.mubr.bf16.mxu1 %v17057_v38 }
 0x7d5   : > { %v8086_v34 = vmax.f32 %v8085_v21, %v6697_v22  ;;  %v6699_v63 = vpop.f32.mrb[71].mxu0 }
 0x7d6   : > { %v8213_v35 = vmax.f32 %v8212_v48, %v6699_v63  ;;  %v6020_v32 = vpop.f32.mrb[68].mxu1 }
 0x7d7   : > { %v7831_v14 = vmax.f32 %v7830_v33, %v6020_v32  ;;  %v6022_v60 = vpop.f32.mrb[69].mxu1  ;;  %6962 = vmatmul.mubr.bf16.gmra.mrb[176].mxu0 %v15345_v39 }
 0x7d8   : > { %v7958_v49 = vmax.f32 %v7957_v55, %v6022_v60  ;;  %v6024_v57 = vpop.f32.mrb[70].mxu1  ;;  %6971 = vmatprep.mubr.bf16.mxu0 %v17057_v38 }
 0x7d9   : > { %v7832_v3 = vmax.f32 %v7831_v14, %v6024_v57  ;;  %v6026_v27 = vpop.f32.mrb[71].mxu1 }
 0x7da   : > { %v7959_v12 = vmax.f32 %v7958_v49, %v6026_v27  ;;  %v6703_v17 = vpop.f32.mrb[72].mxu0  ;;  %v17366_v49 = vld [vmem:[#allocation62_spill] sm:$0xff] }
 0x7db   : > { %v8087_v26 = vmax.f32 %v8086_v34, %v6703_v17  ;;  %6289 = vmatmul.mubr.bf16.gmra.mrb[176].mxu1 %v15345_v39  ;;  %v6705_v11 = vpop.f32.mrb[73].mxu0 }
 0x7dc   : > { %v8214_v16 = vmax.f32 %v8213_v35, %v6705_v11  ;;  %v6707_v45 = vpop.f32.mrb[74].mxu0  ;;  %6298 = vmatprep.mubr.bf16.mxu1 %v17057_v38 }
 0x7dd   : > { %v8088_v6 = vmax.f32 %v8087_v26, %v6707_v45  ;;  %v6709_v2 = vpop.f32.mrb[75].mxu0 }
 0x7de   : > { %v8215_v42 = vmax.f32 %v8214_v16, %v6709_v2  ;;  %v6030_v36 = vpop.f32.mrb[72].mxu1 }
 0x7df   : > { %v7833_v5 = vmax.f32 %v7832_v3, %v6030_v36  ;;  %v6032_v10 = vpop.f32.mrb[73].mxu1  ;;  %6972 = vmatmul.mubr.bf16.gmra.mrb[180].mxu0 %v15341_v62 }
 0x7e0   : > { %v7960_v29 = vmax.f32 %v7959_v12, %v6032_v10  ;;  %v6034_v44 = vpop.f32.mrb[74].mxu1  ;;  %6981 = vmatprep.mubr.bf16.mxu0 %v17057_v38 }
 0x7e1   : > { %v7834_v20 = vmax.f32 %v7833_v5, %v6034_v44  ;;  %v6036_v43 = vpop.f32.mrb[75].mxu1  ;;  %v17367_v44 = vld [vmem:[#allocation16_spill] sm:$0xff] }
 0x7e2   : > { %v7961_v39 = vmax.f32 %v7960_v29, %v6036_v43  ;;  %v6713_v31 = vpop.f32.mrb[76].mxu0 }
 0x7e3   : > { %v8089_v58 = vmax.f32 %v8088_v6, %v6713_v31  ;;  %6299 = vmatmul.mubr.bf16.gmra.mrb[180].mxu1 %v15341_v62  ;;  %v6715_v50 = vpop.f32.mrb[77].mxu0 }
 0x7e4   : > { %v8216_v1 = vmax.f32 %v8215_v42, %v6715_v50  ;;  %v6717_v15 = vpop.f32.mrb[78].mxu0  ;;  %6308 = vmatprep.mubr.bf16.mxu1 %v17057_v38 }
 0x7e5   : > { %v8090_v52 = vmax.f32 %v8089_v58, %v6717_v15  ;;  %v6719_v47 = vpop.f32.mrb[79].mxu0 }
 0x7e6   : > { %v8217_v23 = vmax.f32 %v8216_v1, %v6719_v47  ;;  %v6040_v24 = vpop.f32.mrb[76].mxu1 }
 0x7e7   : > { %v7835_v7 = vmax.f32 %v7834_v20, %v6040_v24  ;;  %v6042_v8 = vpop.f32.mrb[77].mxu1  ;;  %6982 = vmatmul.mubr.bf16.gmra.mrb[184].mxu0 %v17365_v61 }
 0x7e8   : > { %v7962_v37 = vmax.f32 %v7961_v39, %v6042_v8  ;;  %v6044_v33 = vpop.f32.mrb[78].mxu1  ;;  %6991 = vmatprep.mubr.bf16.mxu0 %v17057_v38 }
 0x7e9   : > { %v7836_v19 = vmax.f32 %v7835_v7, %v6044_v33  ;;  %v6046_v55 = vpop.f32.mrb[79].mxu1  ;;  %v17368_v33 = vld [vmem:[#allocation49_spill] sm:$0xff] }
 0x7ea   : > { %v7963_v62 = vmax.f32 %v7962_v37, %v6046_v55  ;;  %v6723_v30 = vpop.f32.mrb[80].mxu0 }
 0x7eb   : > { %v8091_v21 = vmax.f32 %v8090_v52, %v6723_v30  ;;  %6309 = vmatmul.mubr.bf16.gmra.mrb[184].mxu1 %v17365_v61  ;;  %v6725_v59 = vpop.f32.mrb[81].mxu0 }
 0x7ec   : > { %v8218_v48 = vmax.f32 %v8217_v23, %v6725_v59  ;;  %v6727_v22 = vpop.f32.mrb[82].mxu0  ;;  %6318 = vmatprep.mubr.bf16.mxu1 %v17057_v38 }
 0x7ed   : > { %v8092_v34 = vmax.f32 %v8091_v21, %v6727_v22  ;;  %v6729_v63 = vpop.f32.mrb[83].mxu0 }
 0x7ee   : > { %v8219_v35 = vmax.f32 %v8218_v48, %v6729_v63  ;;  %v6050_v32 = vpop.f32.mrb[80].mxu1 }
 0x7ef   : > { %v7837_v14 = vmax.f32 %v7836_v19, %v6050_v32  ;;  %v6052_v60 = vpop.f32.mrb[81].mxu1  ;;  %6992 = vmatmul.mubr.bf16.gmra.mrb[188].mxu0 %v17366_v49 }
 0x7f0   : > { %v7964_v57 = vmax.f32 %v7963_v62, %v6052_v60  ;;  %v6054_v3 = vpop.f32.mrb[82].mxu1  ;;  %7001 = vmatprep.mubr.bf16.mxu0 %v17057_v38 }
 0x7f1   : > { %v7838_v27 = vmax.f32 %v7837_v14, %v6054_v3  ;;  %v6056_v12 = vpop.f32.mrb[83].mxu1  ;;  %v17369_v3 = vld [vmem:[#allocation17_spill] sm:$0xff] }
 0x7f2   : > { %v7965_v17 = vmax.f32 %v7964_v57, %v6056_v12  ;;  %v6733_v26 = vpop.f32.mrb[84].mxu0 }
 0x7f3   : > { %v8093_v11 = vmax.f32 %v8092_v34, %v6733_v26  ;;  %6319 = vmatmul.mubr.bf16.gmra.mrb[188].mxu1 %v17366_v49  ;;  %v6735_v16 = vpop.f32.mrb[85].mxu0 }
 0x7f4   : > { %v8220_v45 = vmax.f32 %v8219_v35, %v6735_v16  ;;  %v6737_v6 = vpop.f32.mrb[86].mxu0  ;;  %6328 = vmatprep.mubr.bf16.mxu1 %v17057_v38 }
 0x7f5   : > { %v8094_v2 = vmax.f32 %v8093_v11, %v6737_v6  ;;  %v6739_v42 = vpop.f32.mrb[87].mxu0 }
 0x7f6   : > { %v8221_v36 = vmax.f32 %v8220_v45, %v6739_v42  ;;  %v6060_v5 = vpop.f32.mrb[84].mxu1 }
 0x7f7   : > { %v7839_v10 = vmax.f32 %v7838_v27, %v6060_v5  ;;  %v6062_v29 = vpop.f32.mrb[85].mxu1  ;;  %7002 = vmatmul.mubr.bf16.gmra.mrb[192].mxu0 %v17367_v44 }
 0x7f8   : > { %v7966_v20 = vmax.f32 %v7965_v17, %v6062_v29  ;;  %v6064_v43 = vpop.f32.mrb[86].mxu1  ;;  %7011 = vmatprep.mubr.bf16.mxu0 %v17057_v38 }
 0x7f9   : > { %v7840_v39 = vmax.f32 %v7839_v10, %v6064_v43  ;;  %v6066_v31 = vpop.f32.mrb[87].mxu1  ;;  %v17370_v43 = vld [vmem:[#allocation32_spill] sm:$0xff] }
 0x7fa   : > { %v7967_v58 = vmax.f32 %v7966_v20, %v6066_v31  ;;  %v6743_v50 = vpop.f32.mrb[88].mxu0 }
 0x7fb   : > { %v8095_v1 = vmax.f32 %v8094_v2, %v6743_v50  ;;  %6329 = vmatmul.mubr.bf16.gmra.mrb[192].mxu1 %v17367_v44  ;;  %v6745_v15 = vpop.f32.mrb[89].mxu0 }
 0x7fc   : > { %v8222_v52 = vmax.f32 %v8221_v36, %v6745_v15  ;;  %v6747_v47 = vpop.f32.mrb[90].mxu0  ;;  %6338 = vmatprep.mubr.bf16.mxu1 %v17057_v38 }
 0x7fd   : > { %v8096_v23 = vmax.f32 %v8095_v1, %v6747_v47  ;;  %v6749_v24 = vpop.f32.mrb[91].mxu0 }
 0x7fe   : > { %v8223_v7 = vmax.f32 %v8222_v52, %v6749_v24  ;;  %v6070_v8 = vpop.f32.mrb[88].mxu1 }
 0x7ff   : > { %v7841_v61 = vmax.f32 %v7840_v39, %v6070_v8  ;;  %v6072_v37 = vpop.f32.mrb[89].mxu1  ;;  %7012 = vmatmul.mubr.bf16.gmra.mrb[196].mxu0 %v17368_v33 }
 0x800   : > { %v7968_v19 = vmax.f32 %v7967_v58, %v6072_v37  ;;  %v6074_v55 = vpop.f32.mrb[90].mxu1  ;;  %7021 = vmatprep.mubr.bf16.mxu0 %v17057_v38 }
 0x801   : > { %v7842_v62 = vmax.f32 %v7841_v61, %v6074_v55  ;;  %v6076_v30 = vpop.f32.mrb[91].mxu1  ;;  %v17371_v55 = vld [vmem:[#allocation47_spill] sm:$0xff] }
 0x802   : > { %v7969_v21 = vmax.f32 %v7968_v19, %v6076_v30  ;;  %v6753_v59 = vpop.f32.mrb[92].mxu0 }
 0x803   : > { %v8097_v48 = vmax.f32 %v8096_v23, %v6753_v59  ;;  %6339 = vmatmul.mubr.bf16.gmra.mrb[196].mxu1 %v17368_v33  ;;  %v6755_v22 = vpop.f32.mrb[93].mxu0 }
 0x804   : > { %v8224_v34 = vmax.f32 %v8223_v7, %v6755_v22  ;;  %v6757_v63 = vpop.f32.mrb[94].mxu0  ;;  %6348 = vmatprep.mubr.bf16.mxu1 %v17057_v38 }
 0x805   : > { %v8098_v35 = vmax.f32 %v8097_v48, %v6757_v63  ;;  %v6759_v32 = vpop.f32.mrb[95].mxu0 }
 0x806   : > { %v8225_v14 = vmax.f32 %v8224_v34, %v6759_v32  ;;  %v6080_v60 = vpop.f32.mrb[92].mxu1 }
 0x807   : > { %v7843_v49 = vmax.f32 %v7842_v62, %v6080_v60  ;;  %v6082_v57 = vpop.f32.mrb[93].mxu1  ;;  %7022 = vmatmul.mubr.bf16.gmra.mrb[200].mxu0 %v17369_v3 }
 0x808   : > { %v7970_v27 = vmax.f32 %v7969_v21, %v6082_v57  ;;  %v6084_v12 = vpop.f32.mrb[94].mxu1  ;;  %7031 = vmatprep.mubr.bf16.mxu0 %v17057_v38 }
 0x809   : > { %v7844_v17 = vmax.f32 %v7843_v49, %v6084_v12  ;;  %v6086_v26 = vpop.f32.mrb[95].mxu1  ;;  %v17372_v12 = vld [vmem:[#allocation18_spill] sm:$0xff] }
 0x80a   : > { %v7971_v11 = vmax.f32 %v7970_v27, %v6086_v26  ;;  %v6763_v16 = vpop.f32.mrb[96].mxu0 }
 0x80b   : > { %v8099_v45 = vmax.f32 %v8098_v35, %v6763_v16  ;;  %6349 = vmatmul.mubr.bf16.gmra.mrb[200].mxu1 %v17369_v3  ;;  %v6765_v6 = vpop.f32.mrb[97].mxu0 }
 0x80c   : > { %v8226_v2 = vmax.f32 %v8225_v14, %v6765_v6  ;;  %v6767_v42 = vpop.f32.mrb[98].mxu0  ;;  %6358 = vmatprep.mubr.bf16.mxu1 %v17057_v38 }
 0x80d   : > { %v8100_v36 = vmax.f32 %v8099_v45, %v6767_v42  ;;  %v6769_v5 = vpop.f32.mrb[99].mxu0 }
 0x80e   : > { %v8227_v10 = vmax.f32 %v8226_v2, %v6769_v5  ;;  %v6090_v29 = vpop.f32.mrb[96].mxu1 }
 0x80f   : > { %v7845_v44 = vmax.f32 %v7844_v17, %v6090_v29  ;;  %v6092_v20 = vpop.f32.mrb[97].mxu1  ;;  %7032 = vmatmul.mubr.bf16.gmra.mrb[204].mxu0 %v17370_v43 }
 0x810   : > { %v7972_v39 = vmax.f32 %v7971_v11, %v6092_v20  ;;  %v6094_v31 = vpop.f32.mrb[98].mxu1  ;;  %7041 = vmatprep.mubr.bf16.mxu0 %v17057_v38 }
 0x811   : > { %v7846_v58 = vmax.f32 %v7845_v44, %v6094_v31  ;;  %v6096_v50 = vpop.f32.mrb[99].mxu1  ;;  %v17373_v31 = vld [vmem:[#allocation38_spill] sm:$0xff] }
 0x812   : > { %v7973_v1 = vmax.f32 %v7972_v39, %v6096_v50  ;;  %v6773_v15 = vpop.f32.mrb[100].mxu0 }
 0x813   : > { %v8101_v52 = vmax.f32 %v8100_v36, %v6773_v15  ;;  %6359 = vmatmul.mubr.bf16.gmra.mrb[204].mxu1 %v17370_v43  ;;  %v6775_v47 = vpop.f32.mrb[101].mxu0 }
 0x814   : > { %v8228_v23 = vmax.f32 %v8227_v10, %v6775_v47  ;;  %v6777_v24 = vpop.f32.mrb[102].mxu0  ;;  %6368 = vmatprep.mubr.bf16.mxu1 %v17057_v38 }
 0x815   : > { %v8102_v7 = vmax.f32 %v8101_v52, %v6777_v24  ;;  %v6779_v8 = vpop.f32.mrb[103].mxu0 }
 0x816   : > { %v8229_v61 = vmax.f32 %v8228_v23, %v6779_v8  ;;  %v6100_v37 = vpop.f32.mrb[100].mxu1 }
 0x817   : > { %v7847_v33 = vmax.f32 %v7846_v58, %v6100_v37  ;;  %v6102_v19 = vpop.f32.mrb[101].mxu1  ;;  %7042 = vmatmul.mubr.bf16.gmra.mrb[208].mxu0 %v17371_v55 }
 0x818   : > { %v7974_v62 = vmax.f32 %v7973_v1, %v6102_v19  ;;  %v6104_v30 = vpop.f32.mrb[102].mxu1  ;;  %7051 = vmatprep.mubr.bf16.mxu0 %v17057_v38 }
 0x819   : > { %v7848_v21 = vmax.f32 %v7847_v33, %v6104_v30  ;;  %v6106_v59 = vpop.f32.mrb[103].mxu1  ;;  %v17374_v30 = vld [vmem:[#allocation58_spill] sm:$0xff] }
 0x81a   : > { %v7975_v48 = vmax.f32 %v7974_v62, %v6106_v59  ;;  %v6783_v22 = vpop.f32.mrb[104].mxu0 }
 0x81b   : > { %v8103_v34 = vmax.f32 %v8102_v7, %v6783_v22  ;;  %6369 = vmatmul.mubr.bf16.gmra.mrb[208].mxu1 %v17371_v55  ;;  %v6785_v63 = vpop.f32.mrb[105].mxu0 }
 0x81c   : > { %v8230_v35 = vmax.f32 %v8229_v61, %v6785_v63  ;;  %v6787_v32 = vpop.f32.mrb[106].mxu0  ;;  %6378 = vmatprep.mubr.bf16.mxu1 %v17057_v38 }
 0x81d   : > { %v8104_v14 = vmax.f32 %v8103_v34, %v6787_v32  ;;  %v6789_v60 = vpop.f32.mrb[107].mxu0 }
 0x81e   : > { %v8231_v49 = vmax.f32 %v8230_v35, %v6789_v60  ;;  %v6110_v57 = vpop.f32.mrb[104].mxu1 }
 0x81f   : > { %v7849_v3 = vmax.f32 %v7848_v21, %v6110_v57  ;;  %v6112_v27 = vpop.f32.mrb[105].mxu1  ;;  %7052 = vmatmul.mubr.bf16.gmra.mrb[212].mxu0 %v17372_v12 }
 0x820   : > { %v7976_v17 = vmax.f32 %v7975_v48, %v6112_v27  ;;  %v6114_v26 = vpop.f32.mrb[106].mxu1  ;;  %7061 = vmatprep.mubr.bf16.mxu0 %v17057_v38 }
 0x821   : > { %v7850_v11 = vmax.f32 %v7849_v3, %v6114_v26  ;;  %v6116_v16 = vpop.f32.mrb[107].mxu1  ;;  %v17375_v26 = vld [vmem:[#allocation30_spill] sm:$0xff] }
 0x822   : > { %v7977_v45 = vmax.f32 %v7976_v17, %v6116_v16  ;;  %v6793_v6 = vpop.f32.mrb[108].mxu0 }
 0x823   : > { %v8105_v2 = vmax.f32 %v8104_v14, %v6793_v6  ;;  %6379 = vmatmul.mubr.bf16.gmra.mrb[212].mxu1 %v17372_v12  ;;  %v6795_v42 = vpop.f32.mrb[109].mxu0 }
 0x824   : > { %v8232_v36 = vmax.f32 %v8231_v49, %v6795_v42  ;;  %v6797_v5 = vpop.f32.mrb[110].mxu0  ;;  %6388 = vmatprep.mubr.bf16.mxu1 %v17057_v38 }
 0x825   : > { %v8106_v10 = vmax.f32 %v8105_v2, %v6797_v5  ;;  %v6799_v29 = vpop.f32.mrb[111].mxu0 }
 0x826   : > { %v8233_v44 = vmax.f32 %v8232_v36, %v6799_v29  ;;  %v6120_v20 = vpop.f32.mrb[108].mxu1 }
 0x827   : > { %v7851_v43 = vmax.f32 %v7850_v11, %v6120_v20  ;;  %v6122_v39 = vpop.f32.mrb[109].mxu1  ;;  %7062 = vmatmul.mubr.bf16.gmra.mrb[216].mxu0 %v17373_v31 }
 0x828   : > { %v7978_v58 = vmax.f32 %v7977_v45, %v6122_v39  ;;  %v6124_v50 = vpop.f32.mrb[110].mxu1  ;;  %7071 = vmatprep.mubr.bf16.mxu0 %v17057_v38 }
 0x829   : > { %v7852_v1 = vmax.f32 %v7851_v43, %v6124_v50  ;;  %v6126_v15 = vpop.f32.mrb[111].mxu1 }
 0x82a   : > { %v7979_v52 = vmax.f32 %v7978_v58, %v6126_v15  ;;  %v6803_v47 = vpop.f32.mrb[112].mxu0 }
 0x82b   : > { %v8107_v23 = vmax.f32 %v8106_v10, %v6803_v47  ;;  %6389 = vmatmul.mubr.bf16.gmra.mrb[216].mxu1 %v17373_v31  ;;  %v6805_v24 = vpop.f32.mrb[113].mxu0 }
 0x82c   : > { %v8234_v7 = vmax.f32 %v8233_v44, %v6805_v24  ;;  %v6807_v8 = vpop.f32.mrb[114].mxu0  ;;  %6398 = vmatprep.mubr.bf16.mxu1 %v17057_v38 }
 0x82d   : > { %v8108_v61 = vmax.f32 %v8107_v23, %v6807_v8  ;;  %v6809_v37 = vpop.f32.mrb[115].mxu0 }
 0x82e   : > { %v8235_v33 = vmax.f32 %v8234_v7, %v6809_v37  ;;  %v6130_v19 = vpop.f32.mrb[112].mxu1 }
 0x82f   : > { %v7853_v55 = vmax.f32 %v7852_v1, %v6130_v19  ;;  %v6132_v62 = vpop.f32.mrb[113].mxu1  ;;  %7072 = vmatmul.mubr.bf16.gmra.mrb[220].mxu0 %v17374_v30 }
 0x830   : > { %v7980_v21 = vmax.f32 %v7979_v52, %v6132_v62  ;;  %v6134_v59 = vpop.f32.mrb[114].mxu1  ;;  %7081 = vmatprep.mubr.bf16.mxu0 %v17057_v38 }
 0x831   : > { %v7854_v48 = vmax.f32 %v7853_v55, %v6134_v59  ;;  %v6136_v22 = vpop.f32.mrb[115].mxu1 }
 0x832   : > { %v7981_v34 = vmax.f32 %v7980_v21, %v6136_v22  ;;  %v6813_v63 = vpop.f32.mrb[116].mxu0 }
 0x833   : > { %v8109_v35 = vmax.f32 %v8108_v61, %v6813_v63  ;;  %6399 = vmatmul.mubr.bf16.gmra.mrb[220].mxu1 %v17374_v30  ;;  %v6815_v32 = vpop.f32.mrb[117].mxu0 }
 0x834   : > { %v8236_v14 = vmax.f32 %v8235_v33, %v6815_v32  ;;  %v6817_v60 = vpop.f32.mrb[118].mxu0  ;;  %6408 = vmatprep.mubr.bf16.mxu1 %v17057_v38 }
 0x835   : > { %v8110_v49 = vmax.f32 %v8109_v35, %v6817_v60  ;;  %v6819_v57 = vpop.f32.mrb[119].mxu0 }
 0x836   : > { %v8237_v3 = vmax.f32 %v8236_v14, %v6819_v57  ;;  %v6140_v27 = vpop.f32.mrb[116].mxu1 }
 0x837   : > { %v7855_v12 = vmax.f32 %v7854_v48, %v6140_v27  ;;  %v6142_v17 = vpop.f32.mrb[117].mxu1  ;;  %7082 = vmatmul.mubr.bf16.gmra.mrb[224].mxu0 %v17375_v26 }
 0x838   : > { %v7982_v11 = vmax.f32 %v7981_v34, %v6142_v17  ;;  %v6144_v16 = vpop.f32.mrb[118].mxu1  ;;  %7091 = vmatprep.mubr.bf16.mxu0 %v17057_v38  ;;  %v17376_v17 = vld [vmem:[#allocation36_spill] sm:$0xff] }
 0x839   : > { %v7856_v45 = vmax.f32 %v7855_v12, %v6144_v16  ;;  %v6146_v6 = vpop.f32.mrb[119].mxu1 }
 0x83a   : > { %v7983_v2 = vmax.f32 %v7982_v11, %v6146_v6  ;;  %v6823_v42 = vpop.f32.mrb[120].mxu0 }
 0x83b   : > { %v8111_v36 = vmax.f32 %v8110_v49, %v6823_v42  ;;  %6409 = vmatmul.mubr.bf16.gmra.mrb[224].mxu1 %v17375_v26  ;;  %v6825_v5 = vpop.f32.mrb[121].mxu0 }
 0x83c   : > { %v8238_v10 = vmax.f32 %v8237_v3, %v6825_v5  ;;  %v6827_v29 = vpop.f32.mrb[122].mxu0  ;;  %6418 = vmatprep.mubr.bf16.mxu1 %v17057_v38 }
 0x83d   : > { %v8112_v44 = vmax.f32 %v8111_v36, %v6827_v29  ;;  %v6829_v20 = vpop.f32.mrb[123].mxu0 }
 0x83e   : > { %v8239_v43 = vmax.f32 %v8238_v10, %v6829_v20  ;;  %v6150_v39 = vpop.f32.mrb[120].mxu1 }
 0x83f   : > { %v7857_v31 = vmax.f32 %v7856_v45, %v6150_v39  ;;  %v6152_v58 = vpop.f32.mrb[121].mxu1  ;;  %7092 = vmatmul.mubr.bf16.gmra.mrb[228].mxu0 %v17352_v0 }
 0x840   : > { %v7984_v50 = vmax.f32 %v7983_v2, %v6152_v58  ;;  %v6154_v1 = vpop.f32.mrb[122].mxu1  ;;  %7101 = vmatprep.mubr.bf16.mxu0 %v17057_v38 }
 0x841   : > { %v7858_v15 = vmax.f32 %v7857_v31, %v6154_v1  ;;  %v6156_v52 = vpop.f32.mrb[123].mxu1  ;;  %v17377_v31 = vld [vmem:[#allocation56_spill] sm:$0xff] }
 0x842   : > { %v7985_v47 = vmax.f32 %v7984_v50, %v6156_v52  ;;  %v6833_v23 = vpop.f32.mrb[124].mxu0 }
 0x843   : > { %v8113_v24 = vmax.f32 %v8112_v44, %v6833_v23  ;;  %6419 = vmatmul.mubr.bf16.gmra.mrb[228].mxu1 %v17352_v0  ;;  %v6835_v7 = vpop.f32.mrb[125].mxu0 }
 0x844   : > { %v8240_v8 = vmax.f32 %v8239_v43, %v6835_v7  ;;  %v6837_v61 = vpop.f32.mrb[126].mxu0  ;;  %6428 = vmatprep.mubr.bf16.mxu1 %v17057_v38 }
 0x845   : > { %v8114_v37 = vmax.f32 %v8113_v24, %v6837_v61  ;;  %v6839_v33 = vpop.f32.mrb[127].mxu0 }
 0x846   : > { %v8241_v19 = vmax.f32 %v8240_v8, %v6839_v33  ;;  %v6160_v55 = vpop.f32.mrb[124].mxu1 }
 0x847   : > { %v7859_v62 = vmax.f32 %v7858_v15, %v6160_v55  ;;  %v6162_v30 = vpop.f32.mrb[125].mxu1  ;;  %7102 = vmatmul.mubr.bf16.gmra.mrb[232].mxu0 %v17353_v41 }
 0x848   : > { %v7986_v21 = vmax.f32 %v7985_v47, %v6162_v30  ;;  %v6164_v59 = vpop.f32.mrb[126].mxu1  ;;  %7111 = vmatprep.mubr.bf16.mxu0 %v17057_v38  ;;  %v17378_v30 = vld [vmem:[#allocation34_spill] sm:$0xff] }
 0x849   : > { %v7860_v48 = vmax.f32 %v7859_v62, %v6164_v59  ;;  %v6166_v22 = vpop.f32.mrb[127].mxu1 }
 0x84a   : > { %v7987_v0 = vmax.f32 %v7986_v21, %v6166_v22  ;;  %v6843_v34 = vpop.f32.mrb[128].mxu0 }
 0x84b   : > { %v8115_v63 = vmax.f32 %v8114_v37, %v6843_v34  ;;  %6429 = vmatmul.mubr.bf16.gmra.mrb[232].mxu1 %v17353_v41  ;;  %v6845_v35 = vpop.f32.mrb[129].mxu0 }
 0x84c   : > { %v8242_v32 = vmax.f32 %v8241_v19, %v6845_v35  ;;  %v6847_v14 = vpop.f32.mrb[130].mxu0  ;;  %6438 = vmatprep.mubr.bf16.mxu1 %v17057_v38 }
 0x84d   : > { %v8116_v60 = vmax.f32 %v8115_v63, %v6847_v14  ;;  %v6849_v49 = vpop.f32.mrb[131].mxu0 }
 0x84e   : > { %v8243_v57 = vmax.f32 %v8242_v32, %v6849_v49  ;;  %v6170_v3 = vpop.f32.mrb[128].mxu1 }
 0x84f   : > { %v7861_v27 = vmax.f32 %v7860_v48, %v6170_v3  ;;  %v6172_v12 = vpop.f32.mrb[129].mxu1  ;;  %7112 = vmatmul.mubr.bf16.gmra.mrb[236].mxu0 %v17376_v17 }
 0x850   : > { %v7988_v26 = vmax.f32 %v7987_v0, %v6172_v12  ;;  %v6174_v11 = vpop.f32.mrb[130].mxu1  ;;  %7121 = vmatprep.mubr.bf16.mxu0 %v17057_v38 }
 0x851   : > { %v7862_v16 = vmax.f32 %v7861_v27, %v6174_v11  ;;  %v6176_v45 = vpop.f32.mrb[131].mxu1 }
 0x852   : > { %v7989_v41 = vmax.f32 %v7988_v26, %v6176_v45  ;;  %v6853_v6 = vpop.f32.mrb[132].mxu0 }
 0x853   : > { %v8117_v2 = vmax.f32 %v8116_v60, %v6853_v6  ;;  %6439 = vmatmul.mubr.bf16.gmra.mrb[236].mxu1 %v17376_v17  ;;  %v6855_v42 = vpop.f32.mrb[133].mxu0  ;;  %v17379_v17 = vld [vmem:[#allocation45_spill] sm:$0xff] }
 0x854   : > { %v8244_v36 = vmax.f32 %v8243_v57, %v6855_v42  ;;  %v6857_v5 = vpop.f32.mrb[134].mxu0  ;;  %6448 = vmatprep.mubr.bf16.mxu1 %v17057_v38 }
 0x855   : > { %v8118_v10 = vmax.f32 %v8117_v2, %v6857_v5  ;;  %v6859_v29 = vpop.f32.mrb[135].mxu0 }
 0x856   : > { %v8245_v44 = vmax.f32 %v8244_v36, %v6859_v29  ;;  %v6180_v20 = vpop.f32.mrb[132].mxu1 }
 0x857   : > { %v7863_v43 = vmax.f32 %v7862_v16, %v6180_v20  ;;  %v6182_v39 = vpop.f32.mrb[133].mxu1  ;;  %7122 = vmatmul.mubr.bf16.gmra.mrb[240].mxu0 %v17377_v31 }
 0x858   : > { %v7990_v58 = vmax.f32 %v7989_v41, %v6182_v39  ;;  %v6184_v50 = vpop.f32.mrb[134].mxu1  ;;  %7131 = vmatprep.mubr.bf16.mxu0 %v17057_v38 }
 0x859   : > { %v7864_v1 = vmax.f32 %v7863_v43, %v6184_v50  ;;  %v6186_v15 = vpop.f32.mrb[135].mxu1 }
 0x85a   : > { %v7991_v52 = vmax.f32 %v7990_v58, %v6186_v15  ;;  %v6863_v47 = vpop.f32.mrb[136].mxu0 }
 0x85b   : > { %v8119_v23 = vmax.f32 %v8118_v10, %v6863_v47  ;;  %6449 = vmatmul.mubr.bf16.gmra.mrb[240].mxu1 %v17377_v31  ;;  %v6865_v24 = vpop.f32.mrb[137].mxu0  ;;  %v17380_v31 = vld [vmem:[#allocation42_spill] sm:$0xff] }
 0x85c   : > { %v8246_v7 = vmax.f32 %v8245_v44, %v6865_v24  ;;  %v6867_v8 = vpop.f32.mrb[138].mxu0  ;;  %6458 = vmatprep.mubr.bf16.mxu1 %v17057_v38 }
 0x85d   : > { %v8120_v61 = vmax.f32 %v8119_v23, %v6867_v8  ;;  %v6869_v37 = vpop.f32.mrb[139].mxu0 }
 0x85e   : > { %v8247_v33 = vmax.f32 %v8246_v7, %v6869_v37  ;;  %v6190_v19 = vpop.f32.mrb[136].mxu1 }
 0x85f   : > { %v7865_v55 = vmax.f32 %v7864_v1, %v6190_v19  ;;  %v6192_v62 = vpop.f32.mrb[137].mxu1  ;;  %7132 = vmatmul.mubr.bf16.gmra.mrb[244].mxu0 %v17378_v30 }
 0x860   : > { %v7992_v21 = vmax.f32 %v7991_v52, %v6192_v62  ;;  %v6194_v59 = vpop.f32.mrb[138].mxu1  ;;  %7141 = vmatprep.mubr.bf16.mxu0 %v17057_v38 }
 0x861   : > { %v7866_v48 = vmax.f32 %v7865_v55, %v6194_v59  ;;  %v6196_v22 = vpop.f32.mrb[139].mxu1 }
 0x862   : > { %v7993_v0 = vmax.f32 %v7992_v21, %v6196_v22  ;;  %v6873_v34 = vpop.f32.mrb[140].mxu0 }
 0x863   : > { %v8121_v63 = vmax.f32 %v8120_v61, %v6873_v34  ;;  %6459 = vmatmul.mubr.bf16.gmra.mrb[244].mxu1 %v17378_v30  ;;  %v6875_v35 = vpop.f32.mrb[141].mxu0 }
 0x864   : > { %v8248_v32 = vmax.f32 %v8247_v33, %v6875_v35  ;;  %v6877_v14 = vpop.f32.mrb[142].mxu0  ;;  %6468 = vmatprep.mubr.bf16.mxu1 %v17057_v38 }
 0x865   : > { %v8122_v60 = vmax.f32 %v8121_v63, %v6877_v14  ;;  %v6879_v49 = vpop.f32.mrb[143].mxu0 }
 0x866   : > { %v8249_v57 = vmax.f32 %v8248_v32, %v6879_v49  ;;  %v6200_v3 = vpop.f32.mrb[140].mxu1 }
 0x867   : > { %v7867_v27 = vmax.f32 %v7866_v48, %v6200_v3  ;;  %v6202_v12 = vpop.f32.mrb[141].mxu1  ;;  %7142 = vmatmul.mubr.bf16.gmra.mrb[248].mxu0 %v17379_v17 }
 0x868   : > { %v7994_v26 = vmax.f32 %v7993_v0, %v6202_v12  ;;  %v6204_v11 = vpop.f32.mrb[142].mxu1  ;;  %7151 = vmatprep.mubr.bf16.mxu0 %v17057_v38 }
 0x869   : > { %v7868_v16 = vmax.f32 %v7867_v27, %v6204_v11  ;;  %v6206_v45 = vpop.f32.mrb[143].mxu1 }
 0x86a   : > { %v7995_v41 = vmax.f32 %v7994_v26, %v6206_v45  ;;  %v6883_v6 = vpop.f32.mrb[144].mxu0 }
 0x86b   : > { %v8123_v2 = vmax.f32 %v8122_v60, %v6883_v6  ;;  %6469 = vmatmul.mubr.bf16.gmra.mrb[248].mxu1 %v17379_v17  ;;  %v6885_v42 = vpop.f32.mrb[145].mxu0 }
 0x86c   : > { %v8250_v36 = vmax.f32 %v8249_v57, %v6885_v42  ;;  %v6887_v5 = vpop.f32.mrb[146].mxu0  ;;  %6478 = vmatprep.mubr.bf16.mxu1 %v17057_v38 }
 0x86d   : > { %v8124_v10 = vmax.f32 %v8123_v2, %v6887_v5  ;;  %v6889_v29 = vpop.f32.mrb[147].mxu0 }
 0x86e   : > { %v8251_v44 = vmax.f32 %v8250_v36, %v6889_v29  ;;  %v6210_v20 = vpop.f32.mrb[144].mxu1 }
 0x86f   : > { %v7869_v43 = vmax.f32 %v7868_v16, %v6210_v20  ;;  %v6212_v39 = vpop.f32.mrb[145].mxu1  ;;  %7152 = vmatmul.mubr.bf16.gmra.mrb[252].mxu0 %v17380_v31  ;;  %v17381_v20 = vld [vmem:[#allocation61_spill] sm:$0xff] }
 0x870   : > { %v7996_v58 = vmax.f32 %v7995_v41, %v6212_v39  ;;  %v6214_v50 = vpop.f32.mrb[146].mxu1  ;;  %7161 = vmatprep.mubr.bf16.mxu0 %v17057_v38 }
 0x871   : > { %v7870_v1 = vmax.f32 %v7869_v43, %v6214_v50  ;;  %v6216_v15 = vpop.f32.mrb[147].mxu1 }
 0x872   : > { %v7997_v52 = vmax.f32 %v7996_v58, %v6216_v15  ;;  %v6893_v47 = vpop.f32.mrb[148].mxu0 }
 0x873   : > { %v8125_v23 = vmax.f32 %v8124_v10, %v6893_v47  ;;  %6479 = vmatmul.mubr.bf16.gmra.mrb[252].mxu1 %v17380_v31  ;;  %v6895_v24 = vpop.f32.mrb[149].mxu0 }
 0x874   : > { %v8252_v7 = vmax.f32 %v8251_v44, %v6895_v24  ;;  %v6897_v8 = vpop.f32.mrb[150].mxu0  ;;  %6488 = vmatprep.mubr.bf16.mxu1 %v17057_v38 }
 0x875   : > { %v8126_v61 = vmax.f32 %v8125_v23, %v6897_v8  ;;  %v6899_v37 = vpop.f32.mrb[151].mxu0 }
 0x876   : > { %v8253_v33 = vmax.f32 %v8252_v7, %v6899_v37  ;;  %v6220_v19 = vpop.f32.mrb[148].mxu1 }
 0x877   : > { %v7871_v55 = vmax.f32 %v7870_v1, %v6220_v19  ;;  %v6222_v62 = vpop.f32.mrb[149].mxu1  ;;  %7162 = vmatmul.mubr.bf16.gmra.mrb[0].mxu0 %v17359_v53 }
 0x878   : > { %v7998_v30 = vmax.f32 %v7997_v52, %v6222_v62  ;;  %v6224_v21 = vpop.f32.mrb[150].mxu1  ;;  %7171 = vmatprep.mubr.bf16.mxu0 %v17057_v38 }
 0x879   : > { %v7872_v59 = vmax.f32 %v7871_v55, %v6224_v21  ;;  %v6226_v48 = vpop.f32.mrb[151].mxu1 }
 0x87a   : > { %v7999_v22 = vmax.f32 %v7998_v30, %v6226_v48  ;;  %v6903_v0 = vpop.f32.mrb[152].mxu0 }
 0x87b   : > { %v8127_v34 = vmax.f32 %v8126_v61, %v6903_v0  ;;  %6489 = vmatmul.mubr.bf16.gmra.mrb[0].mxu1 %v17359_v53  ;;  %v6905_v63 = vpop.f32.mrb[153].mxu0 }
 0x87c   : > { %v8254_v35 = vmax.f32 %v8253_v33, %v6905_v63  ;;  %v6907_v32 = vpop.f32.mrb[154].mxu0  ;;  %6498 = vmatprep.mubr.bf16.mxu1 %v17057_v38  ;;  %v17382_v33 = vld [vmem:[#allocation67_spill] sm:$0xff] }
 0x87d   : > { %v8128_v14 = vmax.f32 %v8127_v34, %v6907_v32  ;;  %v6909_v60 = vpop.f32.mrb[155].mxu0 }
 0x87e   : > { %v8255_v49 = vmax.f32 %v8254_v35, %v6909_v60  ;;  %v6230_v57 = vpop.f32.mrb[152].mxu1 }
 0x87f   : > { %v7873_v3 = vmax.f32 %v7872_v59, %v6230_v57  ;;  %v6232_v27 = vpop.f32.mrb[153].mxu1  ;;  %7172 = vmatmul.mubr.bf16.gmra.mrb[4].mxu0 %v17360_v28  ;;  %v17383_v57 = vld [vmem:[#allocation66_spill] sm:$0xff] }
 0x880   : > { %v8000_v12 = vmax.f32 %v7999_v22, %v6232_v27  ;;  %v6234_v17 = vpop.f32.mrb[154].mxu1  ;;  %7181 = vmatprep.mubr.bf16.mxu0 %v17057_v38 }
 0x881   : > { %v7874_v26 = vmax.f32 %v7873_v3, %v6234_v17  ;;  %v6236_v11 = vpop.f32.mrb[155].mxu1 }
 0x882   : > { %v8001_v53 = vmax.f32 %v8000_v12, %v6236_v11  ;;  %v6913_v16 = vpop.f32.mrb[156].mxu0 }
 0x883   : > { %v8129_v45 = vmax.f32 %v8128_v14, %v6913_v16  ;;  %6499 = vmatmul.mubr.bf16.gmra.mrb[4].mxu1 %v17360_v28  ;;  %v6915_v41 = vpop.f32.mrb[157].mxu0 }
 0x884   : > { %v8256_v6 = vmax.f32 %v8255_v49, %v6915_v41  ;;  %v6917_v2 = vpop.f32.mrb[158].mxu0  ;;  %6508 = vmatprep.mubr.bf16.mxu1 %v17057_v38 }
 0x885   : > { %v8130_v42 = vmax.f32 %v8129_v45, %v6917_v2  ;;  %v6919_v36 = vpop.f32.mrb[159].mxu0 }
 0x886   : > { %v8257_v5 = vmax.f32 %v8256_v6, %v6919_v36  ;;  %v6240_v10 = vpop.f32.mrb[156].mxu1 }
 0x887   : > { %v7875_v29 = vmax.f32 %v7874_v26, %v6240_v10  ;;  %v6242_v44 = vpop.f32.mrb[157].mxu1  ;;  %7182 = vmatmul.mubr.bf16.gmra.mrb[8].mxu0 %v17381_v20 }
 0x888   : > { %v8002_v43 = vmax.f32 %v8001_v53, %v6242_v44  ;;  %v6244_v39 = vpop.f32.mrb[158].mxu1  ;;  %7191 = vmatprep.mubr.bf16.mxu0 %v17057_v38 }
 0x889   : > { %v7876_v31 = vmax.f32 %v7875_v29, %v6244_v39  ;;  %v6246_v58 = vpop.f32.mrb[159].mxu1  ;;  %v17384_v29 = vld [vmem:[#allocation63_spill] sm:$0xff] }
 0x88a   : > { %v8003_v28 = vmax.f32 %v8002_v43, %v6246_v58  ;;  %v6923_v50 = vpop.f32.mrb[160].mxu0 }
 0x88b   : > { %v8131_v1 = vmax.f32 %v8130_v42, %v6923_v50  ;;  %6509 = vmatmul.mubr.bf16.gmra.mrb[8].mxu1 %v17381_v20  ;;  %v6925_v15 = vpop.f32.mrb[161].mxu0 }
 0x88c   : > { %v8258_v52 = vmax.f32 %v8257_v5, %v6925_v15  ;;  %v6927_v47 = vpop.f32.mrb[162].mxu0  ;;  %6518 = vmatprep.mubr.bf16.mxu1 %v17057_v38 }
 0x88d   : > { %v8132_v23 = vmax.f32 %v8131_v1, %v6927_v47  ;;  %v6929_v24 = vpop.f32.mrb[163].mxu0 }
 0x88e   : > { %v8259_v7 = vmax.f32 %v8258_v52, %v6929_v24  ;;  %v6250_v8 = vpop.f32.mrb[160].mxu1 }
 0x88f   : > { %v7877_v61 = vmax.f32 %v7876_v31, %v6250_v8  ;;  %v6252_v37 = vpop.f32.mrb[161].mxu1  ;;  %7192 = vmatmul.mubr.bf16.gmra.mrb[12].mxu0 %v17382_v33 }
 0x890   : > { %v8004_v19 = vmax.f32 %v8003_v28, %v6252_v37  ;;  %v6254_v55 = vpop.f32.mrb[162].mxu1  ;;  %7201 = vmatprep.mubr.bf16.mxu0 %v17057_v38 }
 0x891   : > { %v7878_v62 = vmax.f32 %v7877_v61, %v6254_v55  ;;  %v6256_v30 = vpop.f32.mrb[163].mxu1 }
 0x892   : > { %v8005_v21 = vmax.f32 %v8004_v19, %v6256_v30  ;;  %v6933_v59 = vpop.f32.mrb[164].mxu0 }
 0x893   : > { %v8133_v48 = vmax.f32 %v8132_v23, %v6933_v59  ;;  %6519 = vmatmul.mubr.bf16.gmra.mrb[12].mxu1 %v17382_v33  ;;  %v6935_v22 = vpop.f32.mrb[165].mxu0 }
 0x894   : > { %v8260_v0 = vmax.f32 %v8259_v7, %v6935_v22  ;;  %v6937_v34 = vpop.f32.mrb[166].mxu0  ;;  %6528 = vmatprep.mubr.bf16.mxu1 %v17057_v38 }
 0x895   : > { %v8134_v63 = vmax.f32 %v8133_v48, %v6937_v34  ;;  %v6939_v35 = vpop.f32.mrb[167].mxu0 }
 0x896   : > { %v8261_v32 = vmax.f32 %v8260_v0, %v6939_v35  ;;  %v6260_v14 = vpop.f32.mrb[164].mxu1 }
 0x897   : > { %v7879_v60 = vmax.f32 %v7878_v62, %v6260_v14  ;;  %v6262_v49 = vpop.f32.mrb[165].mxu1  ;;  %7202 = vmatmul.mubr.bf16.gmra.mrb[16].mxu0 %v17383_v57 }
 0x898   : > { %v8006_v3 = vmax.f32 %v8005_v21, %v6262_v49  ;;  %v6264_v27 = vpop.f32.mrb[166].mxu1  ;;  %7211 = vmatprep.mubr.bf16.mxu0 %v17057_v38 }
 0x899   : > { %v7880_v12 = vmax.f32 %v7879_v60, %v6264_v27  ;;  %v6266_v17 = vpop.f32.mrb[167].mxu1 }
 0x89a   : > { %v8007_v26 = vmax.f32 %v8006_v3, %v6266_v17  ;;  %v6943_v11 = vpop.f32.mrb[168].mxu0 }
 0x89b   : > { %v8135_v53 = vmax.f32 %v8134_v63, %v6943_v11  ;;  %6529 = vmatmul.mubr.bf16.gmra.mrb[16].mxu1 %v17383_v57  ;;  %v6945_v16 = vpop.f32.mrb[169].mxu0 }
 0x89c   : > { %v8262_v45 = vmax.f32 %v8261_v32, %v6945_v16  ;;  %v6947_v41 = vpop.f32.mrb[170].mxu0  ;;  %6538 = vmatprep.mubr.bf16.mxu1 %v17057_v38 }
 0x89d   : > { %v8136_v6 = vmax.f32 %v8135_v53, %v6947_v41  ;;  %v6949_v2 = vpop.f32.mrb[171].mxu0 }
 0x89e   : > { %v8263_v42 = vmax.f32 %v8262_v45, %v6949_v2  ;;  %v6270_v36 = vpop.f32.mrb[168].mxu1 }
 0x89f   : > { %v7881_v5 = vmax.f32 %v7880_v12, %v6270_v36  ;;  %v6272_v10 = vpop.f32.mrb[169].mxu1  ;;  %7212 = vmatmul.mubr.bf16.gmra.mrb[20].mxu0 %v17384_v29 }
 0x8a0   : > { %v8008_v44 = vmax.f32 %v8007_v26, %v6272_v10  ;;  %v6274_v20 = vpop.f32.mrb[170].mxu1  ;;  %7221 = vmatprep.mubr.bf16.mxu0 %v17057_v38 }
 0x8a1   : > { %v7882_v43 = vmax.f32 %v7881_v5, %v6274_v20  ;;  %v6276_v39 = vpop.f32.mrb[171].mxu1 }
 0x8a2   : > { %v8009_v31 = vmax.f32 %v8008_v44, %v6276_v39  ;;  %v6953_v58 = vpop.f32.mrb[172].mxu0 }
 0x8a3   : > { %v8137_v28 = vmax.f32 %v8136_v6, %v6953_v58  ;;  %6539 = vmatmul.mubr.bf16.gmra.mrb[20].mxu1 %v17384_v29  ;;  %v6955_v50 = vpop.f32.mrb[173].mxu0 }
 0x8a4   : > { %v8264_v1 = vmax.f32 %v8263_v42, %v6955_v50  ;;  %v6957_v15 = vpop.f32.mrb[174].mxu0  ;;  %6548 = vmatprep.mubr.bf16.mxu1 %v17057_v38 }
 0x8a5   : > { %v8138_v52 = vmax.f32 %v8137_v28, %v6957_v15  ;;  %v6959_v47 = vpop.f32.mrb[175].mxu0 }
 0x8a6   : > { %v8265_v23 = vmax.f32 %v8264_v1, %v6959_v47  ;;  %v6280_v24 = vpop.f32.mrb[172].mxu1 }
 0x8a7   : > { %v7883_v7 = vmax.f32 %v7882_v43, %v6280_v24  ;;  %v6282_v8 = vpop.f32.mrb[173].mxu1  ;;  %7222 = vmatmul.mubr.bf16.gmra.mrb[24].mxu0 %v17363_v13 }
 0x8a8   : > { %v8010_v61 = vmax.f32 %v8009_v31, %v6282_v8  ;;  %v6284_v37 = vpop.f32.mrb[174].mxu1  ;;  %7231 = vmatprep.mubr.bf16.mxu0 %v17057_v38 }
 0x8a9   : > { %v7884_v33 = vmax.f32 %v7883_v7, %v6284_v37  ;;  %v6286_v19 = vpop.f32.mrb[175].mxu1 }
 0x8aa   : > { %v8011_v55 = vmax.f32 %v8010_v61, %v6286_v19  ;;  %v6963_v62 = vpop.f32.mrb[176].mxu0 }
 0x8ab   : > { %v8139_v30 = vmax.f32 %v8138_v52, %v6963_v62  ;;  %6549 = vmatmul.mubr.bf16.gmra.mrb[24].mxu1 %v17363_v13  ;;  %v6965_v21 = vpop.f32.mrb[177].mxu0 }
 0x8ac   : > { %v8266_v59 = vmax.f32 %v8265_v23, %v6965_v21  ;;  %v6967_v48 = vpop.f32.mrb[178].mxu0  ;;  %6558 = vmatprep.mubr.bf16.mxu1 %v17057_v38 }
 0x8ad   : > { %v8140_v22 = vmax.f32 %v8139_v30, %v6967_v48  ;;  %v6969_v0 = vpop.f32.mrb[179].mxu0 }
 0x8ae   : > { %v8267_v34 = vmax.f32 %v8266_v59, %v6969_v0  ;;  %v6290_v63 = vpop.f32.mrb[176].mxu1 }
 0x8af   : > { %v7885_v35 = vmax.f32 %v7884_v33, %v6290_v63  ;;  %v6292_v32 = vpop.f32.mrb[177].mxu1  ;;  %7232 = vmatmul.mubr.bf16.gmra.mrb[28].mxu0 %v17364_v9 }
 0x8b0   : > { %v8012_v14 = vmax.f32 %v8011_v55, %v6292_v32  ;;  %v6294_v60 = vpop.f32.mrb[178].mxu1  ;;  %7241 = vmatprep.mubr.bf16.mxu0 %v17057_v38 }
 0x8b1   : > { %v7886_v49 = vmax.f32 %v7885_v35, %v6294_v60  ;;  %v6296_v57 = vpop.f32.mrb[179].mxu1 }
 0x8b2   : > { %v8013_v13 = vmax.f32 %v8012_v14, %v6296_v57  ;;  %v6973_v3 = vpop.f32.mrb[180].mxu0 }
 0x8b3   : > { %v8141_v27 = vmax.f32 %v8140_v22, %v6973_v3  ;;  %6559 = vmatmul.mubr.bf16.gmra.mrb[28].mxu1 %v17364_v9  ;;  %v6975_v12 = vpop.f32.mrb[181].mxu0 }
 0x8b4   : > { %v8268_v17 = vmax.f32 %v8267_v34, %v6975_v12  ;;  %v6977_v26 = vpop.f32.mrb[182].mxu0  ;;  %6568 = vmatprep.mubr.bf16.mxu1 %v17057_v38 }
 0x8b5   : > { %v8142_v11 = vmax.f32 %v8141_v27, %v6977_v26  ;;  %v6979_v53 = vpop.f32.mrb[183].mxu0 }
 0x8b6   : > { %v8269_v16 = vmax.f32 %v8268_v17, %v6979_v53  ;;  %v6300_v45 = vpop.f32.mrb[180].mxu1 }
 0x8b7   : > { %v7887_v41 = vmax.f32 %v7886_v49, %v6300_v45  ;;  %v6302_v6 = vpop.f32.mrb[181].mxu1  ;;  %7242 = vmatmul.mubr.bf16.gmra.mrb[32].mxu0 %v15233_v4 }
 0x8b8   : > { %v8014_v2 = vmax.f32 %v8013_v13, %v6302_v6  ;;  %v6304_v42 = vpop.f32.mrb[182].mxu1  ;;  %7251 = vmatprep.mubr.bf16.mxu0 %v17057_v38 }
 0x8b9   : > { %v7888_v36 = vmax.f32 %v7887_v41, %v6304_v42  ;;  %v6306_v5 = vpop.f32.mrb[183].mxu1 }
 0x8ba   : > { %v8015_v9 = vmax.f32 %v8014_v2, %v6306_v5  ;;  %v6983_v10 = vpop.f32.mrb[184].mxu0 }
 0x8bb   : > { %v8143_v29 = vmax.f32 %v8142_v11, %v6983_v10  ;;  %6569 = vmatmul.mubr.bf16.gmra.mrb[32].mxu1 %v15233_v4  ;;  %v6985_v44 = vpop.f32.mrb[185].mxu0 }
 0x8bc   : > { %v8270_v20 = vmax.f32 %v8269_v16, %v6985_v44  ;;  %v6987_v43 = vpop.f32.mrb[186].mxu0  ;;  %6578 = vmatprep.mubr.bf16.mxu1 %v17057_v38 }
 0x8bd   : > { %v8144_v39 = vmax.f32 %v8143_v29, %v6987_v43  ;;  %v6989_v31 = vpop.f32.mrb[187].mxu0 }
 0x8be   : > { %v8271_v58 = vmax.f32 %v8270_v20, %v6989_v31  ;;  %v6310_v28 = vpop.f32.mrb[184].mxu1 }
 0x8bf   : > { %v7889_v50 = vmax.f32 %v7888_v36, %v6310_v28  ;;  %v6312_v1 = vpop.f32.mrb[185].mxu1  ;;  %7252 = vmatmul.mubr.bf16.gmra.mrb[36].mxu0 %v15231_v51 }
 0x8c0   : > { %v8016_v15 = vmax.f32 %v8015_v9, %v6312_v1  ;;  %v6314_v52 = vpop.f32.mrb[186].mxu1  ;;  %7261 = vmatprep.mubr.bf16.mxu0 %v17057_v38 }
 0x8c1   : > { %v7890_v47 = vmax.f32 %v7889_v50, %v6314_v52  ;;  %v6316_v23 = vpop.f32.mrb[187].mxu1 }
 0x8c2   : > { %v8017_v4 = vmax.f32 %v8016_v15, %v6316_v23  ;;  %v6993_v24 = vpop.f32.mrb[188].mxu0 }
 0x8c3   : > { %v8145_v7 = vmax.f32 %v8144_v39, %v6993_v24  ;;  %6579 = vmatmul.mubr.bf16.gmra.mrb[36].mxu1 %v15231_v51  ;;  %v6995_v8 = vpop.f32.mrb[189].mxu0 }
 0x8c4   : > { %v8272_v61 = vmax.f32 %v8271_v58, %v6995_v8  ;;  %v6997_v37 = vpop.f32.mrb[190].mxu0  ;;  %6588 = vmatprep.mubr.bf16.mxu1 %v17057_v38 }
 0x8c5   : > { %v8146_v33 = vmax.f32 %v8145_v7, %v6997_v37  ;;  %v6999_v19 = vpop.f32.mrb[191].mxu0 }
 0x8c6   : > { %v8273_v55 = vmax.f32 %v8272_v61, %v6999_v19  ;;  %v6320_v62 = vpop.f32.mrb[188].mxu1 }
 0x8c7   : > { %v7891_v30 = vmax.f32 %v7890_v47, %v6320_v62  ;;  %v6322_v21 = vpop.f32.mrb[189].mxu1  ;;  %7262 = vmatmul.mubr.bf16.gmra.mrb[40].mxu0 %v15292_v40 }
 0x8c8   : > { %v8018_v59 = vmax.f32 %v8017_v4, %v6322_v21  ;;  %v6324_v48 = vpop.f32.mrb[190].mxu1  ;;  %7271 = vmatprep.mubr.bf16.mxu0 %v17057_v38 }
 0x8c9   : > { %v7892_v22 = vmax.f32 %v7891_v30, %v6324_v48  ;;  %v6326_v0 = vpop.f32.mrb[191].mxu1 }
 0x8ca   : > { %v8019_v51 = vmax.f32 %v8018_v59, %v6326_v0  ;;  %v7003_v34 = vpop.f32.mrb[192].mxu0 }
 0x8cb   : > { %v8147_v63 = vmax.f32 %v8146_v33, %v7003_v34  ;;  %6589 = vmatmul.mubr.bf16.gmra.mrb[40].mxu1 %v15292_v40  ;;  %v7005_v35 = vpop.f32.mrb[193].mxu0 }
 0x8cc   : > { %v8274_v32 = vmax.f32 %v8273_v55, %v7005_v35  ;;  %v7007_v14 = vpop.f32.mrb[194].mxu0  ;;  %6598 = vmatprep.mubr.bf16.mxu1 %v17057_v38 }
 0x8cd   : > { %v8148_v60 = vmax.f32 %v8147_v63, %v7007_v14  ;;  %v7009_v49 = vpop.f32.mrb[195].mxu0 }
 0x8ce   : > { %v8275_v57 = vmax.f32 %v8274_v32, %v7009_v49  ;;  %v6330_v13 = vpop.f32.mrb[192].mxu1 }
 0x8cf   : > { %v7893_v3 = vmax.f32 %v7892_v22, %v6330_v13  ;;  %v6332_v27 = vpop.f32.mrb[193].mxu1  ;;  %7272 = vmatmul.mubr.bf16.gmra.mrb[44].mxu0 %v15289_v18 }
 0x8d0   : > { %v8020_v12 = vmax.f32 %v8019_v51, %v6332_v27  ;;  %v6334_v17 = vpop.f32.mrb[194].mxu1  ;;  %7281 = vmatprep.mubr.bf16.mxu0 %v17057_v38 }
 0x8d1   : > { %v7894_v26 = vmax.f32 %v7893_v3, %v6334_v17  ;;  %v6336_v11 = vpop.f32.mrb[195].mxu1 }
 0x8d2   : > { %v8021_v40 = vmax.f32 %v8020_v12, %v6336_v11  ;;  %v7013_v53 = vpop.f32.mrb[196].mxu0 }
 0x8d3   : > { %v8149_v16 = vmax.f32 %v8148_v60, %v7013_v53  ;;  %6599 = vmatmul.mubr.bf16.gmra.mrb[44].mxu1 %v15289_v18  ;;  %v7015_v45 = vpop.f32.mrb[197].mxu0 }
 0x8d4   : > { %v8276_v41 = vmax.f32 %v8275_v57, %v7015_v45  ;;  %v7017_v6 = vpop.f32.mrb[198].mxu0  ;;  %6608 = vmatprep.mubr.bf16.mxu1 %v17057_v38 }
 0x8d5   : > { %v8150_v2 = vmax.f32 %v8149_v16, %v7017_v6  ;;  %v7019_v42 = vpop.f32.mrb[199].mxu0 }
 0x8d6   : > { %v8277_v36 = vmax.f32 %v8276_v41, %v7019_v42  ;;  %v6340_v5 = vpop.f32.mrb[196].mxu1 }
 0x8d7   : > { %v7895_v9 = vmax.f32 %v7894_v26, %v6340_v5  ;;  %v6342_v10 = vpop.f32.mrb[197].mxu1  ;;  %7282 = vmatmul.mubr.bf16.gmra.mrb[48].mxu0 %v15353_v54 }
 0x8d8   : > { %v8022_v29 = vmax.f32 %v8021_v40, %v6342_v10  ;;  %v6344_v44 = vpop.f32.mrb[198].mxu1  ;;  %7291 = vmatprep.mubr.bf16.mxu0 %v17057_v38 }
 0x8d9   : > { %v7896_v20 = vmax.f32 %v7895_v9, %v6344_v44  ;;  %v6346_v43 = vpop.f32.mrb[199].mxu1 }
 0x8da   : > { %v8023_v18 = vmax.f32 %v8022_v29, %v6346_v43  ;;  %v7023_v39 = vpop.f32.mrb[200].mxu0 }
 0x8db   : > { %v8151_v31 = vmax.f32 %v8150_v2, %v7023_v39  ;;  %6609 = vmatmul.mubr.bf16.gmra.mrb[48].mxu1 %v15353_v54  ;;  %v7025_v58 = vpop.f32.mrb[201].mxu0 }
 0x8dc   : > { %v8278_v28 = vmax.f32 %v8277_v36, %v7025_v58  ;;  %v7027_v50 = vpop.f32.mrb[202].mxu0  ;;  %6618 = vmatprep.mubr.bf16.mxu1 %v17057_v38 }
 0x8dd   : > { %v8152_v1 = vmax.f32 %v8151_v31, %v7027_v50  ;;  %v7029_v15 = vpop.f32.mrb[203].mxu0 }
 0x8de   : > { %v8279_v52 = vmax.f32 %v8278_v28, %v7029_v15  ;;  %v6350_v47 = vpop.f32.mrb[200].mxu1 }
 0x8df   : > { %v7897_v23 = vmax.f32 %v7896_v20, %v6350_v47  ;;  %v6352_v4 = vpop.f32.mrb[201].mxu1  ;;  %7292 = vmatmul.mubr.bf16.gmra.mrb[52].mxu0 %v15351_v46 }
 0x8e0   : > { %v8024_v24 = vmax.f32 %v8023_v18, %v6352_v4  ;;  %v6354_v7 = vpop.f32.mrb[202].mxu1  ;;  %7301 = vmatprep.mubr.bf16.mxu0 %v17057_v38 }
 0x8e1   : > { %v7898_v8 = vmax.f32 %v7897_v23, %v6354_v7  ;;  %v6356_v61 = vpop.f32.mrb[203].mxu1 }
 0x8e2   : > { %v8025_v54 = vmax.f32 %v8024_v24, %v6356_v61  ;;  %v7033_v37 = vpop.f32.mrb[204].mxu0 }
 0x8e3   : > { %v8153_v33 = vmax.f32 %v8152_v1, %v7033_v37  ;;  %6619 = vmatmul.mubr.bf16.gmra.mrb[52].mxu1 %v15351_v46  ;;  %v7035_v19 = vpop.f32.mrb[205].mxu0 }
 0x8e4   : > { %v8280_v55 = vmax.f32 %v8279_v52, %v7035_v19  ;;  %v7037_v62 = vpop.f32.mrb[206].mxu0  ;;  %6628 = vmatprep.mubr.bf16.mxu1 %v17057_v38 }
 0x8e5   : > { %v8154_v30 = vmax.f32 %v8153_v33, %v7037_v62  ;;  %v7039_v21 = vpop.f32.mrb[207].mxu0 }
 0x8e6   : > { %v8281_v59 = vmax.f32 %v8280_v55, %v7039_v21  ;;  %v6360_v48 = vpop.f32.mrb[204].mxu1 }
 0x8e7   : > { %v7899_v22 = vmax.f32 %v7898_v8, %v6360_v48  ;;  %v6362_v0 = vpop.f32.mrb[205].mxu1  ;;  %7302 = vmatmul.mubr.bf16.gmra.mrb[56].mxu0 %v15411_v25 }
 0x8e8   : > { %v8026_v51 = vmax.f32 %v8025_v54, %v6362_v0  ;;  %v6364_v34 = vpop.f32.mrb[206].mxu1  ;;  %7311 = vmatprep.mubr.bf16.mxu0 %v17057_v38 }
 0x8e9   : > { %v7900_v63 = vmax.f32 %v7899_v22, %v6364_v34  ;;  %v6366_v35 = vpop.f32.mrb[207].mxu1 }
 0x8ea   : > { %v8027_v46 = vmax.f32 %v8026_v51, %v6366_v35  ;;  %v7043_v32 = vpop.f32.mrb[208].mxu0 }
 0x8eb   : > { %v8155_v14 = vmax.f32 %v8154_v30, %v7043_v32  ;;  %6629 = vmatmul.mubr.bf16.gmra.mrb[56].mxu1 %v15411_v25  ;;  %v7045_v60 = vpop.f32.mrb[209].mxu0 }
 0x8ec   : > { %v8282_v49 = vmax.f32 %v8281_v59, %v7045_v60  ;;  %v7047_v57 = vpop.f32.mrb[210].mxu0  ;;  %6638 = vmatprep.mubr.bf16.mxu1 %v17057_v38 }
 0x8ed   : > { %v8156_v13 = vmax.f32 %v8155_v14, %v7047_v57  ;;  %v7049_v3 = vpop.f32.mrb[211].mxu0 }
 0x8ee   : > { %v8283_v27 = vmax.f32 %v8282_v49, %v7049_v3  ;;  %v6370_v12 = vpop.f32.mrb[208].mxu1 }
 0x8ef   : > { %v7901_v17 = vmax.f32 %v7900_v63, %v6370_v12  ;;  %v6372_v26 = vpop.f32.mrb[209].mxu1  ;;  %7312 = vmatmul.mubr.bf16.gmra.mrb[60].mxu0 %v15409_v56 }
 0x8f0   : > { %v8028_v11 = vmax.f32 %v8027_v46, %v6372_v26  ;;  %v6374_v40 = vpop.f32.mrb[210].mxu1 }
 0x8f1   : > { %v7902_v53 = vmax.f32 %v7901_v17, %v6374_v40  ;;  %v6376_v16 = vpop.f32.mrb[211].mxu1 }
 0x8f2   : > { %v8029_v45 = vmax.f32 %v8028_v11, %v6376_v16  ;;  %v7053_v41 = vpop.f32.mrb[212].mxu0 }
 0x8f3   : > { %v8157_v25 = vmax.f32 %v8156_v13, %v7053_v41  ;;  %6639 = vmatmul.mubr.bf16.gmra.mrb[60].mxu1 %v15409_v56  ;;  %v7055_v6 = vpop.f32.mrb[213].mxu0 }
 0x8f4   : > { %v8284_v2 = vmax.f32 %v8283_v27, %v7055_v6  ;;  %v7057_v38 = vpop.f32.mrb[214].mxu0 }
 0x8f5   : > { %v8158_v42 = vmax.f32 %v8157_v25, %v7057_v38  ;;  %v7059_v36 = vpop.f32.mrb[215].mxu0 }
 0x8f6   : > { %v8285_v5 = vmax.f32 %v8284_v2, %v7059_v36  ;;  %v6380_v9 = vpop.f32.mrb[212].mxu1 }
 0x8f7   : > { %v7903_v10 = vmax.f32 %v7902_v53, %v6380_v9  ;;  %v6382_v29 = vpop.f32.mrb[213].mxu1 }
 0x8f8   : > { %v8030_v44 = vmax.f32 %v8029_v45, %v6382_v29  ;;  %v6384_v20 = vpop.f32.mrb[214].mxu1 }
 0x8f9   : > { %v7904_v43 = vmax.f32 %v7903_v10, %v6384_v20  ;;  %v6386_v18 = vpop.f32.mrb[215].mxu1 }
 0x8fa   : > { %v8031_v39 = vmax.f32 %v8030_v44, %v6386_v18  ;;  %v7063_v31 = vpop.f32.mrb[216].mxu0 }
 0x8fb   : > { %v8159_v58 = vmax.f32 %v8158_v42, %v7063_v31  ;;  %v7065_v28 = vpop.f32.mrb[217].mxu0 }
 0x8fc   : > { %v8286_v50 = vmax.f32 %v8285_v5, %v7065_v28  ;;  %v7067_v1 = vpop.f32.mrb[218].mxu0 }
 0x8fd   : > { %v8160_v56 = vmax.f32 %v8159_v58, %v7067_v1  ;;  %v7069_v15 = vpop.f32.mrb[219].mxu0 }
 0x8fe   : > { %v8287_v52 = vmax.f32 %v8286_v50, %v7069_v15  ;;  %v6390_v47 = vpop.f32.mrb[216].mxu1 }
 0x8ff   : > { %v7905_v23 = vmax.f32 %v7904_v43, %v6390_v47  ;;  %v6392_v4 = vpop.f32.mrb[217].mxu1 }
 0x900   : > { %v8032_v24 = vmax.f32 %v8031_v39, %v6392_v4  ;;  %v6394_v7 = vpop.f32.mrb[218].mxu1 }
 0x901   : > { %v7906_v8 = vmax.f32 %v7905_v23, %v6394_v7  ;;  %v6396_v61 = vpop.f32.mrb[219].mxu1 }
 0x902   : > { %v8033_v54 = vmax.f32 %v8032_v24, %v6396_v61  ;;  %v7073_v37 = vpop.f32.mrb[220].mxu0 }
 0x903   : > { %v8161_v33 = vmax.f32 %v8160_v56, %v7073_v37  ;;  %v7075_v19 = vpop.f32.mrb[221].mxu0 }
 0x904   : > { %v8288_v55 = vmax.f32 %v8287_v52, %v7075_v19  ;;  %v7077_v62 = vpop.f32.mrb[222].mxu0 }
 0x905   : > { %v8162_v30 = vmax.f32 %v8161_v33, %v7077_v62  ;;  %v7079_v21 = vpop.f32.mrb[223].mxu0 }
 0x906   : > { %v8289_v59 = vmax.f32 %v8288_v55, %v7079_v21  ;;  %v6400_v48 = vpop.f32.mrb[220].mxu1 }
 0x907   : > { %v7907_v22 = vmax.f32 %v7906_v8, %v6400_v48  ;;  %v6402_v0 = vpop.f32.mrb[221].mxu1 }
 0x908   : > { %v8034_v51 = vmax.f32 %v8033_v54, %v6402_v0  ;;  %v6404_v34 = vpop.f32.mrb[222].mxu1 }
 0x909   : > { %v7908_v63 = vmax.f32 %v7907_v22, %v6404_v34  ;;  %v6406_v35 = vpop.f32.mrb[223].mxu1 }
 0x90a   : > { %v8035_v46 = vmax.f32 %v8034_v51, %v6406_v35  ;;  %v7083_v32 = vpop.f32.mrb[224].mxu0 }
 0x90b   : > { %v8163_v14 = vmax.f32 %v8162_v30, %v7083_v32  ;;  %v7085_v60 = vpop.f32.mrb[225].mxu0 }
 0x90c   : > { %v8290_v49 = vmax.f32 %v8289_v59, %v7085_v60  ;;  %v7087_v57 = vpop.f32.mrb[226].mxu0 }
 0x90d   : > { %v8164_v13 = vmax.f32 %v8163_v14, %v7087_v57  ;;  %v7089_v3 = vpop.f32.mrb[227].mxu0 }
 0x90e   : > { %v8291_v27 = vmax.f32 %v8290_v49, %v7089_v3  ;;  %v6410_v12 = vpop.f32.mrb[224].mxu1 }
 0x90f   : > { %v7909_v17 = vmax.f32 %v7908_v63, %v6410_v12  ;;  %v6412_v26 = vpop.f32.mrb[225].mxu1 }
 0x910   : > { %v8036_v11 = vmax.f32 %v8035_v46, %v6412_v26  ;;  %v6414_v40 = vpop.f32.mrb[226].mxu1 }
 0x911   : > { %v7910_v53 = vmax.f32 %v7909_v17, %v6414_v40  ;;  %v6416_v16 = vpop.f32.mrb[227].mxu1 }
 0x912   : > { %v8037_v45 = vmax.f32 %v8036_v11, %v6416_v16  ;;  %v7093_v41 = vpop.f32.mrb[228].mxu0 }
 0x913   : > { %v8165_v25 = vmax.f32 %v8164_v13, %v7093_v41  ;;  %v7095_v6 = vpop.f32.mrb[229].mxu0 }
 0x914   : > { %v8292_v2 = vmax.f32 %v8291_v27, %v7095_v6  ;;  %v7097_v38 = vpop.f32.mrb[230].mxu0 }
 0x915   : > { %v8166_v42 = vmax.f32 %v8165_v25, %v7097_v38  ;;  %v7099_v36 = vpop.f32.mrb[231].mxu0 }
 0x916   : > { %v8293_v5 = vmax.f32 %v8292_v2, %v7099_v36  ;;  %v6420_v9 = vpop.f32.mrb[228].mxu1 }
 0x917   : > { %v7911_v10 = vmax.f32 %v7910_v53, %v6420_v9  ;;  %v6422_v29 = vpop.f32.mrb[229].mxu1 }
 0x918   : > { %v8038_v44 = vmax.f32 %v8037_v45, %v6422_v29  ;;  %v6424_v20 = vpop.f32.mrb[230].mxu1 }
 0x919   : > { %v7912_v43 = vmax.f32 %v7911_v10, %v6424_v20  ;;  %v6426_v18 = vpop.f32.mrb[231].mxu1 }
 0x91a   : > { %v8039_v39 = vmax.f32 %v8038_v44, %v6426_v18  ;;  %v7103_v31 = vpop.f32.mrb[232].mxu0 }
 0x91b   : > { %v8167_v58 = vmax.f32 %v8166_v42, %v7103_v31  ;;  %v7105_v28 = vpop.f32.mrb[233].mxu0 }
 0x91c   : > { %v8294_v50 = vmax.f32 %v8293_v5, %v7105_v28  ;;  %v7107_v1 = vpop.f32.mrb[234].mxu0 }
 0x91d   : > { %v8168_v56 = vmax.f32 %v8167_v58, %v7107_v1  ;;  %v7109_v15 = vpop.f32.mrb[235].mxu0 }
 0x91e   : > { %v8295_v52 = vmax.f32 %v8294_v50, %v7109_v15  ;;  %v6430_v47 = vpop.f32.mrb[232].mxu1 }
 0x91f   : > { %v7913_v23 = vmax.f32 %v7912_v43, %v6430_v47  ;;  %v6432_v4 = vpop.f32.mrb[233].mxu1 }
 0x920   : > { %v8040_v24 = vmax.f32 %v8039_v39, %v6432_v4  ;;  %v6434_v7 = vpop.f32.mrb[234].mxu1 }
 0x921   : > { %v7914_v8 = vmax.f32 %v7913_v23, %v6434_v7  ;;  %v6436_v61 = vpop.f32.mrb[235].mxu1 }
 0x922   : > { %v8041_v54 = vmax.f32 %v8040_v24, %v6436_v61  ;;  %v7113_v37 = vpop.f32.mrb[236].mxu0 }
 0x923   : > { %v8169_v33 = vmax.f32 %v8168_v56, %v7113_v37  ;;  %v7115_v19 = vpop.f32.mrb[237].mxu0 }
 0x924   : > { %v8296_v55 = vmax.f32 %v8295_v52, %v7115_v19  ;;  %v7117_v62 = vpop.f32.mrb[238].mxu0 }
 0x925   : > { %v8170_v30 = vmax.f32 %v8169_v33, %v7117_v62  ;;  %v7119_v21 = vpop.f32.mrb[239].mxu0 }
 0x926   : > { %v8297_v59 = vmax.f32 %v8296_v55, %v7119_v21  ;;  %v6440_v48 = vpop.f32.mrb[236].mxu1 }
 0x927   : > { %v7915_v22 = vmax.f32 %v7914_v8, %v6440_v48  ;;  %v6442_v0 = vpop.f32.mrb[237].mxu1 }
 0x928   : > { %v8042_v51 = vmax.f32 %v8041_v54, %v6442_v0  ;;  %v6444_v34 = vpop.f32.mrb[238].mxu1 }
 0x929   : > { %v7916_v63 = vmax.f32 %v7915_v22, %v6444_v34  ;;  %v6446_v35 = vpop.f32.mrb[239].mxu1 }
 0x92a   : > { %v8043_v46 = vmax.f32 %v8042_v51, %v6446_v35  ;;  %v7123_v32 = vpop.f32.mrb[240].mxu0 }
 0x92b   : > { %v8171_v14 = vmax.f32 %v8170_v30, %v7123_v32  ;;  %v7125_v60 = vpop.f32.mrb[241].mxu0 }
 0x92c   : > { %v8298_v49 = vmax.f32 %v8297_v59, %v7125_v60  ;;  %v7127_v57 = vpop.f32.mrb[242].mxu0 }
 0x92d   : > { %v8172_v13 = vmax.f32 %v8171_v14, %v7127_v57  ;;  %v7129_v3 = vpop.f32.mrb[243].mxu0 }
 0x92e   : > { %v8299_v27 = vmax.f32 %v8298_v49, %v7129_v3  ;;  %v6450_v12 = vpop.f32.mrb[240].mxu1 }
 0x92f   : > { %v7917_v17 = vmax.f32 %v7916_v63, %v6450_v12  ;;  %v6452_v26 = vpop.f32.mrb[241].mxu1 }
 0x930   : > { %v8044_v11 = vmax.f32 %v8043_v46, %v6452_v26  ;;  %v6454_v40 = vpop.f32.mrb[242].mxu1 }
 0x931   : > { %v7918_v53 = vmax.f32 %v7917_v17, %v6454_v40  ;;  %v6456_v16 = vpop.f32.mrb[243].mxu1 }
 0x932   : > { %v8045_v45 = vmax.f32 %v8044_v11, %v6456_v16  ;;  %v7133_v41 = vpop.f32.mrb[244].mxu0 }
 0x933   : > { %v8173_v25 = vmax.f32 %v8172_v13, %v7133_v41  ;;  %v7135_v6 = vpop.f32.mrb[245].mxu0 }
 0x934   : > { %v8300_v2 = vmax.f32 %v8299_v27, %v7135_v6  ;;  %v7137_v38 = vpop.f32.mrb[246].mxu0 }
 0x935   : > { %v8174_v42 = vmax.f32 %v8173_v25, %v7137_v38  ;;  %v7139_v36 = vpop.f32.mrb[247].mxu0 }
 0x936   : > { %v8301_v5 = vmax.f32 %v8300_v2, %v7139_v36  ;;  %v6460_v9 = vpop.f32.mrb[244].mxu1 }
 0x937   : > { %v7919_v10 = vmax.f32 %v7918_v53, %v6460_v9  ;;  %v6462_v29 = vpop.f32.mrb[245].mxu1 }
 0x938   : > { %v8046_v44 = vmax.f32 %v8045_v45, %v6462_v29  ;;  %v6464_v20 = vpop.f32.mrb[246].mxu1 }
 0x939   : > { %v7920_v43 = vmax.f32 %v7919_v10, %v6464_v20  ;;  %v6466_v18 = vpop.f32.mrb[247].mxu1 }
 0x93a   : > { %v8047_v39 = vmax.f32 %v8046_v44, %v6466_v18  ;;  %v7143_v31 = vpop.f32.mrb[248].mxu0 }
 0x93b   : > { %v8175_v58 = vmax.f32 %v8174_v42, %v7143_v31  ;;  %v7145_v28 = vpop.f32.mrb[249].mxu0 }
 0x93c   : > { %v8302_v50 = vmax.f32 %v8301_v5, %v7145_v28  ;;  %v7147_v1 = vpop.f32.mrb[250].mxu0 }
 0x93d   : > { %v8176_v56 = vmax.f32 %v8175_v58, %v7147_v1  ;;  %v7149_v15 = vpop.f32.mrb[251].mxu0 }
 0x93e   : > { %v8303_v52 = vmax.f32 %v8302_v50, %v7149_v15  ;;  %v6470_v47 = vpop.f32.mrb[248].mxu1 }
 0x93f   : > { %v7921_v23 = vmax.f32 %v7920_v43, %v6470_v47  ;;  %v6472_v4 = vpop.f32.mrb[249].mxu1 }
 0x940   : > { %v8048_v24 = vmax.f32 %v8047_v39, %v6472_v4  ;;  %v6474_v7 = vpop.f32.mrb[250].mxu1 }
 0x941   : > { %v7922_v8 = vmax.f32 %v7921_v23, %v6474_v7  ;;  %v6476_v61 = vpop.f32.mrb[251].mxu1 }
 0x942   : > { %v8049_v54 = vmax.f32 %v8048_v24, %v6476_v61  ;;  %v7153_v37 = vpop.f32.mrb[252].mxu0 }
 0x943   : > { %v8177_v33 = vmax.f32 %v8176_v56, %v7153_v37  ;;  %v7155_v19 = vpop.f32.mrb[253].mxu0 }
 0x944   : > { %v8304_v55 = vmax.f32 %v8303_v52, %v7155_v19  ;;  %v7157_v62 = vpop.f32.mrb[254].mxu0 }
 0x945   : > { %v8178_v30 = vmax.f32 %v8177_v33, %v7157_v62  ;;  %v7159_v21 = vpop.f32.mrb[255].mxu0 }
 0x946   : > { %v8305_v59 = vmax.f32 %v8304_v55, %v7159_v21  ;;  %v6480_v48 = vpop.f32.mrb[252].mxu1 }
 0x947   : > { %v7923_v22 = vmax.f32 %v7922_v8, %v6480_v48  ;;  %v6482_v0 = vpop.f32.mrb[253].mxu1 }
 0x948   : > { %v8050_v51 = vmax.f32 %v8049_v54, %v6482_v0  ;;  %v6484_v34 = vpop.f32.mrb[254].mxu1 }
 0x949   : > { %v7924_v63 = vmax.f32 %v7923_v22, %v6484_v34  ;;  %v6486_v35 = vpop.f32.mrb[255].mxu1 }
 0x94a   : > { %v8051_v46 = vmax.f32 %v8050_v51, %v6486_v35  ;;  %v7163_v32 = vpop.f32.mrb[0].mxu0 }
 0x94b   : > { %v8179_v14 = vmax.f32 %v8178_v30, %v7163_v32  ;;  %v7165_v60 = vpop.f32.mrb[1].mxu0 }
 0x94c   : > { %v8306_v49 = vmax.f32 %v8305_v59, %v7165_v60  ;;  %v7167_v57 = vpop.f32.mrb[2].mxu0 }
 0x94d   : > { %v8180_v13 = vmax.f32 %v8179_v14, %v7167_v57  ;;  %v7169_v3 = vpop.f32.mrb[3].mxu0 }
 0x94e   : > { %v8307_v27 = vmax.f32 %v8306_v49, %v7169_v3  ;;  %v6490_v12 = vpop.f32.mrb[0].mxu1 }
 0x94f   : > { %v7925_v17 = vmax.f32 %v7924_v63, %v6490_v12  ;;  %v6492_v26 = vpop.f32.mrb[1].mxu1 }
 0x950   : > { %v8052_v11 = vmax.f32 %v8051_v46, %v6492_v26  ;;  %v6494_v40 = vpop.f32.mrb[2].mxu1 }
 0x951   : > { %v7926_v53 = vmax.f32 %v7925_v17, %v6494_v40  ;;  %v6496_v16 = vpop.f32.mrb[3].mxu1 }
 0x952   : > { %v8053_v45 = vmax.f32 %v8052_v11, %v6496_v16  ;;  %v7173_v41 = vpop.f32.mrb[4].mxu0 }
 0x953   : > { %v8181_v25 = vmax.f32 %v8180_v13, %v7173_v41  ;;  %v7175_v6 = vpop.f32.mrb[5].mxu0 }
 0x954   : > { %v8308_v2 = vmax.f32 %v8307_v27, %v7175_v6  ;;  %v7177_v38 = vpop.f32.mrb[6].mxu0 }
 0x955   : > { %v8182_v42 = vmax.f32 %v8181_v25, %v7177_v38  ;;  %v7179_v36 = vpop.f32.mrb[7].mxu0 }
 0x956   : > { %v8309_v5 = vmax.f32 %v8308_v2, %v7179_v36  ;;  %v6500_v9 = vpop.f32.mrb[4].mxu1 }
 0x957   : > { %v7927_v10 = vmax.f32 %v7926_v53, %v6500_v9  ;;  %v6502_v29 = vpop.f32.mrb[5].mxu1 }
 0x958   : > { %v8054_v44 = vmax.f32 %v8053_v45, %v6502_v29  ;;  %v6504_v20 = vpop.f32.mrb[6].mxu1 }
 0x959   : > { %v7928_v43 = vmax.f32 %v7927_v10, %v6504_v20  ;;  %v6506_v18 = vpop.f32.mrb[7].mxu1 }
 0x95a   : > { %v8055_v39 = vmax.f32 %v8054_v44, %v6506_v18  ;;  %v7183_v31 = vpop.f32.mrb[8].mxu0 }
 0x95b   : > { %v8183_v58 = vmax.f32 %v8182_v42, %v7183_v31  ;;  %v7185_v28 = vpop.f32.mrb[9].mxu0 }
 0x95c   : > { %v8310_v50 = vmax.f32 %v8309_v5, %v7185_v28  ;;  %v7187_v1 = vpop.f32.mrb[10].mxu0 }
 0x95d   : > { %v8184_v56 = vmax.f32 %v8183_v58, %v7187_v1  ;;  %v7189_v15 = vpop.f32.mrb[11].mxu0 }
 0x95e   : > { %v8311_v52 = vmax.f32 %v8310_v50, %v7189_v15  ;;  %v6510_v47 = vpop.f32.mrb[8].mxu1 }
 0x95f   : > { %v7929_v23 = vmax.f32 %v7928_v43, %v6510_v47  ;;  %v6512_v4 = vpop.f32.mrb[9].mxu1 }
 0x960   : > { %v8056_v24 = vmax.f32 %v8055_v39, %v6512_v4  ;;  %v6514_v7 = vpop.f32.mrb[10].mxu1 }
 0x961   : > { %v7930_v8 = vmax.f32 %v7929_v23, %v6514_v7  ;;  %v6516_v61 = vpop.f32.mrb[11].mxu1 }
 0x962   : > { %v8057_v54 = vmax.f32 %v8056_v24, %v6516_v61  ;;  %v7193_v37 = vpop.f32.mrb[12].mxu0 }
 0x963   : > { %v8185_v33 = vmax.f32 %v8184_v56, %v7193_v37  ;;  %v7195_v19 = vpop.f32.mrb[13].mxu0 }
 0x964   : > { %v8312_v55 = vmax.f32 %v8311_v52, %v7195_v19  ;;  %v7197_v62 = vpop.f32.mrb[14].mxu0 }
 0x965   : > { %v8186_v30 = vmax.f32 %v8185_v33, %v7197_v62  ;;  %v7199_v21 = vpop.f32.mrb[15].mxu0 }
 0x966   : > { %v8313_v59 = vmax.f32 %v8312_v55, %v7199_v21  ;;  %v6520_v48 = vpop.f32.mrb[12].mxu1 }
 0x967   : > { %v7931_v22 = vmax.f32 %v7930_v8, %v6520_v48  ;;  %v6522_v0 = vpop.f32.mrb[13].mxu1 }
 0x968   : > { %v8058_v51 = vmax.f32 %v8057_v54, %v6522_v0  ;;  %v6524_v34 = vpop.f32.mrb[14].mxu1 }
 0x969   : > { %v7932_v63 = vmax.f32 %v7931_v22, %v6524_v34  ;;  %v6526_v35 = vpop.f32.mrb[15].mxu1 }
 0x96a   : > { %v8059_v46 = vmax.f32 %v8058_v51, %v6526_v35  ;;  %v7203_v32 = vpop.f32.mrb[16].mxu0 }
 0x96b   : > { %v8187_v14 = vmax.f32 %v8186_v30, %v7203_v32  ;;  %v7205_v60 = vpop.f32.mrb[17].mxu0 }
 0x96c   : > { %v8314_v49 = vmax.f32 %v8313_v59, %v7205_v60  ;;  %v7207_v57 = vpop.f32.mrb[18].mxu0 }
 0x96d   : > { %v8188_v13 = vmax.f32 %v8187_v14, %v7207_v57  ;;  %v7209_v3 = vpop.f32.mrb[19].mxu0 }
 0x96e   : > { %v8315_v27 = vmax.f32 %v8314_v49, %v7209_v3  ;;  %v6530_v12 = vpop.f32.mrb[16].mxu1 }
 0x96f   : > { %v7933_v17 = vmax.f32 %v7932_v63, %v6530_v12  ;;  %v6532_v26 = vpop.f32.mrb[17].mxu1 }
 0x970   : > { %v8060_v11 = vmax.f32 %v8059_v46, %v6532_v26  ;;  %v6534_v40 = vpop.f32.mrb[18].mxu1 }
 0x971   : > { %v7934_v53 = vmax.f32 %v7933_v17, %v6534_v40  ;;  %v6536_v16 = vpop.f32.mrb[19].mxu1 }
 0x972   : > { %v8061_v45 = vmax.f32 %v8060_v11, %v6536_v16  ;;  %v7213_v41 = vpop.f32.mrb[20].mxu0 }
 0x973   : > { %v8189_v25 = vmax.f32 %v8188_v13, %v7213_v41  ;;  %v7215_v6 = vpop.f32.mrb[21].mxu0 }
 0x974   : > { %v8316_v2 = vmax.f32 %v8315_v27, %v7215_v6  ;;  %v7217_v38 = vpop.f32.mrb[22].mxu0 }
 0x975   : > { %v8190_v42 = vmax.f32 %v8189_v25, %v7217_v38  ;;  %v7219_v36 = vpop.f32.mrb[23].mxu0 }
 0x976   : > { %v8317_v5 = vmax.f32 %v8316_v2, %v7219_v36  ;;  %v6540_v9 = vpop.f32.mrb[20].mxu1 }
 0x977   : > { %v7935_v10 = vmax.f32 %v7934_v53, %v6540_v9  ;;  %v6542_v29 = vpop.f32.mrb[21].mxu1 }
 0x978   : > { %v8062_v44 = vmax.f32 %v8061_v45, %v6542_v29  ;;  %v6544_v20 = vpop.f32.mrb[22].mxu1 }
 0x979   : > { %v7936_v43 = vmax.f32 %v7935_v10, %v6544_v20  ;;  %v6546_v18 = vpop.f32.mrb[23].mxu1 }
 0x97a   : > { %v8063_v39 = vmax.f32 %v8062_v44, %v6546_v18  ;;  %v7223_v31 = vpop.f32.mrb[24].mxu0 }
 0x97b   : > { %v8191_v58 = vmax.f32 %v8190_v42, %v7223_v31  ;;  %v7225_v28 = vpop.f32.mrb[25].mxu0 }
 0x97c   : > { %v8318_v50 = vmax.f32 %v8317_v5, %v7225_v28  ;;  %v7227_v1 = vpop.f32.mrb[26].mxu0 }
 0x97d   : > { %v8192_v56 = vmax.f32 %v8191_v58, %v7227_v1  ;;  %v7229_v15 = vpop.f32.mrb[27].mxu0 }
 0x97e   : > { %v8319_v52 = vmax.f32 %v8318_v50, %v7229_v15  ;;  %v6550_v47 = vpop.f32.mrb[24].mxu1 }
 0x97f   : > { %v7937_v23 = vmax.f32 %v7936_v43, %v6550_v47  ;;  %v6552_v4 = vpop.f32.mrb[25].mxu1 }
 0x980   : > { %v8064_v24 = vmax.f32 %v8063_v39, %v6552_v4  ;;  %v6554_v7 = vpop.f32.mrb[26].mxu1 }
 0x981   : > { %v7938_v8 = vmax.f32 %v7937_v23, %v6554_v7  ;;  %v6556_v61 = vpop.f32.mrb[27].mxu1 }
 0x982   : > { %v8065_v54 = vmax.f32 %v8064_v24, %v6556_v61  ;;  %v7233_v37 = vpop.f32.mrb[28].mxu0 }
 0x983   : > { %v8193_v33 = vmax.f32 %v8192_v56, %v7233_v37  ;;  %v7235_v19 = vpop.f32.mrb[29].mxu0 }
 0x984   : > { %v8320_v55 = vmax.f32 %v8319_v52, %v7235_v19  ;;  %v7237_v62 = vpop.f32.mrb[30].mxu0 }
 0x985   : > { %v8194_v30 = vmax.f32 %v8193_v33, %v7237_v62  ;;  %v7239_v21 = vpop.f32.mrb[31].mxu0 }
 0x986   : > { %v8321_v59 = vmax.f32 %v8320_v55, %v7239_v21  ;;  %v6560_v48 = vpop.f32.mrb[28].mxu1 }
 0x987   : > { %v7939_v22 = vmax.f32 %v7938_v8, %v6560_v48  ;;  %v6562_v0 = vpop.f32.mrb[29].mxu1 }
 0x988   : > { %v8066_v51 = vmax.f32 %v8065_v54, %v6562_v0  ;;  %v6564_v34 = vpop.f32.mrb[30].mxu1 }
 0x989   : > { %v7940_v63 = vmax.f32 %v7939_v22, %v6564_v34  ;;  %v6566_v35 = vpop.f32.mrb[31].mxu1 }
 0x98a   : > { %v8067_v46 = vmax.f32 %v8066_v51, %v6566_v35  ;;  %v7243_v32 = vpop.f32.mrb[32].mxu0 }
 0x98b   : > { %v8195_v14 = vmax.f32 %v8194_v30, %v7243_v32  ;;  %v7245_v60 = vpop.f32.mrb[33].mxu0 }
 0x98c   : > { %v8322_v49 = vmax.f32 %v8321_v59, %v7245_v60  ;;  %v7247_v57 = vpop.f32.mrb[34].mxu0 }
 0x98d   : > { %v8196_v13 = vmax.f32 %v8195_v14, %v7247_v57  ;;  %v7249_v3 = vpop.f32.mrb[35].mxu0 }
 0x98e   : > { %v8323_v27 = vmax.f32 %v8322_v49, %v7249_v3  ;;  %v6570_v12 = vpop.f32.mrb[32].mxu1 }
 0x98f   : > { %v7941_v17 = vmax.f32 %v7940_v63, %v6570_v12  ;;  %v6572_v26 = vpop.f32.mrb[33].mxu1 }
 0x990   : > { %v8068_v11 = vmax.f32 %v8067_v46, %v6572_v26  ;;  %v6574_v40 = vpop.f32.mrb[34].mxu1 }
 0x991   : > { %v7942_v53 = vmax.f32 %v7941_v17, %v6574_v40  ;;  %v6576_v16 = vpop.f32.mrb[35].mxu1 }
 0x992   : > { %v8069_v45 = vmax.f32 %v8068_v11, %v6576_v16  ;;  %v7253_v41 = vpop.f32.mrb[36].mxu0 }
 0x993   : > { %v8197_v25 = vmax.f32 %v8196_v13, %v7253_v41  ;;  %v7255_v6 = vpop.f32.mrb[37].mxu0 }
 0x994   : > { %v8324_v2 = vmax.f32 %v8323_v27, %v7255_v6  ;;  %v7257_v38 = vpop.f32.mrb[38].mxu0 }
 0x995   : > { %v8198_v42 = vmax.f32 %v8197_v25, %v7257_v38  ;;  %v7259_v36 = vpop.f32.mrb[39].mxu0 }
 0x996   : > { %v8325_v5 = vmax.f32 %v8324_v2, %v7259_v36  ;;  %v6580_v9 = vpop.f32.mrb[36].mxu1 }
 0x997   : > { %v7943_v10 = vmax.f32 %v7942_v53, %v6580_v9  ;;  %v6582_v29 = vpop.f32.mrb[37].mxu1 }
 0x998   : > { %v8070_v44 = vmax.f32 %v8069_v45, %v6582_v29  ;;  %v6584_v20 = vpop.f32.mrb[38].mxu1 }
 0x999   : > { %v7944_v43 = vmax.f32 %v7943_v10, %v6584_v20  ;;  %v6586_v18 = vpop.f32.mrb[39].mxu1 }
 0x99a   : > { %v8071_v39 = vmax.f32 %v8070_v44, %v6586_v18  ;;  %v7263_v31 = vpop.f32.mrb[40].mxu0 }
 0x99b   : > { %v8199_v58 = vmax.f32 %v8198_v42, %v7263_v31  ;;  %v7265_v28 = vpop.f32.mrb[41].mxu0 }
 0x99c   : > { %v8326_v50 = vmax.f32 %v8325_v5, %v7265_v28  ;;  %v7267_v1 = vpop.f32.mrb[42].mxu0 }
 0x99d   : > { %v8200_v56 = vmax.f32 %v8199_v58, %v7267_v1  ;;  %v7269_v15 = vpop.f32.mrb[43].mxu0 }
 0x99e   : > { %v8327_v52 = vmax.f32 %v8326_v50, %v7269_v15  ;;  %v6590_v47 = vpop.f32.mrb[40].mxu1 }
 0x99f   : > { %v7945_v23 = vmax.f32 %v7944_v43, %v6590_v47  ;;  %v6592_v4 = vpop.f32.mrb[41].mxu1 }
 0x9a0   : > { %v8072_v24 = vmax.f32 %v8071_v39, %v6592_v4  ;;  %v6594_v7 = vpop.f32.mrb[42].mxu1 }
 0x9a1   : > { %v7946_v8 = vmax.f32 %v7945_v23, %v6594_v7  ;;  %v6596_v61 = vpop.f32.mrb[43].mxu1 }
 0x9a2   : > { %v8073_v54 = vmax.f32 %v8072_v24, %v6596_v61  ;;  %v7273_v37 = vpop.f32.mrb[44].mxu0 }
 0x9a3   : > { %v8201_v33 = vmax.f32 %v8200_v56, %v7273_v37  ;;  %v7275_v19 = vpop.f32.mrb[45].mxu0 }
 0x9a4   : > { %v8328_v55 = vmax.f32 %v8327_v52, %v7275_v19  ;;  %v7277_v62 = vpop.f32.mrb[46].mxu0 }
 0x9a5   : > { %v8202_v30 = vmax.f32 %v8201_v33, %v7277_v62  ;;  %v7279_v21 = vpop.f32.mrb[47].mxu0 }
 0x9a6   : > { %v8329_v59 = vmax.f32 %v8328_v55, %v7279_v21  ;;  %v6600_v48 = vpop.f32.mrb[44].mxu1 }
 0x9a7   : > { %v7947_v22 = vmax.f32 %v7946_v8, %v6600_v48  ;;  %v6602_v0 = vpop.f32.mrb[45].mxu1  ;;  %v8345_v48 = vld [vmem:[#allocation2 + $0x38] sm:$0xff] }
 0x9a8   : > { %v8074_v51 = vmax.f32 %v8073_v54, %v6602_v0  ;;  %v6604_v34 = vpop.f32.mrb[46].mxu1 }
 0x9a9   : > { %v7948_v63 = vmax.f32 %v7947_v22, %v6604_v34  ;;  %v6606_v35 = vpop.f32.mrb[47].mxu1 }
 0x9aa   : > { %v8075_v46 = vmax.f32 %v8074_v51, %v6606_v35  ;;  %v7283_v32 = vpop.f32.mrb[48].mxu0 }
 0x9ab   : > { %v8203_v14 = vmax.f32 %v8202_v30, %v7283_v32  ;;  %v7285_v60 = vpop.f32.mrb[49].mxu0  ;;  %v8344_v30 = vld [vmem:[#allocation2 + $0x30] sm:$0xff] }
 0x9ac   : > { %v8330_v49 = vmax.f32 %v8329_v59, %v7285_v60  ;;  %v7287_v57 = vpop.f32.mrb[50].mxu0 }
 0x9ad   : > { %v8204_v13 = vmax.f32 %v8203_v14, %v7287_v57  ;;  %v7289_v3 = vpop.f32.mrb[51].mxu0  ;;  %v8342_v14 = vld [vmem:[#allocation2 + $0x20] sm:$0xff]  ;;  %v8343_v57 = vld [vmem:[#allocation2 + $0x28] sm:$0xff] }
 0x9ae   : > { %v8331_v27 = vmax.f32 %v8330_v49, %v7289_v3  ;;  %v6610_v12 = vpop.f32.mrb[48].mxu1 }
 0x9af   : > { %v7949_v17 = vmax.f32 %v7948_v63, %v6610_v12  ;;  %v6612_v26 = vpop.f32.mrb[49].mxu1  ;;  %v12111_v12 = vld [vmem:[%s16953_s7 + $0x4] ss:$16 sps:$4 sm:$0xff] (!%p11242_p8)  }
 0x9b0   : > { %v8076_v11 = vmax.f32 %v8075_v46, %v6612_v26  ;;  %v6614_v40 = vpop.f32.mrb[50].mxu1  ;;  %10046 = vmatprep.subr.bf16.mxu1 (!%p11242_p8), %v12111_v12  ;;  %v12115_v26 = vld [vmem:[%s16953_s7] ss:$16 sps:$4 sm:$0xff] (!%p11242_p8)  }
 0x9b1   : > { %v7950_v53 = vmax.f32 %v7949_v17, %v6614_v40  ;;  %v6616_v16 = vpop.f32.mrb[51].mxu1  ;;  %v12113_v17 = vld [vmem:[%s16953_s7 + $0x204] ss:$16 sps:$4 sm:$0xff] (!%p11242_p8)   ;;  %10047 = vmatpush1.bf16.msra.mxu1 (!%p11242_p8), %v12115_v26 }
 0x9b2   : > { %v8077_v45 = vmax.f32 %v8076_v11, %v6616_v16  ;;  %v7293_v41 = vpop.f32.mrb[52].mxu0  ;;  %v12116_v11 = vld [vmem:[%s16953_s7 + $0x200] ss:$16 sps:$4 sm:$0xff] (!%p11242_p8)   ;;  %10087 = vmatprep.subr.bf16.mxu0 (!%p11242_p8), %v12113_v17  ;;  %v12117_v40 = vld [vmem:[%s16953_s7 + $0x24] ss:$16 sps:$4 sm:$0xff] (!%p11242_p8)  }
 0x9b3   : > { %v8205_v25 = vmax.f32 %v8204_v13, %v7293_v41  ;;  %v7295_v6 = vpop.f32.mrb[53].mxu0  ;;  %10088 = vmatpush1.bf16.msra.mxu0 (!%p11242_p8), %v12116_v11  ;;  %v12121_v16 = vld [vmem:[%s16953_s7 + $0x20] ss:$16 sps:$4 sm:$0xff] (!%p11242_p8)   ;;  %10048 = vmatprep.subr.bf16.mxu1 (!%p11242_p8), %v12117_v40  ;;  %v12123_v41 = vld [vmem:[%s16953_s7 + $0x44] ss:$16 sps:$4 sm:$0xff] (!%p11242_p8)  }
 0x9b4   : > { %v8332_v2 = vmax.f32 %v8331_v27, %v7295_v6  ;;  %v7297_v38 = vpop.f32.mrb[54].mxu0  ;;  %v12127_v6 = vld [vmem:[%s16953_s7 + $0x40] ss:$16 sps:$4 sm:$0xff] (!%p11242_p8)  }
 0x9b5   : > { %v8206_v42 = vmax.f32 %v8205_v25, %v7297_v38  ;;  %v7299_v36 = vpop.f32.mrb[55].mxu0  ;;  %v12125_v25 = vld [vmem:[%s16953_s7 + $0x244] ss:$16 sps:$4 sm:$0xff] (!%p11242_p8)   ;;  %10049 = vmatpush1.bf16.msra.mxu1 (!%p11242_p8), %v12121_v16 }
 0x9b6   : > { %v8333_v5 = vmax.f32 %v8332_v2, %v7299_v36  ;;  %v6620_v9 = vpop.f32.mrb[52].mxu1  ;;  %v12128_v2 = vld [vmem:[%s16953_s7 + $0x240] ss:$16 sps:$4 sm:$0xff] (!%p11242_p8)   ;;  %v12129_v38 = vld [vmem:[%s16953_s7 + $0x64] ss:$16 sps:$4 sm:$0xff] (!%p11242_p8)   ;;  %10050 = vmatprep.subr.bf16.mxu1 (!%p11242_p8), %v12123_v41 }
 0x9b7   : > { %v7951_v10 = vmax.f32 %v7950_v53, %v6620_v9  ;;  %v6622_v29 = vpop.f32.mrb[53].mxu1  ;;  %v12119_v53 = vld [vmem:[%s16953_s7 + $0x224] ss:$16 sps:$4 sm:$0xff] (!%p11242_p8)   ;;  %v12133_v36 = vld [vmem:[%s16953_s7 + $0x60] ss:$16 sps:$4 sm:$0xff] (!%p11242_p8)  }
 0x9b8   : > { %v8078_v44 = vmax.f32 %v8077_v45, %v6622_v29  ;;  %v6624_v20 = vpop.f32.mrb[54].mxu1  ;;  %v12122_v45 = vld [vmem:[%s16953_s7 + $0x220] ss:$16 sps:$4 sm:$0xff] (!%p11242_p8)   ;;  %10089 = vmatprep.subr.bf16.mxu0 (!%p11242_p8), %v12119_v53  ;;  %v12135_v9 = vld [vmem:[%s16953_s7 + $0x84] ss:$16 sps:$4 sm:$0xff] (!%p11242_p8)  }
 0x9b9   : > { %v7952_v43 = vmax.f32 %v7951_v10, %v6624_v20  ;;  %v6626_v18 = vpop.f32.mrb[55].mxu1  ;;  %10090 = vmatpush1.bf16.msra.mxu0 (!%p11242_p8), %v12122_v45  ;;  %10051 = vmatpush1.bf16.msra.mxu1 (!%p11242_p8), %v12127_v6  ;;  %v12137_v10 = vld [vmem:[%s16953_s7 + $0x284] ss:$16 sps:$4 sm:$0xff] (!%p11242_p8)   ;;  %v12139_v29 = vld [vmem:[%s16953_s7 + $0x80] ss:$16 sps:$4 sm:$0xff] (!%p11242_p8)  }
 0x9ba   : > { %v8079_v39 = vmax.f32 %v8078_v44, %v6626_v18  ;;  %v7303_v31 = vpop.f32.mrb[56].mxu0  ;;  %10091 = vmatprep.subr.bf16.mxu0 (!%p11242_p8), %v12125_v25  ;;  %10052 = vmatprep.subr.bf16.mxu1 (!%p11242_p8), %v12129_v38  ;;  %v12140_v44 = vld [vmem:[%s16953_s7 + $0x280] ss:$16 sps:$4 sm:$0xff] (!%p11242_p8)   ;;  %v12141_v20 = vld [vmem:[%s16953_s7 + $0xa4] ss:$16 sps:$4 sm:$0xff] (!%p11242_p8)  }
 0x9bb   : > { %v8207_v58 = vmax.f32 %v8206_v42, %v7303_v31  ;;  %v7305_v28 = vpop.f32.mrb[57].mxu0  ;;  %v12131_v42 = vld [vmem:[%s16953_s7 + $0x264] ss:$16 sps:$4 sm:$0xff] (!%p11242_p8)   ;;  %v12145_v18 = vld [vmem:[%s16953_s7 + $0xa0] ss:$16 sps:$4 sm:$0xff] (!%p11242_p8)  }
 0x9bc   : > { %v8334_v50 = vmax.f32 %v8333_v5, %v7305_v28  ;;  %v7307_v1 = vpop.f32.mrb[58].mxu0  ;;  %v12134_v5 = vld [vmem:[%s16953_s7 + $0x260] ss:$16 sps:$4 sm:$0xff] (!%p11242_p8)   ;;  %v12147_v31 = vld [vmem:[%s16953_s7 + $0xc4] ss:$16 sps:$4 sm:$0xff] (!%p11242_p8)  }
 0x9bd   : > { %v8208_v56 = vmax.f32 %v8207_v58, %v7307_v1  ;;  %v7309_v15 = vpop.f32.mrb[59].mxu0  ;;  %10092 = vmatpush1.bf16.msra.mxu0 (!%p11242_p8), %v12128_v2  ;;  %10053 = vmatpush1.bf16.msra.mxu1 (!%p11242_p8), %v12133_v36  ;;  %v12149_v58 = vld [vmem:[%s16953_s7 + $0x2c4] ss:$16 sps:$4 sm:$0xff] (!%p11242_p8)   ;;  %v12151_v28 = vld [vmem:[%s16953_s7 + $0xc0] ss:$16 sps:$4 sm:$0xff] (!%p11242_p8)  }
 0x9be   : > { %v8335_v52 = vmax.f32 %v8334_v50, %v7309_v15  ;;  %v6630_v47 = vpop.f32.mrb[56].mxu1  ;;  %10093 = vmatprep.subr.bf16.mxu0 (!%p11242_p8), %v12131_v42  ;;  %10054 = vmatprep.subr.bf16.mxu1 (!%p11242_p8), %v12135_v9  ;;  %v12152_v50 = vld [vmem:[%s16953_s7 + $0x2c0] ss:$16 sps:$4 sm:$0xff] (!%p11242_p8)   ;;  %v12153_v1 = vld [vmem:[%s16953_s7 + $0xe4] ss:$16 sps:$4 sm:$0xff] (!%p11242_p8)  }
 0x9bf   : > { %v7953_v23 = vmax.f32 %v7952_v43, %v6630_v47  ;;  %v6632_v4 = vpop.f32.mrb[57].mxu1  ;;  %v12143_v43 = vld [vmem:[%s16953_s7 + $0x2a4] ss:$16 sps:$4 sm:$0xff] (!%p11242_p8)   ;;  %v12157_v15 = vld [vmem:[%s16953_s7 + $0xe0] ss:$16 sps:$4 sm:$0xff] (!%p11242_p8)  }
 0x9c0   : > { %v8080_v24 = vmax.f32 %v8079_v39, %v6632_v4  ;;  %v6634_v7 = vpop.f32.mrb[58].mxu1  ;;  %v12146_v39 = vld [vmem:[%s16953_s7 + $0x2a0] ss:$16 sps:$4 sm:$0xff] (!%p11242_p8)   ;;  %v12159_v47 = vld [vmem:[%s16953_s7 + $0x104] ss:$16 sps:$4 sm:$0xff] (!%p11242_p8)  }
 0x9c1   : > { %v7954_v8 = vmax.f32 %v7953_v23, %v6634_v7  ;;  %v6636_v61 = vpop.f32.mrb[59].mxu1  ;;  %10094 = vmatpush1.bf16.msra.mxu0 (!%p11242_p8), %v12134_v5  ;;  %10055 = vmatpush1.bf16.msra.mxu1 (!%p11242_p8), %v12139_v29  ;;  %v12161_v23 = vld [vmem:[%s16953_s7 + $0x304] ss:$16 sps:$4 sm:$0xff] (!%p11242_p8)   ;;  %v12163_v4 = vld [vmem:[%s16953_s7 + $0x100] ss:$16 sps:$4 sm:$0xff] (!%p11242_p8)   ;;  %v17387_v29 = vld [vmem:[#allocation5_spill] sm:$0xff] (!%p11242_p8) }
 0x9c2   : > { %v8081_v54 = vmax.f32 %v8080_v24, %v6636_v61  ;;  %v7313_v37 = vpop.f32.mrb[60].mxu0  ;;  %10095 = vmatprep.subr.bf16.mxu0 (!%p11242_p8), %v12137_v10  ;;  %10056 = vmatprep.subr.bf16.mxu1 (!%p11242_p8), %v12141_v20  ;;  %v12164_v24 = vld [vmem:[%s16953_s7 + $0x300] ss:$16 sps:$4 sm:$0xff] (!%p11242_p8)   ;;  %v12165_v7 = vld [vmem:[%s16953_s7 + $0x124] ss:$16 sps:$4 sm:$0xff] (!%p11242_p8)  }
 0x9c3   : > { %v8209_v33 = vmax.f32 %v8208_v56, %v7313_v37  ;;  %v7315_v19 = vpop.f32.mrb[61].mxu0  ;;  %v12155_v56 = vld [vmem:[%s16953_s7 + $0x2e4] ss:$16 sps:$4 sm:$0xff] (!%p11242_p8)   ;;  %v12169_v61 = vld [vmem:[%s16953_s7 + $0x120] ss:$16 sps:$4 sm:$0xff] (!%p11242_p8)  }
 0x9c4   : > { %v8336_v55 = vmax.f32 %v8335_v52, %v7315_v19  ;;  %v7317_v62 = vpop.f32.mrb[62].mxu0  ;;  %v12158_v52 = vld [vmem:[%s16953_s7 + $0x2e0] ss:$16 sps:$4 sm:$0xff] (!%p11242_p8)   ;;  %v12171_v37 = vld [vmem:[%s16953_s7 + $0x144] ss:$16 sps:$4 sm:$0xff] (!%p11242_p8)  }
 0x9c5   : > { %v8210_v21 = vmax.f32 %v8209_v33, %v7317_v62  ;;  %v7319_v59 = vpop.f32.mrb[63].mxu0  ;;  %10096 = vmatpush1.bf16.msra.mxu0 (!%p11242_p8), %v12140_v44  ;;  %10057 = vmatpush1.bf16.msra.mxu1 (!%p11242_p8), %v12145_v18  ;;  %v12173_v33 = vld [vmem:[%s16953_s7 + $0x344] ss:$16 sps:$4 sm:$0xff] (!%p11242_p8)   ;;  %v12175_v19 = vld [vmem:[%s16953_s7 + $0x140] ss:$16 sps:$4 sm:$0xff] (!%p11242_p8)  }
 0x9c6   : > { %v8337_v22 = vmax.f32 %v8336_v55, %v7319_v59  ;;  %v6640_v0 = vpop.f32.mrb[60].mxu1  ;;  %10097 = vmatprep.subr.bf16.mxu0 (!%p11242_p8), %v12143_v43  ;;  %10058 = vmatprep.subr.bf16.mxu1 (!%p11242_p8), %v12147_v31  ;;  %v12176_v55 = vld [vmem:[%s16953_s7 + $0x340] ss:$16 sps:$4 sm:$0xff] (!%p11242_p8)   ;;  %v12177_v62 = vld [vmem:[%s16953_s7 + $0x164] ss:$16 sps:$4 sm:$0xff] (!%p11242_p8)   ;;  %v8367_v59 = vld [vmem:[#allocation2 + $0x8] sm:$0xff] (!%p11242_p8) }
 0x9c7   : > { %v8352_v51 = vmax.f32 %v8344_v30, %v8210_v21  ;;  %v7955_v34 = vmax.f32 %v7954_v8, %v6640_v0  ;;  %v6642_v63 = vpop.f32.mrb[61].mxu1  ;;  %v12167_v8 = vld [vmem:[%s16953_s7 + $0x324] ss:$16 sps:$4 sm:$0xff] (!%p11242_p8)   ;;  %v12181_v21 = vld [vmem:[%s16953_s7 + $0x160] ss:$16 sps:$4 sm:$0xff] (!%p11242_p8)  }
 0x9c8   : > { %v8353_v35 = vmax.f32 %v8345_v48, %v8337_v22  ;;  %v8082_v46 = vmax.f32 %v8081_v54, %v6642_v63  ;;  %v6644_v32 = vpop.f32.mrb[62].mxu1  ;;  %8365 = sbr.rel (%p11242_p8) target bundleno = 3460 (0xd84), region = 84  ;;  %v12170_v54 = vld [vmem:[%s16953_s7 + $0x320] ss:$16 sps:$4 sm:$0xff] (!%p11242_p8)   ;;  %v12179_v30 = vld [vmem:[%s16953_s7 + $0x364] ss:$16 sps:$4 sm:$0xff] (!%p11242_p8)  }
 0x9c9   : > { %8360 = vst [vmem:[#allocation2 + $0x30] sm:$0xff] %v8352_v51  ;;  %v7956_v60 = vmax.f32 %v7955_v34, %v6644_v32  ;;  %v6646_v49 = vpop.f32.mrb[63].mxu1  ;;  %10098 = vmatpush1.bf16.msra.mxu0 (!%p11242_p8), %v12146_v39  ;;  %10059 = vmatpush1.bf16.msra.mxu1 (!%p11242_p8), %v12151_v28  ;;  %v12182_v48 = vld [vmem:[%s16953_s7 + $0x360] ss:$16 sps:$4 sm:$0xff] (!%p11242_p8)   ;;  %v8380_v22 = vrot.slane (!%p11242_p8), %v8367_v59, 4  ;;  %v8369_v51 = vld [vmem:[#allocation2 + $0x18] sm:$0xff] (!%p11242_p8) }
 0x9ca   : > { %8361 = vst [vmem:[#allocation2 + $0x38] sm:$0xff] %v8353_v35  ;;  %v8083_v13 = vmax.f32 %v8082_v46, %v6646_v49  ;;  %10099 = vmatprep.subr.bf16.mxu0 (!%p11242_p8), %v12149_v58  ;;  %10060 = vmatprep.subr.bf16.mxu1 (!%p11242_p8), %v12153_v1  ;;  %v8366_v0 = vld [vmem:[#allocation2] sm:$0xff] (!%p11242_p8)  ;;  %v8392_v35 = vrot.slane (!%p11242_p8), %v8369_v51, 4  ;;  %v17386_v42 = vld [vmem:[#allocation6_spill] sm:$0xff] (!%p11242_p8) }
 0x9cb   : > { %v8350_v3 = vmax.f32 %v8342_v14, %v7956_v60  ;;  %v12183_v34 = vld [vmem:[%s16953_s7 + $0x184] ss:$16 sps:$4 sm:$0xff] (!%p11242_p8)   ;;  %v8374_v63 = vrot.slane (!%p11242_p8), %v8366_v0, 4  ;;  %v8381_v32 = vmax.f32 (!%p11242_p8), %v8367_v59, %v8380_v22  ;;  %v12187_v14 = vld [vmem:[%s16953_s7 + $0x180] ss:$16 sps:$4 sm:$0xff] (!%p11242_p8)  }
 0x9cc   : > { %v8351_v27 = vmax.f32 %v8343_v57, %v8083_v13  ;;  %v12185_v46 = vld [vmem:[%s16953_s7 + $0x384] ss:$16 sps:$4 sm:$0xff] (!%p11242_p8)   ;;  %v8393_v49 = vmax.f32 (!%p11242_p8), %v8369_v51, %v8392_v35  ;;  %v12188_v13 = vld [vmem:[%s16953_s7 + $0x380] ss:$16 sps:$4 sm:$0xff] (!%p11242_p8)  }
 0x9cd   : > { %8358 = vst [vmem:[#allocation2 + $0x20] sm:$0xff] %v8350_v3  ;;  %10100 = vmatpush1.bf16.msra.mxu0 (!%p11242_p8), %v12152_v50  ;;  %10061 = vmatpush1.bf16.msra.mxu1 (!%p11242_p8), %v12157_v15  ;;  %v8375_v60 = vmax.f32 (!%p11242_p8), %v8366_v0, %v8374_v63  ;;  %v8368_v57 = vld [vmem:[#allocation2 + $0x10] sm:$0xff] (!%p11242_p8)  ;;  %v8382_v3 = vrot.slane (!%p11242_p8), %v8381_v32, 2  ;;  %v15999_v12 = vld [vmem:[%s16952_s6] sm:$0xff] (!%p11242_p8)  ;;  %v12210_v63 = vld [vmem:[%s16953_s7 + $0x8] ss:$16 sps:$4 sm:$0xff] (!%p11242_p8)  }
 0x9ce   : > { %8359 = vst [vmem:[#allocation2 + $0x28] sm:$0xff] %v8351_v27  ;;  %10101 = vmatprep.subr.bf16.mxu0 (!%p11242_p8), %v12155_v56  ;;  %10062 = vmatprep.subr.bf16.mxu1 (!%p11242_p8), %v12159_v47  ;;  %v8386_v27 = vrot.slane (!%p11242_p8), %v8368_v57, 4  ;;  %v8394_v26 = vrot.slane (!%p11242_p8), %v8393_v49, 2  ;;  %v17385_v11 = vld [vmem:[#allocation4_spill] sm:$0xff] (!%p11242_p8)  ;;  %v8431_v36 = vrot.slane (!%p11242_p8), %v15999_v12, %v17386_v42  ;;  %v8427_v44 = vrot.slane (!%p11242_p8), %v15999_v12, %v17387_v29 }
 0x9cf   : > { %v8376_v17 = vrot.slane %v8375_v60, 2  ;;  %v8438_v40 = vsub.s32 3, %v17385_v11  ;;  %v12189_v53 = vld [vmem:[%s16953_s7 + $0x1a4] ss:$16 sps:$4 sm:$0xff]   ;;  %v8383_v45 = vmax.f32 %v8381_v32, %v8382_v3  ;;  %v12193_v2 = vld [vmem:[%s16953_s7 + $0x1a0] ss:$16 sps:$4 sm:$0xff]  }
 0x9d0   : > { %v12191_v16 = vld [vmem:[%s16953_s7 + $0x3a4] ss:$16 sps:$4 sm:$0xff]   ;;  %v8387_v41 = vmax.f32 %v8368_v57, %v8386_v27  ;;  %v8395_v6 = vmax.f32 %v8393_v49, %v8394_v26  ;;  %v12194_v9 = vld [vmem:[%s16953_s7 + $0x3a0] ss:$16 sps:$4 sm:$0xff]   ;;  %v12224_v49 = vld [vmem:[%s16953_s7 + $0x4c] ss:$16 sps:$4 sm:$0xff]  }
 0x9d1   : > { %10102 = vmatpush1.bf16.msra.mxu0 %v12158_v52  ;;  %10063 = vmatpush1.bf16.msra.mxu1 %v12163_v4  ;;  %v8377_v25 = vmax.f32 %v8375_v60, %v8376_v17  ;;  %v8384_v38 = vrot.slane %v8383_v45, 1  ;;  %v8439_v43 = vrot.slane %v15999_v12, %v8438_v40  ;;  %v12195_v18 = vld [vmem:[%s16953_s7 + $0x1c4] ss:$16 sps:$4 sm:$0xff]   ;;  %v12199_v1 = vld [vmem:[%s16953_s7 + $0x1c0] ss:$16 sps:$4 sm:$0xff]   ;;  %v17388_v52 = vld [vmem:[#allocation7_spill] sm:$0xff] }
 0x9d2   : > { %10103 = vmatprep.subr.bf16.mxu0 %v12161_v23  ;;  %10064 = vmatprep.subr.bf16.mxu1 %v12165_v7  ;;  %v8388_v5 = vrot.slane %v8387_v41, 2  ;;  %v8396_v20 = vrot.slane %v8395_v6, 1  ;;  %v12197_v39 = vld [vmem:[%s16953_s7 + $0x3c4] ss:$16 sps:$4 sm:$0xff]   ;;  %v8435_v47 = vrot.slane %v15999_v12, %v17388_v52  ;;  %v12200_v23 = vld [vmem:[%s16953_s7 + $0x3c0] ss:$16 sps:$4 sm:$0xff]  }
 0x9d3   : > { %v8378_v10 = vrot.slane %v8377_v25, 1  ;;  %v8385_v31 = vmax.f32 %v8383_v45, %v8384_v38  ;;  %v12201_v7 = vld [vmem:[%s16953_s7 + $0x1e4] ss:$16 sps:$4 sm:$0xff]   ;;  %v12207_v51 = vld [vmem:[%s16953_s7 + $0x400] ss:$16 sps:$4 sm:$0xff]  }
 0x9d4   : > { %v8389_v58 = vmax.f32 %v8387_v41, %v8388_v5  ;;  %v8397_v50 = vmax.f32 %v8395_v6, %v8396_v20  ;;  %v12209_v59 = vld [vmem:[%s16953_s7 + $0x404] ss:$16 sps:$4 sm:$0xff]   ;;  %v12213_v32 = vld [vmem:[%s16953_s7 + $0x420] ss:$16 sps:$4 sm:$0xff]   ;;  %v12230_v27 = vld [vmem:[%s16953_s7 + $0x6c] ss:$16 sps:$4 sm:$0xff]  }
 0x9d5   : > { %10104 = vmatpush1.bf16.msra.mxu0 %v12164_v24  ;;  %10065 = vmatpush1.bf16.msra.mxu1 %v12169_v61  ;;  %v8379_v28 = vmax.f32 %v8377_v25, %v8378_v10  ;;  %v8465_v56 = vadd.f32 %v8431_v36, %v8385_v31  ;;  %v12215_v35 = vld [vmem:[%s16953_s7 + $0x424] ss:$16 sps:$4 sm:$0xff]   ;;  %v12219_v57 = vld [vmem:[%s16953_s7 + $0x440] ss:$16 sps:$4 sm:$0xff]   ;;  %v12228_v26 = vld [vmem:[%s16953_s7 + $0x68] ss:$16 sps:$4 sm:$0xff]  }
 0x9d6   : > { %10105 = vmatprep.subr.bf16.mxu0 %v12167_v8  ;;  %10066 = vmatprep.subr.bf16.mxu1 %v12171_v37  ;;  %v8390_v15 = vrot.slane %v8389_v58, 1  ;;  %v8467_v24 = vadd.f32 %v8439_v43, %v8397_v50  ;;  %v12203_v8 = vld [vmem:[%s16953_s7 + $0x3e4] ss:$16 sps:$4 sm:$0xff]   ;;  %v12225_v17 = vld [vmem:[%s16953_s7 + $0x460] ss:$16 sps:$4 sm:$0xff]  }
 0x9d7   : > { %v8464_v4 = vadd.f32 %v8427_v44, %v8379_v28  ;;  %v8473_v61 = vmax.f32 %v8465_v56, 0.0  ;;  %v12221_v60 = vld [vmem:[%s16953_s7 + $0x444] ss:$16 sps:$4 sm:$0xff]   ;;  %v12231_v45 = vld [vmem:[%s16953_s7 + $0x480] ss:$16 sps:$4 sm:$0xff]  }
 0x9d8   : > { %v8475_v37 = vmax.f32 %v8467_v24, 0.0  ;;  %v12227_v3 = vld [vmem:[%s16953_s7 + $0x464] ss:$16 sps:$4 sm:$0xff]   ;;  %v12234_v41 = vld [vmem:[%s16953_s7 + $0x88] ss:$16 sps:$4 sm:$0xff]  }
 0x9d9   : > { %10106 = vmatpush1.bf16.msra.mxu0 %v12170_v54  ;;  %10067 = vmatpush1.bf16.msra.mxu1 %v12175_v19  ;;  %v8391_v54 = vmax.f32 %v8389_v58, %v8390_v15  ;;  %v8481_v19 = vpack.c.bf16 %v8473_v61, %v8473_v61  ;;  %v12239_v25 = vld [vmem:[%s16953_s7 + $0x4a4] ss:$16 sps:$4 sm:$0xff]   ;;  %v12242_v6 = vld [vmem:[%s16953_s7 + $0xac] ss:$16 sps:$4 sm:$0xff]   ;;  %v12240_v38 = vld [vmem:[%s16953_s7 + $0xa8] ss:$16 sps:$4 sm:$0xff]  }
 0x9da   : > { %10107 = vmatprep.subr.bf16.mxu0 %v12173_v33  ;;  %10068 = vmatprep.subr.bf16.mxu1 %v12177_v62  ;;  %v12205_v33 = vld [vmem:[%s16953_s7 + $0x1e0] ss:$16 sps:$4 sm:$0xff]   ;;  %v12245_v36 = vld [vmem:[%s16953_s7 + $0x4c4] ss:$16 sps:$4 sm:$0xff]   ;;  %v12248_v5 = vld [vmem:[%s16953_s7 + $0xcc] ss:$16 sps:$4 sm:$0xff]  }
 0x9db   : > { %v8466_v62 = vadd.f32 %v8435_v47, %v8391_v54  ;;  %10078 = vmatprep.mubr.bf16.mxu1 %v8481_v19  ;;  %v12243_v10 = vld [vmem:[%s16953_s7 + $0x4c0] ss:$16 sps:$4 sm:$0xff]   ;;  %v12246_v44 = vld [vmem:[%s16953_s7 + $0xc8] ss:$16 sps:$4 sm:$0xff]   ;;  %v12251_v43 = vld [vmem:[%s16953_s7 + $0x4e4] ss:$16 sps:$4 sm:$0xff]  }
 0x9dc   : > { %v12249_v31 = vld [vmem:[%s16953_s7 + $0x4e0] ss:$16 sps:$4 sm:$0xff]   ;;  %v12252_v58 = vld [vmem:[%s16953_s7 + $0xe8] ss:$16 sps:$4 sm:$0xff]   ;;  %v12257_v28 = vld [vmem:[%s16953_s7 + $0x504] ss:$16 sps:$4 sm:$0xff]  }
 0x9dd   : > { %10108 = vmatpush1.bf16.msra.mxu0 %v12176_v55  ;;  %10069 = vmatpush1.bf16.msra.mxu1 %v12181_v21  ;;  %v8472_v55 = vmax.f32 %v8464_v4, 0.0  ;;  %v16047_v21 = vpack.c.bf16 %v8475_v37, %v8475_v37  ;;  %v8474_v22 = vmax.f32 %v8466_v62, 0.0  ;;  %v8370_v56 = vld [vmem:[#allocation2 + $0x20] sm:$0xff]  ;;  %v12260_v15 = vld [vmem:[%s16953_s7 + $0x10c] ss:$16 sps:$4 sm:$0xff]  }
 0x9de   : > { %10109 = vmatprep.subr.bf16.mxu0 %v12179_v30  ;;  %10070 = vmatprep.subr.bf16.mxu1 %v12183_v34  ;;  %v12206_v30 = vld [vmem:[%s16953_s7 + $0x3e0] ss:$16 sps:$4 sm:$0xff]   ;;  %v8398_v4 = vrot.slane %v8370_v56, 4  ;;  %v12258_v24 = vld [vmem:[%s16953_s7 + $0x108] ss:$16 sps:$4 sm:$0xff]  }
 0x9df   : > { %10119 = vmatprep.mubr.bf16.mxu0 %v16047_v21  ;;  %v16056_v0 = vpack.c.bf16 %v8472_v55, %v8472_v55  ;;  %v16061_v34 = vpack.c.bf16 %v8474_v22, %v8474_v22  ;;  %v12266_v54 = vld [vmem:[%s16953_s7 + $0x12c] ss:$16 sps:$4 sm:$0xff]   ;;  %v12264_v55 = vld [vmem:[%s16953_s7 + $0x128] ss:$16 sps:$4 sm:$0xff]   ;;  %v12269_v62 = vld [vmem:[%s16953_s7 + $0x544] ss:$16 sps:$4 sm:$0xff]  }
 0x9e0   : > { %v12267_v22 = vld [vmem:[%s16953_s7 + $0x540] ss:$16 sps:$4 sm:$0xff]  }
 0x9e1   : > { %10110 = vmatpush1.bf16.msra.mxu0 %v12182_v48  ;;  %10071 = vmatpush1.bf16.msra.mxu1 %v12187_v14  ;;  %v12212_v48 = vld [vmem:[%s16953_s7 + $0xc] ss:$16 sps:$4 sm:$0xff]   ;;  %v12216_v14 = vld [vmem:[%s16953_s7 + $0x28] ss:$16 sps:$4 sm:$0xff]  }
 0x9e2   : > { %10111 = vmatprep.subr.bf16.mxu0 %v12185_v46  ;;  %10072 = vmatprep.subr.bf16.mxu1 %v12189_v53  ;;  %v12218_v46 = vld [vmem:[%s16953_s7 + $0x2c] ss:$16 sps:$4 sm:$0xff]   ;;  %v12233_v53 = vld [vmem:[%s16953_s7 + $0x484] ss:$16 sps:$4 sm:$0xff]  }
 0x9e5   : > { %10112 = vmatpush1.bf16.msra.mxu0 %v12188_v13  ;;  %10073 = vmatpush1.bf16.msra.mxu1 %v12193_v2  ;;  %v12222_v13 = vld [vmem:[%s16953_s7 + $0x48] ss:$16 sps:$4 sm:$0xff]   ;;  %v12237_v2 = vld [vmem:[%s16953_s7 + $0x4a0] ss:$16 sps:$4 sm:$0xff]  }
 0x9e6   : > { %10113 = vmatprep.subr.bf16.mxu0 %v12191_v16  ;;  %10074 = vmatprep.subr.bf16.mxu1 %v12195_v18  ;;  %v12236_v16 = vld [vmem:[%s16953_s7 + $0x8c] ss:$16 sps:$4 sm:$0xff]  }
 0x9e7   : > { %v12254_v18 = vld [vmem:[%s16953_s7 + $0xec] ss:$16 sps:$4 sm:$0xff]  }
 0x9e9   : > { %10114 = vmatpush1.bf16.msra.mxu0 %v12194_v9  ;;  %10075 = vmatpush1.bf16.msra.mxu1 %v12199_v1  ;;  %v8371_v9 = vld [vmem:[#allocation2 + $0x28] sm:$0xff]  ;;  %v8446_v1 = vsub.s32 5, %v17385_v11 }
 0x9ea   : > { %10115 = vmatprep.subr.bf16.mxu0 %v12197_v39  ;;  %10076 = vmatprep.subr.bf16.mxu1 %v12201_v7  ;;  %v8404_v20 = vrot.slane %v8371_v9, 4  ;;  %v12263_v7 = vld [vmem:[%s16953_s7 + $0x524] ss:$16 sps:$4 sm:$0xff]  }
 0x9eb   : > { %v8447_v61 = vrot.slane %v15999_v12, %v8446_v1  ;;  %v12311_v1 = vld [vmem:[%s16953_s7 + $0x624] ss:$16 sps:$4 sm:$0xff]  }
 0x9ec   : > { %v8405_v39 = vmax.f32 %v8371_v9, %v8404_v20  ;;  %v12294_v9 = vld [vmem:[%s16953_s7 + $0x1c8] ss:$16 sps:$4 sm:$0xff]   ;;  %v12297_v20 = vld [vmem:[%s16953_s7 + $0x5e0] ss:$16 sps:$4 sm:$0xff]  }
 0x9ed   : > { %10116 = vmatpush1.bf16.msra.mxu0 %v12200_v23  ;;  %10077 = vmatpush1.bf16.msra.mxu1 %v12205_v33  ;;  %v12255_v23 = vld [vmem:[%s16953_s7 + $0x500] ss:$16 sps:$4 sm:$0xff]  }
 0x9ee   : > { %10117 = vmatprep.subr.bf16.mxu0 %v12203_v8  ;;  %10210 = vmatprep.subr.bf16.mxu1 %v12212_v48  ;;  %v8406_v50 = vrot.slane %v8405_v39, 2  ;;  %v12261_v33 = vld [vmem:[%s16953_s7 + $0x520] ss:$16 sps:$4 sm:$0xff]  }
 0x9f0   : > { %10079 = vmatmul.mubr.bf16.vlgmr.msra.gmra.mrb[0].mxu1 %v16056_v0  ;;  %v8407_v47 = vmax.f32 %v8405_v39, %v8406_v50  ;;  %v12305_v39 = vld [vmem:[%s16953_s7 + $0x604] ss:$16 sps:$4 sm:$0xff]   ;;  %v12306_v50 = vld [vmem:[%s16953_s7 + $0x208] ss:$16 sps:$4 sm:$0xff]  }
 0x9f1   : > { %10118 = vmatpush1.bf16.msra.mxu0 %v12206_v30  ;;  %10211 = vmatpush1.bf16.msra.mxu1 %v12210_v63  ;;  %v12270_v63 = vld [vmem:[%s16953_s7 + $0x148] ss:$16 sps:$4 sm:$0xff]  }
 0x9f2   : > { %10128 = vmatprep.subr.bf16.mxu0 %v12209_v59  ;;  %10212 = vmatprep.subr.bf16.mxu1 %v12218_v46  ;;  %v8408_v8 = vrot.slane %v8407_v47, 1  ;;  %v12272_v59 = vld [vmem:[%s16953_s7 + $0x14c] ss:$16 sps:$4 sm:$0xff]  }
 0x9f3   : > { %10242 = vmatprep.mubr.bf16.mxu1 %v8481_v19  ;;  %v8399_v19 = vmax.f32 %v8370_v56, %v8398_v4  ;;  %v12314_v56 = vld [vmem:[%s16953_s7 + $0x22c] ss:$16 sps:$4 sm:$0xff]   ;;  %v12312_v4 = vld [vmem:[%s16953_s7 + $0x228] ss:$16 sps:$4 sm:$0xff]  }
 0x9f4   : > { %10120 = vmatmul.mubr.bf16.vlgmr.msra.gmra.mrb[0].mxu0 %v16061_v34  ;;  %v8409_v37 = vmax.f32 %v8407_v47, %v8408_v8  ;;  %v12309_v47 = vld [vmem:[%s16953_s7 + $0x620] ss:$16 sps:$4 sm:$0xff]  }
 0x9f5   : > { %10129 = vmatpush1.bf16.msra.mxu0 %v12207_v51  ;;  %10213 = vmatpush1.bf16.msra.mxu1 %v12216_v14  ;;  %v8400_v51 = vrot.slane %v8399_v19, 2  ;;  %v12273_v14 = vld [vmem:[%s16953_s7 + $0x560] ss:$16 sps:$4 sm:$0xff]  }
 0x9f6   : > { %10130 = vmatprep.subr.bf16.mxu0 %v12215_v35  ;;  %10214 = vmatprep.subr.bf16.mxu1 %v12224_v49  ;;  %v8469_v30 = vadd.f32 %v8447_v61, %v8409_v37  ;;  %v12275_v35 = vld [vmem:[%s16953_s7 + $0x564] ss:$16 sps:$4 sm:$0xff]   ;;  %v12276_v49 = vld [vmem:[%s16953_s7 + $0x168] ss:$16 sps:$4 sm:$0xff]   ;;  %v12315_v8 = vld [vmem:[%s16953_s7 + $0x640] ss:$16 sps:$4 sm:$0xff]  }
 0x9f7   : > { %v12318_v37 = vld [vmem:[%s16953_s7 + $0x248] ss:$16 sps:$4 sm:$0xff]  }
 0x9f8   : > { %v8477_v48 = vmax.f32 %v8469_v30, 0.0 }
 0x9f9   : > { %10131 = vmatpush1.bf16.msra.mxu0 %v12213_v32  ;;  %10215 = vmatpush1.bf16.msra.mxu1 %v12222_v13  ;;  %v12278_v32 = vld [vmem:[%s16953_s7 + $0x16c] ss:$16 sps:$4 sm:$0xff]  }
 0x9fa   : > { %10132 = vmatprep.subr.bf16.mxu0 %v12221_v60  ;;  %10216 = vmatprep.subr.bf16.mxu1 %v12230_v27  ;;  %v16193_v46 = vpack.c.bf16 %v8477_v48, %v8477_v48  ;;  %v8401_v60 = vmax.f32 %v8399_v19, %v8400_v51  ;;  %v12284_v13 = vld [vmem:[%s16953_s7 + $0x18c] ss:$16 sps:$4 sm:$0xff]   ;;  %v12329_v48 = vld [vmem:[%s16953_s7 + $0x684] ss:$16 sps:$4 sm:$0xff]  }
 0x9fc   : > { %10160 = vmatprep.mubr.bf16.mxu0 %v16193_v46  ;;  %v8402_v27 = vrot.slane %v8401_v60, 1 }
 0x9fd   : > { %10133 = vmatpush1.bf16.msra.mxu0 %v12219_v57  ;;  %10217 = vmatpush1.bf16.msra.mxu1 %v12228_v26  ;;  %v12281_v57 = vld [vmem:[%s16953_s7 + $0x584] ss:$16 sps:$4 sm:$0xff]   ;;  %v12282_v26 = vld [vmem:[%s16953_s7 + $0x188] ss:$16 sps:$4 sm:$0xff]  }
 0x9fe   : > { %10134 = vmatprep.subr.bf16.mxu0 %v12227_v3  ;;  %10218 = vmatprep.subr.bf16.mxu1 %v12236_v16  ;;  %v12279_v3 = vld [vmem:[%s16953_s7 + $0x580] ss:$16 sps:$4 sm:$0xff]   ;;  %v12290_v16 = vld [vmem:[%s16953_s7 + $0x1ac] ss:$16 sps:$4 sm:$0xff]  }
 0xa01   : > { %10135 = vmatpush1.bf16.msra.mxu0 %v12225_v17  ;;  %10219 = vmatpush1.bf16.msra.mxu1 %v12234_v41  ;;  %v8442_v17 = vsub.s32 4, %v17385_v11  ;;  %v8403_v41 = vmax.f32 %v8401_v60, %v8402_v27  ;;  %v12344_v27 = vld [vmem:[%s16953_s7 + $0x2cc] ss:$16 sps:$4 sm:$0xff]  }
 0xa02   : > { %10136 = vmatprep.subr.bf16.mxu0 %v12233_v53  ;;  %10220 = vmatprep.subr.bf16.mxu1 %v12242_v6  ;;  %v12287_v53 = vld [vmem:[%s16953_s7 + $0x5a4] ss:$16 sps:$4 sm:$0xff]   ;;  %v12288_v6 = vld [vmem:[%s16953_s7 + $0x1a8] ss:$16 sps:$4 sm:$0xff]  }
 0xa05   : > { %10137 = vmatpush1.bf16.msra.mxu0 %v12231_v45  ;;  %10221 = vmatpush1.bf16.msra.mxu1 %v12240_v38  ;;  %v12285_v45 = vld [vmem:[%s16953_s7 + $0x5a0] ss:$16 sps:$4 sm:$0xff]   ;;  %v12296_v38 = vld [vmem:[%s16953_s7 + $0x1cc] ss:$16 sps:$4 sm:$0xff]  }
 0xa06   : > { %10138 = vmatprep.subr.bf16.mxu0 %v12239_v25  ;;  %10222 = vmatprep.subr.bf16.mxu1 %v12248_v5  ;;  %v8443_v25 = vrot.slane %v15999_v12, %v8442_v17  ;;  %v12339_v17 = vld [vmem:[%s16953_s7 + $0x6c0] ss:$16 sps:$4 sm:$0xff]  }
 0xa08   : > { %v8468_v5 = vadd.f32 %v8443_v25, %v8403_v41  ;;  %v12348_v41 = vld [vmem:[%s16953_s7 + $0x2e8] ss:$16 sps:$4 sm:$0xff]   ;;  %v8372_v25 = vld [vmem:[#allocation2 + $0x30] sm:$0xff] }
 0xa09   : > { %10139 = vmatpush1.bf16.msra.mxu0 %v12237_v2  ;;  %10223 = vmatpush1.bf16.msra.mxu1 %v12246_v44  ;;  %v12293_v2 = vld [vmem:[%s16953_s7 + $0x5c4] ss:$16 sps:$4 sm:$0xff]   ;;  %v12302_v44 = vld [vmem:[%s16953_s7 + $0x1ec] ss:$16 sps:$4 sm:$0xff]  }
 0xa0a   : > { %10140 = vmatprep.subr.bf16.mxu0 %v12245_v36  ;;  %10224 = vmatprep.subr.bf16.mxu1 %v12254_v18  ;;  %v12291_v36 = vld [vmem:[%s16953_s7 + $0x5c0] ss:$16 sps:$4 sm:$0xff]   ;;  %v12300_v18 = vld [vmem:[%s16953_s7 + $0x1e8] ss:$16 sps:$4 sm:$0xff]  }
 0xa0d   : > { %10141 = vmatpush1.bf16.msra.mxu0 %v12243_v10  ;;  %10225 = vmatpush1.bf16.msra.mxu1 %v12252_v58  ;;  %v12299_v10 = vld [vmem:[%s16953_s7 + $0x5e4] ss:$16 sps:$4 sm:$0xff]   ;;  %v12303_v58 = vld [vmem:[%s16953_s7 + $0x600] ss:$16 sps:$4 sm:$0xff]  }
 0xa0e   : > { %10142 = vmatprep.subr.bf16.mxu0 %v12251_v43  ;;  %10226 = vmatprep.subr.bf16.mxu1 %v12260_v15  ;;  %v8476_v43 = vmax.f32 %v8468_v5, 0.0  ;;  %v8373_v15 = vld [vmem:[#allocation2 + $0x38] sm:$0xff] }
 0xa0f   : > { %v12354_v5 = vld [vmem:[%s16953_s7 + $0x308] ss:$16 sps:$4 sm:$0xff]  }
 0xa11   : > { %10143 = vmatpush1.bf16.msra.mxu0 %v12249_v31  ;;  %10227 = vmatpush1.bf16.msra.mxu1 %v12258_v24  ;;  %v12308_v31 = vld [vmem:[%s16953_s7 + $0x20c] ss:$16 sps:$4 sm:$0xff]   ;;  %v12317_v24 = vld [vmem:[%s16953_s7 + $0x644] ss:$16 sps:$4 sm:$0xff]  }
 0xa12   : > { %10144 = vmatprep.subr.bf16.mxu0 %v12257_v28  ;;  %10228 = vmatprep.subr.bf16.mxu1 %v12266_v54  ;;  %v16264_v28 = vpack.c.bf16 %v8476_v43, %v8476_v43  ;;  %v8454_v54 = vsub.s32 7, %v17385_v11  ;;  %v12360_v43 = vld [vmem:[%s16953_s7 + $0x328] ss:$16 sps:$4 sm:$0xff]  }
 0xa14   : > { %v8455_v30 = vrot.slane %v15999_v12, %v8454_v54  ;;  %v12327_v12 = vld [vmem:[%s16953_s7 + $0x680] ss:$16 sps:$4 sm:$0xff]   ;;  %v12383_v54 = vld [vmem:[%s16953_s7 + $0x7a4] ss:$16 sps:$4 sm:$0xff]  }
 0xa15   : > { %10145 = vmatpush1.bf16.msra.mxu0 %v12255_v23  ;;  %10229 = vmatpush1.bf16.msra.mxu1 %v12264_v55  ;;  %v8416_v23 = vrot.slane %v8373_v15, 4  ;;  %v12321_v55 = vld [vmem:[%s16953_s7 + $0x660] ss:$16 sps:$4 sm:$0xff]  }
 0xa16   : > { %10146 = vmatprep.subr.bf16.mxu0 %v12263_v7  ;;  %10230 = vmatprep.subr.bf16.mxu1 %v12272_v59  ;;  %v12324_v59 = vld [vmem:[%s16953_s7 + $0x268] ss:$16 sps:$4 sm:$0xff]  }
 0xa17   : > { %v8417_v7 = vmax.f32 %v8373_v15, %v8416_v23  ;;  %v12369_v15 = vld [vmem:[%s16953_s7 + $0x760] ss:$16 sps:$4 sm:$0xff]  }
 0xa19   : > { %10147 = vmatpush1.bf16.msra.mxu0 %v12261_v33  ;;  %10231 = vmatpush1.bf16.msra.mxu1 %v12270_v63  ;;  %v8418_v61 = vrot.slane %v8417_v7, 2  ;;  %v12323_v33 = vld [vmem:[%s16953_s7 + $0x664] ss:$16 sps:$4 sm:$0xff]  }
 0xa1a   : > { %10148 = vmatprep.subr.bf16.mxu0 %v12269_v62  ;;  %10232 = vmatprep.subr.bf16.mxu1 %v12278_v32  ;;  %v12335_v32 = vld [vmem:[%s16953_s7 + $0x6a4] ss:$16 sps:$4 sm:$0xff]  }
 0xa1b   : > { %v8419_v19 = vmax.f32 %v8417_v7, %v8418_v61  ;;  %v12378_v7 = vld [vmem:[%s16953_s7 + $0x388] ss:$16 sps:$4 sm:$0xff]   ;;  %v8450_v61 = vsub.s32 6, %v17385_v11  ;;  %v12604_v11 = vld [vmem:[%s16957_s11 + $0x30] sm:$0xff]  }
 0xa1d   : > { %10149 = vmatpush1.bf16.msra.mxu0 %v12267_v22  ;;  %10233 = vmatpush1.bf16.msra.mxu1 %v12276_v49  ;;  %v8420_v62 = vrot.slane %v8419_v19, 1  ;;  %v12332_v22 = vld [vmem:[%s16953_s7 + $0x28c] ss:$16 sps:$4 sm:$0xff]  }
 0xa1e   : > { %10150 = vmatprep.subr.bf16.mxu0 %v12275_v35  ;;  %10234 = vmatprep.subr.bf16.mxu1 %v12284_v13  ;;  %v12330_v35 = vld [vmem:[%s16953_s7 + $0x288] ss:$16 sps:$4 sm:$0xff]  }
 0xa1f   : > { %v8421_v51 = vmax.f32 %v8419_v19, %v8420_v62  ;;  %v12336_v13 = vld [vmem:[%s16953_s7 + $0x2a8] ss:$16 sps:$4 sm:$0xff]  }
 0xa21   : > { %10151 = vmatpush1.bf16.msra.mxu0 %v12273_v14  ;;  %10235 = vmatpush1.bf16.msra.mxu1 %v12282_v26  ;;  %v8471_v63 = vadd.f32 %v8455_v30, %v8421_v51  ;;  %v12338_v14 = vld [vmem:[%s16953_s7 + $0x2ac] ss:$16 sps:$4 sm:$0xff]   ;;  %v12342_v26 = vld [vmem:[%s16953_s7 + $0x2c8] ss:$16 sps:$4 sm:$0xff]   ;;  %v12389_v30 = vld [vmem:[%s16953_s7 + $0x7c4] ss:$16 sps:$4 sm:$0xff]  }
 0xa22   : > { %10152 = vmatprep.subr.bf16.mxu0 %v12281_v57  ;;  %10236 = vmatprep.subr.bf16.mxu1 %v12290_v16  ;;  %v12333_v57 = vld [vmem:[%s16953_s7 + $0x6a0] ss:$16 sps:$4 sm:$0xff]   ;;  %v12350_v16 = vld [vmem:[%s16953_s7 + $0x2ec] ss:$16 sps:$4 sm:$0xff]  }
 0xa23   : > { %v8479_v60 = vmax.f32 %v8471_v63, 0.0  ;;  %v12398_v63 = vld [vmem:[%s16953_s7 + $0x3ec] ss:$16 sps:$4 sm:$0xff]  }
 0xa25   : > { %10153 = vmatpush1.bf16.msra.mxu0 %v12279_v3  ;;  %10237 = vmatpush1.bf16.msra.mxu1 %v12288_v6  ;;  %v16328_v49 = vpack.c.bf16 %v8479_v60, %v8479_v60  ;;  %v12341_v3 = vld [vmem:[%s16953_s7 + $0x6c4] ss:$16 sps:$4 sm:$0xff]   ;;  %v12401_v60 = vld [vmem:[%s16953_s7 + $0x40c] ss:$16 sps:$4 sm:$0xff]  }
 0xa26   : > { %10154 = vmatprep.subr.bf16.mxu0 %v12287_v53  ;;  %10238 = vmatprep.subr.bf16.mxu1 %v12296_v38  ;;  %v12347_v53 = vld [vmem:[%s16953_s7 + $0x6e4] ss:$16 sps:$4 sm:$0xff]   ;;  %v12351_v38 = vld [vmem:[%s16953_s7 + $0x700] ss:$16 sps:$4 sm:$0xff]  }
 0xa27   : > { %v12353_v6 = vld [vmem:[%s16953_s7 + $0x704] ss:$16 sps:$4 sm:$0xff]  }
 0xa29   : > { %10155 = vmatpush1.bf16.msra.mxu0 %v12285_v45  ;;  %10239 = vmatpush1.bf16.msra.mxu1 %v12294_v9  ;;  %v12345_v45 = vld [vmem:[%s16953_s7 + $0x6e0] ss:$16 sps:$4 sm:$0xff]   ;;  %v12359_v9 = vld [vmem:[%s16953_s7 + $0x724] ss:$16 sps:$4 sm:$0xff]  }
 0xa2a   : > { %10156 = vmatprep.subr.bf16.mxu0 %v12293_v2  ;;  %10240 = vmatprep.subr.bf16.mxu1 %v12302_v44  ;;  %v12356_v2 = vld [vmem:[%s16953_s7 + $0x30c] ss:$16 sps:$4 sm:$0xff]   ;;  %v12357_v44 = vld [vmem:[%s16953_s7 + $0x720] ss:$16 sps:$4 sm:$0xff]  }
 0xa2d   : > { %10157 = vmatpush1.bf16.msra.mxu0 %v12291_v36  ;;  %10241 = vmatpush1.bf16.msra.mxu1 %v12300_v18  ;;  %v8410_v36 = vrot.slane %v8372_v25, 4  ;;  %v12365_v18 = vld [vmem:[%s16953_s7 + $0x744] ss:$16 sps:$4 sm:$0xff]  }
 0xa2e   : > { %10158 = vmatprep.subr.bf16.mxu0 %v12299_v10  ;;  %10251 = vmatprep.subr.bf16.mxu1 %v12308_v31  ;;  %v12362_v10 = vld [vmem:[%s16953_s7 + $0x32c] ss:$16 sps:$4 sm:$0xff]   ;;  %v12363_v31 = vld [vmem:[%s16953_s7 + $0x740] ss:$16 sps:$4 sm:$0xff]  }
 0xa30   : > { %10243 = vmatmul.mubr.bf16.vlgmr.msra.gmra.mrb[4].mxu1 %v16056_v0  ;;  %v12320_v0 = vld [vmem:[%s16953_s7 + $0x24c] ss:$16 sps:$4 sm:$0xff]  }
 0xa31   : > { %10159 = vmatpush1.bf16.msra.mxu0 %v12297_v20  ;;  %10252 = vmatpush1.bf16.msra.mxu1 %v12306_v50  ;;  %v8411_v20 = vmax.f32 %v8372_v25, %v8410_v36  ;;  %v12501_v25 = vld [vmem:[%s16955_s9 + $0x20] ss:$8 sps:$4 sm:$0xff]   ;;  %v12504_v36 = vld [vmem:[%s16955_s9 + $0x30] ss:$8 sps:$4 sm:$0xff]  }
 0xa32   : > { %10169 = vmatprep.subr.bf16.mxu0 %v12305_v39  ;;  %10253 = vmatprep.subr.bf16.mxu1 %v12314_v56  ;;  %v12368_v39 = vld [vmem:[%s16953_s7 + $0x34c] ss:$16 sps:$4 sm:$0xff]  }
 0xa33   : > { %10283 = vmatprep.mubr.bf16.mxu1 %v16047_v21  ;;  %v12326_v21 = vld [vmem:[%s16953_s7 + $0x26c] ss:$16 sps:$4 sm:$0xff]   ;;  %v8412_v50 = vrot.slane %v8411_v20, 2 }
 0xa34   : > { %10161 = vmatmul.mubr.bf16.vlgmr.msra.gmra.mrb[0].mxu0 %v16264_v28  ;;  %v12374_v56 = vld [vmem:[%s16953_s7 + $0x36c] ss:$16 sps:$4 sm:$0xff]  }
 0xa35   : > { %10170 = vmatpush1.bf16.msra.mxu0 %v12303_v58  ;;  %10254 = vmatpush1.bf16.msra.mxu1 %v12312_v4  ;;  %v12366_v58 = vld [vmem:[%s16953_s7 + $0x348] ss:$16 sps:$4 sm:$0xff]   ;;  %v8413_v23 = vmax.f32 %v8411_v20, %v8412_v50  ;;  %v12377_v4 = vld [vmem:[%s16953_s7 + $0x784] ss:$16 sps:$4 sm:$0xff]   ;;  %v12422_v50 = vld [vmem:[%s16953_s7 + $0x4ec] ss:$16 sps:$4 sm:$0xff]  }
 0xa36   : > { %10171 = vmatprep.subr.bf16.mxu0 %v12311_v1  ;;  %10255 = vmatprep.subr.bf16.mxu1 %v12320_v0  ;;  %v12371_v1 = vld [vmem:[%s16953_s7 + $0x764] ss:$16 sps:$4 sm:$0xff]   ;;  %v12375_v0 = vld [vmem:[%s16953_s7 + $0x780] ss:$16 sps:$4 sm:$0xff]  }
 0xa37   : > { %10201 = vmatprep.mubr.bf16.mxu0 %v16328_v49  ;;  %v12512_v20 = vld [vmem:[%s16955_s9 + $0x54] ss:$8 sps:$4 sm:$0xff]  }
 0xa39   : > { %10172 = vmatpush1.bf16.msra.mxu0 %v12309_v47  ;;  %10256 = vmatpush1.bf16.msra.mxu1 %v12318_v37  ;;  %v12372_v47 = vld [vmem:[%s16953_s7 + $0x368] ss:$16 sps:$4 sm:$0xff]   ;;  %v12386_v37 = vld [vmem:[%s16953_s7 + $0x3ac] ss:$16 sps:$4 sm:$0xff]  }
 0xa3a   : > { %10173 = vmatprep.subr.bf16.mxu0 %v12317_v24  ;;  %10257 = vmatprep.subr.bf16.mxu1 %v12326_v21  ;;  %v12380_v24 = vld [vmem:[%s16953_s7 + $0x38c] ss:$16 sps:$4 sm:$0xff]   ;;  %v12384_v21 = vld [vmem:[%s16953_s7 + $0x3a8] ss:$16 sps:$4 sm:$0xff]  }
 0xa3d   : > { %10174 = vmatpush1.bf16.msra.mxu0 %v12315_v8  ;;  %10258 = vmatpush1.bf16.msra.mxu1 %v12324_v59  ;;  %v8414_v8 = vrot.slane %v8413_v23, 1  ;;  %v12392_v59 = vld [vmem:[%s16953_s7 + $0x3cc] ss:$16 sps:$4 sm:$0xff]  }
 0xa3e   : > { %10175 = vmatprep.subr.bf16.mxu0 %v12323_v33  ;;  %10259 = vmatprep.subr.bf16.mxu1 %v12332_v22  ;;  %v12381_v33 = vld [vmem:[%s16953_s7 + $0x7a0] ss:$16 sps:$4 sm:$0xff]   ;;  %v12390_v22 = vld [vmem:[%s16953_s7 + $0x3c8] ss:$16 sps:$4 sm:$0xff]  }
 0xa3f   : > { %v8415_v19 = vmax.f32 %v8413_v23, %v8414_v8  ;;  %v12516_v23 = vld [vmem:[%s16955_s9 + $0x70] ss:$8 sps:$4 sm:$0xff]   ;;  %v12524_v8 = vld [vmem:[%s16955_s9 + $0x94] ss:$8 sps:$4 sm:$0xff]  }
 0xa41   : > { %10176 = vmatpush1.bf16.msra.mxu0 %v12321_v55  ;;  %10260 = vmatpush1.bf16.msra.mxu1 %v12330_v35  ;;  %v12607_v55 = vld [vmem:[%s16952_s6] sm:$0xff] }
 0xa42   : > { %10177 = vmatprep.subr.bf16.mxu0 %v12329_v48  ;;  %10261 = vmatprep.subr.bf16.mxu1 %v12338_v14  ;;  %v8451_v62 = vrot.slane %v12607_v55, %v8450_v61  ;;  %v12387_v48 = vld [vmem:[%s16953_s7 + $0x7c0] ss:$16 sps:$4 sm:$0xff]   ;;  %v12396_v14 = vld [vmem:[%s16953_s7 + $0x3e8] ss:$16 sps:$4 sm:$0xff]  }
 0xa43   : > { %v12393_v35 = vld [vmem:[%s16953_s7 + $0x7e0] ss:$16 sps:$4 sm:$0xff]   ;;  %v12426_v61 = vld [vmem:[%s16953_s7 + $0x528] ss:$16 sps:$4 sm:$0xff]  }
 0xa44   : > { %v8470_v51 = vadd.f32 %v8451_v62, %v8415_v19  ;;  %v12434_v19 = vld [vmem:[%s16953_s7 + $0x56c] ss:$16 sps:$4 sm:$0xff]   ;;  %v12525_v55 = vld [vmem:[%s16955_s9 + $0xa0] ss:$8 sps:$4 sm:$0xff]  }
 0xa45   : > { %10178 = vmatpush1.bf16.msra.mxu0 %v12327_v12  ;;  %10262 = vmatpush1.bf16.msra.mxu1 %v12336_v13  ;;  %v12395_v12 = vld [vmem:[%s16953_s7 + $0x7e4] ss:$16 sps:$4 sm:$0xff]  }
 0xa46   : > { %10179 = vmatprep.subr.bf16.mxu0 %v12335_v32  ;;  %10263 = vmatprep.subr.bf16.mxu1 %v12344_v27  ;;  %v8478_v32 = vmax.f32 %v8470_v51, 0.0  ;;  %v12495_v27 = vld [vmem:[%s16955_s9] ss:$8 sps:$4 sm:$0xff]   ;;  %v12530_v62 = vld [vmem:[%s16955_s9 + $0xb4] ss:$8 sps:$4 sm:$0xff]  }
 0xa47   : > { %v12435_v51 = vld [vmem:[%s16953_s7 + $0x588] ss:$16 sps:$4 sm:$0xff]  }
 0xa48   : > { %v16467_v13 = vpack.c.bf16 %v8478_v32, %v8478_v32  ;;  %v12438_v32 = vld [vmem:[%s16953_s7 + $0x5a8] ss:$16 sps:$4 sm:$0xff]  }
 0xa49   : > { %10180 = vmatpush1.bf16.msra.mxu0 %v12333_v57  ;;  %10264 = vmatpush1.bf16.msra.mxu1 %v12342_v26  ;;  %v12399_v57 = vld [vmem:[%s16953_s7 + $0x408] ss:$16 sps:$4 sm:$0xff]  }
 0xa4a   : > { %10181 = vmatprep.subr.bf16.mxu0 %v12341_v3  ;;  %10265 = vmatprep.subr.bf16.mxu1 %v12350_v16  ;;  %v12404_v3 = vld [vmem:[%s16953_s7 + $0x42c] ss:$16 sps:$4 sm:$0xff]   ;;  %v12402_v26 = vld [vmem:[%s16953_s7 + $0x428] ss:$16 sps:$4 sm:$0xff]  }
 0xa4b   : > { %v12498_v16 = vld [vmem:[%s16955_s9 + $0x10] ss:$8 sps:$4 sm:$0xff]  }
 0xa4d   : > { %10182 = vmatpush1.bf16.msra.mxu0 %v12339_v17  ;;  %10266 = vmatpush1.bf16.msra.mxu1 %v12348_v41  ;;  %v12497_v17 = vld [vmem:[%s16955_s9 + $0x4] ss:$8 sps:$4 sm:$0xff]  }
 0xa4e   : > { %10183 = vmatprep.subr.bf16.mxu0 %v12347_v53  ;;  %10267 = vmatprep.subr.bf16.mxu1 %v12356_v2  ;;  %v12500_v53 = vld [vmem:[%s16955_s9 + $0x14] ss:$8 sps:$4 sm:$0xff]  }
 0xa4f   : > { %v12410_v41 = vld [vmem:[%s16953_s7 + $0x46c] ss:$16 sps:$4 sm:$0xff]  }
 0xa50   : > { %v12413_v2 = vld [vmem:[%s16953_s7 + $0x48c] ss:$16 sps:$4 sm:$0xff]  }
 0xa51   : > { %10184 = vmatpush1.bf16.msra.mxu0 %v12345_v45  ;;  %10268 = vmatpush1.bf16.msra.mxu1 %v12354_v5  ;;  %v12405_v45 = vld [vmem:[%s16953_s7 + $0x448] ss:$16 sps:$4 sm:$0xff]   ;;  %v12509_v5 = vld [vmem:[%s16955_s9 + $0x44] ss:$8 sps:$4 sm:$0xff]  }
 0xa52   : > { %10185 = vmatprep.subr.bf16.mxu0 %v12353_v6  ;;  %10269 = vmatprep.subr.bf16.mxu1 %v12362_v10  ;;  %v12408_v6 = vld [vmem:[%s16953_s7 + $0x468] ss:$16 sps:$4 sm:$0xff]   ;;  %v12416_v10 = vld [vmem:[%s16953_s7 + $0x4ac] ss:$16 sps:$4 sm:$0xff]  }
 0xa55   : > { %10186 = vmatpush1.bf16.msra.mxu0 %v12351_v38  ;;  %10270 = vmatpush1.bf16.msra.mxu1 %v12360_v43  ;;  %v12506_v38 = vld [vmem:[%s16955_s9 + $0x34] ss:$8 sps:$4 sm:$0xff]   ;;  %v12414_v43 = vld [vmem:[%s16953_s7 + $0x4a8] ss:$16 sps:$4 sm:$0xff]  }
 0xa56   : > { %10187 = vmatprep.subr.bf16.mxu0 %v12359_v9  ;;  %10271 = vmatprep.subr.bf16.mxu1 %v12368_v39  ;;  %v12411_v9 = vld [vmem:[%s16953_s7 + $0x488] ss:$16 sps:$4 sm:$0xff]  }
 0xa57   : > { %v12510_v39 = vld [vmem:[%s16955_s9 + $0x50] ss:$8 sps:$4 sm:$0xff]  }
 0xa59   : > { %10188 = vmatpush1.bf16.msra.mxu0 %v12357_v44  ;;  %10272 = vmatpush1.bf16.msra.mxu1 %v12366_v58  ;;  %v12507_v44 = vld [vmem:[%s16955_s9 + $0x40] ss:$8 sps:$4 sm:$0xff]  }
 0xa5a   : > { %10189 = vmatprep.subr.bf16.mxu0 %v12365_v18  ;;  %10273 = vmatprep.subr.bf16.mxu1 %v12374_v56  ;;  %v12419_v18 = vld [vmem:[%s16953_s7 + $0x4cc] ss:$16 sps:$4 sm:$0xff]   ;;  %v12417_v58 = vld [vmem:[%s16953_s7 + $0x4c8] ss:$16 sps:$4 sm:$0xff]  }
 0xa5b   : > { %v12518_v56 = vld [vmem:[%s16955_s9 + $0x74] ss:$8 sps:$4 sm:$0xff]  }
 0xa5d   : > { %10190 = vmatpush1.bf16.msra.mxu0 %v12363_v31  ;;  %10274 = vmatpush1.bf16.msra.mxu1 %v12372_v47  ;;  %v12515_v31 = vld [vmem:[%s16955_s9 + $0x64] ss:$8 sps:$4 sm:$0xff]  }
 0xa5e   : > { %10191 = vmatprep.subr.bf16.mxu0 %v12371_v1  ;;  %10275 = vmatprep.subr.bf16.mxu1 %v12380_v24  ;;  %v12513_v1 = vld [vmem:[%s16955_s9 + $0x60] ss:$8 sps:$4 sm:$0xff]   ;;  %v12425_v47 = vld [vmem:[%s16953_s7 + $0x50c] ss:$16 sps:$4 sm:$0xff]  }
 0xa5f   : > { %v12423_v24 = vld [vmem:[%s16953_s7 + $0x508] ss:$16 sps:$4 sm:$0xff]  }
 0xa61   : > { %10192 = vmatpush1.bf16.msra.mxu0 %v12369_v15  ;;  %10276 = vmatpush1.bf16.msra.mxu1 %v12378_v7  ;;  %v12420_v15 = vld [vmem:[%s16953_s7 + $0x4e8] ss:$16 sps:$4 sm:$0xff]  }
 0xa62   : > { %10193 = vmatprep.subr.bf16.mxu0 %v12377_v4  ;;  %10277 = vmatprep.subr.bf16.mxu1 %v12386_v37  ;;  %v12521_v4 = vld [vmem:[%s16955_s9 + $0x84] ss:$8 sps:$4 sm:$0xff]   ;;  %v12519_v7 = vld [vmem:[%s16955_s9 + $0x80] ss:$8 sps:$4 sm:$0xff]   ;;  %v12522_v37 = vld [vmem:[%s16955_s9 + $0x90] ss:$8 sps:$4 sm:$0xff]  }
 0xa65   : > { %10194 = vmatpush1.bf16.msra.mxu0 %v12375_v0  ;;  %10278 = vmatpush1.bf16.msra.mxu1 %v12384_v21  ;;  %v12428_v0 = vld [vmem:[%s16953_s7 + $0x52c] ss:$16 sps:$4 sm:$0xff]   ;;  %v12429_v21 = vld [vmem:[%s16953_s7 + $0x548] ss:$16 sps:$4 sm:$0xff]  }
 0xa66   : > { %10195 = vmatprep.subr.bf16.mxu0 %v12383_v54  ;;  %10279 = vmatprep.subr.bf16.mxu1 %v12392_v59  ;;  %v12431_v54 = vld [vmem:[%s16953_s7 + $0x54c] ss:$16 sps:$4 sm:$0xff]  }
 0xa67   : > { %v12437_v59 = vld [vmem:[%s16953_s7 + $0x58c] ss:$16 sps:$4 sm:$0xff]  }
 0xa69   : > { %10196 = vmatpush1.bf16.msra.mxu0 %v12381_v33  ;;  %10280 = vmatpush1.bf16.msra.mxu1 %v12390_v22  ;;  %v12527_v33 = vld [vmem:[%s16955_s9 + $0xa4] ss:$8 sps:$4 sm:$0xff]  }
 0xa6a   : > { %10197 = vmatprep.subr.bf16.mxu0 %v12389_v30  ;;  %10281 = vmatprep.subr.bf16.mxu1 %v12398_v63  ;;  %v12432_v30 = vld [vmem:[%s16953_s7 + $0x568] ss:$16 sps:$4 sm:$0xff]   ;;  %v12533_v22 = vld [vmem:[%s16955_s9 + $0xc4] ss:$8 sps:$4 sm:$0xff]  }
 0xa6b   : > { %v12531_v63 = vld [vmem:[%s16955_s9 + $0xc0] ss:$8 sps:$4 sm:$0xff]  }
 0xa6d   : > { %10198 = vmatpush1.bf16.msra.mxu0 %v12387_v48  ;;  %10282 = vmatpush1.bf16.msra.mxu1 %v12396_v14  ;;  %v12528_v48 = vld [vmem:[%s16955_s9 + $0xb0] ss:$8 sps:$4 sm:$0xff]   ;;  %v12443_v14 = vld [vmem:[%s16953_s7 + $0x5cc] ss:$16 sps:$4 sm:$0xff]  }
 0xa6e   : > { %10199 = vmatprep.subr.bf16.mxu0 %v12395_v12  ;;  %10292 = vmatprep.subr.bf16.mxu1 %v12401_v60  ;;  %v12440_v12 = vld [vmem:[%s16953_s7 + $0x5ac] ss:$16 sps:$4 sm:$0xff]   ;;  %v12534_v60 = vld [vmem:[%s16955_s9 + $0xd0] ss:$8 sps:$4 sm:$0xff]  }
 0xa70   : > { %10284 = vmatmul.mubr.bf16.vlgmr.msra.gmra.mrb[4].mxu1 %v16061_v34  ;;  %v12407_v34 = vld [vmem:[%s16953_s7 + $0x44c] ss:$16 sps:$4 sm:$0xff]  }
 0xa71   : > { %10200 = vmatpush1.bf16.msra.mxu0 %v12393_v35  ;;  %10293 = vmatpush1.bf16.msra.mxu1 %v12399_v57  ;;  %v12536_v35 = vld [vmem:[%s16955_s9 + $0xd4] ss:$8 sps:$4 sm:$0xff]   ;;  %v12441_v57 = vld [vmem:[%s16953_s7 + $0x5c8] ss:$16 sps:$4 sm:$0xff]  }
 0xa72   : > { %10324 = vmatprep.mubr.bf16.mxu1 %v16193_v46  ;;  %10294 = vmatprep.subr.bf16.mxu1 %v12404_v3  ;;  %v12503_v46 = vld [vmem:[%s16955_s9 + $0x24] ss:$8 sps:$4 sm:$0xff]  }
 0xa73   : > { %10778 = vmatprep.subr.bf16.mxu0 %v12497_v17  ;;  %v12446_v3 = vld [vmem:[%s16953_s7 + $0x5ec] ss:$16 sps:$4 sm:$0xff]  }
 0xa74   : > { %10202 = vmatmul.mubr.bf16.vlgmr.msra.gmra.mrb[0].mxu0 %v16467_v13  ;;  %v12449_v17 = vld [vmem:[%s16953_s7 + $0x60c] ss:$16 sps:$4 sm:$0xff]  }
 0xa75   : > { %10779 = vmatpush1.bf16.msra.mxu0 %v12495_v27  ;;  %10295 = vmatpush1.bf16.msra.mxu1 %v12402_v26  ;;  %v12444_v27 = vld [vmem:[%s16953_s7 + $0x5e8] ss:$16 sps:$4 sm:$0xff]  }
 0xa76   : > { %10780 = vmatprep.subr.bf16.mxu0 %v12500_v53  ;;  %10296 = vmatprep.subr.bf16.mxu1 %v12407_v34  ;;  %v12447_v26 = vld [vmem:[%s16953_s7 + $0x608] ss:$16 sps:$4 sm:$0xff]   ;;  %v12452_v53 = vld [vmem:[%s16953_s7 + $0x62c] ss:$16 sps:$4 sm:$0xff]  }
 0xa77   : > { %v12450_v34 = vld [vmem:[%s16953_s7 + $0x628] ss:$16 sps:$4 sm:$0xff]  }
 0xa79   : > { %10781 = vmatpush1.bf16.msra.mxu0 %v12498_v16  ;;  %10297 = vmatpush1.bf16.msra.mxu1 %v12405_v45  ;;  %v12455_v16 = vld [vmem:[%s16953_s7 + $0x64c] ss:$16 sps:$4 sm:$0xff]  }
 0xa7a   : > { %10782 = vmatprep.subr.bf16.mxu0 %v12503_v46  ;;  %10298 = vmatprep.subr.bf16.mxu1 %v12410_v41  ;;  %v12453_v46 = vld [vmem:[%s16953_s7 + $0x648] ss:$16 sps:$4 sm:$0xff]   ;;  %v12461_v45 = vld [vmem:[%s16953_s7 + $0x68c] ss:$16 sps:$4 sm:$0xff]  }
 0xa7b   : > { %v12459_v41 = vld [vmem:[%s16953_s7 + $0x688] ss:$16 sps:$4 sm:$0xff]  }
 0xa7d   : > { %10783 = vmatpush1.bf16.msra.mxu0 %v12501_v25  ;;  %10299 = vmatpush1.bf16.msra.mxu1 %v12408_v6  ;;  %v12464_v25 = vld [vmem:[%s16953_s7 + $0x6ac] ss:$16 sps:$4 sm:$0xff]   ;;  %v12462_v6 = vld [vmem:[%s16953_s7 + $0x6a8] ss:$16 sps:$4 sm:$0xff]  }
 0xa7e   : > { %10784 = vmatprep.subr.bf16.mxu0 %v12506_v38  ;;  %10300 = vmatprep.subr.bf16.mxu1 %v12413_v2  ;;  %v12467_v2 = vld [vmem:[%s16953_s7 + $0x6cc] ss:$16 sps:$4 sm:$0xff]  }
 0xa7f   : > { %v12539_v38 = vld [vmem:[%s16955_s9 + $0xe4] ss:$8 sps:$4 sm:$0xff]  }
 0xa81   : > { %10785 = vmatpush1.bf16.msra.mxu0 %v12504_v36  ;;  %10301 = vmatpush1.bf16.msra.mxu1 %v12411_v9 }
 0xa82   : > { %10786 = vmatprep.subr.bf16.mxu0 %v12509_v5  ;;  %10302 = vmatprep.subr.bf16.mxu1 %v12416_v10  ;;  %v12537_v5 = vld [vmem:[%s16955_s9 + $0xe0] ss:$8 sps:$4 sm:$0xff]  }
 0xa85   : > { %10787 = vmatpush1.bf16.msra.mxu0 %v12507_v44  ;;  %10303 = vmatpush1.bf16.msra.mxu1 %v12414_v43  ;;  %v12465_v44 = vld [vmem:[%s16953_s7 + $0x6c8] ss:$16 sps:$4 sm:$0xff]   ;;  %v12470_v43 = vld [vmem:[%s16953_s7 + $0x6ec] ss:$16 sps:$4 sm:$0xff]  }
 0xa86   : > { %10788 = vmatprep.subr.bf16.mxu0 %v12512_v20  ;;  %10304 = vmatprep.subr.bf16.mxu1 %v12419_v18  ;;  %v12542_v18 = vld [vmem:[%s16955_s9 + $0xf4] ss:$8 sps:$4 sm:$0xff]  }
 0xa89   : > { %10789 = vmatpush1.bf16.msra.mxu0 %v12510_v39  ;;  %10305 = vmatpush1.bf16.msra.mxu1 %v12417_v58  ;;  %v12540_v39 = vld [vmem:[%s16955_s9 + $0xf0] ss:$8 sps:$4 sm:$0xff]   ;;  %v12473_v58 = vld [vmem:[%s16953_s7 + $0x70c] ss:$16 sps:$4 sm:$0xff]  }
 0xa8a   : > { %10790 = vmatprep.subr.bf16.mxu0 %v12515_v31  ;;  %10306 = vmatprep.subr.bf16.mxu1 %v12422_v50  ;;  %v12468_v31 = vld [vmem:[%s16953_s7 + $0x6e8] ss:$16 sps:$4 sm:$0xff]   ;;  %v12545_v50 = vld [vmem:[%s16955_s9 + $0x104] ss:$8 sps:$4 sm:$0xff]  }
 0xa8d   : > { %10791 = vmatpush1.bf16.msra.mxu0 %v12513_v1  ;;  %10307 = vmatpush1.bf16.msra.mxu1 %v12420_v15  ;;  %v12471_v1 = vld [vmem:[%s16953_s7 + $0x708] ss:$16 sps:$4 sm:$0xff]  }
 0xa8e   : > { %10792 = vmatprep.subr.bf16.mxu0 %v12518_v56  ;;  %10308 = vmatprep.subr.bf16.mxu1 %v12425_v47  ;;  %v12476_v56 = vld [vmem:[%s16953_s7 + $0x72c] ss:$16 sps:$4 sm:$0xff]   ;;  %v12474_v15 = vld [vmem:[%s16953_s7 + $0x728] ss:$16 sps:$4 sm:$0xff]  }
 0xa8f   : > { %v12479_v47 = vld [vmem:[%s16953_s7 + $0x74c] ss:$16 sps:$4 sm:$0xff]  }
 0xa91   : > { %10793 = vmatpush1.bf16.msra.mxu0 %v12516_v23  ;;  %10309 = vmatpush1.bf16.msra.mxu1 %v12423_v24  ;;  %v12477_v23 = vld [vmem:[%s16953_s7 + $0x748] ss:$16 sps:$4 sm:$0xff]  }
 0xa92   : > { %10794 = vmatprep.subr.bf16.mxu0 %v12521_v4  ;;  %10310 = vmatprep.subr.bf16.mxu1 %v12428_v0  ;;  %v12482_v4 = vld [vmem:[%s16953_s7 + $0x76c] ss:$16 sps:$4 sm:$0xff]   ;;  %v12480_v24 = vld [vmem:[%s16953_s7 + $0x768] ss:$16 sps:$4 sm:$0xff]  }
 0xa93   : > { %v12485_v0 = vld [vmem:[%s16953_s7 + $0x78c] ss:$16 sps:$4 sm:$0xff]  }
 0xa95   : > { %10795 = vmatpush1.bf16.msra.mxu0 %v12519_v7  ;;  %10311 = vmatpush1.bf16.msra.mxu1 %v12426_v61  ;;  %v12483_v7 = vld [vmem:[%s16953_s7 + $0x788] ss:$16 sps:$4 sm:$0xff]  }
 0xa96   : > { %10796 = vmatprep.subr.bf16.mxu0 %v12524_v8  ;;  %10312 = vmatprep.subr.bf16.mxu1 %v12431_v54  ;;  %v12488_v8 = vld [vmem:[%s16953_s7 + $0x7ac] ss:$16 sps:$4 sm:$0xff]   ;;  %v12486_v61 = vld [vmem:[%s16953_s7 + $0x7a8] ss:$16 sps:$4 sm:$0xff]  }
 0xa97   : > { %v12491_v54 = vld [vmem:[%s16953_s7 + $0x7cc] ss:$16 sps:$4 sm:$0xff]  }
 0xa99   : > { %10797 = vmatpush1.bf16.msra.mxu0 %v12522_v37  ;;  %10313 = vmatpush1.bf16.msra.mxu1 %v12429_v21  ;;  %v12489_v37 = vld [vmem:[%s16953_s7 + $0x7c8] ss:$16 sps:$4 sm:$0xff]  }
 0xa9a   : > { %10798 = vmatprep.subr.bf16.mxu0 %v12527_v33  ;;  %10314 = vmatprep.subr.bf16.mxu1 %v12434_v19  ;;  %v12494_v33 = vld [vmem:[%s16953_s7 + $0x7ec] ss:$16 sps:$4 sm:$0xff]   ;;  %v12492_v21 = vld [vmem:[%s16953_s7 + $0x7e8] ss:$16 sps:$4 sm:$0xff]   ;;  %v16763_v19 = vld [vmem:[%s16954_s8] sm:$0xf] }
 0xa9d   : > { %10799 = vmatpush1.bf16.msra.mxu0 %v12525_v55  ;;  %10315 = vmatpush1.bf16.msra.mxu1 %v12432_v30  ;;  %v10029_v55 = vrot.slane %v16763_v19, %v17387_v29 }
 0xa9e   : > { %10800 = vmatprep.subr.bf16.mxu0 %v12530_v62  ;;  %10316 = vmatprep.subr.bf16.mxu1 %v12437_v59  ;;  %v10033_v62 = vrot.slane %v16763_v19, %v17386_v42 }
 0xaa1   : > { %10801 = vmatpush1.bf16.msra.mxu0 %v12528_v48  ;;  %10317 = vmatpush1.bf16.msra.mxu1 %v12435_v51 }
 0xaa2   : > { %10802 = vmatprep.subr.bf16.mxu0 %v12533_v22  ;;  %10318 = vmatprep.subr.bf16.mxu1 %v12440_v12 }
 0xaa5   : > { %10803 = vmatpush1.bf16.msra.mxu0 %v12531_v63  ;;  %10319 = vmatpush1.bf16.msra.mxu1 %v12438_v32 }
 0xaa6   : > { %10804 = vmatprep.subr.bf16.mxu0 %v12536_v35  ;;  %10320 = vmatprep.subr.bf16.mxu1 %v12443_v14 }
 0xaa9   : > { %10805 = vmatpush1.bf16.msra.mxu0 %v12534_v60  ;;  %10321 = vmatpush1.bf16.msra.mxu1 %v12441_v57  ;;  %v12543_v60 = vld [vmem:[%s16955_s9 + $0x100] ss:$8 sps:$4 sm:$0xff]  }
 0xaaa   : > { %10322 = vmatprep.subr.bf16.mxu1 %v12446_v3  ;;  %10806 = vmatprep.subr.bf16.mxu0 %v12539_v38  ;;  %v12548_v3 = vld [vmem:[%s16955_s9 + $0x114] ss:$8 sps:$4 sm:$0xff]   ;;  %v12599_v38 = vld [vmem:[%s16957_s11 + $0x60] sm:$0xff]  }
 0xaad   : > { %10323 = vmatpush1.bf16.msra.mxu1 %v12444_v27  ;;  %10807 = vmatpush1.bf16.msra.mxu0 %v12537_v5  ;;  %v12591_v27 = vld [vmem:[%s16957_s11 + $0x40] sm:$0xff]   ;;  %v12560_v5 = vld [vmem:[%s16955_s9 + $0x154] ss:$8 sps:$4 sm:$0xff]  }
 0xaae   : > { %10333 = vmatprep.subr.bf16.mxu1 %v12449_v17  ;;  %10808 = vmatprep.subr.bf16.mxu0 %v12542_v18  ;;  %v12592_v17 = vld [vmem:[%s16957_s11] sm:$0xff]  }
 0xaaf   : > { %v12561_v18 = vld [vmem:[%s16955_s9 + $0x160] ss:$8 sps:$4 sm:$0xff]  }
 0xab0   : > { %10325 = vmatmul.mubr.bf16.vlgmr.msra.gmra.mrb[4].mxu1 %v16264_v28  ;;  %v12458_v28 = vld [vmem:[%s16953_s7 + $0x66c] ss:$16 sps:$4 sm:$0xff]  }
 0xab1   : > { %10334 = vmatpush1.bf16.msra.mxu1 %v12447_v26  ;;  %10365 = vmatprep.mubr.bf16.mxu1 %v16328_v49  ;;  %v12456_v49 = vld [vmem:[%s16953_s7 + $0x668] ss:$16 sps:$4 sm:$0xff]  }
 0xab2   : > { %10335 = vmatprep.subr.bf16.mxu1 %v12452_v53  ;;  %10809 = vmatpush1.bf16.msra.mxu0 %v12540_v39  ;;  %v12593_v26 = vld [vmem:[%s16957_s11 + $0x48] sm:$0xff]   ;;  %v12546_v53 = vld [vmem:[%s16955_s9 + $0x110] ss:$8 sps:$4 sm:$0xff]   ;;  %v12566_v39 = vld [vmem:[%s16955_s9 + $0x174] ss:$8 sps:$4 sm:$0xff]  }
 0xab3   : > { %10819 = vmatprep.subr.bf16.mxu0 %v12545_v50  ;;  %v12567_v50 = vld [vmem:[%s16955_s9 + $0x180] ss:$8 sps:$4 sm:$0xff]  }
 0xab5   : > { %10336 = vmatpush1.bf16.msra.mxu1 %v12450_v34  ;;  %v12551_v34 = vld [vmem:[%s16955_s9 + $0x124] ss:$8 sps:$4 sm:$0xff]  }
 0xab6   : > { %10337 = vmatprep.subr.bf16.mxu1 %v12455_v16  ;;  %v12594_v16 = vld [vmem:[%s16957_s11 + $0x8] sm:$0xff]  }
 0xab9   : > { %10338 = vmatpush1.bf16.msra.mxu1 %v12453_v46  ;;  %v12595_v46 = vld [vmem:[%s16957_s11 + $0x50] sm:$0xff]  }
 0xaba   : > { %10339 = vmatprep.subr.bf16.mxu1 %v12458_v28  ;;  %v12549_v28 = vld [vmem:[%s16955_s9 + $0x120] ss:$8 sps:$4 sm:$0xff]  }
 0xabd   : > { %10340 = vmatpush1.bf16.msra.mxu1 %v12456_v49  ;;  %v12554_v49 = vld [vmem:[%s16955_s9 + $0x134] ss:$8 sps:$4 sm:$0xff]  }
 0xabe   : > { %10341 = vmatprep.subr.bf16.mxu1 %v12461_v45  ;;  %v12596_v45 = vld [vmem:[%s16957_s11 + $0x10] sm:$0xff]  }
 0xac1   : > { %10342 = vmatpush1.bf16.msra.mxu1 %v12459_v41  ;;  %v12597_v41 = vld [vmem:[%s16957_s11 + $0x58] sm:$0xff]  }
 0xac2   : > { %10343 = vmatprep.subr.bf16.mxu1 %v12464_v25  ;;  %v12552_v25 = vld [vmem:[%s16955_s9 + $0x130] ss:$8 sps:$4 sm:$0xff]  }
 0xac3   : > { %v10080_v36 = vpop.f32.mrb[0].mxu1 }
 0xac4   : > { %v10082_v9 = vpop.f32.mrb[1].mxu1  ;;  %v10081_v30 = vadd.f32 %v10080_v36, %v10029_v55  ;;  %v12555_v36 = vld [vmem:[%s16955_s9 + $0x140] ss:$8 sps:$4 sm:$0xff]   ;;  %v10041_v55 = vrot.slane %v16763_v19, %v8438_v40  ;;  %v12605_v40 = vld [vmem:[%s16957_s11 + $0x78] sm:$0xff]  }
 0xac5   : > { %v10084_v10 = vpop.f32.mrb[2].mxu1  ;;  %10344 = vmatpush1.bf16.msra.mxu1 %v12462_v6  ;;  %v10083_v59 = vadd.f32 %v10082_v9, %v10033_v62  ;;  %v12557_v6 = vld [vmem:[%s16955_s9 + $0x144] ss:$8 sps:$4 sm:$0xff]  }
 0xac6   : > { %v10085_v20 = vpop.f32.mrb[3].mxu1  ;;  %10345 = vmatprep.subr.bf16.mxu1 %v12467_v2  ;;  %v12598_v2 = vld [vmem:[%s16957_s11 + $0x18] sm:$0xff]   ;;  %v12600_v9 = vld [vmem:[%s16957_s11 + $0x20] sm:$0xff]   ;;  %v12601_v10 = vld [vmem:[%s16957_s11 + $0x68] sm:$0xff]  }
 0xac7   : > { %v12563_v20 = vld [vmem:[%s16955_s9 + $0x164] ss:$8 sps:$4 sm:$0xff]  }
 0xac9   : > { %10346 = vmatpush1.bf16.msra.mxu1 %v12465_v44  ;;  %v12558_v44 = vld [vmem:[%s16955_s9 + $0x150] ss:$8 sps:$4 sm:$0xff]  }
 0xaca   : > { %10347 = vmatprep.subr.bf16.mxu1 %v12470_v43  ;;  %v12602_v43 = vld [vmem:[%s16957_s11 + $0x28] sm:$0xff]  }
 0xacd   : > { %10348 = vmatpush1.bf16.msra.mxu1 %v12468_v31  ;;  %v12564_v31 = vld [vmem:[%s16955_s9 + $0x170] ss:$8 sps:$4 sm:$0xff]  }
 0xace   : > { %10349 = vmatprep.subr.bf16.mxu1 %v12473_v58  ;;  %v12569_v58 = vld [vmem:[%s16955_s9 + $0x184] ss:$8 sps:$4 sm:$0xff]  }
 0xad1   : > { %10350 = vmatpush1.bf16.msra.mxu1 %v12471_v1  ;;  %v12572_v1 = vld [vmem:[%s16955_s9 + $0x194] ss:$8 sps:$4 sm:$0xff]  }
 0xad2   : > { %10351 = vmatprep.subr.bf16.mxu1 %v12476_v56  ;;  %v12570_v56 = vld [vmem:[%s16955_s9 + $0x190] ss:$8 sps:$4 sm:$0xff]  }
 0xad5   : > { %10352 = vmatpush1.bf16.msra.mxu1 %v12474_v15  ;;  %v12575_v15 = vld [vmem:[%s16955_s9 + $0x1a4] ss:$8 sps:$4 sm:$0xff]  }
 0xad6   : > { %10353 = vmatprep.subr.bf16.mxu1 %v12479_v47  ;;  %v12573_v47 = vld [vmem:[%s16955_s9 + $0x1a0] ss:$8 sps:$4 sm:$0xff]  }
 0xad9   : > { %10354 = vmatpush1.bf16.msra.mxu1 %v12477_v23  ;;  %v12578_v23 = vld [vmem:[%s16955_s9 + $0x1b4] ss:$8 sps:$4 sm:$0xff]  }
 0xada   : > { %10355 = vmatprep.subr.bf16.mxu1 %v12482_v4  ;;  %v12576_v4 = vld [vmem:[%s16955_s9 + $0x1b0] ss:$8 sps:$4 sm:$0xff]  }
 0xadd   : > { %10356 = vmatpush1.bf16.msra.mxu1 %v12480_v24  ;;  %v12581_v24 = vld [vmem:[%s16955_s9 + $0x1c4] ss:$8 sps:$4 sm:$0xff]  }
 0xade   : > { %10357 = vmatprep.subr.bf16.mxu1 %v12485_v0  ;;  %v12579_v0 = vld [vmem:[%s16955_s9 + $0x1c0] ss:$8 sps:$4 sm:$0xff]  }
 0xae1   : > { %10358 = vmatpush1.bf16.msra.mxu1 %v12483_v7  ;;  %v12584_v7 = vld [vmem:[%s16955_s9 + $0x1d4] ss:$8 sps:$4 sm:$0xff]  }
 0xae2   : > { %10359 = vmatprep.subr.bf16.mxu1 %v12488_v8  ;;  %v12582_v8 = vld [vmem:[%s16955_s9 + $0x1d0] ss:$8 sps:$4 sm:$0xff]  }
 0xae5   : > { %10360 = vmatpush1.bf16.msra.mxu1 %v12486_v61  ;;  %v12587_v61 = vld [vmem:[%s16955_s9 + $0x1e4] ss:$8 sps:$4 sm:$0xff]  }
 0xae6   : > { %10361 = vmatprep.subr.bf16.mxu1 %v12491_v54  ;;  %v12585_v54 = vld [vmem:[%s16955_s9 + $0x1e0] ss:$8 sps:$4 sm:$0xff]  }
 0xae9   : > { %10362 = vmatpush1.bf16.msra.mxu1 %v12489_v37  ;;  %v12590_v37 = vld [vmem:[%s16955_s9 + $0x1f4] ss:$8 sps:$4 sm:$0xff]  }
 0xaea   : > { %10363 = vmatprep.subr.bf16.mxu1 %v12494_v33  ;;  %v12588_v33 = vld [vmem:[%s16955_s9 + $0x1f0] ss:$8 sps:$4 sm:$0xff]  }
 0xaed   : > { %10364 = vmatpush1.bf16.msra.mxu1 %v12492_v21  ;;  %v10037_v21 = vrot.slane %v16763_v19, %v17388_v52  ;;  %v12603_v52 = vld [vmem:[%s16957_s11 + $0x70] sm:$0xff]   ;;  %v12606_v19 = vld [vmem:[%s16957_s11 + $0x38] sm:$0xff]  }
 0xaee   : > { %11649 = vmatprep.subr.bf16.mxu1 %v12591_v27 }
 0xaf0   : > { %10366 = vmatmul.mubr.bf16.vlgmr.msra.gmra.mrb[4].mxu1 %v16467_v13 }
 0xaf1   : > { %11650 = vmatpush3.bf16.msra.mxu1 %v12592_v17 }
 0xaf2   : > { %11651 = vmatprep.subr.bf16.mxu1 %v12593_v26 }
 0xaf5   : > { %11652 = vmatpush3.bf16.msra.mxu1 %v12594_v16 }
 0xaf6   : > { %11653 = vmatprep.subr.bf16.mxu1 %v12595_v46 }
 0xaf9   : > { %11654 = vmatpush3.bf16.msra.mxu1 %v12596_v45 }
 0xafa   : > { %11655 = vmatprep.subr.bf16.mxu1 %v12597_v41 }
 0xafd   : > { %11656 = vmatpush3.bf16.msra.mxu1 %v12598_v2 }
 0xafe   : > { %11657 = vmatprep.subr.bf16.mxu1 %v12599_v38 }
 0xb01   : > { %11658 = vmatpush3.bf16.msra.mxu1 %v12600_v9 }
 0xb02   : > { %11659 = vmatprep.subr.bf16.mxu1 %v12601_v10 }
 0xb05   : > { %11660 = vmatpush3.bf16.msra.mxu1 %v12602_v43 }
 0xb06   : > { %11661 = vmatprep.subr.bf16.mxu1 %v12603_v52 }
 0xb09   : > { %11662 = vmatpush3.bf16.msra.mxu1 %v12604_v11 }
 0xb0a   : > { %11663 = vmatprep.subr.bf16.mxu1 %v12605_v40 }
 0xb0d   : > { %11664 = vmatpush3.bf16.msra.mxu1 %v12606_v19 }
 0xb47   : > { %v10203_v48 = vpop.f32.mrb[0].mxu0 }
 0xb48   : > { %v11816_v22 = vadd.f32 %v10203_v48, %v10081_v30  ;;  %v10205_v51 = vpop.f32.mrb[1].mxu0 }
 0xb49   : > { %v11818_v12 = vadd.f32 %v10205_v51, %v10083_v59  ;;  %v10207_v63 = vpop.f32.mrb[2].mxu0 }
 0xb4a   : > { %v10374_v35 = vmax.f32 %v11816_v22, 0.0  ;;  %v10208_v13 = vpop.f32.mrb[3].mxu0 }
 0xb4b   : > { %v10375_v32 = vmax.f32 %v11818_v12, 0.0 }
 0xb4c   : > { %v10378_v57 = vpack.c.bf16 %v10374_v35, %v10374_v35 }
 0xb4d   : > { %v10379_v14 = vpack.c.bf16 %v10375_v32, %v10375_v32  ;;  %v10446_v32 = vld [vmem:[%s16956_s10] sm:$0x3] }
 0xb4f   : > { %10810 = vmatprep.mubr.bf16.mxu0 %v10379_v14  ;;  %v10771_v14 = vrot.slane %v10446_v32, %v17387_v29  ;;  %v10896_v29 = vld [vmem:[%s16958_s12] sm:$0x1] }
 0xb50   : > { %10811 = vmatmul.mubr.bf16.vlgmr.msra.gmra.mrb[4].mxu0 %v10378_v57 }
 0xb51   : > { %10820 = vmatpush1.bf16.msra.mxu0 %v12543_v60  ;;  %v10775_v60 = vrot.slane %v10446_v32, %v17386_v42 }
 0xb52   : > { %10821 = vmatprep.subr.bf16.mxu0 %v12548_v3 }
 0xb55   : > { %10822 = vmatpush1.bf16.msra.mxu0 %v12546_v53 }
 0xb56   : > { %10823 = vmatprep.subr.bf16.mxu0 %v12551_v34 }
 0xb59   : > { %10824 = vmatpush1.bf16.msra.mxu0 %v12549_v28 }
 0xb5a   : > { %10825 = vmatprep.subr.bf16.mxu0 %v12554_v49 }
 0xb5d   : > { %10826 = vmatpush1.bf16.msra.mxu0 %v12552_v25  ;;  %v11033_v25 = vld [vmem:[%s16959_s13] sm:$0x1] }
 0xb5e   : > { %10827 = vmatprep.subr.bf16.mxu0 %v12557_v6 }
 0xb61   : > { %10828 = vmatpush1.bf16.msra.mxu0 %v12555_v36 }
 0xb62   : > { %10829 = vmatprep.subr.bf16.mxu0 %v12560_v5 }
 0xb65   : > { %10830 = vmatpush1.bf16.msra.mxu0 %v12558_v44 }
 0xb66   : > { %10831 = vmatprep.subr.bf16.mxu0 %v12563_v20 }
 0xb69   : > { %10832 = vmatpush1.bf16.msra.mxu0 %v12561_v18 }
 0xb6a   : > { %10833 = vmatprep.subr.bf16.mxu0 %v12566_v39 }
 0xb6d   : > { %10834 = vmatpush1.bf16.msra.mxu0 %v12564_v31 }
 0xb6e   : > { %10835 = vmatprep.subr.bf16.mxu0 %v12569_v58 }
 0xb71   : > { %10836 = vmatpush1.bf16.msra.mxu0 %v12567_v50 }
 0xb72   : > { %10837 = vmatprep.subr.bf16.mxu0 %v12572_v1 }
 0xb75   : > { %10838 = vmatpush1.bf16.msra.mxu0 %v12570_v56 }
 0xb76   : > { %10839 = vmatprep.subr.bf16.mxu0 %v12575_v15 }
 0xb79   : > { %10840 = vmatpush1.bf16.msra.mxu0 %v12573_v47 }
 0xb7a   : > { %10841 = vmatprep.subr.bf16.mxu0 %v12578_v23 }
 0xb7d   : > { %10842 = vmatpush1.bf16.msra.mxu0 %v12576_v4 }
 0xb7e   : > { %10843 = vmatprep.subr.bf16.mxu0 %v12581_v24 }
 0xb81   : > { %10844 = vmatpush1.bf16.msra.mxu0 %v12579_v0 }
 0xb82   : > { %10845 = vmatprep.subr.bf16.mxu0 %v12584_v7 }
 0xb85   : > { %10846 = vmatpush1.bf16.msra.mxu0 %v12582_v8 }
 0xb86   : > { %10847 = vmatprep.subr.bf16.mxu0 %v12587_v61 }
 0xb89   : > { %10848 = vmatpush1.bf16.msra.mxu0 %v12585_v54 }
 0xb8a   : > { %10849 = vmatprep.subr.bf16.mxu0 %v12590_v37 }
 0xb8d   : > { %10850 = vmatpush1.bf16.msra.mxu0 %v12588_v33 }
 0xbc3   : > { %v10367_v62 = vpop.f32.mrb[4].mxu1 }
 0xbc4   : > { %v11819_v30 = vadd.f32 %v10367_v62, %v10037_v21  ;;  %v10369_v59 = vpop.f32.mrb[5].mxu1 }
 0xbc5   : > { %v11820_v48 = vadd.f32 %v10369_v59, %v10041_v55  ;;  %v10371_v22 = vpop.f32.mrb[6].mxu1 }
 0xbc6   : > { %v10376_v51 = vmax.f32 %v11819_v30, 0.0  ;;  %v10372_v12 = vpop.f32.mrb[7].mxu1 }
 0xbc7   : > { %v10377_v63 = vmax.f32 %v11820_v48, 0.0 }
 0xbc8   : > { %v10380_v13 = vpack.c.bf16 %v10376_v51, %v10376_v51 }
 0xbc9   : > { %v10381_v35 = vpack.c.bf16 %v10377_v63, %v10377_v63 }
 0xbcb   : > { %10851 = vmatprep.mubr.bf16.mxu0 %v10381_v35 }
 0xbcc   : > { %10852 = vmatmul.mubr.bf16.vlgmr.msra.gmra.mrb[4].mxu0 %v10380_v13 }
 0xc9f   : > { %v10853_v57 = vpop.f32.mrb[4].mxu0 }
 0xca0   : > { %v11821_v3 = vadd.f32 %v10853_v57, %v10771_v14  ;;  %v10855_v27 = vpop.f32.mrb[5].mxu0 }
 0xca1   : > { %v11822_v17 = vadd.f32 %v10855_v27, %v10775_v60  ;;  %v10857_v26 = vpop.f32.mrb[6].mxu0 }
 0xca2   : > { %v10860_v53 = vmax.f32 %v11821_v3, 0.0  ;;  %v10858_v34 = vpop.f32.mrb[7].mxu0 }
 0xca3   : > { %v10861_v16 = vmax.f32 %v11822_v17, 0.0 }
 0xca4   : > { %v10862_v28 = vpack.c.bf16 %v10860_v53, %v10860_v53 }
 0xca5   : > { %v10863_v46 = vpack.c.bf16 %v10861_v16, %v10861_v16 }
 0xca7   : > { %11025 = vmatprep.mubr.bf16.mxu1 %v10863_v46 }
 0xca8   : > { %11026 = vmatmul.mubr.bf16.vlgmr.msra.gmra.mrb[8].mxu1 %v10862_v28 }
 0xd7b   : > { %v11665_v49 = vpop.f32.mrb[8].mxu1 }
 0xd7c   : > { %v11666_v45 = vpop.f32.mrb[9].mxu1 }
 0xd7d   : > { %v11667_v42 = vadd.f32 %v11666_v45, %v11665_v49  ;;  %v11668_v41 = vpop.f32.mrb[10].mxu1 }
 0xd7e   : > { %v11669_v6 = vpop.f32.mrb[11].mxu1 }
 0xd7f   : > { %v11028_v2 = vadd.f32 %v11667_v42, %v10896_v29 }
 0xd81   : > { %v11034_v38 = vadd.f32 %v11033_v25, %v11028_v2 }
 0xd83   : > { %11035 = vst [vmem:[%s491_s24] sm:$0x1] %v11034_v38 }
 0xd84 PF: > { %s24_s17 = sadd.s32 1, %s12646_s17   ;;  %s17389_s19 = sld [smem:[#allocation3_spill]] }
 0xd85   : > { %p21_p9 = scmp.ge.s32.totalorder %s24_s17, 8   ;;  %s17390_s29 = smov %s12638_s15 }
 0xd86   : > { %s17391_s30 = smov %s12642_s16  ;;  %s17392_s15 = smov %s17395_s18 }
 0xd87   :  { %23 = sbr.rel (!%p21_p9) target bundleno = 3 (0x3), region = 114 }
 0xd8a   : > { %s17393_s16 = smov %s17389_s19 }

</bundles_post_ra>
